<compile_context>
chip_gen: v6e
topology: v6e:2x2x1
jax: 0.10.0
libtpu: 0.0.40
codegen_flags: <defaults>
</compile_context>

<pallas_src>
import functools

import jax
import jax.numpy as jnp
import numpy as np
from jax import lax
from jax.experimental import pallas as pl
from jax.experimental.pallas import tpu as pltpu


def _round_up(x, m):
    return ((x + m - 1) // m) * m


# ----------------------------------------------------------------------------
# Pallas kernel: fused 2-layer LSTM over the full sequence.
# Gate order follows PyTorch: [i, f, g, o] stacked along the 4*H axis.
# ----------------------------------------------------------------------------
def _encoder_kernel(x_ref,        # (S*Bp, I)     flattened time-major input
                    wih1_ref,     # (I, 4*Hp)
                    whh1_ref,     # (Hp, 4*Hp)
                    b1_ref,       # (1, 4*Hp)     b_ih1 + b_hh1 (gate-padded)
                    w2_ref,       # (Hp+Lp, 4*Lp) fused [W_ih2; W_hh2]
                    b2_ref,       # (1, 4*Lp)     b_ih2 + b_hh2 (gate-padded)
                    out_ref,      # (S*Bp, Lp)
                    xg1_ref,      # scratch (S*Bp, 4*Hp)
                    *, seq_len, batch_p, hidden_p, latent_p, unroll):
    Bp, Hp, Lp = batch_p, hidden_p, latent_p

    # ---- Prologue: layer-1 input projection for ALL steps, bias folded in ----
    xg1_ref[...] = (
        jnp.dot(x_ref[...], wih1_ref[...], preferred_element_type=jnp.float32)
        + b1_ref[...])

    # Hoist the layer-2 bias broadcast out of the recurrent loop
    # (JAX does not CSE broadcast_in_dim).
    b2 = jnp.broadcast_to(b2_ref[...], (Bp, 4 * Lp))

    def gate_acts(g, hs):
        i = jax.nn.sigmoid(g[:, 0 * hs:1 * hs])
        f = jax.nn.sigmoid(g[:, 1 * hs:2 * hs])
        gg = jnp.tanh(g[:, 2 * hs:3 * hs])
        o = jax.nn.sigmoid(g[:, 3 * hs:4 * hs])
        return i, f, gg, o

    def step(t, carry):
        h1, c1, h2, c2 = carry
        if isinstance(t, int):
            row = t * Bp
        else:
            row = pl.multiple_of(t * Bp, Bp)

        # ---- layer 1: per-step work is only the recurrent matmul ----
        g1 = xg1_ref[pl.ds(row, Bp), :] + jnp.dot(
            h1, whh1_ref[...], preferred_element_type=jnp.float32)
        i1, f1, gg1, o1 = gate_acts(g1, Hp)
        c1n = f1 * c1 + i1 * gg1
        h1n = o1 * jnp.tanh(c1n)

        # ---- layer 2: ONE fused matmul over [x_t = h1n, h_prev = h2] ----
        xh = jnp.concatenate([h1n, h2], axis=-1)               # (Bp, Hp+Lp)
        g2 = jnp.dot(xh, w2_ref[...],
                     preferred_element_type=jnp.float32) + b2
        i2, f2, gg2, o2 = gate_acts(g2, Lp)
        c2n = f2 * c2 + i2 * gg2
        h2n = o2 * jnp.tanh(c2n)

        # Lane-dense (Bp, Lp) = (8, 128) unmasked store into the VMEM-resident
        # output slab; HBM writeback happens once at the end of the kernel.
        out_ref[pl.ds(row, Bp), :] = h2n
        return (h1n, c1n, h2n, c2n)

    init = (jnp.zeros((Bp, Hp), jnp.float32),
            jnp.zeros((Bp, Hp), jnp.float32),
            jnp.zeros((Bp, Lp), jnp.float32),
            jnp.zeros((Bp, Lp), jnp.float32))

    if unroll:
        carry = init
        for t in range(seq_len):
            carry = step(t, carry)
    else:
        lax.fori_loop(0, seq_len, step, init)


# ----------------------------------------------------------------------------
# Wrapper: layout plumbing (pad batch to sublane multiple, pad gate blocks to
# 128 lanes with zero weights, flatten time-major), one pallas_call, unpad.
# ----------------------------------------------------------------------------
def _pad_gate_matrix(w, in_dim, in_pad, h, hp):
    """(in_dim, 4*h) -> (in_pad, 4*hp), zero padding per gate block."""
    w4 = w.reshape(in_dim, 4, h)
    w4 = jnp.pad(w4, ((0, in_pad - in_dim), (0, 0), (0, hp - h)))
    return w4.reshape(in_pad, 4 * hp)


def encoder_forward(x, params, *, hidden_size, latent_size):
    """x: (batch, seq, input_size) float32 -> (batch, seq, latent_size)."""
    B, S, I = x.shape
    H, L = hidden_size, latent_size
    Bp = _round_up(max(B, 8), 8)         # sublane-aligned batch
    Hp = _round_up(H, 128)               # lane-aligned gate blocks
    Lp = _round_up(L, 128)

    # time-major, batch-padded, flattened to 2D: row t*Bp + b == x[t, b]
    x_tm = jnp.transpose(x, (1, 0, 2))                       # (S, B, I)
    x_p = jnp.pad(x_tm, ((0, 0), (0, Bp - B), (0, 0)))       # (S, Bp, I)
    x2d = x_p.reshape(S * Bp, I).astype(jnp.float32)

    # Padded / fused weights (zero padding keeps padded lanes exactly zero).
    wih1 = _pad_gate_matrix(params["w_ih1"], I, I, H, Hp)    # (I, 4Hp)
    whh1 = _pad_gate_matrix(params["w_hh1"], H, Hp, H, Hp)   # (Hp, 4Hp)
    b1 = _pad_gate_matrix(params["b1"], 1, 1, H, Hp)         # (1, 4Hp)
    wih2 = _pad_gate_matrix(params["w_ih2"], H, Hp, L, Lp)   # (Hp, 4Lp)
    whh2 = _pad_gate_matrix(params["w_hh2"], L, Lp, L, Lp)   # (Lp, 4Lp)
    b2 = _pad_gate_matrix(params["b2"], 1, 1, L, Lp)         # (1, 4Lp)
    w2 = jnp.concatenate([wih2, whh2], axis=0)               # (Hp+Lp, 4Lp)

    kernel = functools.partial(
        _encoder_kernel,
        seq_len=S, batch_p=Bp, hidden_p=Hp, latent_p=Lp,
        unroll=(S <= 32))

    full2d = lambda i: (0, 0)
    out2d = pl.pallas_call(
        kernel,
        out_shape=jax.ShapeDtypeStruct((S * Bp, Lp), jnp.float32),
        grid_spec=pltpu.PrefetchScalarGridSpec(
            num_scalar_prefetch=0,
            grid=(1,),
            in_specs=[
                pl.BlockSpec((S * Bp, I), full2d),           # x (flattened)
                pl.BlockSpec((I, 4 * Hp), full2d),           # w_ih1
                pl.BlockSpec((Hp, 4 * Hp), full2d),          # w_hh1
                pl.BlockSpec((1, 4 * Hp), full2d),           # b1
                pl.BlockSpec((Hp + Lp, 4 * Lp), full2d),     # [w_ih2; w_hh2]
                pl.BlockSpec((1, 4 * Lp), full2d),           # b2
            ],
            out_specs=pl.BlockSpec((S * Bp, Lp), full2d),
            scratch_shapes=[
                pltpu.VMEM((S * Bp, 4 * Hp), jnp.float32),   # precomputed x-gates
            ],
        ),
        compiler_params=pltpu.CompilerParams(
            dimension_semantics=("arbitrary",)),
    )(x2d, wih1, whh1, b1, w2, b2)

    out = out2d.reshape(S, Bp, Lp)[:, :B, :L]                # unpad
    return jnp.transpose(out, (1, 0, 2))                     # (B, S, L)


# ----------------------------------------------------------------------------
# Deterministic parameter init (PyTorch LSTM layout transposed so the kernel
# computes x @ W).  Gate order [i, f, g, o]; bias = b_ih + b_hh.
# ----------------------------------------------------------------------------
def init_params(key, input_size, hidden_size, latent_size):
    ks = jax.random.split(key, 8)

    def u(k, shape, bound):
        return jax.random.uniform(k, shape, jnp.float32, -bound, bound)

    b1v = 1.0 / np.sqrt(hidden_size)
    b2v = 1.0 / np.sqrt(latent_size)
    return {
        "w_ih1": u(ks[0], (input_size, 4 * hidden_size), b1v),
        "w_hh1": u(ks[1], (hidden_size, 4 * hidden_size), b1v),
        "b1": u(ks[2], (1, 4 * hidden_size), b1v)
              + u(ks[3], (1, 4 * hidden_size), b1v),
        "w_ih2": u(ks[4], (hidden_size, 4 * latent_size), b2v),
        "w_hh2": u(ks[5], (latent_size, 4 * latent_size), b2v),
        "b2": u(ks[6], (1, 4 * latent_size), b2v)
              + u(ks[7], (1, 4 * latent_size), b2v),
    }


# ----------------------------------------------------------------------------
# Pure-JAX reference (matches torch.nn.LSTM semantics) for a sanity check.
# ----------------------------------------------------------------------------
def encoder_reference(x, params, *, hidden_size, latent_size):
    B = x.shape[0]

    def run_layer(seq_in, w_ih, w_hh, b, hs):
        def step(carry, x_t):
            h, c = carry
            gates = x_t @ w_ih + h @ w_hh + b
            i = jax.nn.sigmoid(gates[:, 0 * hs:1 * hs])
            f = jax.nn.sigmoid(gates[:, 1 * hs:2 * hs])
            g = jnp.tanh(gates[:, 2 * hs:3 * hs])
            o = jax.nn.sigmoid(gates[:, 3 * hs:4 * hs])
            c_new = f * c + i * g
            h_new = o * jnp.tanh(c_new)
            return (h_new, c_new), h_new

        h0 = jnp.zeros((B, hs), jnp.float32)
        c0 = jnp.zeros((B, hs), jnp.float32)
        _, ys = lax.scan(step, (h0, c0), jnp.transpose(seq_in, (1, 0, 2)))
        return jnp.transpose(ys, (1, 0, 2))

    y1 = run_layer(x, params["w_ih1"], params["w_hh1"], params["b1"], hidden_size)
    y2 = run_layer(y1, params["w_ih2"], params["w_hh2"], params["b2"], latent_size)
    return y2


if __name__ == "__main__":
    # Small shapes consistent with the module (hidden=128 / latent=16 defaults).
    batch, seq, input_size = 4, 8, 4
    hidden_size, latent_size = 128, 16

    key = jax.random.PRNGKey(0)
    k_x, k_p = jax.random.split(key)
    x = jax.random.normal(k_x, (batch, seq, input_size), jnp.float32)
    params = init_params(k_p, input_size, hidden_size, latent_size)

    out = encoder_forward(x, params,
                          hidden_size=hidden_size, latent_size=latent_size)
    out = jax.block_until_ready(out)

    ref = encoder_reference(x, params,
                            hidden_size=hidden_size, latent_size=latent_size)
    np.testing.assert_allclose(np.asarray(out), np.asarray(ref),
                               rtol=1e-4, atol=1e-4)

    print("KERNEL_OK")
</pallas_src>

<mosaic_0001>
module attributes {stable_mosaic.version = 11 : i64} {
  func.func @_encoder_kernel(%arg0: i32, %arg1: memref<64x4xf32, #tpu.memory_space<vmem>>, %arg2: memref<4x512xf32, #tpu.memory_space<vmem>>, %arg3: memref<128x512xf32, #tpu.memory_space<vmem>>, %arg4: memref<1x512xf32, #tpu.memory_space<vmem>>, %arg5: memref<256x512xf32, #tpu.memory_space<vmem>>, %arg6: memref<1x512xf32, #tpu.memory_space<vmem>>, %arg7: memref<64x128xf32, #tpu.memory_space<vmem>>, %arg8: memref<64x512xf32, #tpu.memory_space<vmem>>) attributes {dimension_semantics = [#tpu.dimension_semantics<arbitrary>], iteration_bounds = array<i64: 1>, scalar_prefetch = 0 : i64, scratch_operands = 1 : i64, tpu.core_type = #tpu.core_type<tc>, window_params = [{pipeline_mode = #tpu.pipeline_mode<synchronous>, transform_indices = @transform_0, window_bounds = array<i64: 64, 4>}, {pipeline_mode = #tpu.pipeline_mode<synchronous>, transform_indices = @transform_1, window_bounds = array<i64: 4, 512>}, {pipeline_mode = #tpu.pipeline_mode<synchronous>, transform_indices = @transform_2, window_bounds = array<i64: 128, 512>}, {pipeline_mode = #tpu.pipeline_mode<synchronous>, transform_indices = @transform_3, window_bounds = array<i64: 1, 512>}, {pipeline_mode = #tpu.pipeline_mode<synchronous>, transform_indices = @transform_4, window_bounds = array<i64: 256, 512>}, {pipeline_mode = #tpu.pipeline_mode<synchronous>, transform_indices = @transform_5, window_bounds = array<i64: 1, 512>}, {pipeline_mode = #tpu.pipeline_mode<synchronous>, transform_indices = @transform_6, window_bounds = array<i64: 64, 128>}]} {
    %c0 = arith.constant 0 : index
    %c0_0 = arith.constant 0 : index
    %0 = vector.load %arg1[%c0, %c0_0] : memref<64x4xf32, #tpu.memory_space<vmem>>, vector<64x4xf32>
    %c0_1 = arith.constant 0 : index
    %c0_2 = arith.constant 0 : index
    %1 = vector.load %arg2[%c0_1, %c0_2] : memref<4x512xf32, #tpu.memory_space<vmem>>, vector<4x512xf32>
    %cst = arith.constant dense<0.000000e+00> : vector<64x512xf32>
    %2 = tpu.matmul %0, %1, %cst {dimension_numbers = #tpu.dot_dimension_numbers<[1], [0], [0], [1], [0, 0, 1, 1], [], []>} : vector<64x4xf32>, vector<4x512xf32>, vector<64x512xf32> -> vector<64x512xf32>
    %c0_3 = arith.constant 0 : index
    %c0_4 = arith.constant 0 : index
    %3 = vector.load %arg4[%c0_3, %c0_4] : memref<1x512xf32, #tpu.memory_space<vmem>>, vector<1x512xf32>
    %4 = vector.broadcast %3 : vector<1x512xf32> to vector<64x512xf32>
    %5 = arith.addf %2, %4 : vector<64x512xf32>
    %c0_5 = arith.constant 0 : index
    %c0_6 = arith.constant 0 : index
    %6 = vector.load %arg8[%c0_5, %c0_6] : memref<64x512xf32, #tpu.memory_space<vmem>>, vector<64x512xf32>
    tpu.vector_store %arg8[%c0_5, %c0_6], %5 {strides = array<i32>} : memref<64x512xf32, #tpu.memory_space<vmem>>, vector<64x512xf32>,
    %c0_7 = arith.constant 0 : index
    %c0_8 = arith.constant 0 : index
    %7 = vector.load %arg6[%c0_7, %c0_8] : memref<1x512xf32, #tpu.memory_space<vmem>>, vector<1x512xf32>
    %8 = vector.shape_cast %7 : vector<1x512xf32> to vector<1x512xf32>
    %9 = vector.broadcast %8 : vector<1x512xf32> to vector<8x512xf32>
    %cst_9 = arith.constant 0.000000e+00 : f32
    %10 = vector.broadcast %cst_9 : f32 to vector<8x128xf32>
    %cst_10 = arith.constant 0.000000e+00 : f32
    %11 = vector.broadcast %cst_10 : f32 to vector<8x128xf32>
    %cst_11 = arith.constant 0.000000e+00 : f32
    %12 = vector.broadcast %cst_11 : f32 to vector<8x128xf32>
    %cst_12 = arith.constant 0.000000e+00 : f32
    %13 = vector.broadcast %cst_12 : f32 to vector<8x128xf32>
    %c0_13 = arith.constant 0 : index
    %c0_14 = arith.constant 0 : index
    %14 = vector.load %arg8[%c0_13, %c0_14] : memref<64x512xf32, #tpu.memory_space<vmem>>, vector<8x512xf32>
    %c0_15 = arith.constant 0 : index
    %c0_16 = arith.constant 0 : index
    %15 = vector.load %arg3[%c0_15, %c0_16] : memref<128x512xf32, #tpu.memory_space<vmem>>, vector<128x512xf32>
    %cst_17 = arith.constant dense<0.000000e+00> : vector<8x512xf32>
    %16 = tpu.matmul %10, %15, %cst_17 {dimension_numbers = #tpu.dot_dimension_numbers<[1], [0], [0], [1], [0, 0, 1, 1], [], []>} : vector<8x128xf32>, vector<128x512xf32>, vector<8x512xf32> -> vector<8x512xf32>
    %17 = arith.addf %14, %16 : vector<8x512xf32>
    %18 = vector.extract_strided_slice %17 {offsets = [0, 0], sizes = [8, 128], strides = [1, 1]} : vector<8x512xf32> to vector<8x128xf32>
    %19 = arith.negf %18 : vector<8x128xf32>
    %20 = math.exp %19 : vector<8x128xf32>
    %cst_18 = arith.constant 1.000000e+00 : f32
    %21 = vector.broadcast %cst_18 : f32 to vector<8x128xf32>
    %22 = arith.addf %21, %20 : vector<8x128xf32>
    %23 = arith.divf %21, %22 : vector<8x128xf32>
    %24 = vector.extract_strided_slice %17 {offsets = [0, 128], sizes = [8, 128], strides = [1, 1]} : vector<8x512xf32> to vector<8x128xf32>
    %25 = arith.negf %24 : vector<8x128xf32>
    %26 = math.exp %25 : vector<8x128xf32>
    %cst_19 = arith.constant 1.000000e+00 : f32
    %27 = vector.broadcast %cst_19 : f32 to vector<8x128xf32>
    %28 = arith.addf %27, %26 : vector<8x128xf32>
    %29 = arith.divf %27, %28 : vector<8x128xf32>
    %30 = vector.extract_strided_slice %17 {offsets = [0, 256], sizes = [8, 128], strides = [1, 1]} : vector<8x512xf32> to vector<8x128xf32>
    %31 = math.tanh %30 : vector<8x128xf32>
    %32 = vector.extract_strided_slice %17 {offsets = [0, 384], sizes = [8, 128], strides = [1, 1]} : vector<8x512xf32> to vector<8x128xf32>
    %33 = arith.negf %32 : vector<8x128xf32>
    %34 = math.exp %33 : vector<8x128xf32>
    %cst_20 = arith.constant 1.000000e+00 : f32
    %35 = vector.broadcast %cst_20 : f32 to vector<8x128xf32>
    %36 = arith.addf %35, %34 : vector<8x128xf32>
    %37 = arith.divf %35, %36 : vector<8x128xf32>
    %38 = arith.mulf %29, %11 : vector<8x128xf32>
    %39 = arith.mulf %23, %31 : vector<8x128xf32>
    %40 = arith.addf %38, %39 : vector<8x128xf32>
    %41 = math.tanh %40 : vector<8x128xf32>
    %42 = arith.mulf %37, %41 : vector<8x128xf32>
    %43 = tpu.concatenate %42, %12 in 1 : vector<8x128xf32>, vector<8x128xf32> -> vector<8x256xf32>
    %c0_21 = arith.constant 0 : index
    %c0_22 = arith.constant 0 : index
    %44 = vector.load %arg5[%c0_21, %c0_22] : memref<256x512xf32, #tpu.memory_space<vmem>>, vector<256x512xf32>
    %cst_23 = arith.constant dense<0.000000e+00> : vector<8x512xf32>
    %45 = tpu.matmul %43, %44, %cst_23 {dimension_numbers = #tpu.dot_dimension_numbers<[1], [0], [0], [1], [0, 0, 1, 1], [], []>} : vector<8x256xf32>, vector<256x512xf32>, vector<8x512xf32> -> vector<8x512xf32>
    %46 = arith.addf %45, %9 : vector<8x512xf32>
    %47 = vector.extract_strided_slice %46 {offsets = [0, 0], sizes = [8, 128], strides = [1, 1]} : vector<8x512xf32> to vector<8x128xf32>
    %48 = arith.negf %47 : vector<8x128xf32>
    %49 = math.exp %48 : vector<8x128xf32>
    %cst_24 = arith.constant 1.000000e+00 : f32
    %50 = vector.broadcast %cst_24 : f32 to vector<8x128xf32>
    %51 = arith.addf %50, %49 : vector<8x128xf32>
    %52 = arith.divf %50, %51 : vector<8x128xf32>
    %53 = vector.extract_strided_slice %46 {offsets = [0, 128], sizes = [8, 128], strides = [1, 1]} : vector<8x512xf32> to vector<8x128xf32>
    %54 = arith.negf %53 : vector<8x128xf32>
    %55 = math.exp %54 : vector<8x128xf32>
    %cst_25 = arith.constant 1.000000e+00 : f32
    %56 = vector.broadcast %cst_25 : f32 to vector<8x128xf32>
    %57 = arith.addf %56, %55 : vector<8x128xf32>
    %58 = arith.divf %56, %57 : vector<8x128xf32>
    %59 = vector.extract_strided_slice %46 {offsets = [0, 256], sizes = [8, 128], strides = [1, 1]} : vector<8x512xf32> to vector<8x128xf32>
    %60 = math.tanh %59 : vector<8x128xf32>
    %61 = vector.extract_strided_slice %46 {offsets = [0, 384], sizes = [8, 128], strides = [1, 1]} : vector<8x512xf32> to vector<8x128xf32>
    %62 = arith.negf %61 : vector<8x128xf32>
    %63 = math.exp %62 : vector<8x128xf32>
    %cst_26 = arith.constant 1.000000e+00 : f32
    %64 = vector.broadcast %cst_26 : f32 to vector<8x128xf32>
    %65 = arith.addf %64, %63 : vector<8x128xf32>
    %66 = arith.divf %64, %65 : vector<8x128xf32>
    %67 = arith.mulf %58, %13 : vector<8x128xf32>
    %68 = arith.mulf %52, %60 : vector<8x128xf32>
    %69 = arith.addf %67, %68 : vector<8x128xf32>
    %70 = math.tanh %69 : vector<8x128xf32>
    %71 = arith.mulf %66, %70 : vector<8x128xf32>
    %c0_27 = arith.constant 0 : index
    %c0_28 = arith.constant 0 : index
    %72 = vector.load %arg7[%c0_27, %c0_28] : memref<64x128xf32, #tpu.memory_space<vmem>>, vector<8x128xf32>
    tpu.vector_store %arg7[%c0_27, %c0_28], %71 {strides = array<i32>} : memref<64x128xf32, #tpu.memory_space<vmem>>, vector<8x128xf32>,
    %c8 = arith.constant 8 : index
    %c0_29 = arith.constant 0 : index
    %73 = vector.load %arg8[%c8, %c0_29] : memref<64x512xf32, #tpu.memory_space<vmem>>, vector<8x512xf32>
    %c0_30 = arith.constant 0 : index
    %c0_31 = arith.constant 0 : index
    %74 = vector.load %arg3[%c0_30, %c0_31] : memref<128x512xf32, #tpu.memory_space<vmem>>, vector<128x512xf32>
    %cst_32 = arith.constant dense<0.000000e+00> : vector<8x512xf32>
    %75 = tpu.matmul %42, %74, %cst_32 {dimension_numbers = #tpu.dot_dimension_numbers<[1], [0], [0], [1], [0, 0, 1, 1], [], []>} : vector<8x128xf32>, vector<128x512xf32>, vector<8x512xf32> -> vector<8x512xf32>
    %76 = arith.addf %73, %75 : vector<8x512xf32>
    %77 = vector.extract_strided_slice %76 {offsets = [0, 0], sizes = [8, 128], strides = [1, 1]} : vector<8x512xf32> to vector<8x128xf32>
    %78 = arith.negf %77 : vector<8x128xf32>
    %79 = math.exp %78 : vector<8x128xf32>
    %cst_33 = arith.constant 1.000000e+00 : f32
    %80 = vector.broadcast %cst_33 : f32 to vector<8x128xf32>
    %81 = arith.addf %80, %79 : vector<8x128xf32>
    %82 = arith.divf %80, %81 : vector<8x128xf32>
    %83 = vector.extract_strided_slice %76 {offsets = [0, 128], sizes = [8, 128], strides = [1, 1]} : vector<8x512xf32> to vector<8x128xf32>
    %84 = arith.negf %83 : vector<8x128xf32>
    %85 = math.exp %84 : vector<8x128xf32>
    %cst_34 = arith.constant 1.000000e+00 : f32
    %86 = vector.broadcast %cst_34 : f32 to vector<8x128xf32>
    %87 = arith.addf %86, %85 : vector<8x128xf32>
    %88 = arith.divf %86, %87 : vector<8x128xf32>
    %89 = vector.extract_strided_slice %76 {offsets = [0, 256], sizes = [8, 128], strides = [1, 1]} : vector<8x512xf32> to vector<8x128xf32>
    %90 = math.tanh %89 : vector<8x128xf32>
    %91 = vector.extract_strided_slice %76 {offsets = [0, 384], sizes = [8, 128], strides = [1, 1]} : vector<8x512xf32> to vector<8x128xf32>
    %92 = arith.negf %91 : vector<8x128xf32>
    %93 = math.exp %92 : vector<8x128xf32>
    %cst_35 = arith.constant 1.000000e+00 : f32
    %94 = vector.broadcast %cst_35 : f32 to vector<8x128xf32>
    %95 = arith.addf %94, %93 : vector<8x128xf32>
    %96 = arith.divf %94, %95 : vector<8x128xf32>
    %97 = arith.mulf %88, %40 : vector<8x128xf32>
    %98 = arith.mulf %82, %90 : vector<8x128xf32>
    %99 = arith.addf %97, %98 : vector<8x128xf32>
    %100 = math.tanh %99 : vector<8x128xf32>
    %101 = arith.mulf %96, %100 : vector<8x128xf32>
    %102 = tpu.concatenate %101, %71 in 1 : vector<8x128xf32>, vector<8x128xf32> -> vector<8x256xf32>
    %c0_36 = arith.constant 0 : index
    %c0_37 = arith.constant 0 : index
    %103 = vector.load %arg5[%c0_36, %c0_37] : memref<256x512xf32, #tpu.memory_space<vmem>>, vector<256x512xf32>
    %cst_38 = arith.constant dense<0.000000e+00> : vector<8x512xf32>
    %104 = tpu.matmul %102, %103, %cst_38 {dimension_numbers = #tpu.dot_dimension_numbers<[1], [0], [0], [1], [0, 0, 1, 1], [], []>} : vector<8x256xf32>, vector<256x512xf32>, vector<8x512xf32> -> vector<8x512xf32>
    %105 = arith.addf %104, %9 : vector<8x512xf32>
    %106 = vector.extract_strided_slice %105 {offsets = [0, 0], sizes = [8, 128], strides = [1, 1]} : vector<8x512xf32> to vector<8x128xf32>
    %107 = arith.negf %106 : vector<8x128xf32>
    %108 = math.exp %107 : vector<8x128xf32>
    %cst_39 = arith.constant 1.000000e+00 : f32
    %109 = vector.broadcast %cst_39 : f32 to vector<8x128xf32>
    %110 = arith.addf %109, %108 : vector<8x128xf32>
    %111 = arith.divf %109, %110 : vector<8x128xf32>
    %112 = vector.extract_strided_slice %105 {offsets = [0, 128], sizes = [8, 128], strides = [1, 1]} : vector<8x512xf32> to vector<8x128xf32>
    %113 = arith.negf %112 : vector<8x128xf32>
    %114 = math.exp %113 : vector<8x128xf32>
    %cst_40 = arith.constant 1.000000e+00 : f32
    %115 = vector.broadcast %cst_40 : f32 to vector<8x128xf32>
    %116 = arith.addf %115, %114 : vector<8x128xf32>
    %117 = arith.divf %115, %116 : vector<8x128xf32>
    %118 = vector.extract_strided_slice %105 {offsets = [0, 256], sizes = [8, 128], strides = [1, 1]} : vector<8x512xf32> to vector<8x128xf32>
    %119 = math.tanh %118 : vector<8x128xf32>
    %120 = vector.extract_strided_slice %105 {offsets = [0, 384], sizes = [8, 128], strides = [1, 1]} : vector<8x512xf32> to vector<8x128xf32>
    %121 = arith.negf %120 : vector<8x128xf32>
    %122 = math.exp %121 : vector<8x128xf32>
    %cst_41 = arith.constant 1.000000e+00 : f32
    %123 = vector.broadcast %cst_41 : f32 to vector<8x128xf32>
    %124 = arith.addf %123, %122 : vector<8x128xf32>
    %125 = arith.divf %123, %124 : vector<8x128xf32>
    %126 = arith.mulf %117, %69 : vector<8x128xf32>
    %127 = arith.mulf %111, %119 : vector<8x128xf32>
    %128 = arith.addf %126, %127 : vector<8x128xf32>
    %129 = math.tanh %128 : vector<8x128xf32>
    %130 = arith.mulf %125, %129 : vector<8x128xf32>
    %c8_42 = arith.constant 8 : index
    %c0_43 = arith.constant 0 : index
    %131 = vector.load %arg7[%c8_42, %c0_43] : memref<64x128xf32, #tpu.memory_space<vmem>>, vector<8x128xf32>
    tpu.vector_store %arg7[%c8_42, %c0_43], %130 {strides = array<i32>} : memref<64x128xf32, #tpu.memory_space<vmem>>, vector<8x128xf32>,
    %c16 = arith.constant 16 : index
    %c0_44 = arith.constant 0 : index
    %132 = vector.load %arg8[%c16, %c0_44] : memref<64x512xf32, #tpu.memory_space<vmem>>, vector<8x512xf32>
    %c0_45 = arith.constant 0 : index
    %c0_46 = arith.constant 0 : index
    %133 = vector.load %arg3[%c0_45, %c0_46] : memref<128x512xf32, #tpu.memory_space<vmem>>, vector<128x512xf32>
    %cst_47 = arith.constant dense<0.000000e+00> : vector<8x512xf32>
    %134 = tpu.matmul %101, %133, %cst_47 {dimension_numbers = #tpu.dot_dimension_numbers<[1], [0], [0], [1], [0, 0, 1, 1], [], []>} : vector<8x128xf32>, vector<128x512xf32>, vector<8x512xf32> -> vector<8x512xf32>
    %135 = arith.addf %132, %134 : vector<8x512xf32>
    %136 = vector.extract_strided_slice %135 {offsets = [0, 0], sizes = [8, 128], strides = [1, 1]} : vector<8x512xf32> to vector<8x128xf32>
    %137 = arith.negf %136 : vector<8x128xf32>
    %138 = math.exp %137 : vector<8x128xf32>
    %cst_48 = arith.constant 1.000000e+00 : f32
    %139 = vector.broadcast %cst_48 : f32 to vector<8x128xf32>
    %140 = arith.addf %139, %138 : vector<8x128xf32>
    %141 = arith.divf %139, %140 : vector<8x128xf32>
    %142 = vector.extract_strided_slice %135 {offsets = [0, 128], sizes = [8, 128], strides = [1, 1]} : vector<8x512xf32> to vector<8x128xf32>
    %143 = arith.negf %142 : vector<8x128xf32>
    %144 = math.exp %143 : vector<8x128xf32>
    %cst_49 = arith.constant 1.000000e+00 : f32
    %145 = vector.broadcast %cst_49 : f32 to vector<8x128xf32>
    %146 = arith.addf %145, %144 : vector<8x128xf32>
    %147 = arith.divf %145, %146 : vector<8x128xf32>
    %148 = vector.extract_strided_slice %135 {offsets = [0, 256], sizes = [8, 128], strides = [1, 1]} : vector<8x512xf32> to vector<8x128xf32>
    %149 = math.tanh %148 : vector<8x128xf32>
    %150 = vector.extract_strided_slice %135 {offsets = [0, 384], sizes = [8, 128], strides = [1, 1]} : vector<8x512xf32> to vector<8x128xf32>
    %151 = arith.negf %150 : vector<8x128xf32>
    %152 = math.exp %151 : vector<8x128xf32>
    %cst_50 = arith.constant 1.000000e+00 : f32
    %153 = vector.broadcast %cst_50 : f32 to vector<8x128xf32>
    %154 = arith.addf %153, %152 : vector<8x128xf32>
    %155 = arith.divf %153, %154 : vector<8x128xf32>
    %156 = arith.mulf %147, %99 : vector<8x128xf32>
    %157 = arith.mulf %141, %149 : vector<8x128xf32>
    %158 = arith.addf %156, %157 : vector<8x128xf32>
    %159 = math.tanh %158 : vector<8x128xf32>
    %160 = arith.mulf %155, %159 : vector<8x128xf32>
    %161 = tpu.concatenate %160, %130 in 1 : vector<8x128xf32>, vector<8x128xf32> -> vector<8x256xf32>
    %c0_51 = arith.constant 0 : index
    %c0_52 = arith.constant 0 : index
    %162 = vector.load %arg5[%c0_51, %c0_52] : memref<256x512xf32, #tpu.memory_space<vmem>>, vector<256x512xf32>
    %cst_53 = arith.constant dense<0.000000e+00> : vector<8x512xf32>
    %163 = tpu.matmul %161, %162, %cst_53 {dimension_numbers = #tpu.dot_dimension_numbers<[1], [0], [0], [1], [0, 0, 1, 1], [], []>} : vector<8x256xf32>, vector<256x512xf32>, vector<8x512xf32> -> vector<8x512xf32>
    %164 = arith.addf %163, %9 : vector<8x512xf32>
    %165 = vector.extract_strided_slice %164 {offsets = [0, 0], sizes = [8, 128], strides = [1, 1]} : vector<8x512xf32> to vector<8x128xf32>
    %166 = arith.negf %165 : vector<8x128xf32>
    %167 = math.exp %166 : vector<8x128xf32>
    %cst_54 = arith.constant 1.000000e+00 : f32
    %168 = vector.broadcast %cst_54 : f32 to vector<8x128xf32>
    %169 = arith.addf %168, %167 : vector<8x128xf32>
    %170 = arith.divf %168, %169 : vector<8x128xf32>
    %171 = vector.extract_strided_slice %164 {offsets = [0, 128], sizes = [8, 128], strides = [1, 1]} : vector<8x512xf32> to vector<8x128xf32>
    %172 = arith.negf %171 : vector<8x128xf32>
    %173 = math.exp %172 : vector<8x128xf32>
    %cst_55 = arith.constant 1.000000e+00 : f32
    %174 = vector.broadcast %cst_55 : f32 to vector<8x128xf32>
    %175 = arith.addf %174, %173 : vector<8x128xf32>
    %176 = arith.divf %174, %175 : vector<8x128xf32>
    %177 = vector.extract_strided_slice %164 {offsets = [0, 256], sizes = [8, 128], strides = [1, 1]} : vector<8x512xf32> to vector<8x128xf32>
    %178 = math.tanh %177 : vector<8x128xf32>
    %179 = vector.extract_strided_slice %164 {offsets = [0, 384], sizes = [8, 128], strides = [1, 1]} : vector<8x512xf32> to vector<8x128xf32>
    %180 = arith.negf %179 : vector<8x128xf32>
    %181 = math.exp %180 : vector<8x128xf32>
    %cst_56 = arith.constant 1.000000e+00 : f32
    %182 = vector.broadcast %cst_56 : f32 to vector<8x128xf32>
    %183 = arith.addf %182, %181 : vector<8x128xf32>
    %184 = arith.divf %182, %183 : vector<8x128xf32>
    %185 = arith.mulf %176, %128 : vector<8x128xf32>
    %186 = arith.mulf %170, %178 : vector<8x128xf32>
    %187 = arith.addf %185, %186 : vector<8x128xf32>
    %188 = math.tanh %187 : vector<8x128xf32>
    %189 = arith.mulf %184, %188 : vector<8x128xf32>
    %c16_57 = arith.constant 16 : index
    %c0_58 = arith.constant 0 : index
    %190 = vector.load %arg7[%c16_57, %c0_58] : memref<64x128xf32, #tpu.memory_space<vmem>>, vector<8x128xf32>
    tpu.vector_store %arg7[%c16_57, %c0_58], %189 {strides = array<i32>} : memref<64x128xf32, #tpu.memory_space<vmem>>, vector<8x128xf32>,
    %c24 = arith.constant 24 : index
    %c0_59 = arith.constant 0 : index
    %191 = vector.load %arg8[%c24, %c0_59] : memref<64x512xf32, #tpu.memory_space<vmem>>, vector<8x512xf32>
    %c0_60 = arith.constant 0 : index
    %c0_61 = arith.constant 0 : index
    %192 = vector.load %arg3[%c0_60, %c0_61] : memref<128x512xf32, #tpu.memory_space<vmem>>, vector<128x512xf32>
    %cst_62 = arith.constant dense<0.000000e+00> : vector<8x512xf32>
    %193 = tpu.matmul %160, %192, %cst_62 {dimension_numbers = #tpu.dot_dimension_numbers<[1], [0], [0], [1], [0, 0, 1, 1], [], []>} : vector<8x128xf32>, vector<128x512xf32>, vector<8x512xf32> -> vector<8x512xf32>
    %194 = arith.addf %191, %193 : vector<8x512xf32>
    %195 = vector.extract_strided_slice %194 {offsets = [0, 0], sizes = [8, 128], strides = [1, 1]} : vector<8x512xf32> to vector<8x128xf32>
    %196 = arith.negf %195 : vector<8x128xf32>
    %197 = math.exp %196 : vector<8x128xf32>
    %cst_63 = arith.constant 1.000000e+00 : f32
    %198 = vector.broadcast %cst_63 : f32 to vector<8x128xf32>
    %199 = arith.addf %198, %197 : vector<8x128xf32>
    %200 = arith.divf %198, %199 : vector<8x128xf32>
    %201 = vector.extract_strided_slice %194 {offsets = [0, 128], sizes = [8, 128], strides = [1, 1]} : vector<8x512xf32> to vector<8x128xf32>
    %202 = arith.negf %201 : vector<8x128xf32>
    %203 = math.exp %202 : vector<8x128xf32>
    %cst_64 = arith.constant 1.000000e+00 : f32
    %204 = vector.broadcast %cst_64 : f32 to vector<8x128xf32>
    %205 = arith.addf %204, %203 : vector<8x128xf32>
    %206 = arith.divf %204, %205 : vector<8x128xf32>
    %207 = vector.extract_strided_slice %194 {offsets = [0, 256], sizes = [8, 128], strides = [1, 1]} : vector<8x512xf32> to vector<8x128xf32>
    %208 = math.tanh %207 : vector<8x128xf32>
    %209 = vector.extract_strided_slice %194 {offsets = [0, 384], sizes = [8, 128], strides = [1, 1]} : vector<8x512xf32> to vector<8x128xf32>
    %210 = arith.negf %209 : vector<8x128xf32>
    %211 = math.exp %210 : vector<8x128xf32>
    %cst_65 = arith.constant 1.000000e+00 : f32
    %212 = vector.broadcast %cst_65 : f32 to vector<8x128xf32>
    %213 = arith.addf %212, %211 : vector<8x128xf32>
    %214 = arith.divf %212, %213 : vector<8x128xf32>
    %215 = arith.mulf %206, %158 : vector<8x128xf32>
    %216 = arith.mulf %200, %208 : vector<8x128xf32>
    %217 = arith.addf %215, %216 : vector<8x128xf32>
    %218 = math.tanh %217 : vector<8x128xf32>
    %219 = arith.mulf %214, %218 : vector<8x128xf32>
    %220 = tpu.concatenate %219, %189 in 1 : vector<8x128xf32>, vector<8x128xf32> -> vector<8x256xf32>
    %c0_66 = arith.constant 0 : index
    %c0_67 = arith.constant 0 : index
    %221 = vector.load %arg5[%c0_66, %c0_67] : memref<256x512xf32, #tpu.memory_space<vmem>>, vector<256x512xf32>
    %cst_68 = arith.constant dense<0.000000e+00> : vector<8x512xf32>
    %222 = tpu.matmul %220, %221, %cst_68 {dimension_numbers = #tpu.dot_dimension_numbers<[1], [0], [0], [1], [0, 0, 1, 1], [], []>} : vector<8x256xf32>, vector<256x512xf32>, vector<8x512xf32> -> vector<8x512xf32>
    %223 = arith.addf %222, %9 : vector<8x512xf32>
    %224 = vector.extract_strided_slice %223 {offsets = [0, 0], sizes = [8, 128], strides = [1, 1]} : vector<8x512xf32> to vector<8x128xf32>
    %225 = arith.negf %224 : vector<8x128xf32>
    %226 = math.exp %225 : vector<8x128xf32>
    %cst_69 = arith.constant 1.000000e+00 : f32
    %227 = vector.broadcast %cst_69 : f32 to vector<8x128xf32>
    %228 = arith.addf %227, %226 : vector<8x128xf32>
    %229 = arith.divf %227, %228 : vector<8x128xf32>
    %230 = vector.extract_strided_slice %223 {offsets = [0, 128], sizes = [8, 128], strides = [1, 1]} : vector<8x512xf32> to vector<8x128xf32>
    %231 = arith.negf %230 : vector<8x128xf32>
    %232 = math.exp %231 : vector<8x128xf32>
    %cst_70 = arith.constant 1.000000e+00 : f32
    %233 = vector.broadcast %cst_70 : f32 to vector<8x128xf32>
    %234 = arith.addf %233, %232 : vector<8x128xf32>
    %235 = arith.divf %233, %234 : vector<8x128xf32>
    %236 = vector.extract_strided_slice %223 {offsets = [0, 256], sizes = [8, 128], strides = [1, 1]} : vector<8x512xf32> to vector<8x128xf32>
    %237 = math.tanh %236 : vector<8x128xf32>
    %238 = vector.extract_strided_slice %223 {offsets = [0, 384], sizes = [8, 128], strides = [1, 1]} : vector<8x512xf32> to vector<8x128xf32>
    %239 = arith.negf %238 : vector<8x128xf32>
    %240 = math.exp %239 : vector<8x128xf32>
    %cst_71 = arith.constant 1.000000e+00 : f32
    %241 = vector.broadcast %cst_71 : f32 to vector<8x128xf32>
    %242 = arith.addf %241, %240 : vector<8x128xf32>
    %243 = arith.divf %241, %242 : vector<8x128xf32>
    %244 = arith.mulf %235, %187 : vector<8x128xf32>
    %245 = arith.mulf %229, %237 : vector<8x128xf32>
    %246 = arith.addf %244, %245 : vector<8x128xf32>
    %247 = math.tanh %246 : vector<8x128xf32>
    %248 = arith.mulf %243, %247 : vector<8x128xf32>
    %c24_72 = arith.constant 24 : index
    %c0_73 = arith.constant 0 : index
    %249 = vector.load %arg7[%c24_72, %c0_73] : memref<64x128xf32, #tpu.memory_space<vmem>>, vector<8x128xf32>
    tpu.vector_store %arg7[%c24_72, %c0_73], %248 {strides = array<i32>} : memref<64x128xf32, #tpu.memory_space<vmem>>, vector<8x128xf32>,
    %c32 = arith.constant 32 : index
    %c0_74 = arith.constant 0 : index
    %250 = vector.load %arg8[%c32, %c0_74] : memref<64x512xf32, #tpu.memory_space<vmem>>, vector<8x512xf32>
    %c0_75 = arith.constant 0 : index
    %c0_76 = arith.constant 0 : index
    %251 = vector.load %arg3[%c0_75, %c0_76] : memref<128x512xf32, #tpu.memory_space<vmem>>, vector<128x512xf32>
    %cst_77 = arith.constant dense<0.000000e+00> : vector<8x512xf32>
    %252 = tpu.matmul %219, %251, %cst_77 {dimension_numbers = #tpu.dot_dimension_numbers<[1], [0], [0], [1], [0, 0, 1, 1], [], []>} : vector<8x128xf32>, vector<128x512xf32>, vector<8x512xf32> -> vector<8x512xf32>
    %253 = arith.addf %250, %252 : vector<8x512xf32>
    %254 = vector.extract_strided_slice %253 {offsets = [0, 0], sizes = [8, 128], strides = [1, 1]} : vector<8x512xf32> to vector<8x128xf32>
    %255 = arith.negf %254 : vector<8x128xf32>
    %256 = math.exp %255 : vector<8x128xf32>
    %cst_78 = arith.constant 1.000000e+00 : f32
    %257 = vector.broadcast %cst_78 : f32 to vector<8x128xf32>
    %258 = arith.addf %257, %256 : vector<8x128xf32>
    %259 = arith.divf %257, %258 : vector<8x128xf32>
    %260 = vector.extract_strided_slice %253 {offsets = [0, 128], sizes = [8, 128], strides = [1, 1]} : vector<8x512xf32> to vector<8x128xf32>
    %261 = arith.negf %260 : vector<8x128xf32>
    %262 = math.exp %261 : vector<8x128xf32>
    %cst_79 = arith.constant 1.000000e+00 : f32
    %263 = vector.broadcast %cst_79 : f32 to vector<8x128xf32>
    %264 = arith.addf %263, %262 : vector<8x128xf32>
    %265 = arith.divf %263, %264 : vector<8x128xf32>
    %266 = vector.extract_strided_slice %253 {offsets = [0, 256], sizes = [8, 128], strides = [1, 1]} : vector<8x512xf32> to vector<8x128xf32>
    %267 = math.tanh %266 : vector<8x128xf32>
    %268 = vector.extract_strided_slice %253 {offsets = [0, 384], sizes = [8, 128], strides = [1, 1]} : vector<8x512xf32> to vector<8x128xf32>
    %269 = arith.negf %268 : vector<8x128xf32>
    %270 = math.exp %269 : vector<8x128xf32>
    %cst_80 = arith.constant 1.000000e+00 : f32
    %271 = vector.broadcast %cst_80 : f32 to vector<8x128xf32>
    %272 = arith.addf %271, %270 : vector<8x128xf32>
    %273 = arith.divf %271, %272 : vector<8x128xf32>
    %274 = arith.mulf %265, %217 : vector<8x128xf32>
    %275 = arith.mulf %259, %267 : vector<8x128xf32>
    %276 = arith.addf %274, %275 : vector<8x128xf32>
    %277 = math.tanh %276 : vector<8x128xf32>
    %278 = arith.mulf %273, %277 : vector<8x128xf32>
    %279 = tpu.concatenate %278, %248 in 1 : vector<8x128xf32>, vector<8x128xf32> -> vector<8x256xf32>
    %c0_81 = arith.constant 0 : index
    %c0_82 = arith.constant 0 : index
    %280 = vector.load %arg5[%c0_81, %c0_82] : memref<256x512xf32, #tpu.memory_space<vmem>>, vector<256x512xf32>
    %cst_83 = arith.constant dense<0.000000e+00> : vector<8x512xf32>
    %281 = tpu.matmul %279, %280, %cst_83 {dimension_numbers = #tpu.dot_dimension_numbers<[1], [0], [0], [1], [0, 0, 1, 1], [], []>} : vector<8x256xf32>, vector<256x512xf32>, vector<8x512xf32> -> vector<8x512xf32>
    %282 = arith.addf %281, %9 : vector<8x512xf32>
    %283 = vector.extract_strided_slice %282 {offsets = [0, 0], sizes = [8, 128], strides = [1, 1]} : vector<8x512xf32> to vector<8x128xf32>
    %284 = arith.negf %283 : vector<8x128xf32>
    %285 = math.exp %284 : vector<8x128xf32>
    %cst_84 = arith.constant 1.000000e+00 : f32
    %286 = vector.broadcast %cst_84 : f32 to vector<8x128xf32>
    %287 = arith.addf %286, %285 : vector<8x128xf32>
    %288 = arith.divf %286, %287 : vector<8x128xf32>
    %289 = vector.extract_strided_slice %282 {offsets = [0, 128], sizes = [8, 128], strides = [1, 1]} : vector<8x512xf32> to vector<8x128xf32>
    %290 = arith.negf %289 : vector<8x128xf32>
    %291 = math.exp %290 : vector<8x128xf32>
    %cst_85 = arith.constant 1.000000e+00 : f32
    %292 = vector.broadcast %cst_85 : f32 to vector<8x128xf32>
    %293 = arith.addf %292, %291 : vector<8x128xf32>
    %294 = arith.divf %292, %293 : vector<8x128xf32>
    %295 = vector.extract_strided_slice %282 {offsets = [0, 256], sizes = [8, 128], strides = [1, 1]} : vector<8x512xf32> to vector<8x128xf32>
    %296 = math.tanh %295 : vector<8x128xf32>
    %297 = vector.extract_strided_slice %282 {offsets = [0, 384], sizes = [8, 128], strides = [1, 1]} : vector<8x512xf32> to vector<8x128xf32>
    %298 = arith.negf %297 : vector<8x128xf32>
    %299 = math.exp %298 : vector<8x128xf32>
    %cst_86 = arith.constant 1.000000e+00 : f32
    %300 = vector.broadcast %cst_86 : f32 to vector<8x128xf32>
    %301 = arith.addf %300, %299 : vector<8x128xf32>
    %302 = arith.divf %300, %301 : vector<8x128xf32>
    %303 = arith.mulf %294, %246 : vector<8x128xf32>
    %304 = arith.mulf %288, %296 : vector<8x128xf32>
    %305 = arith.addf %303, %304 : vector<8x128xf32>
    %306 = math.tanh %305 : vector<8x128xf32>
    %307 = arith.mulf %302, %306 : vector<8x128xf32>
    %c32_87 = arith.constant 32 : index
    %c0_88 = arith.constant 0 : index
    %308 = vector.load %arg7[%c32_87, %c0_88] : memref<64x128xf32, #tpu.memory_space<vmem>>, vector<8x128xf32>
    tpu.vector_store %arg7[%c32_87, %c0_88], %307 {strides = array<i32>} : memref<64x128xf32, #tpu.memory_space<vmem>>, vector<8x128xf32>,
    %c40 = arith.constant 40 : index
    %c0_89 = arith.constant 0 : index
    %309 = vector.load %arg8[%c40, %c0_89] : memref<64x512xf32, #tpu.memory_space<vmem>>, vector<8x512xf32>
    %c0_90 = arith.constant 0 : index
    %c0_91 = arith.constant 0 : index
    %310 = vector.load %arg3[%c0_90, %c0_91] : memref<128x512xf32, #tpu.memory_space<vmem>>, vector<128x512xf32>
    %cst_92 = arith.constant dense<0.000000e+00> : vector<8x512xf32>
    %311 = tpu.matmul %278, %310, %cst_92 {dimension_numbers = #tpu.dot_dimension_numbers<[1], [0], [0], [1], [0, 0, 1, 1], [], []>} : vector<8x128xf32>, vector<128x512xf32>, vector<8x512xf32> -> vector<8x512xf32>
    %312 = arith.addf %309, %311 : vector<8x512xf32>
    %313 = vector.extract_strided_slice %312 {offsets = [0, 0], sizes = [8, 128], strides = [1, 1]} : vector<8x512xf32> to vector<8x128xf32>
    %314 = arith.negf %313 : vector<8x128xf32>
    %315 = math.exp %314 : vector<8x128xf32>
    %cst_93 = arith.constant 1.000000e+00 : f32
    %316 = vector.broadcast %cst_93 : f32 to vector<8x128xf32>
    %317 = arith.addf %316, %315 : vector<8x128xf32>
    %318 = arith.divf %316, %317 : vector<8x128xf32>
    %319 = vector.extract_strided_slice %312 {offsets = [0, 128], sizes = [8, 128], strides = [1, 1]} : vector<8x512xf32> to vector<8x128xf32>
    %320 = arith.negf %319 : vector<8x128xf32>
    %321 = math.exp %320 : vector<8x128xf32>
    %cst_94 = arith.constant 1.000000e+00 : f32
    %322 = vector.broadcast %cst_94 : f32 to vector<8x128xf32>
    %323 = arith.addf %322, %321 : vector<8x128xf32>
    %324 = arith.divf %322, %323 : vector<8x128xf32>
    %325 = vector.extract_strided_slice %312 {offsets = [0, 256], sizes = [8, 128], strides = [1, 1]} : vector<8x512xf32> to vector<8x128xf32>
    %326 = math.tanh %325 : vector<8x128xf32>
    %327 = vector.extract_strided_slice %312 {offsets = [0, 384], sizes = [8, 128], strides = [1, 1]} : vector<8x512xf32> to vector<8x128xf32>
    %328 = arith.negf %327 : vector<8x128xf32>
    %329 = math.exp %328 : vector<8x128xf32>
    %cst_95 = arith.constant 1.000000e+00 : f32
    %330 = vector.broadcast %cst_95 : f32 to vector<8x128xf32>
    %331 = arith.addf %330, %329 : vector<8x128xf32>
    %332 = arith.divf %330, %331 : vector<8x128xf32>
    %333 = arith.mulf %324, %276 : vector<8x128xf32>
    %334 = arith.mulf %318, %326 : vector<8x128xf32>
    %335 = arith.addf %333, %334 : vector<8x128xf32>
    %336 = math.tanh %335 : vector<8x128xf32>
    %337 = arith.mulf %332, %336 : vector<8x128xf32>
    %338 = tpu.concatenate %337, %307 in 1 : vector<8x128xf32>, vector<8x128xf32> -> vector<8x256xf32>
    %c0_96 = arith.constant 0 : index
    %c0_97 = arith.constant 0 : index
    %339 = vector.load %arg5[%c0_96, %c0_97] : memref<256x512xf32, #tpu.memory_space<vmem>>, vector<256x512xf32>
    %cst_98 = arith.constant dense<0.000000e+00> : vector<8x512xf32>
    %340 = tpu.matmul %338, %339, %cst_98 {dimension_numbers = #tpu.dot_dimension_numbers<[1], [0], [0], [1], [0, 0, 1, 1], [], []>} : vector<8x256xf32>, vector<256x512xf32>, vector<8x512xf32> -> vector<8x512xf32>
    %341 = arith.addf %340, %9 : vector<8x512xf32>
    %342 = vector.extract_strided_slice %341 {offsets = [0, 0], sizes = [8, 128], strides = [1, 1]} : vector<8x512xf32> to vector<8x128xf32>
    %343 = arith.negf %342 : vector<8x128xf32>
    %344 = math.exp %343 : vector<8x128xf32>
    %cst_99 = arith.constant 1.000000e+00 : f32
    %345 = vector.broadcast %cst_99 : f32 to vector<8x128xf32>
    %346 = arith.addf %345, %344 : vector<8x128xf32>
    %347 = arith.divf %345, %346 : vector<8x128xf32>
    %348 = vector.extract_strided_slice %341 {offsets = [0, 128], sizes = [8, 128], strides = [1, 1]} : vector<8x512xf32> to vector<8x128xf32>
    %349 = arith.negf %348 : vector<8x128xf32>
    %350 = math.exp %349 : vector<8x128xf32>
    %cst_100 = arith.constant 1.000000e+00 : f32
    %351 = vector.broadcast %cst_100 : f32 to vector<8x128xf32>
    %352 = arith.addf %351, %350 : vector<8x128xf32>
    %353 = arith.divf %351, %352 : vector<8x128xf32>
    %354 = vector.extract_strided_slice %341 {offsets = [0, 256], sizes = [8, 128], strides = [1, 1]} : vector<8x512xf32> to vector<8x128xf32>
    %355 = math.tanh %354 : vector<8x128xf32>
    %356 = vector.extract_strided_slice %341 {offsets = [0, 384], sizes = [8, 128], strides = [1, 1]} : vector<8x512xf32> to vector<8x128xf32>
    %357 = arith.negf %356 : vector<8x128xf32>
    %358 = math.exp %357 : vector<8x128xf32>
    %cst_101 = arith.constant 1.000000e+00 : f32
    %359 = vector.broadcast %cst_101 : f32 to vector<8x128xf32>
    %360 = arith.addf %359, %358 : vector<8x128xf32>
    %361 = arith.divf %359, %360 : vector<8x128xf32>
    %362 = arith.mulf %353, %305 : vector<8x128xf32>
    %363 = arith.mulf %347, %355 : vector<8x128xf32>
    %364 = arith.addf %362, %363 : vector<8x128xf32>
    %365 = math.tanh %364 : vector<8x128xf32>
    %366 = arith.mulf %361, %365 : vector<8x128xf32>
    %c40_102 = arith.constant 40 : index
    %c0_103 = arith.constant 0 : index
    %367 = vector.load %arg7[%c40_102, %c0_103] : memref<64x128xf32, #tpu.memory_space<vmem>>, vector<8x128xf32>
    tpu.vector_store %arg7[%c40_102, %c0_103], %366 {strides = array<i32>} : memref<64x128xf32, #tpu.memory_space<vmem>>, vector<8x128xf32>,
    %c48 = arith.constant 48 : index
    %c0_104 = arith.constant 0 : index
    %368 = vector.load %arg8[%c48, %c0_104] : memref<64x512xf32, #tpu.memory_space<vmem>>, vector<8x512xf32>
    %c0_105 = arith.constant 0 : index
    %c0_106 = arith.constant 0 : index
    %369 = vector.load %arg3[%c0_105, %c0_106] : memref<128x512xf32, #tpu.memory_space<vmem>>, vector<128x512xf32>
    %cst_107 = arith.constant dense<0.000000e+00> : vector<8x512xf32>
    %370 = tpu.matmul %337, %369, %cst_107 {dimension_numbers = #tpu.dot_dimension_numbers<[1], [0], [0], [1], [0, 0, 1, 1], [], []>} : vector<8x128xf32>, vector<128x512xf32>, vector<8x512xf32> -> vector<8x512xf32>
    %371 = arith.addf %368, %370 : vector<8x512xf32>
    %372 = vector.extract_strided_slice %371 {offsets = [0, 0], sizes = [8, 128], strides = [1, 1]} : vector<8x512xf32> to vector<8x128xf32>
    %373 = arith.negf %372 : vector<8x128xf32>
    %374 = math.exp %373 : vector<8x128xf32>
    %cst_108 = arith.constant 1.000000e+00 : f32
    %375 = vector.broadcast %cst_108 : f32 to vector<8x128xf32>
    %376 = arith.addf %375, %374 : vector<8x128xf32>
    %377 = arith.divf %375, %376 : vector<8x128xf32>
    %378 = vector.extract_strided_slice %371 {offsets = [0, 128], sizes = [8, 128], strides = [1, 1]} : vector<8x512xf32> to vector<8x128xf32>
    %379 = arith.negf %378 : vector<8x128xf32>
    %380 = math.exp %379 : vector<8x128xf32>
    %cst_109 = arith.constant 1.000000e+00 : f32
    %381 = vector.broadcast %cst_109 : f32 to vector<8x128xf32>
    %382 = arith.addf %381, %380 : vector<8x128xf32>
    %383 = arith.divf %381, %382 : vector<8x128xf32>
    %384 = vector.extract_strided_slice %371 {offsets = [0, 256], sizes = [8, 128], strides = [1, 1]} : vector<8x512xf32> to vector<8x128xf32>
    %385 = math.tanh %384 : vector<8x128xf32>
    %386 = vector.extract_strided_slice %371 {offsets = [0, 384], sizes = [8, 128], strides = [1, 1]} : vector<8x512xf32> to vector<8x128xf32>
    %387 = arith.negf %386 : vector<8x128xf32>
    %388 = math.exp %387 : vector<8x128xf32>
    %cst_110 = arith.constant 1.000000e+00 : f32
    %389 = vector.broadcast %cst_110 : f32 to vector<8x128xf32>
    %390 = arith.addf %389, %388 : vector<8x128xf32>
    %391 = arith.divf %389, %390 : vector<8x128xf32>
    %392 = arith.mulf %383, %335 : vector<8x128xf32>
    %393 = arith.mulf %377, %385 : vector<8x128xf32>
    %394 = arith.addf %392, %393 : vector<8x128xf32>
    %395 = math.tanh %394 : vector<8x128xf32>
    %396 = arith.mulf %391, %395 : vector<8x128xf32>
    %397 = tpu.concatenate %396, %366 in 1 : vector<8x128xf32>, vector<8x128xf32> -> vector<8x256xf32>
    %c0_111 = arith.constant 0 : index
    %c0_112 = arith.constant 0 : index
    %398 = vector.load %arg5[%c0_111, %c0_112] : memref<256x512xf32, #tpu.memory_space<vmem>>, vector<256x512xf32>
    %cst_113 = arith.constant dense<0.000000e+00> : vector<8x512xf32>
    %399 = tpu.matmul %397, %398, %cst_113 {dimension_numbers = #tpu.dot_dimension_numbers<[1], [0], [0], [1], [0, 0, 1, 1], [], []>} : vector<8x256xf32>, vector<256x512xf32>, vector<8x512xf32> -> vector<8x512xf32>
    %400 = arith.addf %399, %9 : vector<8x512xf32>
    %401 = vector.extract_strided_slice %400 {offsets = [0, 0], sizes = [8, 128], strides = [1, 1]} : vector<8x512xf32> to vector<8x128xf32>
    %402 = arith.negf %401 : vector<8x128xf32>
    %403 = math.exp %402 : vector<8x128xf32>
    %cst_114 = arith.constant 1.000000e+00 : f32
    %404 = vector.broadcast %cst_114 : f32 to vector<8x128xf32>
    %405 = arith.addf %404, %403 : vector<8x128xf32>
    %406 = arith.divf %404, %405 : vector<8x128xf32>
    %407 = vector.extract_strided_slice %400 {offsets = [0, 128], sizes = [8, 128], strides = [1, 1]} : vector<8x512xf32> to vector<8x128xf32>
    %408 = arith.negf %407 : vector<8x128xf32>
    %409 = math.exp %408 : vector<8x128xf32>
    %cst_115 = arith.constant 1.000000e+00 : f32
    %410 = vector.broadcast %cst_115 : f32 to vector<8x128xf32>
    %411 = arith.addf %410, %409 : vector<8x128xf32>
    %412 = arith.divf %410, %411 : vector<8x128xf32>
    %413 = vector.extract_strided_slice %400 {offsets = [0, 256], sizes = [8, 128], strides = [1, 1]} : vector<8x512xf32> to vector<8x128xf32>
    %414 = math.tanh %413 : vector<8x128xf32>
    %415 = vector.extract_strided_slice %400 {offsets = [0, 384], sizes = [8, 128], strides = [1, 1]} : vector<8x512xf32> to vector<8x128xf32>
    %416 = arith.negf %415 : vector<8x128xf32>
    %417 = math.exp %416 : vector<8x128xf32>
    %cst_116 = arith.constant 1.000000e+00 : f32
    %418 = vector.broadcast %cst_116 : f32 to vector<8x128xf32>
    %419 = arith.addf %418, %417 : vector<8x128xf32>
    %420 = arith.divf %418, %419 : vector<8x128xf32>
    %421 = arith.mulf %412, %364 : vector<8x128xf32>
    %422 = arith.mulf %406, %414 : vector<8x128xf32>
    %423 = arith.addf %421, %422 : vector<8x128xf32>
    %424 = math.tanh %423 : vector<8x128xf32>
    %425 = arith.mulf %420, %424 : vector<8x128xf32>
    %c48_117 = arith.constant 48 : index
    %c0_118 = arith.constant 0 : index
    %426 = vector.load %arg7[%c48_117, %c0_118] : memref<64x128xf32, #tpu.memory_space<vmem>>, vector<8x128xf32>
    tpu.vector_store %arg7[%c48_117, %c0_118], %425 {strides = array<i32>} : memref<64x128xf32, #tpu.memory_space<vmem>>, vector<8x128xf32>,
    %c56 = arith.constant 56 : index
    %c0_119 = arith.constant 0 : index
    %427 = vector.load %arg8[%c56, %c0_119] : memref<64x512xf32, #tpu.memory_space<vmem>>, vector<8x512xf32>
    %c0_120 = arith.constant 0 : index
    %c0_121 = arith.constant 0 : index
    %428 = vector.load %arg3[%c0_120, %c0_121] : memref<128x512xf32, #tpu.memory_space<vmem>>, vector<128x512xf32>
    %cst_122 = arith.constant dense<0.000000e+00> : vector<8x512xf32>
    %429 = tpu.matmul %396, %428, %cst_122 {dimension_numbers = #tpu.dot_dimension_numbers<[1], [0], [0], [1], [0, 0, 1, 1], [], []>} : vector<8x128xf32>, vector<128x512xf32>, vector<8x512xf32> -> vector<8x512xf32>
    %430 = arith.addf %427, %429 : vector<8x512xf32>
    %431 = vector.extract_strided_slice %430 {offsets = [0, 0], sizes = [8, 128], strides = [1, 1]} : vector<8x512xf32> to vector<8x128xf32>
    %432 = arith.negf %431 : vector<8x128xf32>
    %433 = math.exp %432 : vector<8x128xf32>
    %cst_123 = arith.constant 1.000000e+00 : f32
    %434 = vector.broadcast %cst_123 : f32 to vector<8x128xf32>
    %435 = arith.addf %434, %433 : vector<8x128xf32>
    %436 = arith.divf %434, %435 : vector<8x128xf32>
    %437 = vector.extract_strided_slice %430 {offsets = [0, 128], sizes = [8, 128], strides = [1, 1]} : vector<8x512xf32> to vector<8x128xf32>
    %438 = arith.negf %437 : vector<8x128xf32>
    %439 = math.exp %438 : vector<8x128xf32>
    %cst_124 = arith.constant 1.000000e+00 : f32
    %440 = vector.broadcast %cst_124 : f32 to vector<8x128xf32>
    %441 = arith.addf %440, %439 : vector<8x128xf32>
    %442 = arith.divf %440, %441 : vector<8x128xf32>
    %443 = vector.extract_strided_slice %430 {offsets = [0, 256], sizes = [8, 128], strides = [1, 1]} : vector<8x512xf32> to vector<8x128xf32>
    %444 = math.tanh %443 : vector<8x128xf32>
    %445 = vector.extract_strided_slice %430 {offsets = [0, 384], sizes = [8, 128], strides = [1, 1]} : vector<8x512xf32> to vector<8x128xf32>
    %446 = arith.negf %445 : vector<8x128xf32>
    %447 = math.exp %446 : vector<8x128xf32>
    %cst_125 = arith.constant 1.000000e+00 : f32
    %448 = vector.broadcast %cst_125 : f32 to vector<8x128xf32>
    %449 = arith.addf %448, %447 : vector<8x128xf32>
    %450 = arith.divf %448, %449 : vector<8x128xf32>
    %451 = arith.mulf %442, %394 : vector<8x128xf32>
    %452 = arith.mulf %436, %444 : vector<8x128xf32>
    %453 = arith.addf %451, %452 : vector<8x128xf32>
    %454 = math.tanh %453 : vector<8x128xf32>
    %455 = arith.mulf %450, %454 : vector<8x128xf32>
    %456 = tpu.concatenate %455, %425 in 1 : vector<8x128xf32>, vector<8x128xf32> -> vector<8x256xf32>
    %c0_126 = arith.constant 0 : index
    %c0_127 = arith.constant 0 : index
    %457 = vector.load %arg5[%c0_126, %c0_127] : memref<256x512xf32, #tpu.memory_space<vmem>>, vector<256x512xf32>
    %cst_128 = arith.constant dense<0.000000e+00> : vector<8x512xf32>
    %458 = tpu.matmul %456, %457, %cst_128 {dimension_numbers = #tpu.dot_dimension_numbers<[1], [0], [0], [1], [0, 0, 1, 1], [], []>} : vector<8x256xf32>, vector<256x512xf32>, vector<8x512xf32> -> vector<8x512xf32>
    %459 = arith.addf %458, %9 : vector<8x512xf32>
    %460 = vector.extract_strided_slice %459 {offsets = [0, 0], sizes = [8, 128], strides = [1, 1]} : vector<8x512xf32> to vector<8x128xf32>
    %461 = arith.negf %460 : vector<8x128xf32>
    %462 = math.exp %461 : vector<8x128xf32>
    %cst_129 = arith.constant 1.000000e+00 : f32
    %463 = vector.broadcast %cst_129 : f32 to vector<8x128xf32>
    %464 = arith.addf %463, %462 : vector<8x128xf32>
    %465 = arith.divf %463, %464 : vector<8x128xf32>
    %466 = vector.extract_strided_slice %459 {offsets = [0, 128], sizes = [8, 128], strides = [1, 1]} : vector<8x512xf32> to vector<8x128xf32>
    %467 = arith.negf %466 : vector<8x128xf32>
    %468 = math.exp %467 : vector<8x128xf32>
    %cst_130 = arith.constant 1.000000e+00 : f32
    %469 = vector.broadcast %cst_130 : f32 to vector<8x128xf32>
    %470 = arith.addf %469, %468 : vector<8x128xf32>
    %471 = arith.divf %469, %470 : vector<8x128xf32>
    %472 = vector.extract_strided_slice %459 {offsets = [0, 256], sizes = [8, 128], strides = [1, 1]} : vector<8x512xf32> to vector<8x128xf32>
    %473 = math.tanh %472 : vector<8x128xf32>
    %474 = vector.extract_strided_slice %459 {offsets = [0, 384], sizes = [8, 128], strides = [1, 1]} : vector<8x512xf32> to vector<8x128xf32>
    %475 = arith.negf %474 : vector<8x128xf32>
    %476 = math.exp %475 : vector<8x128xf32>
    %cst_131 = arith.constant 1.000000e+00 : f32
    %477 = vector.broadcast %cst_131 : f32 to vector<8x128xf32>
    %478 = arith.addf %477, %476 : vector<8x128xf32>
    %479 = arith.divf %477, %478 : vector<8x128xf32>
    %480 = arith.mulf %471, %423 : vector<8x128xf32>
    %481 = arith.mulf %465, %473 : vector<8x128xf32>
    %482 = arith.addf %480, %481 : vector<8x128xf32>
    %483 = math.tanh %482 : vector<8x128xf32>
    %484 = arith.mulf %479, %483 : vector<8x128xf32>
    %c56_132 = arith.constant 56 : index
    %c0_133 = arith.constant 0 : index
    %485 = vector.load %arg7[%c56_132, %c0_133] : memref<64x128xf32, #tpu.memory_space<vmem>>, vector<8x128xf32>
    tpu.vector_store %arg7[%c56_132, %c0_133], %484 {strides = array<i32>} : memref<64x128xf32, #tpu.memory_space<vmem>>, vector<8x128xf32>,
    return
  }
  func.func @transform_0(%arg0: i32) -> (i32, i32) {
    %c0_i32 = arith.constant 0 : i32
    %c0_i32_0 = arith.constant 0 : i32
    %c0_i32_1 = arith.constant 0 : i32
    return %c0_i32, %c0_i32_0 : i32, i32
  }
  func.func @transform_1(%arg0: i32) -> (i32, i32) {
    %c0_i32 = arith.constant 0 : i32
    %c0_i32_0 = arith.constant 0 : i32
    %c0_i32_1 = arith.constant 0 : i32
    return %c0_i32, %c0_i32_0 : i32, i32
  }
  func.func @transform_2(%arg0: i32) -> (i32, i32) {
    %c0_i32 = arith.constant 0 : i32
    %c0_i32_0 = arith.constant 0 : i32
    %c0_i32_1 = arith.constant 0 : i32
    return %c0_i32, %c0_i32_0 : i32, i32
  }
  func.func @transform_3(%arg0: i32) -> (i32, i32) {
    %c0_i32 = arith.constant 0 : i32
    %c0_i32_0 = arith.constant 0 : i32
    %c0_i32_1 = arith.constant 0 : i32
    return %c0_i32, %c0_i32_0 : i32, i32
  }
  func.func @transform_4(%arg0: i32) -> (i32, i32) {
    %c0_i32 = arith.constant 0 : i32
    %c0_i32_0 = arith.constant 0 : i32
    %c0_i32_1 = arith.constant 0 : i32
    return %c0_i32, %c0_i32_0 : i32, i32
  }
  func.func @transform_5(%arg0: i32) -> (i32, i32) {
    %c0_i32 = arith.constant 0 : i32
    %c0_i32_0 = arith.constant 0 : i32
    %c0_i32_1 = arith.constant 0 : i32
    return %c0_i32, %c0_i32_0 : i32, i32
  }
  func.func @transform_6(%arg0: i32) -> (i32, i32) {
    %c0_i32 = arith.constant 0 : i32
    %c0_i32_0 = arith.constant 0 : i32
    %c0_i32_1 = arith.constant 0 : i32
    return %c0_i32, %c0_i32_0 : i32, i32
  }
}

</mosaic_0001>

<bundles_post_ra>
// kernel: tpu_custom_call.1
= control target key start
LH: loop header
LB: loop body
LE: loop exit
PB: predicated region body
PF: predicated region fallthrough
CT: control target
= control target key end

     0   :  { %11 = vsyncpa [#allocation4], 0  ;;  %s8428_s0 = inlined_call_operand.vmem [shape: f32[64,4], index: 0, kind: input, shape index: {}]   ;;  %s8429_s1 = inlined_call_operand.vmem [shape: f32[4,512], index: 1, kind: input, shape index: {}]   ;;  %s8430_s2 = inlined_call_operand.hbm [shape: f32[128,512], index: 2, kind: input, shape index: {}]   ;;  %s8431_s3 = inlined_call_operand.vmem [shape: f32[1,512], index: 3, kind: input, shape index: {}]   ;;  %s8432_s4 = inlined_call_operand.hbm [shape: f32[256,512], index: 4, kind: input, shape index: {}]   ;;  %s8433_s5 = inlined_call_operand.vmem [shape: f32[1,512], index: 5, kind: input, shape index: {}]   ;;  %s8434_s6 = inlined_call_operand.hbm [shape: f32[64,128], index: 6, kind: output, shape index: {}]  }
   0x1   :  { %12 = vsyncpa [#allocation7], 0 }
   0x2   :  { %13 = vsyncpa [#allocation5], 0  ;;  %s5092_s21 = smov [#allocation3]  }
   0x3   :  { %s23_s22 = sshll.u32 %s5092_s21, 4  ;;  %s24_s22 = int_to_ptr.vmem [resolvable:$true] %s23_s22 }
   0x4   :  { %s5034_s23 = scalar_lea.vmem %s24_s22, 8192  ;;  %p5039_p1 = scmp.lt.s32.totalorder %s24_s22, %s24_s22 }
   0x5   :  { %p5035_p0 = scmp.ne.s32.totalorder %s24_s22, %s5034_s23  ;;  %p5040_p2 = scmp.lt.s32.totalorder %s5034_s23, %s5034_s23 }
   0x7   :  { %p5041_p3 = por %p5040_p2, %p5039_p1 }
   0x9   :  { %p5042_p4 = pnand %p5041_p3, %p5035_p0 }
   0xb   :  { %5045 = shalt.err (!%p5042_p4)
}
   0xc   :  { %s5093_s24 = smov 512   ;;  %s5094_s25 = smov 32  }
   0xd   :  { %29 = dma.hbm_to_vmem [thread:$0]  %s8430_s2, 8192, %s24_s22, [#allocation4], %s5093_s24, %s5093_s24, %s5094_s25  }
   0xe   :  { %s5095_s28 = smov [#allocation6]  }
   0xf   :  { %s37_s29 = sshll.u32 %s5095_s28, 4  ;;  %s38_s29 = int_to_ptr.vmem [resolvable:$true] %s37_s29 }
  0x10   :  { %s5054_s30 = scalar_lea.vmem %s38_s29, 16384  ;;  %p5059_p6 = scmp.lt.s32.totalorder %s38_s29, %s38_s29 }
  0x11   :  { %p5055_p5 = scmp.ne.s32.totalorder %s38_s29, %s5054_s30  ;;  %p5060_p7 = scmp.lt.s32.totalorder %s5054_s30, %s5054_s30 }
  0x13   :  { %p5061_p8 = por %p5060_p7, %p5059_p6 }
  0x15   :  { %p5062_p9 = pnand %p5061_p8, %p5055_p5 }
  0x17   :  { %5065 = shalt.err (!%p5062_p9)
}
  0x18   :  { %43 = dma.hbm_to_vmem [thread:$0]  %s8432_s4, 16384, %s38_s29, [#allocation7], %s5093_s24, %s5093_s24, %s5094_s25  }
  0x19   :  { %5086 = dma.done.wait [#allocation4], 8192  }
  0x1a   :  { %5087 = vsyncadd [#allocation4], 4294959104 }
  0x1b   :  { %5088 = dma.done.wait [#allocation7], 16384  }
  0x1c   :  { %5089 = vsyncadd [#allocation7], 4294950912  ;;  %v8435_v0 = vmov 0.0   ;;  %v60_v1 = vld [vmem:[%s8429_s1] sm:$0xff]  ;;  %vm113_vm0 = vcmask 1043456   ;;  %v61_v2 = vld [vmem:[%s8429_s1 + $0x8] sm:$0xff] }
  0x1d   :  { %186 = vmatprep.mubr.f32.mxu0 %v8435_v0  ;;  %299 = vmatprep.mubr.f32.mxu1 %v8435_v0  ;;  %v86_v3 = vcombine.high %v60_v1, %v60_v1  ;;  %v87_v4 = vcombine.high %v61_v2, %v61_v2  ;;  %v52_v5 = vld [vmem:[%s8428_s0] sm:$0xff]  ;;  %vm88_vm1 = vcmask 31744   ;;  %v467_v6 = vld [vmem:[#allocation3 + $0x1e8] sm:$0xff]  ;;  %v469_v7 = vld [vmem:[#allocation3 + $0x1f8] sm:$0xff] }
  0x1e   :  { %v466_v8 = vld [vmem:[#allocation3 + $0x1e0] sm:$0xff]  ;;  %v468_v9 = vld [vmem:[#allocation3 + $0x1f0] sm:$0xff]  ;;  %v463_v10 = vld [vmem:[#allocation3 + $0x1c8] sm:$0xff] }
  0x1f   :  { %4684 = vmatprep.subr.msk.mxu0 %vm113_vm0, %v86_v3  ;;  %4694 = vmatprep.subr.msk.mxu1 %vm113_vm0, %v87_v4  ;;  %v465_v11 = vld [vmem:[#allocation3 + $0x1d8] sm:$0xff]  ;;  %v462_v12 = vld [vmem:[#allocation3 + $0x1c0] sm:$0xff]  ;;  %v464_v13 = vld [vmem:[#allocation3 + $0x1d0] sm:$0xff] }
  0x20   :  { %4685 = vmatpush1.msk.msra.mxu0 %vm113_vm0, %v60_v1  ;;  %4695 = vmatpush1.msk.msra.mxu1 %vm113_vm0, %v61_v2  ;;  %v53_v14 = vld [vmem:[%s8428_s0 + $0x8] sm:$0xff]  ;;  %v461_v16 = vld [vmem:[#allocation3 + $0x1b8] sm:$0xff]  ;;  %v458_v17 = vld [vmem:[#allocation3 + $0x1a0] sm:$0xff] }
  0x21   :  { %4686 = vmatmul.mubr.msk.f32.vlgmr.msra.gmra.mxu0 %vm88_vm1, %v52_v5  ;;  %4696 = vmatmul.mubr.msk.f32.vlgmr.msra.gmra.mxu1 %vm88_vm1, %v52_v5  ;;  %v459_v15 = vld [vmem:[#allocation3 + $0x1a8] sm:$0xff]  ;;  %v460_v18 = vld [vmem:[#allocation3 + $0x1b0] sm:$0xff]  ;;  %v457_v20 = vld [vmem:[#allocation3 + $0x198] sm:$0xff] }
  0x22   :  { %470 = vmatprep.subr.mxu0 %v467_v6  ;;  %541 = vmatprep.subr.mxu1 %v469_v7  ;;  %v455_v19 = vld [vmem:[#allocation3 + $0x188] sm:$0xff]  ;;  %v454_v21 = vld [vmem:[#allocation3 + $0x180] sm:$0xff]  ;;  %v456_v22 = vld [vmem:[#allocation3 + $0x190] sm:$0xff] }
  0x23   :  { %471 = vmatpush1.msra.mxu0 %v466_v8  ;;  %542 = vmatpush1.msra.mxu1 %v468_v9  ;;  %v54_v23 = vld [vmem:[%s8428_s0 + $0x10] sm:$0xff]  ;;  %v451_v24 = vld [vmem:[#allocation3 + $0x168] sm:$0xff]  ;;  %v453_v25 = vld [vmem:[#allocation3 + $0x178] sm:$0xff] }
  0x24   :  { %472 = vmatprep.subr.mxu0 %v463_v10  ;;  %543 = vmatprep.subr.mxu1 %v465_v11  ;;  %v450_v26 = vld [vmem:[#allocation3 + $0x160] sm:$0xff]  ;;  %v452_v27 = vld [vmem:[#allocation3 + $0x170] sm:$0xff]  ;;  %v447_v28 = vld [vmem:[#allocation3 + $0x148] sm:$0xff] }
  0x25   :  { %192 = vmatprep.mubr.f32.mxu0 %v8435_v0  ;;  %305 = vmatprep.mubr.f32.mxu1 %v8435_v0  ;;  %v449_v29 = vld [vmem:[#allocation3 + $0x158] sm:$0xff]  ;;  %v446_v30 = vld [vmem:[#allocation3 + $0x140] sm:$0xff]  ;;  %v448_v31 = vld [vmem:[#allocation3 + $0x150] sm:$0xff] }
  0x26   :  { %473 = vmatpush1.msra.mxu0 %v462_v12  ;;  %544 = vmatpush1.msra.mxu1 %v464_v13  ;;  %v55_v32 = vld [vmem:[%s8428_s0 + $0x18] sm:$0xff]  ;;  %v443_v33 = vld [vmem:[#allocation3 + $0x128] sm:$0xff]  ;;  %v442_v35 = vld [vmem:[#allocation3 + $0x120] sm:$0xff] }
  0x27   :  { %4687 = vmatmul.mubr.msk.f32.gmra.mxu0 %vm88_vm1, %v53_v14  ;;  %4697 = vmatmul.mubr.msk.f32.gmra.mxu1 %vm88_vm1, %v53_v14  ;;  %v445_v34 = vld [vmem:[#allocation3 + $0x138] sm:$0xff]  ;;  %v444_v36 = vld [vmem:[#allocation3 + $0x130] sm:$0xff]  ;;  %v439_v37 = vld [vmem:[#allocation3 + $0x108] sm:$0xff] }
  0x28   :  { %474 = vmatprep.subr.mxu0 %v459_v15  ;;  %545 = vmatprep.subr.mxu1 %v461_v16  ;;  %v441_v38 = vld [vmem:[#allocation3 + $0x118] sm:$0xff]  ;;  %v438_v39 = vld [vmem:[#allocation3 + $0x100] sm:$0xff]  ;;  %v440_v40 = vld [vmem:[#allocation3 + $0x110] sm:$0xff] }
  0x29   :  { %475 = vmatpush1.msra.mxu0 %v458_v17  ;;  %546 = vmatpush1.msra.mxu1 %v460_v18  ;;  %v56_v41 = vld [vmem:[%s8428_s0 + $0x20] sm:$0xff]  ;;  %v435_v42 = vld [vmem:[#allocation3 + $0xe8] sm:$0xff]  ;;  %v437_v43 = vld [vmem:[#allocation3 + $0xf8] sm:$0xff] }
  0x2a   :  { %476 = vmatprep.subr.mxu0 %v455_v19  ;;  %547 = vmatprep.subr.mxu1 %v457_v20  ;;  %v434_v44 = vld [vmem:[#allocation3 + $0xe0] sm:$0xff]  ;;  %v436_v45 = vld [vmem:[#allocation3 + $0xf0] sm:$0xff]  ;;  %v431_v46 = vld [vmem:[#allocation3 + $0xc8] sm:$0xff] }
  0x2b   :  { %198 = vmatprep.mubr.f32.mxu0 %v8435_v0  ;;  %311 = vmatprep.mubr.f32.mxu1 %v8435_v0  ;;  %v433_v47 = vld [vmem:[#allocation3 + $0xd8] sm:$0xff]  ;;  %v5182_v48 = vld [vmem:[#allocation3 + $0xc0] sm:$0xff]  ;;  %v5184_v49 = vld [vmem:[#allocation3 + $0xd0] sm:$0xff] }
  0x2c   :  { %477 = vmatpush1.msra.mxu0 %v454_v21  ;;  %548 = vmatpush1.msra.mxu1 %v456_v22  ;;  %v57_v50 = vld [vmem:[%s8428_s0 + $0x28] sm:$0xff]  ;;  %v5193_v52 = vld [vmem:[#allocation3 + $0xb8] sm:$0xff]  ;;  %v5197_v53 = vld [vmem:[#allocation3 + $0xa0] sm:$0xff] }
  0x2d   :  { %4688 = vmatmul.mubr.msk.f32.gmra.mxu0 %vm88_vm1, %v54_v23  ;;  %4698 = vmatmul.mubr.msk.f32.gmra.mxu1 %vm88_vm1, %v54_v23  ;;  %v5191_v51 = vld [vmem:[#allocation3 + $0xa8] sm:$0xff]  ;;  %v5199_v54 = vld [vmem:[#allocation3 + $0xb0] sm:$0xff]  ;;  %v5205_v56 = vld [vmem:[#allocation3 + $0x98] sm:$0xff] }
  0x2e   :  { %478 = vmatprep.subr.mxu0 %v451_v24  ;;  %549 = vmatprep.subr.mxu1 %v453_v25  ;;  %v5203_v55 = vld [vmem:[#allocation3 + $0x88] sm:$0xff]  ;;  %v5211_v57 = vld [vmem:[#allocation3 + $0x80] sm:$0xff]  ;;  %v5213_v58 = vld [vmem:[#allocation3 + $0x90] sm:$0xff] }
  0x2f   :  { %479 = vmatpush1.msra.mxu0 %v450_v26  ;;  %550 = vmatpush1.msra.mxu1 %v452_v27  ;;  %v58_v59 = vld [vmem:[%s8428_s0 + $0x30] sm:$0xff]  ;;  %v5222_v60 = vld [vmem:[#allocation3 + $0x68] sm:$0xff]  ;;  %v5224_v61 = vld [vmem:[#allocation3 + $0x78] sm:$0xff] }
  0x30   :  { %480 = vmatprep.subr.mxu0 %v447_v28  ;;  %551 = vmatprep.subr.mxu1 %v449_v29  ;;  %v5228_v62 = vld [vmem:[#allocation3 + $0x60] sm:$0xff]  ;;  %v5230_v63 = vld [vmem:[#allocation3 + $0x70] sm:$0xff]  ;;  %v5234_v1 = vld [vmem:[#allocation3 + $0x48] sm:$0xff] }
  0x31   :  { %204 = vmatprep.mubr.f32.mxu0 %v8435_v0  ;;  %317 = vmatprep.mubr.f32.mxu1 %v8435_v0  ;;  %v5236_v2 = vld [vmem:[#allocation3 + $0x58] sm:$0xff]  ;;  %v5242_v3 = vld [vmem:[#allocation3 + $0x40] sm:$0xff]  ;;  %v5244_v4 = vld [vmem:[#allocation3 + $0x50] sm:$0xff] }
  0x32   :  { %481 = vmatpush1.msra.mxu0 %v446_v30  ;;  %552 = vmatpush1.msra.mxu1 %v448_v31  ;;  %v59_v5 = vld [vmem:[%s8428_s0 + $0x38] sm:$0xff]  ;;  %v5253_v6 = vld [vmem:[#allocation3 + $0x28] sm:$0xff]  ;;  %v5259_v8 = vld [vmem:[#allocation3 + $0x20] sm:$0xff] }
  0x33   :  { %4689 = vmatmul.mubr.msk.f32.gmra.mxu0 %vm88_vm1, %v55_v32  ;;  %4699 = vmatmul.mubr.msk.f32.gmra.mxu1 %vm88_vm1, %v55_v32  ;;  %v5255_v7 = vld [vmem:[#allocation3 + $0x38] sm:$0xff]  ;;  %v5261_v9 = vld [vmem:[#allocation3 + $0x30] sm:$0xff]  ;;  %v5265_v10 = vld [vmem:[#allocation3 + $0x8] sm:$0xff] }
  0x34   :  { %482 = vmatprep.subr.mxu0 %v443_v33  ;;  %553 = vmatprep.subr.mxu1 %v445_v34  ;;  %v5267_v11 = vld [vmem:[#allocation3 + $0x18] sm:$0xff]  ;;  %v5271_v12 = vld [vmem:[#allocation3] sm:$0xff]  ;;  %v5275_v13 = vld [vmem:[#allocation3 + $0x10] sm:$0xff] }
  0x35   :  { %483 = vmatpush1.msra.mxu0 %v442_v35  ;;  %554 = vmatpush1.msra.mxu1 %v444_v36  ;;  %v5287_v14 = vld [vmem:[#allocation6 + $0x1e8] sm:$0xff]  ;;  %v5289_v15 = vld [vmem:[#allocation6 + $0x1f8] sm:$0xff]  ;;  %v5291_v16 = vld [vmem:[#allocation6 + $0x1e0] sm:$0xff] }
  0x36   :  { %484 = vmatprep.subr.mxu0 %v439_v37  ;;  %555 = vmatprep.subr.mxu1 %v441_v38  ;;  %v5295_v17 = vld [vmem:[#allocation6 + $0x1f0] sm:$0xff]  ;;  %v5299_v18 = vld [vmem:[#allocation6 + $0x1c8] sm:$0xff]  ;;  %v5301_v19 = vld [vmem:[#allocation6 + $0x1d8] sm:$0xff] }
  0x37   :  { %210 = vmatprep.mubr.f32.mxu0 %v8435_v0  ;;  %323 = vmatprep.mubr.f32.mxu1 %v8435_v0  ;;  %v5303_v20 = vld [vmem:[#allocation6 + $0x1c0] sm:$0xff]  ;;  %v5307_v21 = vld [vmem:[#allocation6 + $0x1d0] sm:$0xff]  ;;  %v5311_v22 = vld [vmem:[#allocation6 + $0x1a8] sm:$0xff] }
  0x38   :  { %485 = vmatpush1.msra.mxu0 %v438_v39  ;;  %556 = vmatpush1.msra.mxu1 %v440_v40  ;;  %v5313_v23 = vld [vmem:[#allocation6 + $0x1b8] sm:$0xff]  ;;  %v5315_v24 = vld [vmem:[#allocation6 + $0x1a0] sm:$0xff]  ;;  %v5319_v25 = vld [vmem:[#allocation6 + $0x1b0] sm:$0xff] }
  0x39   :  { %4690 = vmatmul.mubr.msk.f32.gmra.mxu0 %vm88_vm1, %v56_v41  ;;  %4700 = vmatmul.mubr.msk.f32.gmra.mxu1 %vm88_vm1, %v56_v41  ;;  %v5323_v26 = vld [vmem:[#allocation6 + $0x188] sm:$0xff]  ;;  %v5325_v27 = vld [vmem:[#allocation6 + $0x198] sm:$0xff]  ;;  %v5327_v28 = vld [vmem:[#allocation6 + $0x180] sm:$0xff] }
  0x3a   :  { %486 = vmatprep.subr.mxu0 %v435_v42  ;;  %557 = vmatprep.subr.mxu1 %v437_v43  ;;  %v5331_v29 = vld [vmem:[#allocation6 + $0x190] sm:$0xff]  ;;  %v5335_v30 = vld [vmem:[#allocation6 + $0x168] sm:$0xff]  ;;  %v5337_v31 = vld [vmem:[#allocation6 + $0x178] sm:$0xff] }
  0x3b   :  { %487 = vmatpush1.msra.mxu0 %v434_v44  ;;  %558 = vmatpush1.msra.mxu1 %v436_v45  ;;  %8973 = vst [vmem:[#allocation12_spill] sm:$0xff] %v5331_v29  ;;  %8974 = vst [vmem:[#allocation13_spill] sm:$0xff] %v5335_v30  ;;  %v5341_v32 = vld [vmem:[#allocation6 + $0x160] sm:$0xff]  ;;  %v5343_v33 = vld [vmem:[#allocation6 + $0x170] sm:$0xff] }
  0x3c   :  { %488 = vmatprep.subr.mxu0 %v431_v46  ;;  %559 = vmatprep.subr.mxu1 %v433_v47  ;;  %8975 = vst [vmem:[#allocation14_spill] sm:$0xff] %v5337_v31  ;;  %8976 = vst [vmem:[#allocation15_spill] sm:$0xff] %v5341_v32  ;;  %v5347_v34 = vld [vmem:[#allocation6 + $0x148] sm:$0xff]  ;;  %v5349_v35 = vld [vmem:[#allocation6 + $0x158] sm:$0xff] }
  0x3d   :  { %216 = vmatprep.mubr.f32.mxu0 %v8435_v0  ;;  %329 = vmatprep.mubr.f32.mxu1 %v8435_v0  ;;  %8977 = vst [vmem:[#allocation16_spill] sm:$0xff] %v5343_v33  ;;  %8978 = vst [vmem:[#allocation17_spill] sm:$0xff] %v5347_v34  ;;  %v5353_v36 = vld [vmem:[#allocation6 + $0x140] sm:$0xff]  ;;  %v5355_v37 = vld [vmem:[#allocation6 + $0x150] sm:$0xff] }
  0x3e   :  { %489 = vmatpush1.msra.mxu0 %v5182_v48  ;;  %560 = vmatpush1.msra.mxu1 %v5184_v49  ;;  %8979 = vst [vmem:[#allocation18_spill] sm:$0xff] %v5349_v35  ;;  %8980 = vst [vmem:[#allocation19_spill] sm:$0xff] %v5353_v36  ;;  %v5359_v38 = vld [vmem:[#allocation6 + $0x128] sm:$0xff]  ;;  %v5361_v39 = vld [vmem:[#allocation6 + $0x138] sm:$0xff] }
  0x3f   :  { %4691 = vmatmul.mubr.msk.f32.gmra.mxu0 %vm88_vm1, %v57_v50  ;;  %4701 = vmatmul.mubr.msk.f32.gmra.mxu1 %vm88_vm1, %v57_v50  ;;  %8981 = vst [vmem:[#allocation20_spill] sm:$0xff] %v5355_v37  ;;  %8982 = vst [vmem:[#allocation21_spill] sm:$0xff] %v5359_v38  ;;  %v5365_v40 = vld [vmem:[#allocation6 + $0x120] sm:$0xff]  ;;  %v5367_v41 = vld [vmem:[#allocation6 + $0x130] sm:$0xff] }
  0x40   :  { %490 = vmatprep.subr.mxu0 %v5191_v51  ;;  %561 = vmatprep.subr.mxu1 %v5193_v52  ;;  %8983 = vst [vmem:[#allocation22_spill] sm:$0xff] %v5361_v39  ;;  %8984 = vst [vmem:[#allocation23_spill] sm:$0xff] %v5365_v40  ;;  %v5371_v42 = vld [vmem:[#allocation6 + $0x108] sm:$0xff]  ;;  %v5373_v43 = vld [vmem:[#allocation6 + $0x118] sm:$0xff] }
  0x41   :  { %491 = vmatpush1.msra.mxu0 %v5197_v53  ;;  %562 = vmatpush1.msra.mxu1 %v5199_v54  ;;  %8985 = vst [vmem:[#allocation24_spill] sm:$0xff] %v5367_v41  ;;  %8986 = vst [vmem:[#allocation25_spill] sm:$0xff] %v5371_v42  ;;  %v5377_v44 = vld [vmem:[#allocation6 + $0x100] sm:$0xff]  ;;  %v5379_v45 = vld [vmem:[#allocation6 + $0x110] sm:$0xff] }
  0x42   :  { %492 = vmatprep.subr.mxu0 %v5203_v55  ;;  %563 = vmatprep.subr.mxu1 %v5205_v56  ;;  %8987 = vst [vmem:[#allocation26_spill] sm:$0xff] %v5373_v43  ;;  %8988 = vst [vmem:[#allocation27_spill] sm:$0xff] %v5377_v44  ;;  %v5383_v46 = vld [vmem:[#allocation6 + $0xe8] sm:$0xff]  ;;  %v5385_v47 = vld [vmem:[#allocation6 + $0xf8] sm:$0xff] }
  0x43   :  { %222 = vmatprep.mubr.f32.mxu0 %v8435_v0  ;;  %335 = vmatprep.mubr.f32.mxu1 %v8435_v0  ;;  %8989 = vst [vmem:[#allocation28_spill] sm:$0xff] %v5379_v45  ;;  %8990 = vst [vmem:[#allocation29_spill] sm:$0xff] %v5383_v46  ;;  %v5389_v50 = vld [vmem:[#allocation6 + $0xe0] sm:$0xff] }
  0x44   :  { %493 = vmatpush1.msra.mxu0 %v5211_v57  ;;  %564 = vmatpush1.msra.mxu1 %v5213_v58  ;;  %8991 = vst [vmem:[#allocation30_spill] sm:$0xff] %v5385_v47  ;;  %8992 = vst [vmem:[#allocation31_spill] sm:$0xff] %v5389_v50 }
  0x45   :  { %4692 = vmatmul.mubr.msk.f32.gmra.mxu0 %vm88_vm1, %v58_v59  ;;  %4702 = vmatmul.mubr.msk.f32.gmra.mxu1 %vm88_vm1, %v58_v59  ;;  %v5391_v59 = vld [vmem:[#allocation6 + $0xf0] sm:$0xff] }
  0x46   :  { %494 = vmatprep.subr.mxu0 %v5222_v60  ;;  %565 = vmatprep.subr.mxu1 %v5224_v61  ;;  %8993 = vst [vmem:[#allocation32_spill] sm:$0xff] %v5391_v59 }
  0x47   :  { %495 = vmatpush1.msra.mxu0 %v5228_v62  ;;  %566 = vmatpush1.msra.mxu1 %v5230_v63 }
  0x48   :  { %496 = vmatprep.subr.mxu0 %v5234_v1  ;;  %567 = vmatprep.subr.mxu1 %v5236_v2 }
  0x49   :  { %228 = vmatprep.mubr.f32.mxu0 %v8435_v0  ;;  %341 = vmatprep.mubr.f32.mxu1 %v8435_v0 }
  0x4a   :  { %497 = vmatpush1.msra.mxu0 %v5242_v3  ;;  %568 = vmatpush1.msra.mxu1 %v5244_v4 }
  0x4b   :  { %4693 = vmatmul.mubr.msk.f32.gmra.mxu0 %vm88_vm1, %v59_v5  ;;  %4703 = vmatmul.mubr.msk.f32.gmra.mxu1 %vm88_vm1, %v59_v5  ;;  %v5395_v5 = vld [vmem:[#allocation6 + $0xc8] sm:$0xff] }
  0x4c   :  { %498 = vmatprep.subr.mxu0 %v5253_v6  ;;  %569 = vmatprep.subr.mxu1 %v5255_v7  ;;  %8994 = vst [vmem:[#allocation33_spill] sm:$0xff] %v5395_v5 }
  0x4d   :  { %499 = vmatpush1.msra.mxu0 %v5259_v8  ;;  %570 = vmatpush1.msra.mxu1 %v5261_v9 }
  0x4e   :  { %500 = vmatprep.subr.mxu0 %v5265_v10  ;;  %571 = vmatprep.subr.mxu1 %v5267_v11 }
  0x4f   :  { %501 = vmatpush1.msra.mxu0 %v5271_v12  ;;  %534 = vmatprep.mubr.f32.mxu0 %v8435_v0 }
  0x50   :  { %572 = vmatpush1.msra.mxu1 %v5275_v13  ;;  %605 = vmatprep.mubr.f32.mxu1 %v8435_v0 }
  0x51   :  { %535 = vmatmul.mubr.f32.vlgmr.msra.gmra.mxu0 %v8435_v0  ;;  %606 = vmatmul.mubr.f32.vlgmr.msra.gmra.mxu1 %v8435_v0 }
  0x52   :  { %832 = vmatprep.mubr.f32.mxu0 %v8435_v0  ;;  %903 = vmatprep.mubr.f32.mxu1 %v8435_v0  ;;  %v5397_v0 = vld [vmem:[#allocation6 + $0xd8] sm:$0xff] }
  0x53   :  { %768 = vmatprep.subr.mxu0 %v5287_v14  ;;  %839 = vmatprep.subr.mxu1 %v5289_v15  ;;  %8995 = vst [vmem:[#allocation34_spill] sm:$0xff] %v5397_v0 }
  0x54   :  { %769 = vmatpush1.msra.mxu0 %v5291_v16  ;;  %840 = vmatpush1.msra.mxu1 %v5295_v17 }
  0x55   :  { %770 = vmatprep.subr.mxu0 %v5299_v18  ;;  %841 = vmatprep.subr.mxu1 %v5301_v19 }
  0x56   :  { %771 = vmatpush1.msra.mxu0 %v5303_v20  ;;  %842 = vmatpush1.msra.mxu1 %v5307_v21 }
  0x57   :  { %772 = vmatprep.subr.mxu0 %v5311_v22  ;;  %843 = vmatprep.subr.mxu1 %v5313_v23 }
  0x58   :  { %773 = vmatpush1.msra.mxu0 %v5315_v24  ;;  %844 = vmatpush1.msra.mxu1 %v5319_v25 }
  0x59   :  { %774 = vmatprep.subr.mxu0 %v5323_v26  ;;  %845 = vmatprep.subr.mxu1 %v5325_v27 }
  0x5a   :  { %775 = vmatpush1.msra.mxu0 %v5327_v28  ;;  %846 = vmatpush1.msra.mxu1 %v5331_v29 }
  0x5b   :  { %776 = vmatprep.subr.mxu0 %v5335_v30  ;;  %847 = vmatprep.subr.mxu1 %v5337_v31 }
  0x5c   :  { %777 = vmatpush1.msra.mxu0 %v5341_v32  ;;  %848 = vmatpush1.msra.mxu1 %v5343_v33 }
  0x5d   :  { %778 = vmatprep.subr.mxu0 %v5347_v34  ;;  %849 = vmatprep.subr.mxu1 %v5349_v35 }
  0x5e   :  { %779 = vmatpush1.msra.mxu0 %v5353_v36  ;;  %850 = vmatpush1.msra.mxu1 %v5355_v37 }
  0x5f   :  { %780 = vmatprep.subr.mxu0 %v5359_v38  ;;  %851 = vmatprep.subr.mxu1 %v5361_v39 }
  0x60   :  { %781 = vmatpush1.msra.mxu0 %v5365_v40  ;;  %852 = vmatpush1.msra.mxu1 %v5367_v41  ;;  %v5625_v41 = vld [vmem:[#allocation6 + $0x260] sm:$0xff] }
  0x61   :  { %782 = vmatprep.subr.mxu0 %v5371_v42  ;;  %853 = vmatprep.subr.mxu1 %v5373_v43  ;;  %v5601_v43 = vld [vmem:[#allocation6 + $0x2a0] sm:$0xff]  ;;  %v5609_v42 = vld [vmem:[#allocation6 + $0x298] sm:$0xff]  ;;  %9072 = vst [vmem:[#allocation111_spill] sm:$0xff] %v5625_v41 }
  0x62   :  { %783 = vmatpush1.msra.mxu0 %v5377_v44  ;;  %854 = vmatpush1.msra.mxu1 %v5379_v45  ;;  %v5401_v45 = vld [vmem:[#allocation6 + $0xc0] sm:$0xff]  ;;  %v5593_v44 = vld [vmem:[#allocation6 + $0x2d0] sm:$0xff]  ;;  %9064 = vst [vmem:[#allocation103_spill] sm:$0xff] %v5601_v43  ;;  %9067 = vst [vmem:[#allocation106_spill] sm:$0xff] %v5609_v42 }
  0x63   :  { %784 = vmatprep.subr.mxu0 %v5383_v46  ;;  %855 = vmatprep.subr.mxu1 %v5385_v47  ;;  %8996 = vst [vmem:[#allocation35_spill] sm:$0xff] %v5401_v45  ;;  %v5403_v46 = vld [vmem:[#allocation6 + $0xd0] sm:$0xff]  ;;  %v5407_v47 = vld [vmem:[#allocation6 + $0xa8] sm:$0xff]  ;;  %9061 = vst [vmem:[#allocation100_spill] sm:$0xff] %v5593_v44 }
  0x64   :  { %785 = vmatpush1.msra.mxu0 %v5389_v50  ;;  %856 = vmatpush1.msra.mxu1 %v5391_v59  ;;  %8997 = vst [vmem:[#allocation36_spill] sm:$0xff] %v5403_v46  ;;  %8998 = vst [vmem:[#allocation37_spill] sm:$0xff] %v5407_v47  ;;  %v5409_v50 = vld [vmem:[#allocation6 + $0xb8] sm:$0xff]  ;;  %v5413_v59 = vld [vmem:[#allocation6 + $0xa0] sm:$0xff] }
  0x65   :  { %786 = vmatprep.subr.mxu0 %v5395_v5  ;;  %857 = vmatprep.subr.mxu1 %v5397_v0  ;;  %8999 = vst [vmem:[#allocation38_spill] sm:$0xff] %v5409_v50  ;;  %9000 = vst [vmem:[#allocation39_spill] sm:$0xff] %v5413_v59  ;;  %v5415_v5 = vld [vmem:[#allocation6 + $0xb0] sm:$0xff]  ;;  %v5419_v0 = vld [vmem:[#allocation6 + $0x88] sm:$0xff] }
  0x66   :  { %787 = vmatpush1.msra.mxu0 %v5401_v45  ;;  %858 = vmatpush1.msra.mxu1 %v5403_v46  ;;  %9001 = vst [vmem:[#allocation40_spill] sm:$0xff] %v5415_v5  ;;  %9002 = vst [vmem:[#allocation41_spill] sm:$0xff] %v5419_v0  ;;  %v5421_v45 = vld [vmem:[#allocation6 + $0x98] sm:$0xff]  ;;  %v5425_v46 = vld [vmem:[#allocation6 + $0x80] sm:$0xff] }
  0x67   :  { %788 = vmatprep.subr.mxu0 %v5407_v47  ;;  %859 = vmatprep.subr.mxu1 %v5409_v50  ;;  %9003 = vst [vmem:[#allocation42_spill] sm:$0xff] %v5421_v45  ;;  %9004 = vst [vmem:[#allocation43_spill] sm:$0xff] %v5425_v46  ;;  %v5427_v47 = vld [vmem:[#allocation6 + $0x90] sm:$0xff]  ;;  %v5431_v50 = vld [vmem:[#allocation6 + $0x68] sm:$0xff] }
  0x68   :  { %789 = vmatpush1.msra.mxu0 %v5413_v59  ;;  %860 = vmatpush1.msra.mxu1 %v5415_v5  ;;  %9005 = vst [vmem:[#allocation44_spill] sm:$0xff] %v5427_v47  ;;  %9006 = vst [vmem:[#allocation45_spill] sm:$0xff] %v5431_v50  ;;  %v5433_v59 = vld [vmem:[#allocation6 + $0x78] sm:$0xff]  ;;  %v5437_v5 = vld [vmem:[#allocation6 + $0x60] sm:$0xff] }
  0x69   :  { %790 = vmatprep.subr.mxu0 %v5419_v0  ;;  %861 = vmatprep.subr.mxu1 %v5421_v45  ;;  %9007 = vst [vmem:[#allocation46_spill] sm:$0xff] %v5433_v59  ;;  %9008 = vst [vmem:[#allocation47_spill] sm:$0xff] %v5437_v5  ;;  %v5439_v0 = vld [vmem:[#allocation6 + $0x70] sm:$0xff]  ;;  %v5443_v45 = vld [vmem:[#allocation6 + $0x48] sm:$0xff] }
  0x6a   :  { %791 = vmatpush1.msra.mxu0 %v5425_v46  ;;  %862 = vmatpush1.msra.mxu1 %v5427_v47  ;;  %9009 = vst [vmem:[#allocation48_spill] sm:$0xff] %v5439_v0  ;;  %9010 = vst [vmem:[#allocation49_spill] sm:$0xff] %v5443_v45  ;;  %v5445_v46 = vld [vmem:[#allocation6 + $0x58] sm:$0xff]  ;;  %v5449_v47 = vld [vmem:[#allocation6 + $0x40] sm:$0xff] }
  0x6b   :  { %792 = vmatprep.subr.mxu0 %v5431_v50  ;;  %863 = vmatprep.subr.mxu1 %v5433_v59  ;;  %9011 = vst [vmem:[#allocation50_spill] sm:$0xff] %v5445_v46  ;;  %9012 = vst [vmem:[#allocation51_spill] sm:$0xff] %v5449_v47  ;;  %v5451_v50 = vld [vmem:[#allocation6 + $0x50] sm:$0xff]  ;;  %v5455_v59 = vld [vmem:[#allocation6 + $0x28] sm:$0xff] }
  0x6c   :  { %793 = vmatpush1.msra.mxu0 %v5437_v5  ;;  %864 = vmatpush1.msra.mxu1 %v5439_v0  ;;  %9013 = vst [vmem:[#allocation52_spill] sm:$0xff] %v5451_v50  ;;  %9014 = vst [vmem:[#allocation53_spill] sm:$0xff] %v5455_v59  ;;  %v5457_v5 = vld [vmem:[#allocation6 + $0x38] sm:$0xff]  ;;  %v5461_v0 = vld [vmem:[#allocation6 + $0x20] sm:$0xff] }
  0x6d   :  { %794 = vmatprep.subr.mxu0 %v5443_v45  ;;  %865 = vmatprep.subr.mxu1 %v5445_v46  ;;  %9015 = vst [vmem:[#allocation54_spill] sm:$0xff] %v5457_v5  ;;  %9016 = vst [vmem:[#allocation55_spill] sm:$0xff] %v5461_v0  ;;  %v5463_v45 = vld [vmem:[#allocation6 + $0x30] sm:$0xff]  ;;  %v5467_v46 = vld [vmem:[#allocation6 + $0x8] sm:$0xff] }
  0x6e   :  { %795 = vmatpush1.msra.mxu0 %v5449_v47  ;;  %866 = vmatpush1.msra.mxu1 %v5451_v50  ;;  %9017 = vst [vmem:[#allocation56_spill] sm:$0xff] %v5463_v45  ;;  %9018 = vst [vmem:[#allocation57_spill] sm:$0xff] %v5467_v46  ;;  %v5469_v47 = vld [vmem:[#allocation6 + $0x18] sm:$0xff]  ;;  %v5473_v50 = vld [vmem:[#allocation6] sm:$0xff] }
  0x6f   :  { %796 = vmatprep.subr.mxu0 %v5455_v59  ;;  %867 = vmatprep.subr.mxu1 %v5457_v5  ;;  %9019 = vst [vmem:[#allocation58_spill] sm:$0xff] %v5469_v47  ;;  %9020 = vst [vmem:[#allocation59_spill] sm:$0xff] %v5473_v50  ;;  %v5475_v59 = vld [vmem:[#allocation6 + $0x10] sm:$0xff]  ;;  %v5479_v5 = vld [vmem:[#allocation6 + $0x3e8] sm:$0xff] }
  0x70   :  { %797 = vmatpush1.msra.mxu0 %v5461_v0  ;;  %868 = vmatpush1.msra.mxu1 %v5463_v45  ;;  %9021 = vst [vmem:[#allocation60_spill] sm:$0xff] %v5475_v59  ;;  %9022 = vst [vmem:[#allocation61_spill] sm:$0xff] %v5479_v5  ;;  %v5481_v0 = vld [vmem:[#allocation6 + $0x3f8] sm:$0xff]  ;;  %v5485_v45 = vld [vmem:[#allocation6 + $0x3e0] sm:$0xff] }
  0x71   :  { %798 = vmatprep.subr.mxu0 %v5467_v46  ;;  %869 = vmatprep.subr.mxu1 %v5469_v47  ;;  %9023 = vst [vmem:[#allocation62_spill] sm:$0xff] %v5481_v0  ;;  %9024 = vst [vmem:[#allocation63_spill] sm:$0xff] %v5485_v45  ;;  %v5487_v46 = vld [vmem:[#allocation6 + $0x3f0] sm:$0xff]  ;;  %v5491_v47 = vld [vmem:[#allocation6 + $0x3c8] sm:$0xff] }
  0x72   :  { %799 = vmatpush1.msra.mxu0 %v5473_v50  ;;  %870 = vmatpush1.msra.mxu1 %v5475_v59  ;;  %9025 = vst [vmem:[#allocation64_spill] sm:$0xff] %v5487_v46  ;;  %9026 = vst [vmem:[#allocation65_spill] sm:$0xff] %v5491_v47  ;;  %v5493_v50 = vld [vmem:[#allocation6 + $0x3d8] sm:$0xff]  ;;  %v5497_v59 = vld [vmem:[#allocation6 + $0x3c0] sm:$0xff] }
  0x73   :  { %800 = vmatprep.subr.mxu0 %v5479_v5  ;;  %871 = vmatprep.subr.mxu1 %v5481_v0  ;;  %9027 = vst [vmem:[#allocation66_spill] sm:$0xff] %v5493_v50  ;;  %9028 = vst [vmem:[#allocation67_spill] sm:$0xff] %v5497_v59  ;;  %v5499_v5 = vld [vmem:[#allocation6 + $0x3d0] sm:$0xff]  ;;  %v5503_v0 = vld [vmem:[#allocation6 + $0x3a8] sm:$0xff] }
  0x74   :  { %801 = vmatpush2.msra.mxu0 %v5485_v45  ;;  %872 = vmatpush2.msra.mxu1 %v5487_v46  ;;  %9029 = vst [vmem:[#allocation68_spill] sm:$0xff] %v5499_v5  ;;  %9030 = vst [vmem:[#allocation69_spill] sm:$0xff] %v5503_v0  ;;  %v5505_v45 = vld [vmem:[#allocation6 + $0x3b8] sm:$0xff]  ;;  %v5509_v46 = vld [vmem:[#allocation6 + $0x3a0] sm:$0xff] }
  0x75   :  { %802 = vmatprep.subr.mxu0 %v5491_v47  ;;  %873 = vmatprep.subr.mxu1 %v5493_v50  ;;  %9031 = vst [vmem:[#allocation70_spill] sm:$0xff] %v5505_v45  ;;  %9032 = vst [vmem:[#allocation71_spill] sm:$0xff] %v5509_v46  ;;  %v5511_v47 = vld [vmem:[#allocation6 + $0x3b0] sm:$0xff]  ;;  %v5515_v50 = vld [vmem:[#allocation6 + $0x388] sm:$0xff] }
  0x76   :  { %803 = vmatpush2.msra.mxu0 %v5497_v59  ;;  %874 = vmatpush2.msra.mxu1 %v5499_v5  ;;  %9033 = vst [vmem:[#allocation72_spill] sm:$0xff] %v5511_v47  ;;  %9034 = vst [vmem:[#allocation73_spill] sm:$0xff] %v5515_v50  ;;  %v5517_v59 = vld [vmem:[#allocation6 + $0x398] sm:$0xff]  ;;  %v5521_v5 = vld [vmem:[#allocation6 + $0x380] sm:$0xff] }
  0x77   :  { %804 = vmatprep.subr.mxu0 %v5503_v0  ;;  %875 = vmatprep.subr.mxu1 %v5505_v45  ;;  %9035 = vst [vmem:[#allocation74_spill] sm:$0xff] %v5517_v59  ;;  %9036 = vst [vmem:[#allocation75_spill] sm:$0xff] %v5521_v5  ;;  %v5523_v0 = vld [vmem:[#allocation6 + $0x390] sm:$0xff]  ;;  %v5527_v45 = vld [vmem:[#allocation6 + $0x368] sm:$0xff] }
  0x78   :  { %805 = vmatpush2.msra.mxu0 %v5509_v46  ;;  %876 = vmatpush2.msra.mxu1 %v5511_v47  ;;  %9037 = vst [vmem:[#allocation76_spill] sm:$0xff] %v5523_v0  ;;  %9038 = vst [vmem:[#allocation77_spill] sm:$0xff] %v5527_v45  ;;  %v5529_v46 = vld [vmem:[#allocation6 + $0x378] sm:$0xff]  ;;  %v5533_v47 = vld [vmem:[#allocation6 + $0x360] sm:$0xff] }
  0x79   :  { %806 = vmatprep.subr.mxu0 %v5515_v50  ;;  %877 = vmatprep.subr.mxu1 %v5517_v59  ;;  %9039 = vst [vmem:[#allocation78_spill] sm:$0xff] %v5529_v46  ;;  %9040 = vst [vmem:[#allocation79_spill] sm:$0xff] %v5533_v47  ;;  %v5535_v50 = vld [vmem:[#allocation6 + $0x370] sm:$0xff]  ;;  %v5539_v59 = vld [vmem:[#allocation6 + $0x348] sm:$0xff] }
  0x7a   :  { %807 = vmatpush2.msra.mxu0 %v5521_v5  ;;  %878 = vmatpush2.msra.mxu1 %v5523_v0  ;;  %9041 = vst [vmem:[#allocation80_spill] sm:$0xff] %v5535_v50  ;;  %9042 = vst [vmem:[#allocation81_spill] sm:$0xff] %v5539_v59  ;;  %v5541_v5 = vld [vmem:[#allocation6 + $0x358] sm:$0xff]  ;;  %v5545_v0 = vld [vmem:[#allocation6 + $0x340] sm:$0xff] }
  0x7b   :  { %808 = vmatprep.subr.mxu0 %v5527_v45  ;;  %879 = vmatprep.subr.mxu1 %v5529_v46  ;;  %9043 = vst [vmem:[#allocation82_spill] sm:$0xff] %v5541_v5  ;;  %9044 = vst [vmem:[#allocation83_spill] sm:$0xff] %v5545_v0  ;;  %v5547_v45 = vld [vmem:[#allocation6 + $0x350] sm:$0xff]  ;;  %v5551_v46 = vld [vmem:[#allocation6 + $0x328] sm:$0xff] }
  0x7c   :  { %809 = vmatpush2.msra.mxu0 %v5533_v47  ;;  %880 = vmatpush2.msra.mxu1 %v5535_v50  ;;  %9045 = vst [vmem:[#allocation84_spill] sm:$0xff] %v5547_v45  ;;  %9046 = vst [vmem:[#allocation85_spill] sm:$0xff] %v5551_v46  ;;  %v5553_v47 = vld [vmem:[#allocation6 + $0x338] sm:$0xff]  ;;  %v5557_v50 = vld [vmem:[#allocation6 + $0x320] sm:$0xff] }
  0x7d   :  { %810 = vmatprep.subr.mxu0 %v5539_v59  ;;  %881 = vmatprep.subr.mxu1 %v5541_v5  ;;  %9047 = vst [vmem:[#allocation86_spill] sm:$0xff] %v5553_v47  ;;  %9048 = vst [vmem:[#allocation87_spill] sm:$0xff] %v5557_v50  ;;  %v5559_v59 = vld [vmem:[#allocation6 + $0x330] sm:$0xff]  ;;  %v5563_v5 = vld [vmem:[#allocation6 + $0x308] sm:$0xff] }
  0x7e   :  { %811 = vmatpush2.msra.mxu0 %v5545_v0  ;;  %882 = vmatpush2.msra.mxu1 %v5547_v45  ;;  %9049 = vst [vmem:[#allocation88_spill] sm:$0xff] %v5559_v59  ;;  %9050 = vst [vmem:[#allocation89_spill] sm:$0xff] %v5563_v5  ;;  %v5565_v0 = vld [vmem:[#allocation6 + $0x318] sm:$0xff]  ;;  %v5569_v45 = vld [vmem:[#allocation6 + $0x300] sm:$0xff] }
  0x7f   :  { %812 = vmatprep.subr.mxu0 %v5551_v46  ;;  %883 = vmatprep.subr.mxu1 %v5553_v47  ;;  %9051 = vst [vmem:[#allocation90_spill] sm:$0xff] %v5565_v0  ;;  %9052 = vst [vmem:[#allocation91_spill] sm:$0xff] %v5569_v45  ;;  %v5571_v46 = vld [vmem:[#allocation6 + $0x310] sm:$0xff]  ;;  %v5575_v47 = vld [vmem:[#allocation6 + $0x2e8] sm:$0xff] }
  0x80   :  { %813 = vmatpush2.msra.mxu0 %v5557_v50  ;;  %884 = vmatpush2.msra.mxu1 %v5559_v59  ;;  %9053 = vst [vmem:[#allocation92_spill] sm:$0xff] %v5571_v46  ;;  %9054 = vst [vmem:[#allocation93_spill] sm:$0xff] %v5575_v47  ;;  %v5577_v50 = vld [vmem:[#allocation6 + $0x2f8] sm:$0xff]  ;;  %v5581_v59 = vld [vmem:[#allocation6 + $0x2e0] sm:$0xff] }
  0x81   :  { %814 = vmatprep.subr.mxu0 %v5563_v5  ;;  %885 = vmatprep.subr.mxu1 %v5565_v0  ;;  %9055 = vst [vmem:[#allocation94_spill] sm:$0xff] %v5577_v50  ;;  %9056 = vst [vmem:[#allocation95_spill] sm:$0xff] %v5581_v59  ;;  %v5583_v5 = vld [vmem:[#allocation6 + $0x2f0] sm:$0xff]  ;;  %v5585_v0 = vld [vmem:[#allocation6 + $0x2c8] sm:$0xff] }
  0x82   :  { %815 = vmatpush2.msra.mxu0 %v5569_v45  ;;  %886 = vmatpush2.msra.mxu1 %v5571_v46  ;;  %9057 = vst [vmem:[#allocation96_spill] sm:$0xff] %v5583_v5  ;;  %9058 = vst [vmem:[#allocation97_spill] sm:$0xff] %v5585_v0  ;;  %v5589_v45 = vld [vmem:[#allocation6 + $0x2d8] sm:$0xff]  ;;  %v5591_v46 = vld [vmem:[#allocation6 + $0x2c0] sm:$0xff] }
  0x83   :  { %816 = vmatprep.subr.mxu0 %v5575_v47  ;;  %887 = vmatprep.subr.mxu1 %v5577_v50  ;;  %9059 = vst [vmem:[#allocation98_spill] sm:$0xff] %v5589_v45  ;;  %9060 = vst [vmem:[#allocation99_spill] sm:$0xff] %v5591_v46  ;;  %v5597_v50 = vld [vmem:[#allocation6 + $0x2a8] sm:$0xff]  ;;  %v5599_v47 = vld [vmem:[#allocation6 + $0x2b8] sm:$0xff] }
  0x84   :  { %817 = vmatpush2.msra.mxu0 %v5581_v59  ;;  %888 = vmatpush2.msra.mxu1 %v5583_v5  ;;  %9062 = vst [vmem:[#allocation101_spill] sm:$0xff] %v5597_v50  ;;  %9063 = vst [vmem:[#allocation102_spill] sm:$0xff] %v5599_v47  ;;  %v5605_v5 = vld [vmem:[#allocation6 + $0x2b0] sm:$0xff]  ;;  %v5607_v59 = vld [vmem:[#allocation6 + $0x288] sm:$0xff] }
  0x85   :  { %818 = vmatprep.subr.mxu0 %v5585_v0  ;;  %889 = vmatprep.subr.mxu1 %v5589_v45  ;;  %9065 = vst [vmem:[#allocation104_spill] sm:$0xff] %v5605_v5  ;;  %9066 = vst [vmem:[#allocation105_spill] sm:$0xff] %v5607_v59  ;;  %v5613_v45 = vld [vmem:[#allocation6 + $0x280] sm:$0xff]  ;;  %v5615_v0 = vld [vmem:[#allocation6 + $0x290] sm:$0xff] }
  0x86   :  { %819 = vmatpush2.msra.mxu0 %v5591_v46  ;;  %890 = vmatpush2.msra.mxu1 %v5593_v44  ;;  %9068 = vst [vmem:[#allocation107_spill] sm:$0xff] %v5613_v45  ;;  %9069 = vst [vmem:[#allocation108_spill] sm:$0xff] %v5615_v0  ;;  %v5619_v46 = vld [vmem:[#allocation6 + $0x268] sm:$0xff]  ;;  %v5621_v44 = vld [vmem:[#allocation6 + $0x278] sm:$0xff] }
  0x87   :  { %820 = vmatprep.subr.mxu0 %v5597_v50  ;;  %891 = vmatprep.subr.mxu1 %v5599_v47  ;;  %9070 = vst [vmem:[#allocation109_spill] sm:$0xff] %v5619_v46  ;;  %9071 = vst [vmem:[#allocation110_spill] sm:$0xff] %v5621_v44  ;;  %v5627_v50 = vld [vmem:[#allocation6 + $0x270] sm:$0xff]  ;;  %v5631_v47 = vld [vmem:[#allocation6 + $0x248] sm:$0xff] }
  0x88   :  { %821 = vmatpush2.msra.mxu0 %v5601_v43  ;;  %892 = vmatpush2.msra.mxu1 %v5605_v5  ;;  %9073 = vst [vmem:[#allocation112_spill] sm:$0xff] %v5627_v50  ;;  %9074 = vst [vmem:[#allocation113_spill] sm:$0xff] %v5631_v47  ;;  %v5633_v43 = vld [vmem:[#allocation6 + $0x258] sm:$0xff]  ;;  %v5637_v5 = vld [vmem:[#allocation6 + $0x240] sm:$0xff] }
  0x89   :  { %822 = vmatprep.subr.mxu0 %v5607_v59  ;;  %893 = vmatprep.subr.mxu1 %v5609_v42  ;;  %9075 = vst [vmem:[#allocation114_spill] sm:$0xff] %v5633_v43  ;;  %9076 = vst [vmem:[#allocation115_spill] sm:$0xff] %v5637_v5  ;;  %v5639_v59 = vld [vmem:[#allocation6 + $0x250] sm:$0xff]  ;;  %v5643_v42 = vld [vmem:[#allocation6 + $0x228] sm:$0xff] }
  0x8a   :  { %823 = vmatpush2.msra.mxu0 %v5613_v45  ;;  %894 = vmatpush2.msra.mxu1 %v5615_v0  ;;  %9077 = vst [vmem:[#allocation116_spill] sm:$0xff] %v5639_v59  ;;  %9078 = vst [vmem:[#allocation117_spill] sm:$0xff] %v5643_v42  ;;  %v5645_v45 = vld [vmem:[#allocation6 + $0x238] sm:$0xff]  ;;  %v5649_v0 = vld [vmem:[#allocation6 + $0x220] sm:$0xff] }
  0x8b   :  { %824 = vmatprep.subr.mxu0 %v5619_v46  ;;  %895 = vmatprep.subr.mxu1 %v5621_v44  ;;  %9079 = vst [vmem:[#allocation118_spill] sm:$0xff] %v5645_v45  ;;  %9080 = vst [vmem:[#allocation119_spill] sm:$0xff] %v5649_v0  ;;  %v5651_v46 = vld [vmem:[#allocation6 + $0x230] sm:$0xff]  ;;  %v5655_v44 = vld [vmem:[#allocation6 + $0x208] sm:$0xff] }
  0x8c   :  { %825 = vmatpush2.msra.mxu0 %v5625_v41  ;;  %896 = vmatpush2.msra.mxu1 %v5627_v50  ;;  %9081 = vst [vmem:[#allocation120_spill] sm:$0xff] %v5651_v46  ;;  %9082 = vst [vmem:[#allocation121_spill] sm:$0xff] %v5655_v44  ;;  %v5657_v41 = vld [vmem:[#allocation6 + $0x218] sm:$0xff]  ;;  %v5661_v50 = vld [vmem:[#allocation6 + $0x200] sm:$0xff] }
  0x8d   :  { %826 = vmatprep.subr.mxu0 %v5631_v47  ;;  %897 = vmatprep.subr.mxu1 %v5633_v43  ;;  %9083 = vst [vmem:[#allocation122_spill] sm:$0xff] %v5657_v41  ;;  %9084 = vst [vmem:[#allocation123_spill] sm:$0xff] %v5661_v50  ;;  %v5663_v47 = vld [vmem:[#allocation6 + $0x210] sm:$0xff]  ;;  %v5667_v43 = vld [vmem:[#allocation3 + $0x1e8] sm:$0xff] }
  0x8e   :  { %827 = vmatpush2.msra.mxu0 %v5637_v5  ;;  %898 = vmatpush2.msra.mxu1 %v5639_v59  ;;  %9085 = vst [vmem:[#allocation124_spill] sm:$0xff] %v5663_v47  ;;  %9086 = vst [vmem:[#allocation125_spill] sm:$0xff] %v5667_v43  ;;  %v5669_v5 = vld [vmem:[#allocation3 + $0x1f8] sm:$0xff] }
  0x8f   :  { %828 = vmatprep.subr.mxu0 %v5643_v42  ;;  %899 = vmatprep.subr.mxu1 %v5645_v45  ;;  %9087 = vst [vmem:[#allocation126_spill] sm:$0xff] %v5669_v5  ;;  %v64_v45 = vlaneseq }
  0x90   :  { %829 = vmatpush2.msra.mxu0 %v5649_v0  ;;  %900 = vmatpush2.msra.mxu1 %v5651_v46 }
  0x91   :  { %830 = vmatprep.subr.mxu0 %v5655_v44  ;;  %901 = vmatprep.subr.mxu1 %v5657_v41  ;;  %v5677_v0 = vshrl.u32 %v64_v45, 7 }
  0x92   :  { %831 = vmatpush2.msra.mxu0 %v5661_v50  ;;  %902 = vmatpush2.msra.mxu1 %v5663_v47  ;;  %v62_v50 = vld [vmem:[%s8431_s3] sm:$0xf] }
  0x93   :  { %1003 = vmatprep.subr.mxu0 %v5667_v43  ;;  %1074 = vmatprep.subr.mxu1 %v5669_v5  ;;  %v8548_v59 = vsub.s32 0, %v5677_v0  ;;  %v8550_v44 = vsub.s32 2, %v5677_v0  ;;  %v8554_v5 = vsub.s32 1, %v5677_v0  ;;  %v8555_v45 = vsub.s32 3, %v5677_v0 }
  0x95   :  { %v67_v41 = vrot.slane %v62_v50, %v8548_v59  ;;  %v5698_v40 = vrot.slane %v62_v50, %v8550_v44  ;;  %v71_v37 = vrot.slane %v62_v50, %v8554_v5  ;;  %v5704_v36 = vrot.slane %v62_v50, %v8555_v45 }
  0xe1   :  { %v5679_v46 = vpop.f32.mrf.mxu0  ;;  %v5681_v42 = vpop.f32.mrf.mxu1 }
  0xe3   :  { %v5688_v47 = vpop.f32.mrf.mxu0  ;;  %v5690_v43 = vpop.f32.mrf.mxu1 }
  0xe7   :  { %v194_v39 = vpop.f32.mrf.mxu0  ;;  %v307_v38 = vpop.f32.mrf.mxu1 }
  0xe8   :  { %v5706_v35 = vadd.f32 %v194_v39, %v67_v41  ;;  %v5709_v34 = vadd.f32 %v307_v38, %v5698_v40 }
  0xe9   :  { %v196_v33 = vpop.f32.mrf.mxu0  ;;  %v309_v59 = vpop.f32.mrf.mxu1 }
  0xea   :  { %9088 = vst [vmem:[#allocation127_spill] sm:$0xff] %v5706_v35  ;;  %9089 = vst [vmem:[#allocation128_spill] sm:$0xff] %v5709_v34  ;;  %v5711_v32 = vadd.f32 %v196_v33, %v71_v37  ;;  %v5714_v44 = vadd.f32 %v309_v59, %v5704_v36 }
  0xec   :  { %9090 = vst [vmem:[#allocation129_spill] sm:$0xff] %v5711_v32  ;;  %9091 = vst [vmem:[#allocation130_spill] sm:$0xff] %v5714_v44 }
  0xed   :  { %v200_v31 = vpop.f32.mrf.mxu0  ;;  %v313_v30 = vpop.f32.mrf.mxu1 }
  0xee   :  { %v5716_v29 = vadd.f32 %v200_v31, %v67_v41  ;;  %v5719_v5 = vadd.f32 %v313_v30, %v5698_v40 }
  0xef   :  { %v202_v50 = vpop.f32.mrf.mxu0  ;;  %v315_v39 = vpop.f32.mrf.mxu1 }
  0xf0   :  { %9092 = vst [vmem:[#allocation131_spill] sm:$0xff] %v5716_v29  ;;  %9093 = vst [vmem:[#allocation132_spill] sm:$0xff] %v5719_v5  ;;  %v5721_v45 = vadd.f32 %v202_v50, %v71_v37  ;;  %v5724_v38 = vadd.f32 %v315_v39, %v5704_v36 }
  0xf2   :  { %9094 = vst [vmem:[#allocation133_spill] sm:$0xff] %v5721_v45  ;;  %9095 = vst [vmem:[#allocation134_spill] sm:$0xff] %v5724_v38 }
  0xf3   :  { %v206_v34 = vpop.f32.mrf.mxu0  ;;  %v319_v33 = vpop.f32.mrf.mxu1 }
  0xf4   :  { %v5726_v32 = vadd.f32 %v206_v34, %v67_v41  ;;  %v5729_v59 = vadd.f32 %v319_v33, %v5698_v40 }
  0xf5   :  { %v208_v44 = vpop.f32.mrf.mxu0  ;;  %v321_v31 = vpop.f32.mrf.mxu1 }
  0xf6   :  { %9096 = vst [vmem:[#allocation135_spill] sm:$0xff] %v5726_v32  ;;  %9097 = vst [vmem:[#allocation136_spill] sm:$0xff] %v5729_v59  ;;  %v5731_v29 = vadd.f32 %v208_v44, %v71_v37  ;;  %v5734_v30 = vadd.f32 %v321_v31, %v5704_v36 }
  0xf8   :  { %9098 = vst [vmem:[#allocation137_spill] sm:$0xff] %v5731_v29  ;;  %9099 = vst [vmem:[#allocation138_spill] sm:$0xff] %v5734_v30 }
  0xf9   :  { %v212_v5 = vpop.f32.mrf.mxu0  ;;  %v325_v50 = vpop.f32.mrf.mxu1 }
  0xfa   :  { %v5736_v45 = vadd.f32 %v212_v5, %v67_v41  ;;  %v5739_v39 = vadd.f32 %v325_v50, %v5698_v40 }
  0xfb   :  { %v214_v38 = vpop.f32.mrf.mxu0  ;;  %v327_v34 = vpop.f32.mrf.mxu1 }
  0xfc   :  { %9100 = vst [vmem:[#allocation139_spill] sm:$0xff] %v5736_v45  ;;  %9101 = vst [vmem:[#allocation140_spill] sm:$0xff] %v5739_v39  ;;  %v5741_v32 = vadd.f32 %v214_v38, %v71_v37  ;;  %v5744_v33 = vadd.f32 %v327_v34, %v5704_v36 }
  0xfe   :  { %9102 = vst [vmem:[#allocation141_spill] sm:$0xff] %v5741_v32  ;;  %9103 = vst [vmem:[#allocation142_spill] sm:$0xff] %v5744_v33 }
  0xff   :  { %v218_v59 = vpop.f32.mrf.mxu0  ;;  %v331_v44 = vpop.f32.mrf.mxu1 }
 0x100   :  { %v5746_v29 = vadd.f32 %v218_v59, %v67_v41  ;;  %v5749_v31 = vadd.f32 %v331_v44, %v5698_v40 }
 0x101   :  { %v220_v30 = vpop.f32.mrf.mxu0  ;;  %v333_v5 = vpop.f32.mrf.mxu1 }
 0x102   :  { %9104 = vst [vmem:[#allocation143_spill] sm:$0xff] %v5746_v29  ;;  %9105 = vst [vmem:[#allocation144_spill] sm:$0xff] %v5749_v31  ;;  %v5751_v45 = vadd.f32 %v220_v30, %v71_v37  ;;  %v5754_v50 = vadd.f32 %v333_v5, %v5704_v36 }
 0x104   :  { %9106 = vst [vmem:[#allocation145_spill] sm:$0xff] %v5751_v45  ;;  %9107 = vst [vmem:[#allocation146_spill] sm:$0xff] %v5754_v50 }
 0x105   :  { %v224_v39 = vpop.f32.mrf.mxu0  ;;  %v337_v38 = vpop.f32.mrf.mxu1 }
 0x106   :  { %v5756_v32 = vadd.f32 %v224_v39, %v67_v41  ;;  %v5759_v34 = vadd.f32 %v337_v38, %v5698_v40 }
 0x107   :  { %v226_v33 = vpop.f32.mrf.mxu0  ;;  %v339_v59 = vpop.f32.mrf.mxu1 }
 0x108   :  { %9108 = vst [vmem:[#allocation147_spill] sm:$0xff] %v5756_v32  ;;  %9109 = vst [vmem:[#allocation148_spill] sm:$0xff] %v5759_v34  ;;  %v5761_v29 = vadd.f32 %v226_v33, %v71_v37  ;;  %v5764_v44 = vadd.f32 %v339_v59, %v5704_v36  ;;  %v189_v33 = vadd.f32 %v5679_v46, %v67_v41 }
 0x109   :  { %v191_v59 = vadd.f32 %v5688_v47, %v71_v37 }
 0x10a   :  { %9110 = vst [vmem:[#allocation149_spill] sm:$0xff] %v5761_v29  ;;  %9111 = vst [vmem:[#allocation150_spill] sm:$0xff] %v5764_v44 }
 0x10b   :  { %v230_v31 = vpop.f32.mrf.mxu0  ;;  %v343_v30 = vpop.f32.mrf.mxu1 }
 0x10c   :  { %v5766_v45 = vadd.f32 %v230_v31, %v67_v41  ;;  %v5769_v5 = vadd.f32 %v343_v30, %v5698_v40 }
 0x10d   :  { %v232_v50 = vpop.f32.mrf.mxu0  ;;  %v345_v39 = vpop.f32.mrf.mxu1 }
 0x10e   :  { %9112 = vst [vmem:[#allocation151_spill] sm:$0xff] %v5766_v45  ;;  %9113 = vst [vmem:[#allocation152_spill] sm:$0xff] %v5769_v5  ;;  %v5771_v32 = vadd.f32 %v232_v50, %v71_v37  ;;  %v5774_v38 = vadd.f32 %v345_v39, %v5704_v36  ;;  %v304_v50 = vadd.f32 %v5690_v43, %v5704_v36 }
 0x10f   :  { %v302_v39 = vadd.f32 %v5681_v42, %v5698_v40 }
 0x110   :  { %9114 = vst [vmem:[#allocation153_spill] sm:$0xff] %v5771_v32  ;;  %9115 = vst [vmem:[#allocation154_spill] sm:$0xff] %v5774_v38 }
 0x111   :  { %v536_v34 = vpop.f32.mrf.mxu0  ;;  %v607_v45 = vpop.f32.mrf.mxu1 }
 0x112   :  { %v612_v44 = vadd.f32 %v536_v34, %v189_v33  ;;  %v614_v38 = vadd.f32 %v607_v45, %v302_v39  ;;  %v5787_v45 = vld [vmem:[#allocation3 + $0x1e0] sm:$0xff]  ;;  %v5799_v39 = vld [vmem:[#allocation3 + $0x1d0] sm:$0xff] }
 0x113   :  { %v538_v29 = vpop.f32.mrf.mxu0  ;;  %v609_v5 = vpop.f32.mrf.mxu1 }
 0x114   :  { %v4704_v35 = vmul.f32 -1.442695, %v612_v44  ;;  %v613_v31 = vadd.f32 %v538_v29, %v191_v59  ;;  %v615_v32 = vadd.f32 %v609_v5, %v304_v50  ;;  %v5797_v50 = vld [vmem:[#allocation3 + $0x1c0] sm:$0xff] }
 0x116   :  { %4762 = vpow2.f32 %v4704_v35  ;;  %v4705_v30 = vmul.f32 -1.442695, %v613_v31  ;;  %v4706_v41 = vmul.f32 -1.442695, %v615_v32  ;;  %v5791_v31 = vld [vmem:[#allocation3 + $0x1c8] sm:$0xff] }
 0x118   :  { %4764 = vpow2.f32 %v4705_v30  ;;  %v5793_v30 = vld [vmem:[#allocation3 + $0x1d8] sm:$0xff] }
 0x119   :  { %4766 = vpow2.f32 %v4706_v41  ;;  %v5803_v41 = vld [vmem:[#allocation3 + $0x1a8] sm:$0xff] }
 0x123   :  { %v4763_v46 = vpop.eup %4762 }
 0x124   :  { %v619_v37 = vadd.f32 1.0, %v4763_v46  ;;  %v5805_v46 = vld [vmem:[#allocation3 + $0x1b8] sm:$0xff] }
 0x125   :  { %v4765_v47 = vpop.eup %4764 }
 0x126   :  { %4768 = vrcp.f32 %v619_v37  ;;  %v625_v29 = vadd.f32 1.0, %v4765_v47  ;;  %v4767_v35 = vpop.eup %4766  ;;  %v5809_v37 = vld [vmem:[#allocation3 + $0x1a0] sm:$0xff]  ;;  %v5811_v47 = vld [vmem:[#allocation3 + $0x1b0] sm:$0xff] }
 0x127   :  { %4770 = vtanh.f32 %v614_v38  ;;  %v632_v59 = vadd.f32 1.0, %v4767_v35  ;;  %v5789_v38 = vld [vmem:[#allocation3 + $0x1f0] sm:$0xff]  ;;  %9116 = vst [vmem:[#allocation155_spill] sm:$0xff] %v5811_v47  ;;  %v5817_v35 = vld [vmem:[#allocation3 + $0x198] sm:$0xff] }
 0x128   :  { %4772 = vrcp.f32 %v625_v29  ;;  %v5815_v29 = vld [vmem:[#allocation3 + $0x188] sm:$0xff]  ;;  %9118 = vst [vmem:[#allocation157_spill] sm:$0xff] %v5817_v35 }
 0x129   :  { %4774 = vrcp.f32 %v632_v59  ;;  %9117 = vst [vmem:[#allocation156_spill] sm:$0xff] %v5815_v29  ;;  %v5829_v59 = vld [vmem:[#allocation3 + $0x178] sm:$0xff] }
 0x12a   :  { %9122 = vst [vmem:[#allocation161_spill] sm:$0xff] %v5829_v59 }
 0x133   :  { %v4769_v34 = vpop.eup %4768 }
 0x134   :  { %v4771_v44 = vpop.eup %4770 }
 0x135   :  { %v4773_v33 = vpop.eup %4772  ;;  %v636_v43 = vmul.f32 %v4771_v44, %v4769_v34  ;;  %v5821_v34 = vld [vmem:[#allocation3 + $0x180] sm:$0xff]  ;;  %v5823_v44 = vld [vmem:[#allocation3 + $0x190] sm:$0xff] }
 0x136   :  { %v635_v36 = vmul.f32 0.0, %v4773_v33  ;;  %v4775_v32 = vpop.eup %4774  ;;  %9119 = vst [vmem:[#allocation158_spill] sm:$0xff] %v5821_v34  ;;  %9120 = vst [vmem:[#allocation159_spill] sm:$0xff] %v5823_v44  ;;  %v5827_v33 = vld [vmem:[#allocation3 + $0x168] sm:$0xff] }
 0x137   :  { %9121 = vst [vmem:[#allocation160_spill] sm:$0xff] %v5827_v33 }
 0x138   :  { %v5782_v5 = vadd.f32 %v636_v43, %v635_v36  ;;  %v5833_v36 = vld [vmem:[#allocation3 + $0x160] sm:$0xff]  ;;  %v5835_v43 = vld [vmem:[#allocation3 + $0x170] sm:$0xff] }
 0x139   :  { %9123 = vst [vmem:[#allocation162_spill] sm:$0xff] %v5833_v36  ;;  %9124 = vst [vmem:[#allocation163_spill] sm:$0xff] %v5835_v43 }
 0x13a   :  { %4776 = vtanh.f32 %v5782_v5 }
 0x147   :  { %v4777_v40 = vpop.eup %4776 }
 0x148   :  { %v5785_v42 = vmul.f32 %v4777_v40, %v4775_v32  ;;  %v5839_v32 = vld [vmem:[#allocation3 + $0x148] sm:$0xff]  ;;  %v5841_v40 = vld [vmem:[#allocation3 + $0x158] sm:$0xff] }
 0x149   :  { %9125 = vst [vmem:[#allocation164_spill] sm:$0xff] %v5839_v32  ;;  %9126 = vst [vmem:[#allocation165_spill] sm:$0xff] %v5841_v40 }
 0x14a   :  { %833 = vmatmul.mubr.f32.vlgmr.msra.gmra.mxu0 %v5785_v42  ;;  %904 = vmatmul.mubr.f32.vlgmr.msra.gmra.mxu1 %v5785_v42 }
 0x14b   :  { %1004 = vmatpush1.msra.mxu0 %v5787_v45  ;;  %1075 = vmatpush1.msra.mxu1 %v5789_v38 }
 0x14c   :  { %1005 = vmatprep.subr.mxu0 %v5791_v31  ;;  %1076 = vmatprep.subr.mxu1 %v5793_v30 }
 0x14d   :  { %1006 = vmatpush1.msra.mxu0 %v5797_v50  ;;  %1077 = vmatpush1.msra.mxu1 %v5799_v39 }
 0x14e   :  { %1007 = vmatprep.subr.mxu0 %v5803_v41  ;;  %1078 = vmatprep.subr.mxu1 %v5805_v46 }
 0x14f   :  { %1008 = vmatpush1.msra.mxu0 %v5809_v37  ;;  %1079 = vmatpush1.msra.mxu1 %v5811_v47  ;;  %v5845_v47 = vld [vmem:[#allocation3 + $0x140] sm:$0xff] }
 0x150   :  { %1009 = vmatprep.subr.mxu0 %v5815_v29  ;;  %1080 = vmatprep.subr.mxu1 %v5817_v35  ;;  %9127 = vst [vmem:[#allocation166_spill] sm:$0xff] %v5845_v47  ;;  %v5847_v29 = vld [vmem:[#allocation3 + $0x150] sm:$0xff]  ;;  %v5851_v35 = vld [vmem:[#allocation3 + $0x128] sm:$0xff] }
 0x151   :  { %1010 = vmatpush1.msra.mxu0 %v5821_v34  ;;  %1081 = vmatpush1.msra.mxu1 %v5823_v44  ;;  %9128 = vst [vmem:[#allocation167_spill] sm:$0xff] %v5847_v29  ;;  %9129 = vst [vmem:[#allocation168_spill] sm:$0xff] %v5851_v35  ;;  %v5853_v34 = vld [vmem:[#allocation3 + $0x138] sm:$0xff]  ;;  %v5857_v44 = vld [vmem:[#allocation3 + $0x120] sm:$0xff] }
 0x152   :  { %1011 = vmatprep.subr.mxu0 %v5827_v33  ;;  %1082 = vmatprep.subr.mxu1 %v5829_v59  ;;  %9130 = vst [vmem:[#allocation169_spill] sm:$0xff] %v5853_v34  ;;  %9131 = vst [vmem:[#allocation170_spill] sm:$0xff] %v5857_v44  ;;  %v5859_v33 = vld [vmem:[#allocation3 + $0x130] sm:$0xff]  ;;  %v5863_v59 = vld [vmem:[#allocation3 + $0x108] sm:$0xff] }
 0x153   :  { %1012 = vmatpush1.msra.mxu0 %v5833_v36  ;;  %1083 = vmatpush1.msra.mxu1 %v5835_v43  ;;  %v5865_v36 = vld [vmem:[#allocation3 + $0x118] sm:$0xff]  ;;  %v5022_v43 = vld [vmem:[#allocation3 + $0xe0] sm:$0xff] }
 0x154   :  { %1013 = vmatprep.subr.mxu0 %v5839_v32  ;;  %1084 = vmatprep.subr.mxu1 %v5841_v40  ;;  %v5018_v40 = vld [vmem:[#allocation3 + $0x100] sm:$0xff]  ;;  %v5021_v32 = vld [vmem:[#allocation3 + $0xf8] sm:$0xff] }
 0x155   :  { %1014 = vmatpush1.msra.mxu0 %v5845_v47  ;;  %1085 = vmatpush1.msra.mxu1 %v5847_v29  ;;  %v5019_v47 = vld [vmem:[#allocation3 + $0x110] sm:$0xff]  ;;  %v5020_v29 = vld [vmem:[#allocation3 + $0xe8] sm:$0xff] }
 0x156   :  { %1015 = vmatprep.subr.mxu0 %v5851_v35  ;;  %1086 = vmatprep.subr.mxu1 %v5853_v34  ;;  %v5023_v35 = vld [vmem:[#allocation3 + $0xf0] sm:$0xff]  ;;  %v5024_v34 = vld [vmem:[#allocation3 + $0xc8] sm:$0xff] }
 0x157   :  { %1016 = vmatpush1.msra.mxu0 %v5857_v44  ;;  %1087 = vmatpush1.msra.mxu1 %v5859_v33  ;;  %v5025_v44 = vld [vmem:[#allocation3 + $0xd8] sm:$0xff] }
 0x158   :  { %1017 = vmatprep.subr.mxu0 %v5863_v59  ;;  %1088 = vmatprep.subr.mxu1 %v5865_v36 }
 0x159   :  { %1018 = vmatpush1.msra.mxu0 %v5018_v40  ;;  %1089 = vmatpush1.msra.mxu1 %v5019_v47  ;;  %v9174_v47 = vld [vmem:[#allocation53_spill] sm:$0xff]  ;;  %v9181_v40 = vld [vmem:[#allocation60_spill] sm:$0xff] }
 0x15a   :  { %1019 = vmatprep.subr.mxu0 %v5020_v29  ;;  %1090 = vmatprep.subr.mxu1 %v5021_v32  ;;  %v9175_v29 = vld [vmem:[#allocation54_spill] sm:$0xff]  ;;  %v9180_v32 = vld [vmem:[#allocation59_spill] sm:$0xff] }
 0x15b   :  { %1020 = vmatpush1.msra.mxu0 %v5022_v43  ;;  %1091 = vmatpush1.msra.mxu1 %v5023_v35  ;;  %v9176_v35 = vld [vmem:[#allocation55_spill] sm:$0xff]  ;;  %v9179_v43 = vld [vmem:[#allocation58_spill] sm:$0xff] }
 0x15c   :  { %1021 = vmatprep.subr.mxu0 %v5024_v34  ;;  %1092 = vmatprep.subr.mxu1 %v5025_v44  ;;  %v9177_v34 = vld [vmem:[#allocation56_spill] sm:$0xff]  ;;  %v9178_v44 = vld [vmem:[#allocation57_spill] sm:$0xff] }
 0x15d   :  { %1022 = vmatpush1.msra.mxu0 %v5182_v48  ;;  %1093 = vmatpush1.msra.mxu1 %v5184_v49  ;;  %v9132_v48 = vmov 0.0   ;;  %v9133_v49 = vld [vmem:[#allocation12_spill] sm:$0xff] }
 0x15e   :  { %1023 = vmatprep.subr.mxu0 %v5191_v51  ;;  %1094 = vmatprep.subr.mxu1 %v5193_v52  ;;  %v9134_v51 = vld [vmem:[#allocation13_spill] sm:$0xff]  ;;  %v9135_v52 = vld [vmem:[#allocation14_spill] sm:$0xff] }
 0x15f   :  { %1024 = vmatpush1.msra.mxu0 %v5197_v53  ;;  %1095 = vmatpush1.msra.mxu1 %v5199_v54  ;;  %v9136_v53 = vld [vmem:[#allocation15_spill] sm:$0xff]  ;;  %v9137_v54 = vld [vmem:[#allocation16_spill] sm:$0xff] }
 0x160   :  { %1025 = vmatprep.subr.mxu0 %v5203_v55  ;;  %1096 = vmatprep.subr.mxu1 %v5205_v56  ;;  %v9138_v55 = vld [vmem:[#allocation17_spill] sm:$0xff]  ;;  %v9139_v56 = vld [vmem:[#allocation18_spill] sm:$0xff] }
 0x161   :  { %1026 = vmatpush1.msra.mxu0 %v5211_v57  ;;  %1097 = vmatpush1.msra.mxu1 %v5213_v58  ;;  %v9140_v57 = vld [vmem:[#allocation19_spill] sm:$0xff]  ;;  %v9141_v58 = vld [vmem:[#allocation20_spill] sm:$0xff] }
 0x162   :  { %1027 = vmatprep.subr.mxu0 %v5222_v60  ;;  %1098 = vmatprep.subr.mxu1 %v5224_v61  ;;  %v9142_v60 = vld [vmem:[#allocation21_spill] sm:$0xff]  ;;  %v9143_v61 = vld [vmem:[#allocation22_spill] sm:$0xff] }
 0x163   :  { %1028 = vmatpush1.msra.mxu0 %v5228_v62  ;;  %1099 = vmatpush1.msra.mxu1 %v5230_v63  ;;  %v9144_v62 = vld [vmem:[#allocation23_spill] sm:$0xff]  ;;  %v9145_v63 = vld [vmem:[#allocation24_spill] sm:$0xff] }
 0x164   :  { %1029 = vmatprep.subr.mxu0 %v5234_v1  ;;  %1100 = vmatprep.subr.mxu1 %v5236_v2  ;;  %v9146_v1 = vld [vmem:[#allocation25_spill] sm:$0xff]  ;;  %v9147_v2 = vld [vmem:[#allocation26_spill] sm:$0xff] }
 0x165   :  { %1030 = vmatpush1.msra.mxu0 %v5242_v3  ;;  %1101 = vmatpush1.msra.mxu1 %v5244_v4  ;;  %v9148_v3 = vld [vmem:[#allocation27_spill] sm:$0xff]  ;;  %v9149_v4 = vld [vmem:[#allocation28_spill] sm:$0xff] }
 0x166   :  { %1031 = vmatprep.subr.mxu0 %v5253_v6  ;;  %1102 = vmatprep.subr.mxu1 %v5255_v7  ;;  %v9150_v6 = vld [vmem:[#allocation29_spill] sm:$0xff]  ;;  %v9151_v7 = vld [vmem:[#allocation30_spill] sm:$0xff] }
 0x167   :  { %1032 = vmatpush1.msra.mxu0 %v5259_v8  ;;  %1103 = vmatpush1.msra.mxu1 %v5261_v9  ;;  %v9152_v8 = vld [vmem:[#allocation31_spill] sm:$0xff]  ;;  %v9153_v9 = vld [vmem:[#allocation32_spill] sm:$0xff] }
 0x168   :  { %1033 = vmatprep.subr.mxu0 %v5265_v10  ;;  %1104 = vmatprep.subr.mxu1 %v5267_v11  ;;  %v9154_v10 = vld [vmem:[#allocation33_spill] sm:$0xff]  ;;  %v9155_v11 = vld [vmem:[#allocation34_spill] sm:$0xff] }
 0x169   :  { %1034 = vmatpush1.msra.mxu0 %v5271_v12  ;;  %1067 = vmatprep.mubr.f32.mxu0 %v9132_v48  ;;  %v9156_v12 = vld [vmem:[#allocation35_spill] sm:$0xff] }
 0x16a   :  { %1105 = vmatpush1.msra.mxu1 %v5275_v13  ;;  %1138 = vmatprep.mubr.f32.mxu1 %v9132_v48  ;;  %v9157_v13 = vld [vmem:[#allocation36_spill] sm:$0xff] }
 0x16b   :  { %1068 = vmatmul.mubr.f32.vlgmr.msra.gmra.mxu0 %v5785_v42  ;;  %1139 = vmatmul.mubr.f32.vlgmr.msra.gmra.mxu1 %v5785_v42  ;;  %v9173_v42 = vld [vmem:[#allocation52_spill] sm:$0xff] }
 0x16c   :  { %1301 = vmatprep.subr.mxu0 %v5287_v14  ;;  %1372 = vmatprep.subr.mxu1 %v5289_v15  ;;  %v9158_v14 = vld [vmem:[#allocation37_spill] sm:$0xff]  ;;  %v9159_v15 = vld [vmem:[#allocation38_spill] sm:$0xff] }
 0x16d   :  { %1302 = vmatpush1.msra.mxu0 %v5291_v16  ;;  %1373 = vmatpush1.msra.mxu1 %v5295_v17  ;;  %v9160_v16 = vld [vmem:[#allocation39_spill] sm:$0xff]  ;;  %v9161_v17 = vld [vmem:[#allocation40_spill] sm:$0xff] }
 0x16e   :  { %1303 = vmatprep.subr.mxu0 %v5299_v18  ;;  %1374 = vmatprep.subr.mxu1 %v5301_v19  ;;  %v9162_v18 = vld [vmem:[#allocation41_spill] sm:$0xff]  ;;  %v9163_v19 = vld [vmem:[#allocation42_spill] sm:$0xff] }
 0x16f   :  { %1304 = vmatpush1.msra.mxu0 %v5303_v20  ;;  %1375 = vmatpush1.msra.mxu1 %v5307_v21  ;;  %v9164_v20 = vld [vmem:[#allocation43_spill] sm:$0xff]  ;;  %v9165_v21 = vld [vmem:[#allocation44_spill] sm:$0xff] }
 0x170   :  { %1305 = vmatprep.subr.mxu0 %v5311_v22  ;;  %1376 = vmatprep.subr.mxu1 %v5313_v23  ;;  %v9166_v22 = vld [vmem:[#allocation45_spill] sm:$0xff]  ;;  %v9167_v23 = vld [vmem:[#allocation46_spill] sm:$0xff] }
 0x171   :  { %1306 = vmatpush1.msra.mxu0 %v5315_v24  ;;  %1377 = vmatpush1.msra.mxu1 %v5319_v25  ;;  %v9168_v24 = vld [vmem:[#allocation47_spill] sm:$0xff]  ;;  %v9169_v25 = vld [vmem:[#allocation48_spill] sm:$0xff] }
 0x172   :  { %1307 = vmatprep.subr.mxu0 %v5323_v26  ;;  %1378 = vmatprep.subr.mxu1 %v5325_v27  ;;  %v9170_v26 = vld [vmem:[#allocation49_spill] sm:$0xff]  ;;  %v9171_v27 = vld [vmem:[#allocation50_spill] sm:$0xff] }
 0x173   :  { %1308 = vmatpush1.msra.mxu0 %v5327_v28  ;;  %1379 = vmatpush1.msra.mxu1 %v9133_v49  ;;  %v9172_v28 = vld [vmem:[#allocation51_spill] sm:$0xff]  ;;  %v9182_v49 = vld [vmem:[#allocation61_spill] sm:$0xff] }
 0x174   :  { %1309 = vmatprep.subr.mxu0 %v9134_v51  ;;  %1380 = vmatprep.subr.mxu1 %v9135_v52  ;;  %v9183_v51 = vld [vmem:[#allocation62_spill] sm:$0xff]  ;;  %v9184_v52 = vld [vmem:[#allocation63_spill] sm:$0xff] }
 0x175   :  { %1310 = vmatpush1.msra.mxu0 %v9136_v53  ;;  %1381 = vmatpush1.msra.mxu1 %v9137_v54  ;;  %v9185_v53 = vld [vmem:[#allocation64_spill] sm:$0xff]  ;;  %v9186_v54 = vld [vmem:[#allocation65_spill] sm:$0xff] }
 0x176   :  { %1311 = vmatprep.subr.mxu0 %v9138_v55  ;;  %1382 = vmatprep.subr.mxu1 %v9139_v56  ;;  %v9187_v55 = vld [vmem:[#allocation66_spill] sm:$0xff]  ;;  %v9188_v56 = vld [vmem:[#allocation67_spill] sm:$0xff] }
 0x177   :  { %1312 = vmatpush1.msra.mxu0 %v9140_v57  ;;  %1383 = vmatpush1.msra.mxu1 %v9141_v58  ;;  %v9189_v57 = vld [vmem:[#allocation68_spill] sm:$0xff]  ;;  %v9190_v58 = vld [vmem:[#allocation69_spill] sm:$0xff] }
 0x178   :  { %1313 = vmatprep.subr.mxu0 %v9142_v60  ;;  %1384 = vmatprep.subr.mxu1 %v9143_v61  ;;  %v9191_v60 = vld [vmem:[#allocation70_spill] sm:$0xff]  ;;  %v9192_v61 = vld [vmem:[#allocation71_spill] sm:$0xff] }
 0x179   :  { %1314 = vmatpush1.msra.mxu0 %v9144_v62  ;;  %1385 = vmatpush1.msra.mxu1 %v9145_v63  ;;  %v9193_v62 = vld [vmem:[#allocation72_spill] sm:$0xff]  ;;  %v9194_v63 = vld [vmem:[#allocation73_spill] sm:$0xff] }
 0x17a   :  { %1315 = vmatprep.subr.mxu0 %v9146_v1  ;;  %1386 = vmatprep.subr.mxu1 %v9147_v2  ;;  %v9195_v1 = vld [vmem:[#allocation74_spill] sm:$0xff]  ;;  %v9196_v2 = vld [vmem:[#allocation75_spill] sm:$0xff] }
 0x17b   :  { %1316 = vmatpush1.msra.mxu0 %v9148_v3  ;;  %1387 = vmatpush1.msra.mxu1 %v9149_v4  ;;  %v9197_v3 = vld [vmem:[#allocation76_spill] sm:$0xff]  ;;  %v9198_v4 = vld [vmem:[#allocation77_spill] sm:$0xff] }
 0x17c   :  { %1317 = vmatprep.subr.mxu0 %v9150_v6  ;;  %1388 = vmatprep.subr.mxu1 %v9151_v7  ;;  %v9199_v6 = vld [vmem:[#allocation78_spill] sm:$0xff]  ;;  %v9200_v7 = vld [vmem:[#allocation79_spill] sm:$0xff] }
 0x17d   :  { %1318 = vmatpush1.msra.mxu0 %v9152_v8  ;;  %1389 = vmatpush1.msra.mxu1 %v9153_v9  ;;  %v9201_v8 = vld [vmem:[#allocation80_spill] sm:$0xff]  ;;  %v9202_v9 = vld [vmem:[#allocation81_spill] sm:$0xff] }
 0x17e   :  { %1319 = vmatprep.subr.mxu0 %v9154_v10  ;;  %1390 = vmatprep.subr.mxu1 %v9155_v11  ;;  %v9203_v10 = vld [vmem:[#allocation82_spill] sm:$0xff]  ;;  %v9204_v11 = vld [vmem:[#allocation83_spill] sm:$0xff] }
 0x17f   :  { %1320 = vmatpush1.msra.mxu0 %v9156_v12  ;;  %1391 = vmatpush1.msra.mxu1 %v9157_v13  ;;  %v9205_v12 = vld [vmem:[#allocation84_spill] sm:$0xff]  ;;  %v9206_v13 = vld [vmem:[#allocation85_spill] sm:$0xff] }
 0x180   :  { %1321 = vmatprep.subr.mxu0 %v9158_v14  ;;  %1392 = vmatprep.subr.mxu1 %v9159_v15  ;;  %v9207_v14 = vld [vmem:[#allocation86_spill] sm:$0xff]  ;;  %v9208_v15 = vld [vmem:[#allocation87_spill] sm:$0xff] }
 0x181   :  { %1322 = vmatpush1.msra.mxu0 %v9160_v16  ;;  %1393 = vmatpush1.msra.mxu1 %v9161_v17  ;;  %v9209_v16 = vld [vmem:[#allocation88_spill] sm:$0xff]  ;;  %v9210_v17 = vld [vmem:[#allocation89_spill] sm:$0xff] }
 0x182   :  { %1323 = vmatprep.subr.mxu0 %v9162_v18  ;;  %1394 = vmatprep.subr.mxu1 %v9163_v19  ;;  %v9211_v18 = vld [vmem:[#allocation90_spill] sm:$0xff]  ;;  %v9212_v19 = vld [vmem:[#allocation91_spill] sm:$0xff] }
 0x183   :  { %1324 = vmatpush1.msra.mxu0 %v9164_v20  ;;  %1395 = vmatpush1.msra.mxu1 %v9165_v21  ;;  %v9213_v20 = vld [vmem:[#allocation92_spill] sm:$0xff]  ;;  %v9214_v21 = vld [vmem:[#allocation93_spill] sm:$0xff] }
 0x184   :  { %1325 = vmatprep.subr.mxu0 %v9166_v22  ;;  %1396 = vmatprep.subr.mxu1 %v9167_v23  ;;  %v9215_v22 = vld [vmem:[#allocation94_spill] sm:$0xff]  ;;  %v9216_v23 = vld [vmem:[#allocation95_spill] sm:$0xff] }
 0x185   :  { %1326 = vmatpush1.msra.mxu0 %v9168_v24  ;;  %1397 = vmatpush1.msra.mxu1 %v9169_v25  ;;  %v9217_v24 = vld [vmem:[#allocation96_spill] sm:$0xff]  ;;  %v9218_v25 = vld [vmem:[#allocation97_spill] sm:$0xff] }
 0x186   :  { %1327 = vmatprep.subr.mxu0 %v9170_v26  ;;  %1398 = vmatprep.subr.mxu1 %v9171_v27  ;;  %v9219_v26 = vld [vmem:[#allocation98_spill] sm:$0xff]  ;;  %v9220_v27 = vld [vmem:[#allocation99_spill] sm:$0xff] }
 0x187   :  { %1328 = vmatpush1.msra.mxu0 %v9172_v28  ;;  %1399 = vmatpush1.msra.mxu1 %v9173_v42  ;;  %v9221_v28 = vld [vmem:[#allocation100_spill] sm:$0xff]  ;;  %v9222_v42 = vld [vmem:[#allocation101_spill] sm:$0xff] }
 0x188   :  { %1329 = vmatprep.subr.mxu0 %v9174_v47  ;;  %1400 = vmatprep.subr.mxu1 %v9175_v29  ;;  %v9223_v47 = vld [vmem:[#allocation102_spill] sm:$0xff]  ;;  %v9224_v29 = vld [vmem:[#allocation103_spill] sm:$0xff] }
 0x189   :  { %1330 = vmatpush1.msra.mxu0 %v9176_v35  ;;  %1401 = vmatpush1.msra.mxu1 %v9177_v34  ;;  %v9225_v35 = vld [vmem:[#allocation104_spill] sm:$0xff]  ;;  %v9226_v34 = vld [vmem:[#allocation105_spill] sm:$0xff] }
 0x18a   :  { %1331 = vmatprep.subr.mxu0 %v9178_v44  ;;  %1402 = vmatprep.subr.mxu1 %v9179_v43  ;;  %v9227_v44 = vld [vmem:[#allocation106_spill] sm:$0xff]  ;;  %v9228_v43 = vld [vmem:[#allocation107_spill] sm:$0xff] }
 0x18b   :  { %1332 = vmatpush1.msra.mxu0 %v9180_v32  ;;  %1403 = vmatpush1.msra.mxu1 %v9181_v40  ;;  %v9229_v32 = vld [vmem:[#allocation108_spill] sm:$0xff]  ;;  %v9230_v40 = vld [vmem:[#allocation109_spill] sm:$0xff] }
 0x18c   :  { %1333 = vmatprep.subr.mxu0 %v9182_v49  ;;  %1404 = vmatprep.subr.mxu1 %v9183_v51  ;;  %v9231_v49 = vld [vmem:[#allocation110_spill] sm:$0xff]  ;;  %v9232_v51 = vld [vmem:[#allocation111_spill] sm:$0xff] }
 0x18d   :  { %1334 = vmatpush2.msra.mxu0 %v9184_v52  ;;  %1405 = vmatpush2.msra.mxu1 %v9185_v53  ;;  %v9233_v52 = vld [vmem:[#allocation112_spill] sm:$0xff]  ;;  %v9234_v53 = vld [vmem:[#allocation113_spill] sm:$0xff] }
 0x18e   :  { %1335 = vmatprep.subr.mxu0 %v9186_v54  ;;  %1406 = vmatprep.subr.mxu1 %v9187_v55  ;;  %v9235_v54 = vld [vmem:[#allocation114_spill] sm:$0xff]  ;;  %v9236_v55 = vld [vmem:[#allocation115_spill] sm:$0xff] }
 0x18f   :  { %1336 = vmatpush2.msra.mxu0 %v9188_v56  ;;  %1407 = vmatpush2.msra.mxu1 %v9189_v57  ;;  %v9237_v56 = vld [vmem:[#allocation116_spill] sm:$0xff]  ;;  %v9238_v57 = vld [vmem:[#allocation117_spill] sm:$0xff] }
 0x190   :  { %1337 = vmatprep.subr.mxu0 %v9190_v58  ;;  %1408 = vmatprep.subr.mxu1 %v9191_v60  ;;  %v9239_v58 = vld [vmem:[#allocation118_spill] sm:$0xff]  ;;  %v9240_v60 = vld [vmem:[#allocation119_spill] sm:$0xff] }
 0x191   :  { %1338 = vmatpush2.msra.mxu0 %v9192_v61  ;;  %1409 = vmatpush2.msra.mxu1 %v9193_v62  ;;  %v9241_v61 = vld [vmem:[#allocation120_spill] sm:$0xff]  ;;  %v9242_v62 = vld [vmem:[#allocation121_spill] sm:$0xff] }
 0x192   :  { %1339 = vmatprep.subr.mxu0 %v9194_v63  ;;  %1410 = vmatprep.subr.mxu1 %v9195_v1  ;;  %v9243_v63 = vld [vmem:[#allocation122_spill] sm:$0xff]  ;;  %v9244_v1 = vld [vmem:[#allocation123_spill] sm:$0xff] }
 0x193   :  { %1340 = vmatpush2.msra.mxu0 %v9196_v2  ;;  %1411 = vmatpush2.msra.mxu1 %v9197_v3  ;;  %v9245_v2 = vld [vmem:[#allocation124_spill] sm:$0xff]  ;;  %v9246_v3 = vld [vmem:[#allocation125_spill] sm:$0xff] }
 0x194   :  { %1341 = vmatprep.subr.mxu0 %v9198_v4  ;;  %1412 = vmatprep.subr.mxu1 %v9199_v6  ;;  %v9247_v4 = vld [vmem:[#allocation126_spill] sm:$0xff]  ;;  %v380_v6 = vld [vmem:[%s8433_s5] sm:$0xf]  ;;  %s5097_s5 = smov [#allocation8]  }
 0x195   :  { %1342 = vmatpush2.msra.mxu0 %v9200_v7  ;;  %1413 = vmatpush2.msra.mxu1 %v9201_v8  ;;  %v9248_v7 = vsub.s32 0, %v5677_v0  ;;  %s4671_s28 = sshll.u32 %s5097_s5, 4  ;;  %s4672_s28 = int_to_ptr.vmem [resolvable:$true] %s4671_s28 }
 0x196   :  { %1343 = vmatprep.subr.mxu0 %v9202_v9  ;;  %1414 = vmatprep.subr.mxu1 %v9203_v10  ;;  %v9250_v9 = vsub.s32 1, %v5677_v0  ;;  %s5066_s29 = scalar_lea.vmem %s4672_s28, 1024  ;;  %p5071_p11 = scmp.lt.s32.totalorder %s4672_s28, %s4672_s28 }
 0x197   :  { %1344 = vmatpush2.msra.mxu0 %v9204_v11  ;;  %1415 = vmatpush2.msra.mxu1 %v9205_v12  ;;  %v6038_v8 = vrot.slane %v380_v6, %v9248_v7  ;;  %p5067_p10 = scmp.ne.s32.totalorder %s4672_s28, %s5066_s29  ;;  %p5072_p12 = scmp.lt.s32.totalorder %s5066_s29, %s5066_s29 }
 0x198   :  { %1345 = vmatprep.subr.mxu0 %v9206_v13  ;;  %1416 = vmatprep.subr.mxu1 %v9207_v14  ;;  %v6042_v10 = vrot.slane %v380_v6, %v9250_v9 }
 0x199   :  { %1346 = vmatpush2.msra.mxu0 %v9208_v15  ;;  %1417 = vmatpush2.msra.mxu1 %v9209_v16  ;;  %9249 = vst [vmem:[#allocation12_spill] sm:$0xff] %v6038_v8  ;;  %p5073_p13 = por %p5072_p12, %p5071_p11 }
 0x19a   :  { %1347 = vmatprep.subr.mxu0 %v9210_v17  ;;  %1418 = vmatprep.subr.mxu1 %v9211_v18  ;;  %9251 = vst [vmem:[#allocation13_spill] sm:$0xff] %v6042_v10  ;;  %v9252_v18 = vsub.s32 3, %v5677_v0 }
 0x19b   :  { %1348 = vmatpush2.msra.mxu0 %v9212_v19  ;;  %1419 = vmatpush2.msra.mxu1 %v9213_v20  ;;  %p5074_p0 = pnand %p5073_p13, %p5067_p10 }
 0x19c   :  { %1349 = vmatprep.subr.mxu0 %v9214_v21  ;;  %1420 = vmatprep.subr.mxu1 %v9215_v22  ;;  %v6048_v19 = vrot.slane %v380_v6, %v9252_v18  ;;  %v9254_v22 = vsub.s32 2, %v5677_v0 }
 0x19d   :  { %1350 = vmatpush2.msra.mxu0 %v9216_v23  ;;  %1421 = vmatpush2.msra.mxu1 %v9217_v24 }
 0x19e   :  { %1351 = vmatprep.subr.mxu0 %v9218_v25  ;;  %1422 = vmatprep.subr.mxu1 %v9219_v26  ;;  %9253 = vst [vmem:[#allocation14_spill] sm:$0xff] %v6048_v19  ;;  %v6053_v23 = vrot.slane %v380_v6, %v9254_v22 }
 0x19f   :  { %1352 = vmatpush2.msra.mxu0 %v9220_v27  ;;  %1423 = vmatpush2.msra.mxu1 %v9221_v28 }
 0x1a0   :  { %1353 = vmatprep.subr.mxu0 %v9222_v42  ;;  %1424 = vmatprep.subr.mxu1 %v9223_v47  ;;  %9255 = vst [vmem:[#allocation15_spill] sm:$0xff] %v6053_v23 }
 0x1a1   :  { %1354 = vmatpush2.msra.mxu0 %v9224_v29  ;;  %1425 = vmatpush2.msra.mxu1 %v9225_v35 }
 0x1a2   :  { %1355 = vmatprep.subr.mxu0 %v9226_v34  ;;  %1426 = vmatprep.subr.mxu1 %v9227_v44  ;;  %v9256_v34 = vld [vmem:[#allocation127_spill] sm:$0xff] }
 0x1a3   :  { %1356 = vmatpush2.msra.mxu0 %v9228_v43  ;;  %1427 = vmatpush2.msra.mxu1 %v9229_v32 }
 0x1a4   :  { %1357 = vmatprep.subr.mxu0 %v9230_v40  ;;  %1428 = vmatprep.subr.mxu1 %v9231_v49 }
 0x1a5   :  { %1358 = vmatpush2.msra.mxu0 %v9232_v51  ;;  %1429 = vmatpush2.msra.mxu1 %v9233_v52  ;;  %v9257_v51 = vld [vmem:[#allocation129_spill] sm:$0xff] }
 0x1a6   :  { %1359 = vmatprep.subr.mxu0 %v9234_v53  ;;  %1430 = vmatprep.subr.mxu1 %v9235_v54 }
 0x1a7   :  { %1360 = vmatpush2.msra.mxu0 %v9236_v55  ;;  %1431 = vmatpush2.msra.mxu1 %v9237_v56 }
 0x1a8   :  { %1361 = vmatprep.subr.mxu0 %v9238_v57  ;;  %1432 = vmatprep.subr.mxu1 %v9239_v58 }
 0x1a9   :  { %1362 = vmatpush2.msra.mxu0 %v9240_v60  ;;  %1433 = vmatpush2.msra.mxu1 %v9241_v61  ;;  %v9258_v60 = vld [vmem:[#allocation130_spill] sm:$0xff] }
 0x1aa   :  { %1363 = vmatprep.subr.mxu0 %v9242_v62  ;;  %1434 = vmatprep.subr.mxu1 %v9243_v63  ;;  %v9259_v62 = vld [vmem:[#allocation128_spill] sm:$0xff] }
 0x1ab   :  { %1364 = vmatpush2.msra.mxu0 %v9244_v1  ;;  %1435 = vmatpush2.msra.mxu1 %v9245_v2 }
 0x1ac   :  { %1536 = vmatprep.subr.mxu0 %v9246_v3  ;;  %1607 = vmatprep.subr.mxu1 %v9247_v4 }
 0x20a   :  { %v834_v11 = vpop.f32.mrf.mxu0  ;;  %v905_v16 = vpop.f32.mrf.mxu1 }
 0x20b   :  { %v835_v12 = vadd.f32 %v834_v11, %v6038_v8  ;;  %v906_v26 = vadd.f32 %v905_v16, %v6053_v23 }
 0x20c   :  { %v836_v13 = vpop.f32.mrf.mxu0  ;;  %v907_v20 = vpop.f32.mrf.mxu1 }
 0x20d   :  { %v4707_v14 = vmul.f32 -1.442695, %v835_v12  ;;  %v837_v15 = vadd.f32 %v836_v13, %v6042_v10  ;;  %v908_v21 = vadd.f32 %v907_v20, %v6048_v19 }
 0x20f   :  { %4778 = vpow2.f32 %v4707_v14  ;;  %v4708_v17 = vmul.f32 -1.442695, %v837_v15  ;;  %v4709_v24 = vmul.f32 -1.442695, %v908_v21 }
 0x211   :  { %4780 = vpow2.f32 %v4708_v17 }
 0x212   :  { %4782 = vpow2.f32 %v4709_v24 }
 0x21c   :  { %v4779_v25 = vpop.eup %4778 }
 0x21d   :  { %v913_v27 = vadd.f32 1.0, %v4779_v25  ;;  %v9261_v25 = vld [vmem:[#allocation156_spill] sm:$0xff] }
 0x21e   :  { %v4781_v28 = vpop.eup %4780 }
 0x21f   :  { %4784 = vrcp.f32 %v913_v27  ;;  %v919_v42 = vadd.f32 1.0, %v4781_v28  ;;  %v4783_v47 = vpop.eup %4782  ;;  %v9272_v27 = vld [vmem:[#allocation167_spill] sm:$0xff]  ;;  %v9273_v28 = vld [vmem:[#allocation168_spill] sm:$0xff] }
 0x220   :  { %4786 = vtanh.f32 %v906_v26  ;;  %v926_v0 = vadd.f32 1.0, %v4783_v47  ;;  %v9271_v26 = vld [vmem:[#allocation166_spill] sm:$0xff]  ;;  %v6095_v47 = vld [vmem:[#allocation3 + $0x100] sm:$0xff] }
 0x221   :  { %4788 = vrcp.f32 %v919_v42  ;;  %v9274_v42 = vld [vmem:[#allocation169_spill] sm:$0xff] }
 0x22b   :  { %v1069_v29 = vpop.f32.mrf.mxu0  ;;  %v1140_v55 = vpop.f32.mrf.mxu1 }
 0x22c   :  { %v4785_v35 = vpop.eup %4784  ;;  %v1145_v44 = vadd.f32 %v1069_v29, %v9256_v34  ;;  %v1147_v63 = vadd.f32 %v1140_v55, %v9259_v62  ;;  %v6097_v29 = vld [vmem:[#allocation3 + $0x110] sm:$0xff]  ;;  %v6101_v34 = vld [vmem:[#allocation3 + $0xe8] sm:$0xff]  ;;  %v6143_v55 = vld [vmem:[#allocation3 + $0x80] sm:$0xff] }
 0x22d   :  { %v4787_v43 = vpop.eup %4786  ;;  %v1071_v32 = vpop.f32.mrf.mxu0  ;;  %v6157_v62 = vld [vmem:[#allocation3 + $0x70] sm:$0xff] }
 0x22e   :  { %v4789_v40 = vpop.eup %4788  ;;  %v4710_v49 = vmul.f32 -1.442695, %v1145_v44  ;;  %v1146_v52 = vadd.f32 %v1071_v32, %v9257_v51  ;;  %v930_v54 = vmul.f32 %v4787_v43, %v4785_v35  ;;  %v1142_v58 = vpop.f32.mrf.mxu1  ;;  %v9275_v35 = vld [vmem:[#allocation170_spill] sm:$0xff]  ;;  %v6103_v44 = vld [vmem:[#allocation3 + $0xf8] sm:$0xff]  ;;  %v6107_v43 = vld [vmem:[#allocation3 + $0xe0] sm:$0xff] }
 0x22f   :  { %v929_v53 = vmul.f32 0.0, %v4789_v40  ;;  %v1148_v61 = vadd.f32 %v1142_v58, %v9258_v60  ;;  %v6113_v32 = vld [vmem:[#allocation3 + $0xc8] sm:$0xff]  ;;  %v6115_v40 = vld [vmem:[#allocation3 + $0xd8] sm:$0xff]  ;;  %v6131_v51 = vld [vmem:[#allocation3 + $0xa0] sm:$0xff] }
 0x230   :  { %4790 = vpow2.f32 %v4710_v49  ;;  %v4711_v56 = vmul.f32 -1.442695, %v1146_v52  ;;  %v6127_v49 = vld [vmem:[#allocation3 + $0xb8] sm:$0xff]  ;;  %v6133_v52 = vld [vmem:[#allocation3 + $0xb0] sm:$0xff]  ;;  %v6149_v58 = vld [vmem:[#allocation3 + $0x68] sm:$0xff] }
 0x231   :  { %v6058_v57 = vadd.f32 %v930_v54, %v929_v53  ;;  %4792 = vrcp.f32 %v926_v0  ;;  %v4712_v1 = vmul.f32 -1.442695, %v1148_v61  ;;  %v6109_v0 = vld [vmem:[#allocation3 + $0xf0] sm:$0xff]  ;;  %v6137_v53 = vld [vmem:[#allocation3 + $0x88] sm:$0xff]  ;;  %v6139_v54 = vld [vmem:[#allocation3 + $0x98] sm:$0xff] }
 0x232   :  { %4794 = vpow2.f32 %v4711_v56  ;;  %v6145_v56 = vld [vmem:[#allocation3 + $0x90] sm:$0xff]  ;;  %v6151_v60 = vld [vmem:[#allocation3 + $0x78] sm:$0xff]  ;;  %v6155_v61 = vld [vmem:[#allocation3 + $0x60] sm:$0xff] }
 0x233   :  { %4796 = vtanh.f32 %v6058_v57 }
 0x234   :  { %4798 = vtanh.f32 %v1147_v63  ;;  %v6161_v63 = vld [vmem:[#allocation3 + $0x48] sm:$0xff] }
 0x235   :  { %4800 = vpow2.f32 %v4712_v1  ;;  %v6163_v1 = vld [vmem:[#allocation3 + $0x58] sm:$0xff] }
 0x23d   :  { %v4791_v2 = vpop.eup %4790 }
 0x23e   :  { %v4793_v3 = vpop.eup %4792  ;;  %v1152_v4 = vadd.f32 1.0, %v4791_v2  ;;  %v6167_v2 = vld [vmem:[#allocation3 + $0x40] sm:$0xff] }
 0x23f   :  { %v4795_v6 = vpop.eup %4794 }
 0x240   :  { %v4797_v7 = vpop.eup %4796  ;;  %4802 = vrcp.f32 %v1152_v4  ;;  %v1158_v9 = vadd.f32 1.0, %v4795_v6  ;;  %v6173_v4 = vld [vmem:[#allocation3 + $0x28] sm:$0xff]  ;;  %v6175_v6 = vld [vmem:[#allocation3 + $0x38] sm:$0xff] }
 0x241   :  { %v933_v11 = vmul.f32 %v4797_v7, %v4793_v3  ;;  %v4799_v12 = vpop.eup %4798  ;;  %v6169_v3 = vld [vmem:[#allocation3 + $0x50] sm:$0xff]  ;;  %v6179_v7 = vld [vmem:[#allocation3 + $0x20] sm:$0xff] }
 0x242   :  { %4804 = vrcp.f32 %v1158_v9  ;;  %v4801_v13 = vpop.eup %4800  ;;  %v6181_v9 = vld [vmem:[#allocation3 + $0x30] sm:$0xff] }
 0x243   :  { %934 = vst [vmem:[#allocation8] sm:$0xff] %v933_v11  ;;  %1365 = vmatprep.mubr.f32.mxu0 %v933_v11  ;;  %1436 = vmatprep.mubr.f32.mxu1 %v933_v11  ;;  %v1165_v17 = vadd.f32 1.0, %v4801_v13  ;;  %v6185_v11 = vld [vmem:[#allocation3 + $0x8] sm:$0xff]  ;;  %v6191_v13 = vld [vmem:[#allocation3] sm:$0xff] }
 0x245   :  { %4806 = vrcp.f32 %v1165_v17  ;;  %v6211_v17 = vld [vmem:[#allocation6 + $0x1e0] sm:$0xff] }
 0x24d   :  { %v4803_v14 = vpop.eup %4802 }
 0x24e   :  { %v1169_v15 = vmul.f32 %v4803_v14, %v4799_v12  ;;  %v6187_v12 = vld [vmem:[#allocation3 + $0x18] sm:$0xff]  ;;  %v6195_v14 = vld [vmem:[#allocation3 + $0x10] sm:$0xff] }
 0x24f   :  { %v4805_v16 = vpop.eup %4804 }
 0x250   :  { %v1168_v18 = vmul.f32 %v4805_v16, %v5782_v5  ;;  %v9260_v5 = vld [vmem:[#allocation155_spill] sm:$0xff] }
 0x251   :  { %v6207_v16 = vld [vmem:[#allocation6 + $0x1f8] sm:$0xff] }
 0x252   :  { %v6064_v20 = vadd.f32 %v1169_v15, %v1168_v18  ;;  %v4807_v21 = vpop.eup %4806  ;;  %v6205_v15 = vld [vmem:[#allocation6 + $0x1e8] sm:$0xff]  ;;  %v6213_v18 = vld [vmem:[#allocation6 + $0x1f0] sm:$0xff] }
 0x254   :  { %4808 = vtanh.f32 %v6064_v20 }
 0x261   :  { %v4809_v22 = vpop.eup %4808 }
 0x262   :  { %v6067_v24 = vmul.f32 %v4809_v22, %v4807_v21  ;;  %v6217_v21 = vld [vmem:[#allocation6 + $0x1c8] sm:$0xff]  ;;  %v6219_v22 = vld [vmem:[#allocation6 + $0x1d8] sm:$0xff] }
 0x264   :  { %1366 = vmatmul.mubr.f32.vlgmr.msra.gmra.mxu0 %v6067_v24  ;;  %1437 = vmatmul.mubr.f32.vlgmr.msra.gmra.mxu1 %v6067_v24 }
 0x265   :  { %1537 = vmatpush1.msra.mxu0 %v5787_v45  ;;  %1608 = vmatpush1.msra.mxu1 %v5789_v38  ;;  %v9262_v45 = vld [vmem:[#allocation157_spill] sm:$0xff]  ;;  %v9263_v38 = vld [vmem:[#allocation158_spill] sm:$0xff] }
 0x266   :  { %1538 = vmatprep.subr.mxu0 %v5791_v31  ;;  %1609 = vmatprep.subr.mxu1 %v5793_v30  ;;  %v9264_v31 = vld [vmem:[#allocation159_spill] sm:$0xff]  ;;  %v9265_v30 = vld [vmem:[#allocation160_spill] sm:$0xff] }
 0x267   :  { %1539 = vmatpush1.msra.mxu0 %v5797_v50  ;;  %1610 = vmatpush1.msra.mxu1 %v5799_v39  ;;  %v9266_v50 = vld [vmem:[#allocation161_spill] sm:$0xff]  ;;  %v9267_v39 = vld [vmem:[#allocation162_spill] sm:$0xff] }
 0x268   :  { %1540 = vmatprep.subr.mxu0 %v5803_v41  ;;  %1611 = vmatprep.subr.mxu1 %v5805_v46  ;;  %v9268_v41 = vld [vmem:[#allocation163_spill] sm:$0xff]  ;;  %v9269_v46 = vld [vmem:[#allocation164_spill] sm:$0xff] }
 0x269   :  { %1541 = vmatpush1.msra.mxu0 %v5809_v37  ;;  %1612 = vmatpush1.msra.mxu1 %v9260_v5  ;;  %v9270_v37 = vld [vmem:[#allocation165_spill] sm:$0xff]  ;;  %v6225_v5 = vld [vmem:[#allocation6 + $0x1d0] sm:$0xff] }
 0x26a   :  { %1542 = vmatprep.subr.mxu0 %v9261_v25  ;;  %1613 = vmatprep.subr.mxu1 %v9262_v45  ;;  %9276 = vst [vmem:[#allocation16_spill] sm:$0xff] %v6225_v5  ;;  %v6229_v25 = vld [vmem:[#allocation6 + $0x1a8] sm:$0xff]  ;;  %v6231_v45 = vld [vmem:[#allocation6 + $0x1b8] sm:$0xff] }
 0x26b   :  { %1543 = vmatpush1.msra.mxu0 %v9263_v38  ;;  %1614 = vmatpush1.msra.mxu1 %v9264_v31  ;;  %9277 = vst [vmem:[#allocation17_spill] sm:$0xff] %v6229_v25  ;;  %9278 = vst [vmem:[#allocation18_spill] sm:$0xff] %v6231_v45  ;;  %v6235_v38 = vld [vmem:[#allocation6 + $0x1a0] sm:$0xff]  ;;  %v6237_v31 = vld [vmem:[#allocation6 + $0x1b0] sm:$0xff] }
 0x26c   :  { %1544 = vmatprep.subr.mxu0 %v9265_v30  ;;  %1615 = vmatprep.subr.mxu1 %v9266_v50  ;;  %9279 = vst [vmem:[#allocation19_spill] sm:$0xff] %v6235_v38  ;;  %9280 = vst [vmem:[#allocation20_spill] sm:$0xff] %v6237_v31  ;;  %v6241_v30 = vld [vmem:[#allocation6 + $0x188] sm:$0xff]  ;;  %v6243_v50 = vld [vmem:[#allocation6 + $0x198] sm:$0xff] }
 0x26d   :  { %1545 = vmatpush1.msra.mxu0 %v9267_v39  ;;  %1616 = vmatpush1.msra.mxu1 %v9268_v41  ;;  %9281 = vst [vmem:[#allocation21_spill] sm:$0xff] %v6241_v30  ;;  %9282 = vst [vmem:[#allocation22_spill] sm:$0xff] %v6243_v50  ;;  %v6247_v39 = vld [vmem:[#allocation6 + $0x180] sm:$0xff]  ;;  %v6249_v41 = vld [vmem:[#allocation6 + $0x190] sm:$0xff] }
 0x26e   :  { %1546 = vmatprep.subr.mxu0 %v9269_v46  ;;  %1617 = vmatprep.subr.mxu1 %v9270_v37  ;;  %9283 = vst [vmem:[#allocation23_spill] sm:$0xff] %v6247_v39  ;;  %9284 = vst [vmem:[#allocation24_spill] sm:$0xff] %v6249_v41  ;;  %v6253_v46 = vld [vmem:[#allocation6 + $0x168] sm:$0xff]  ;;  %v6255_v37 = vld [vmem:[#allocation6 + $0x178] sm:$0xff] }
 0x26f   :  { %1547 = vmatpush1.msra.mxu0 %v9271_v26  ;;  %1618 = vmatpush1.msra.mxu1 %v9272_v27  ;;  %9285 = vst [vmem:[#allocation25_spill] sm:$0xff] %v6253_v46  ;;  %9286 = vst [vmem:[#allocation26_spill] sm:$0xff] %v6255_v37  ;;  %v6259_v26 = vld [vmem:[#allocation6 + $0x160] sm:$0xff]  ;;  %v6261_v27 = vld [vmem:[#allocation6 + $0x170] sm:$0xff] }
 0x270   :  { %1548 = vmatprep.subr.mxu0 %v9273_v28  ;;  %1619 = vmatprep.subr.mxu1 %v9274_v42  ;;  %9287 = vst [vmem:[#allocation27_spill] sm:$0xff] %v6259_v26  ;;  %9288 = vst [vmem:[#allocation28_spill] sm:$0xff] %v6261_v27  ;;  %v6265_v28 = vld [vmem:[#allocation6 + $0x148] sm:$0xff]  ;;  %v6267_v42 = vld [vmem:[#allocation6 + $0x158] sm:$0xff] }
 0x271   :  { %1549 = vmatpush1.msra.mxu0 %v9275_v35  ;;  %1620 = vmatpush1.msra.mxu1 %v5859_v33  ;;  %v6119_v33 = vld [vmem:[#allocation3 + $0xc0] sm:$0xff]  ;;  %9289 = vst [vmem:[#allocation29_spill] sm:$0xff] %v6265_v28  ;;  %9290 = vst [vmem:[#allocation30_spill] sm:$0xff] %v6267_v42 }
 0x272   :  { %1550 = vmatprep.subr.mxu0 %v5863_v59  ;;  %1621 = vmatprep.subr.mxu1 %v5865_v36  ;;  %v6121_v59 = vld [vmem:[#allocation3 + $0xd0] sm:$0xff]  ;;  %v6125_v36 = vld [vmem:[#allocation3 + $0xa8] sm:$0xff]  ;;  %v6271_v35 = vld [vmem:[#allocation6 + $0x140] sm:$0xff] }
 0x273   :  { %1551 = vmatpush1.msra.mxu0 %v6095_v47  ;;  %1622 = vmatpush1.msra.mxu1 %v6097_v29  ;;  %9291 = vst [vmem:[#allocation31_spill] sm:$0xff] %v6271_v35 }
 0x274   :  { %1552 = vmatprep.subr.mxu0 %v6101_v34  ;;  %1623 = vmatprep.subr.mxu1 %v6103_v44 }
 0x275   :  { %1553 = vmatpush1.msra.mxu0 %v6107_v43  ;;  %1624 = vmatpush1.msra.mxu1 %v6109_v0 }
 0x276   :  { %1554 = vmatprep.subr.mxu0 %v6113_v32  ;;  %1625 = vmatprep.subr.mxu1 %v6115_v40 }
 0x277   :  { %1555 = vmatpush1.msra.mxu0 %v6119_v33  ;;  %1626 = vmatpush1.msra.mxu1 %v6121_v59 }
 0x278   :  { %1556 = vmatprep.subr.mxu0 %v6125_v36  ;;  %1627 = vmatprep.subr.mxu1 %v6127_v49 }
 0x279   :  { %1557 = vmatpush1.msra.mxu0 %v6131_v51  ;;  %1628 = vmatpush1.msra.mxu1 %v6133_v52 }
 0x27a   :  { %1558 = vmatprep.subr.mxu0 %v6137_v53  ;;  %1629 = vmatprep.subr.mxu1 %v6139_v54 }
 0x27b   :  { %1559 = vmatpush1.msra.mxu0 %v6143_v55  ;;  %1630 = vmatpush1.msra.mxu1 %v6145_v56 }
 0x27c   :  { %1560 = vmatprep.subr.mxu0 %v6149_v58  ;;  %1631 = vmatprep.subr.mxu1 %v6151_v60 }
 0x27d   :  { %1561 = vmatpush1.msra.mxu0 %v6155_v61  ;;  %1632 = vmatpush1.msra.mxu1 %v6157_v62 }
 0x27e   :  { %1562 = vmatprep.subr.mxu0 %v6161_v63  ;;  %1633 = vmatprep.subr.mxu1 %v6163_v1 }
 0x27f   :  { %1563 = vmatpush1.msra.mxu0 %v6167_v2  ;;  %1634 = vmatpush1.msra.mxu1 %v6169_v3 }
 0x280   :  { %1564 = vmatprep.subr.mxu0 %v6173_v4  ;;  %1635 = vmatprep.subr.mxu1 %v6175_v6 }
 0x281   :  { %1565 = vmatpush1.msra.mxu0 %v6179_v7  ;;  %1636 = vmatpush1.msra.mxu1 %v6181_v9 }
 0x282   :  { %1566 = vmatprep.subr.mxu0 %v6185_v11  ;;  %1637 = vmatprep.subr.mxu1 %v6187_v12 }
 0x283   :  { %1567 = vmatpush1.msra.mxu0 %v6191_v13  ;;  %1600 = vmatprep.mubr.f32.mxu0 %v9132_v48 }
 0x284   :  { %1638 = vmatpush1.msra.mxu1 %v6195_v14  ;;  %1671 = vmatprep.mubr.f32.mxu1 %v9132_v48 }
 0x285   :  { %1601 = vmatmul.mubr.f32.vlgmr.msra.gmra.mxu0 %v6067_v24  ;;  %1672 = vmatmul.mubr.f32.vlgmr.msra.gmra.mxu1 %v6067_v24  ;;  %v6223_v24 = vld [vmem:[#allocation6 + $0x1c0] sm:$0xff] }
 0x286   :  { %1834 = vmatprep.subr.mxu0 %v6205_v15  ;;  %1905 = vmatprep.subr.mxu1 %v6207_v16 }
 0x287   :  { %1835 = vmatpush1.msra.mxu0 %v6211_v17  ;;  %1906 = vmatpush1.msra.mxu1 %v6213_v18 }
 0x288   :  { %1836 = vmatprep.subr.mxu0 %v6217_v21  ;;  %1907 = vmatprep.subr.mxu1 %v6219_v22 }
 0x289   :  { %1837 = vmatpush1.msra.mxu0 %v6223_v24  ;;  %1908 = vmatpush1.msra.mxu1 %v6225_v5 }
 0x28a   :  { %1838 = vmatprep.subr.mxu0 %v6229_v25  ;;  %1909 = vmatprep.subr.mxu1 %v6231_v45 }
 0x28b   :  { %1839 = vmatpush1.msra.mxu0 %v6235_v38  ;;  %1910 = vmatpush1.msra.mxu1 %v6237_v31 }
 0x28c   :  { %1840 = vmatprep.subr.mxu0 %v6241_v30  ;;  %1911 = vmatprep.subr.mxu1 %v6243_v50  ;;  %v6515_v50 = vld [vmem:[#allocation6 + $0x2b8] sm:$0xff]  ;;  %v6531_v30 = vld [vmem:[#allocation6 + $0x280] sm:$0xff] }
 0x28d   :  { %1841 = vmatpush1.msra.mxu0 %v6247_v39  ;;  %1912 = vmatpush1.msra.mxu1 %v6249_v41  ;;  %v6499_v41 = vld [vmem:[#allocation6 + $0x2f0] sm:$0xff]  ;;  %v6507_v39 = vld [vmem:[#allocation6 + $0x2c0] sm:$0xff]  ;;  %9374 = vst [vmem:[#allocation114_spill] sm:$0xff] %v6515_v50  ;;  %9379 = vst [vmem:[#allocation119_spill] sm:$0xff] %v6531_v30 }
 0x28e   :  { %1842 = vmatprep.subr.mxu0 %v6253_v46  ;;  %1913 = vmatprep.subr.mxu1 %v6255_v37  ;;  %v6273_v46 = vld [vmem:[#allocation6 + $0x150] sm:$0xff]  ;;  %v6277_v37 = vld [vmem:[#allocation6 + $0x128] sm:$0xff]  ;;  %9368 = vst [vmem:[#allocation108_spill] sm:$0xff] %v6499_v41  ;;  %9371 = vst [vmem:[#allocation111_spill] sm:$0xff] %v6507_v39 }
 0x28f   :  { %1843 = vmatpush1.msra.mxu0 %v6259_v26  ;;  %1914 = vmatpush1.msra.mxu1 %v6261_v27  ;;  %9292 = vst [vmem:[#allocation32_spill] sm:$0xff] %v6273_v46  ;;  %9293 = vst [vmem:[#allocation33_spill] sm:$0xff] %v6277_v37  ;;  %v6279_v26 = vld [vmem:[#allocation6 + $0x138] sm:$0xff]  ;;  %v6283_v27 = vld [vmem:[#allocation6 + $0x120] sm:$0xff] }
 0x290   :  { %1844 = vmatprep.subr.mxu0 %v6265_v28  ;;  %1915 = vmatprep.subr.mxu1 %v6267_v42  ;;  %9294 = vst [vmem:[#allocation34_spill] sm:$0xff] %v6279_v26  ;;  %9295 = vst [vmem:[#allocation35_spill] sm:$0xff] %v6283_v27  ;;  %v6285_v28 = vld [vmem:[#allocation6 + $0x130] sm:$0xff]  ;;  %v6289_v42 = vld [vmem:[#allocation6 + $0x108] sm:$0xff] }
 0x291   :  { %1845 = vmatpush1.msra.mxu0 %v6271_v35  ;;  %1916 = vmatpush1.msra.mxu1 %v6273_v46  ;;  %9296 = vst [vmem:[#allocation36_spill] sm:$0xff] %v6285_v28  ;;  %9297 = vst [vmem:[#allocation37_spill] sm:$0xff] %v6289_v42  ;;  %v6291_v35 = vld [vmem:[#allocation6 + $0x118] sm:$0xff]  ;;  %v6295_v46 = vld [vmem:[#allocation6 + $0x100] sm:$0xff] }
 0x292   :  { %1846 = vmatprep.subr.mxu0 %v6277_v37  ;;  %1917 = vmatprep.subr.mxu1 %v6279_v26  ;;  %9298 = vst [vmem:[#allocation38_spill] sm:$0xff] %v6291_v35  ;;  %9299 = vst [vmem:[#allocation39_spill] sm:$0xff] %v6295_v46  ;;  %v6297_v37 = vld [vmem:[#allocation6 + $0x110] sm:$0xff]  ;;  %v6301_v26 = vld [vmem:[#allocation6 + $0xe8] sm:$0xff] }
 0x293   :  { %1847 = vmatpush1.msra.mxu0 %v6283_v27  ;;  %1918 = vmatpush1.msra.mxu1 %v6285_v28  ;;  %9300 = vst [vmem:[#allocation40_spill] sm:$0xff] %v6297_v37  ;;  %9301 = vst [vmem:[#allocation41_spill] sm:$0xff] %v6301_v26  ;;  %v6303_v27 = vld [vmem:[#allocation6 + $0xf8] sm:$0xff]  ;;  %v6307_v28 = vld [vmem:[#allocation6 + $0xe0] sm:$0xff] }
 0x294   :  { %1848 = vmatprep.subr.mxu0 %v6289_v42  ;;  %1919 = vmatprep.subr.mxu1 %v6291_v35  ;;  %9302 = vst [vmem:[#allocation42_spill] sm:$0xff] %v6303_v27  ;;  %9303 = vst [vmem:[#allocation43_spill] sm:$0xff] %v6307_v28  ;;  %v6309_v42 = vld [vmem:[#allocation6 + $0xf0] sm:$0xff]  ;;  %v6313_v35 = vld [vmem:[#allocation6 + $0xc8] sm:$0xff] }
 0x295   :  { %1849 = vmatpush1.msra.mxu0 %v6295_v46  ;;  %1920 = vmatpush1.msra.mxu1 %v6297_v37  ;;  %9304 = vst [vmem:[#allocation44_spill] sm:$0xff] %v6309_v42  ;;  %9305 = vst [vmem:[#allocation45_spill] sm:$0xff] %v6313_v35  ;;  %v6315_v46 = vld [vmem:[#allocation6 + $0xd8] sm:$0xff]  ;;  %v6319_v37 = vld [vmem:[#allocation6 + $0xc0] sm:$0xff] }
 0x296   :  { %1850 = vmatprep.subr.mxu0 %v6301_v26  ;;  %1921 = vmatprep.subr.mxu1 %v6303_v27  ;;  %9306 = vst [vmem:[#allocation46_spill] sm:$0xff] %v6315_v46  ;;  %9307 = vst [vmem:[#allocation47_spill] sm:$0xff] %v6319_v37  ;;  %v6321_v26 = vld [vmem:[#allocation6 + $0xd0] sm:$0xff]  ;;  %v6325_v27 = vld [vmem:[#allocation6 + $0xa8] sm:$0xff] }
 0x297   :  { %1851 = vmatpush1.msra.mxu0 %v6307_v28  ;;  %1922 = vmatpush1.msra.mxu1 %v6309_v42  ;;  %9308 = vst [vmem:[#allocation48_spill] sm:$0xff] %v6321_v26  ;;  %9309 = vst [vmem:[#allocation49_spill] sm:$0xff] %v6325_v27  ;;  %v6327_v28 = vld [vmem:[#allocation6 + $0xb8] sm:$0xff]  ;;  %v6331_v42 = vld [vmem:[#allocation6 + $0xa0] sm:$0xff] }
 0x298   :  { %1852 = vmatprep.subr.mxu0 %v6313_v35  ;;  %1923 = vmatprep.subr.mxu1 %v6315_v46  ;;  %9310 = vst [vmem:[#allocation50_spill] sm:$0xff] %v6327_v28  ;;  %9311 = vst [vmem:[#allocation51_spill] sm:$0xff] %v6331_v42  ;;  %v6333_v35 = vld [vmem:[#allocation6 + $0xb0] sm:$0xff]  ;;  %v6337_v46 = vld [vmem:[#allocation6 + $0x88] sm:$0xff] }
 0x299   :  { %1853 = vmatpush1.msra.mxu0 %v6319_v37  ;;  %1924 = vmatpush1.msra.mxu1 %v6321_v26  ;;  %9312 = vst [vmem:[#allocation52_spill] sm:$0xff] %v6333_v35  ;;  %9313 = vst [vmem:[#allocation53_spill] sm:$0xff] %v6337_v46  ;;  %v6339_v37 = vld [vmem:[#allocation6 + $0x98] sm:$0xff]  ;;  %v6343_v26 = vld [vmem:[#allocation6 + $0x80] sm:$0xff] }
 0x29a   :  { %1854 = vmatprep.subr.mxu0 %v6325_v27  ;;  %1925 = vmatprep.subr.mxu1 %v6327_v28  ;;  %9314 = vst [vmem:[#allocation54_spill] sm:$0xff] %v6339_v37  ;;  %9315 = vst [vmem:[#allocation55_spill] sm:$0xff] %v6343_v26  ;;  %v6345_v27 = vld [vmem:[#allocation6 + $0x90] sm:$0xff]  ;;  %v6349_v28 = vld [vmem:[#allocation6 + $0x68] sm:$0xff] }
 0x29b   :  { %1855 = vmatpush1.msra.mxu0 %v6331_v42  ;;  %1926 = vmatpush1.msra.mxu1 %v6333_v35  ;;  %9316 = vst [vmem:[#allocation56_spill] sm:$0xff] %v6345_v27  ;;  %9317 = vst [vmem:[#allocation57_spill] sm:$0xff] %v6349_v28  ;;  %v6351_v42 = vld [vmem:[#allocation6 + $0x78] sm:$0xff]  ;;  %v6355_v35 = vld [vmem:[#allocation6 + $0x60] sm:$0xff] }
 0x29c   :  { %1856 = vmatprep.subr.mxu0 %v6337_v46  ;;  %1927 = vmatprep.subr.mxu1 %v6339_v37  ;;  %9318 = vst [vmem:[#allocation58_spill] sm:$0xff] %v6351_v42  ;;  %9319 = vst [vmem:[#allocation59_spill] sm:$0xff] %v6355_v35  ;;  %v6357_v46 = vld [vmem:[#allocation6 + $0x70] sm:$0xff]  ;;  %v6361_v37 = vld [vmem:[#allocation6 + $0x48] sm:$0xff] }
 0x29d   :  { %1857 = vmatpush1.msra.mxu0 %v6343_v26  ;;  %1928 = vmatpush1.msra.mxu1 %v6345_v27  ;;  %9320 = vst [vmem:[#allocation60_spill] sm:$0xff] %v6357_v46  ;;  %9321 = vst [vmem:[#allocation61_spill] sm:$0xff] %v6361_v37  ;;  %v6363_v26 = vld [vmem:[#allocation6 + $0x58] sm:$0xff]  ;;  %v6367_v27 = vld [vmem:[#allocation6 + $0x40] sm:$0xff] }
 0x29e   :  { %1858 = vmatprep.subr.mxu0 %v6349_v28  ;;  %1929 = vmatprep.subr.mxu1 %v6351_v42  ;;  %9322 = vst [vmem:[#allocation62_spill] sm:$0xff] %v6363_v26  ;;  %9323 = vst [vmem:[#allocation63_spill] sm:$0xff] %v6367_v27  ;;  %v6369_v28 = vld [vmem:[#allocation6 + $0x50] sm:$0xff]  ;;  %v6373_v42 = vld [vmem:[#allocation6 + $0x28] sm:$0xff] }
 0x29f   :  { %1859 = vmatpush1.msra.mxu0 %v6355_v35  ;;  %1930 = vmatpush1.msra.mxu1 %v6357_v46  ;;  %9324 = vst [vmem:[#allocation64_spill] sm:$0xff] %v6369_v28  ;;  %9325 = vst [vmem:[#allocation65_spill] sm:$0xff] %v6373_v42  ;;  %v6375_v35 = vld [vmem:[#allocation6 + $0x38] sm:$0xff]  ;;  %v6379_v46 = vld [vmem:[#allocation6 + $0x20] sm:$0xff] }
 0x2a0   :  { %1860 = vmatprep.subr.mxu0 %v6361_v37  ;;  %1931 = vmatprep.subr.mxu1 %v6363_v26  ;;  %9326 = vst [vmem:[#allocation66_spill] sm:$0xff] %v6375_v35  ;;  %9327 = vst [vmem:[#allocation67_spill] sm:$0xff] %v6379_v46  ;;  %v6381_v37 = vld [vmem:[#allocation6 + $0x30] sm:$0xff]  ;;  %v6385_v26 = vld [vmem:[#allocation6 + $0x8] sm:$0xff] }
 0x2a1   :  { %1861 = vmatpush1.msra.mxu0 %v6367_v27  ;;  %1932 = vmatpush1.msra.mxu1 %v6369_v28  ;;  %9328 = vst [vmem:[#allocation68_spill] sm:$0xff] %v6381_v37  ;;  %9329 = vst [vmem:[#allocation69_spill] sm:$0xff] %v6385_v26  ;;  %v6387_v27 = vld [vmem:[#allocation6 + $0x18] sm:$0xff]  ;;  %v6391_v28 = vld [vmem:[#allocation6] sm:$0xff] }
 0x2a2   :  { %1862 = vmatprep.subr.mxu0 %v6373_v42  ;;  %1933 = vmatprep.subr.mxu1 %v6375_v35  ;;  %9330 = vst [vmem:[#allocation70_spill] sm:$0xff] %v6387_v27  ;;  %9331 = vst [vmem:[#allocation71_spill] sm:$0xff] %v6391_v28  ;;  %v6393_v42 = vld [vmem:[#allocation6 + $0x10] sm:$0xff]  ;;  %v6397_v35 = vld [vmem:[#allocation6 + $0x3e8] sm:$0xff] }
 0x2a3   :  { %1863 = vmatpush1.msra.mxu0 %v6379_v46  ;;  %1934 = vmatpush1.msra.mxu1 %v6381_v37  ;;  %9332 = vst [vmem:[#allocation72_spill] sm:$0xff] %v6393_v42  ;;  %9333 = vst [vmem:[#allocation73_spill] sm:$0xff] %v6397_v35  ;;  %v6399_v46 = vld [vmem:[#allocation6 + $0x3f8] sm:$0xff]  ;;  %v6403_v37 = vld [vmem:[#allocation6 + $0x3e0] sm:$0xff] }
 0x2a4   :  { %1864 = vmatprep.subr.mxu0 %v6385_v26  ;;  %1935 = vmatprep.subr.mxu1 %v6387_v27  ;;  %9334 = vst [vmem:[#allocation74_spill] sm:$0xff] %v6399_v46  ;;  %9335 = vst [vmem:[#allocation75_spill] sm:$0xff] %v6403_v37  ;;  %v6405_v26 = vld [vmem:[#allocation6 + $0x3f0] sm:$0xff]  ;;  %v6409_v27 = vld [vmem:[#allocation6 + $0x3c8] sm:$0xff] }
 0x2a5   :  { %1865 = vmatpush1.msra.mxu0 %v6391_v28  ;;  %1936 = vmatpush1.msra.mxu1 %v6393_v42  ;;  %9336 = vst [vmem:[#allocation76_spill] sm:$0xff] %v6405_v26  ;;  %9337 = vst [vmem:[#allocation77_spill] sm:$0xff] %v6409_v27  ;;  %v6411_v28 = vld [vmem:[#allocation6 + $0x3d8] sm:$0xff]  ;;  %v6415_v42 = vld [vmem:[#allocation6 + $0x3c0] sm:$0xff] }
 0x2a6   :  { %1866 = vmatprep.subr.mxu0 %v6397_v35  ;;  %1937 = vmatprep.subr.mxu1 %v6399_v46  ;;  %9338 = vst [vmem:[#allocation78_spill] sm:$0xff] %v6411_v28  ;;  %9339 = vst [vmem:[#allocation79_spill] sm:$0xff] %v6415_v42  ;;  %v6417_v35 = vld [vmem:[#allocation6 + $0x3d0] sm:$0xff]  ;;  %v6421_v46 = vld [vmem:[#allocation6 + $0x3a8] sm:$0xff] }
 0x2a7   :  { %1867 = vmatpush2.msra.mxu0 %v6403_v37  ;;  %1938 = vmatpush2.msra.mxu1 %v6405_v26  ;;  %9340 = vst [vmem:[#allocation80_spill] sm:$0xff] %v6417_v35  ;;  %9341 = vst [vmem:[#allocation81_spill] sm:$0xff] %v6421_v46  ;;  %v6423_v37 = vld [vmem:[#allocation6 + $0x3b8] sm:$0xff]  ;;  %v6427_v26 = vld [vmem:[#allocation6 + $0x3a0] sm:$0xff] }
 0x2a8   :  { %1868 = vmatprep.subr.mxu0 %v6409_v27  ;;  %1939 = vmatprep.subr.mxu1 %v6411_v28  ;;  %9342 = vst [vmem:[#allocation82_spill] sm:$0xff] %v6423_v37  ;;  %9343 = vst [vmem:[#allocation83_spill] sm:$0xff] %v6427_v26  ;;  %v6429_v27 = vld [vmem:[#allocation6 + $0x3b0] sm:$0xff]  ;;  %v6433_v28 = vld [vmem:[#allocation6 + $0x388] sm:$0xff] }
 0x2a9   :  { %1869 = vmatpush2.msra.mxu0 %v6415_v42  ;;  %1940 = vmatpush2.msra.mxu1 %v6417_v35  ;;  %9344 = vst [vmem:[#allocation84_spill] sm:$0xff] %v6429_v27  ;;  %9345 = vst [vmem:[#allocation85_spill] sm:$0xff] %v6433_v28  ;;  %v6435_v42 = vld [vmem:[#allocation6 + $0x398] sm:$0xff]  ;;  %v6439_v35 = vld [vmem:[#allocation6 + $0x380] sm:$0xff] }
 0x2aa   :  { %1870 = vmatprep.subr.mxu0 %v6421_v46  ;;  %1941 = vmatprep.subr.mxu1 %v6423_v37  ;;  %9346 = vst [vmem:[#allocation86_spill] sm:$0xff] %v6435_v42  ;;  %9347 = vst [vmem:[#allocation87_spill] sm:$0xff] %v6439_v35  ;;  %v6441_v46 = vld [vmem:[#allocation6 + $0x390] sm:$0xff]  ;;  %v6445_v37 = vld [vmem:[#allocation6 + $0x368] sm:$0xff] }
 0x2ab   :  { %1871 = vmatpush2.msra.mxu0 %v6427_v26  ;;  %1942 = vmatpush2.msra.mxu1 %v6429_v27  ;;  %9348 = vst [vmem:[#allocation88_spill] sm:$0xff] %v6441_v46  ;;  %9349 = vst [vmem:[#allocation89_spill] sm:$0xff] %v6445_v37  ;;  %v6447_v26 = vld [vmem:[#allocation6 + $0x378] sm:$0xff]  ;;  %v6451_v27 = vld [vmem:[#allocation6 + $0x360] sm:$0xff] }
 0x2ac   :  { %1872 = vmatprep.subr.mxu0 %v6433_v28  ;;  %1943 = vmatprep.subr.mxu1 %v6435_v42  ;;  %9350 = vst [vmem:[#allocation90_spill] sm:$0xff] %v6447_v26  ;;  %9351 = vst [vmem:[#allocation91_spill] sm:$0xff] %v6451_v27  ;;  %v6453_v28 = vld [vmem:[#allocation6 + $0x370] sm:$0xff]  ;;  %v6457_v42 = vld [vmem:[#allocation6 + $0x348] sm:$0xff] }
 0x2ad   :  { %1873 = vmatpush2.msra.mxu0 %v6439_v35  ;;  %1944 = vmatpush2.msra.mxu1 %v6441_v46  ;;  %9352 = vst [vmem:[#allocation92_spill] sm:$0xff] %v6453_v28  ;;  %9353 = vst [vmem:[#allocation93_spill] sm:$0xff] %v6457_v42  ;;  %v6459_v35 = vld [vmem:[#allocation6 + $0x358] sm:$0xff]  ;;  %v6463_v46 = vld [vmem:[#allocation6 + $0x340] sm:$0xff] }
 0x2ae   :  { %1874 = vmatprep.subr.mxu0 %v6445_v37  ;;  %1945 = vmatprep.subr.mxu1 %v6447_v26  ;;  %9354 = vst [vmem:[#allocation94_spill] sm:$0xff] %v6459_v35  ;;  %9355 = vst [vmem:[#allocation95_spill] sm:$0xff] %v6463_v46  ;;  %v6465_v37 = vld [vmem:[#allocation6 + $0x350] sm:$0xff]  ;;  %v6469_v26 = vld [vmem:[#allocation6 + $0x328] sm:$0xff] }
 0x2af   :  { %1875 = vmatpush2.msra.mxu0 %v6451_v27  ;;  %1946 = vmatpush2.msra.mxu1 %v6453_v28  ;;  %9356 = vst [vmem:[#allocation96_spill] sm:$0xff] %v6465_v37  ;;  %9357 = vst [vmem:[#allocation97_spill] sm:$0xff] %v6469_v26  ;;  %v6471_v27 = vld [vmem:[#allocation6 + $0x338] sm:$0xff]  ;;  %v6475_v28 = vld [vmem:[#allocation6 + $0x320] sm:$0xff] }
 0x2b0   :  { %1876 = vmatprep.subr.mxu0 %v6457_v42  ;;  %1947 = vmatprep.subr.mxu1 %v6459_v35  ;;  %9358 = vst [vmem:[#allocation98_spill] sm:$0xff] %v6471_v27  ;;  %9359 = vst [vmem:[#allocation99_spill] sm:$0xff] %v6475_v28  ;;  %v6477_v42 = vld [vmem:[#allocation6 + $0x330] sm:$0xff]  ;;  %v6481_v35 = vld [vmem:[#allocation6 + $0x308] sm:$0xff] }
 0x2b1   :  { %1877 = vmatpush2.msra.mxu0 %v6463_v46  ;;  %1948 = vmatpush2.msra.mxu1 %v6465_v37  ;;  %9360 = vst [vmem:[#allocation100_spill] sm:$0xff] %v6477_v42  ;;  %9361 = vst [vmem:[#allocation101_spill] sm:$0xff] %v6481_v35  ;;  %v6483_v46 = vld [vmem:[#allocation6 + $0x318] sm:$0xff]  ;;  %v6487_v37 = vld [vmem:[#allocation6 + $0x300] sm:$0xff] }
 0x2b2   :  { %1878 = vmatprep.subr.mxu0 %v6469_v26  ;;  %1949 = vmatprep.subr.mxu1 %v6471_v27  ;;  %9362 = vst [vmem:[#allocation102_spill] sm:$0xff] %v6483_v46  ;;  %9363 = vst [vmem:[#allocation103_spill] sm:$0xff] %v6487_v37  ;;  %v6489_v26 = vld [vmem:[#allocation6 + $0x310] sm:$0xff]  ;;  %v6491_v27 = vld [vmem:[#allocation6 + $0x2e8] sm:$0xff] }
 0x2b3   :  { %1879 = vmatpush2.msra.mxu0 %v6475_v28  ;;  %1950 = vmatpush2.msra.mxu1 %v6477_v42  ;;  %9364 = vst [vmem:[#allocation104_spill] sm:$0xff] %v6489_v26  ;;  %9365 = vst [vmem:[#allocation105_spill] sm:$0xff] %v6491_v27  ;;  %v6495_v28 = vld [vmem:[#allocation6 + $0x2f8] sm:$0xff]  ;;  %v6497_v42 = vld [vmem:[#allocation6 + $0x2e0] sm:$0xff] }
 0x2b4   :  { %1880 = vmatprep.subr.mxu0 %v6481_v35  ;;  %1951 = vmatprep.subr.mxu1 %v6483_v46  ;;  %9366 = vst [vmem:[#allocation106_spill] sm:$0xff] %v6495_v28  ;;  %9367 = vst [vmem:[#allocation107_spill] sm:$0xff] %v6497_v42  ;;  %v6503_v46 = vld [vmem:[#allocation6 + $0x2c8] sm:$0xff]  ;;  %v6505_v35 = vld [vmem:[#allocation6 + $0x2d8] sm:$0xff] }
 0x2b5   :  { %1881 = vmatpush2.msra.mxu0 %v6487_v37  ;;  %1952 = vmatpush2.msra.mxu1 %v6489_v26  ;;  %9369 = vst [vmem:[#allocation109_spill] sm:$0xff] %v6503_v46  ;;  %9370 = vst [vmem:[#allocation110_spill] sm:$0xff] %v6505_v35  ;;  %v6511_v26 = vld [vmem:[#allocation6 + $0x2d0] sm:$0xff]  ;;  %v6513_v37 = vld [vmem:[#allocation6 + $0x2a8] sm:$0xff] }
 0x2b6   :  { %1882 = vmatprep.subr.mxu0 %v6491_v27  ;;  %1953 = vmatprep.subr.mxu1 %v6495_v28  ;;  %9372 = vst [vmem:[#allocation112_spill] sm:$0xff] %v6511_v26  ;;  %9373 = vst [vmem:[#allocation113_spill] sm:$0xff] %v6513_v37  ;;  %v6519_v28 = vld [vmem:[#allocation6 + $0x2a0] sm:$0xff]  ;;  %v6521_v27 = vld [vmem:[#allocation6 + $0x2b0] sm:$0xff] }
 0x2b7   :  { %1883 = vmatpush2.msra.mxu0 %v6497_v42  ;;  %1954 = vmatpush2.msra.mxu1 %v6499_v41  ;;  %9375 = vst [vmem:[#allocation115_spill] sm:$0xff] %v6519_v28  ;;  %9376 = vst [vmem:[#allocation116_spill] sm:$0xff] %v6521_v27  ;;  %v6525_v42 = vld [vmem:[#allocation6 + $0x288] sm:$0xff]  ;;  %v6527_v41 = vld [vmem:[#allocation6 + $0x298] sm:$0xff] }
 0x2b8   :  { %1884 = vmatprep.subr.mxu0 %v6503_v46  ;;  %1955 = vmatprep.subr.mxu1 %v6505_v35  ;;  %9377 = vst [vmem:[#allocation117_spill] sm:$0xff] %v6525_v42  ;;  %9378 = vst [vmem:[#allocation118_spill] sm:$0xff] %v6527_v41  ;;  %v6533_v46 = vld [vmem:[#allocation6 + $0x290] sm:$0xff]  ;;  %v6537_v35 = vld [vmem:[#allocation6 + $0x268] sm:$0xff] }
 0x2b9   :  { %1885 = vmatpush2.msra.mxu0 %v6507_v39  ;;  %1956 = vmatpush2.msra.mxu1 %v6511_v26  ;;  %9380 = vst [vmem:[#allocation120_spill] sm:$0xff] %v6533_v46  ;;  %9381 = vst [vmem:[#allocation121_spill] sm:$0xff] %v6537_v35  ;;  %v6539_v39 = vld [vmem:[#allocation6 + $0x278] sm:$0xff]  ;;  %v6543_v26 = vld [vmem:[#allocation6 + $0x260] sm:$0xff] }
 0x2ba   :  { %1886 = vmatprep.subr.mxu0 %v6513_v37  ;;  %1957 = vmatprep.subr.mxu1 %v6515_v50  ;;  %9382 = vst [vmem:[#allocation122_spill] sm:$0xff] %v6539_v39  ;;  %9383 = vst [vmem:[#allocation123_spill] sm:$0xff] %v6543_v26  ;;  %v6545_v37 = vld [vmem:[#allocation6 + $0x270] sm:$0xff]  ;;  %v6549_v50 = vld [vmem:[#allocation6 + $0x248] sm:$0xff] }
 0x2bb   :  { %1887 = vmatpush2.msra.mxu0 %v6519_v28  ;;  %1958 = vmatpush2.msra.mxu1 %v6521_v27  ;;  %9384 = vst [vmem:[#allocation124_spill] sm:$0xff] %v6545_v37  ;;  %9385 = vst [vmem:[#allocation125_spill] sm:$0xff] %v6549_v50  ;;  %v6551_v28 = vld [vmem:[#allocation6 + $0x258] sm:$0xff]  ;;  %v6555_v27 = vld [vmem:[#allocation6 + $0x240] sm:$0xff] }
 0x2bc   :  { %1888 = vmatprep.subr.mxu0 %v6525_v42  ;;  %1959 = vmatprep.subr.mxu1 %v6527_v41  ;;  %9386 = vst [vmem:[#allocation126_spill] sm:$0xff] %v6551_v28  ;;  %9387 = vst [vmem:[#allocation127_spill] sm:$0xff] %v6555_v27  ;;  %v6557_v42 = vld [vmem:[#allocation6 + $0x250] sm:$0xff]  ;;  %v6561_v41 = vld [vmem:[#allocation6 + $0x228] sm:$0xff] }
 0x2bd   :  { %1889 = vmatpush2.msra.mxu0 %v6531_v30  ;;  %1960 = vmatpush2.msra.mxu1 %v6533_v46  ;;  %9388 = vst [vmem:[#allocation129_spill] sm:$0xff] %v6557_v42  ;;  %9389 = vst [vmem:[#allocation130_spill] sm:$0xff] %v6561_v41  ;;  %v6563_v30 = vld [vmem:[#allocation6 + $0x238] sm:$0xff]  ;;  %v6567_v46 = vld [vmem:[#allocation6 + $0x220] sm:$0xff] }
 0x2be   :  { %1890 = vmatprep.subr.mxu0 %v6537_v35  ;;  %1961 = vmatprep.subr.mxu1 %v6539_v39  ;;  %9390 = vst [vmem:[#allocation128_spill] sm:$0xff] %v6563_v30  ;;  %9391 = vst [vmem:[#allocation155_spill] sm:$0xff] %v6567_v46  ;;  %v6569_v35 = vld [vmem:[#allocation6 + $0x230] sm:$0xff]  ;;  %v6573_v39 = vld [vmem:[#allocation6 + $0x208] sm:$0xff] }
 0x2bf   :  { %1891 = vmatpush2.msra.mxu0 %v6543_v26  ;;  %1962 = vmatpush2.msra.mxu1 %v6545_v37  ;;  %9392 = vst [vmem:[#allocation156_spill] sm:$0xff] %v6569_v35  ;;  %9393 = vst [vmem:[#allocation157_spill] sm:$0xff] %v6573_v39  ;;  %v6575_v26 = vld [vmem:[#allocation6 + $0x218] sm:$0xff]  ;;  %v6579_v37 = vld [vmem:[#allocation6 + $0x200] sm:$0xff] }
 0x2c0   :  { %1892 = vmatprep.subr.mxu0 %v6549_v50  ;;  %1963 = vmatprep.subr.mxu1 %v6551_v28  ;;  %9394 = vst [vmem:[#allocation158_spill] sm:$0xff] %v6575_v26  ;;  %9395 = vst [vmem:[#allocation159_spill] sm:$0xff] %v6579_v37  ;;  %v6581_v50 = vld [vmem:[#allocation6 + $0x210] sm:$0xff]  ;;  %v6585_v28 = vld [vmem:[#allocation3 + $0x1e8] sm:$0xff] }
 0x2c1   :  { %1893 = vmatpush2.msra.mxu0 %v6555_v27  ;;  %1964 = vmatpush2.msra.mxu1 %v6557_v42  ;;  %9396 = vst [vmem:[#allocation160_spill] sm:$0xff] %v6581_v50  ;;  %9397 = vst [vmem:[#allocation161_spill] sm:$0xff] %v6585_v28  ;;  %v6587_v27 = vld [vmem:[#allocation3 + $0x1f8] sm:$0xff] }
 0x2c2   :  { %1894 = vmatprep.subr.mxu0 %v6561_v41  ;;  %1965 = vmatprep.subr.mxu1 %v6563_v30  ;;  %9398 = vst [vmem:[#allocation162_spill] sm:$0xff] %v6587_v27 }
 0x2c3   :  { %1895 = vmatpush2.msra.mxu0 %v6567_v46  ;;  %1966 = vmatpush2.msra.mxu1 %v6569_v35 }
 0x2c4   :  { %1896 = vmatprep.subr.mxu0 %v6573_v39  ;;  %1967 = vmatprep.subr.mxu1 %v6575_v26 }
 0x2c5   :  { %1897 = vmatpush2.msra.mxu0 %v6579_v37  ;;  %1968 = vmatpush2.msra.mxu1 %v6581_v50 }
 0x2c6   :  { %2069 = vmatprep.subr.mxu0 %v6585_v28  ;;  %2140 = vmatprep.subr.mxu1 %v6587_v27 }
 0x324   :  { %v1367_v30 = vpop.f32.mrf.mxu0  ;;  %v1438_v31 = vpop.f32.mrf.mxu1 }
 0x325   :  { %v1368_v46 = vadd.f32 %v1367_v30, %v6038_v8  ;;  %v1439_v28 = vadd.f32 %v1438_v31, %v6053_v23 }
 0x326   :  { %v1369_v35 = vpop.f32.mrf.mxu0  ;;  %v1440_v26 = vpop.f32.mrf.mxu1 }
 0x327   :  { %v4713_v41 = vmul.f32 -1.442695, %v1368_v46  ;;  %v1370_v42 = vadd.f32 %v1369_v35, %v6042_v10  ;;  %v1441_v37 = vadd.f32 %v1440_v26, %v6048_v19  ;;  %v9399_v10 = vld [vmem:[#allocation131_spill] sm:$0xff] }
 0x329   :  { %4810 = vpow2.f32 %v4713_v41  ;;  %v4714_v39 = vmul.f32 -1.442695, %v1370_v42  ;;  %v4715_v38 = vmul.f32 -1.442695, %v1441_v37  ;;  %v9400_v37 = vld [vmem:[#allocation133_spill] sm:$0xff] }
 0x32b   :  { %4812 = vpow2.f32 %v4714_v39 }
 0x32c   :  { %4814 = vpow2.f32 %v4715_v38 }
 0x336   :  { %v4811_v50 = vpop.eup %4810 }
 0x337   :  { %v1446_v45 = vadd.f32 1.0, %v4811_v50 }
 0x338   :  { %v4813_v27 = vpop.eup %4812 }
 0x339   :  { %4816 = vrcp.f32 %v1446_v45  ;;  %v1452_v30 = vadd.f32 1.0, %v4813_v27  ;;  %v4815_v46 = vpop.eup %4814 }
 0x33a   :  { %4818 = vtanh.f32 %v1439_v28  ;;  %v1459_v50 = vadd.f32 1.0, %v4815_v46 }
 0x33b   :  { %4820 = vrcp.f32 %v1452_v30 }
 0x345   :  { %v1602_v35 = vpop.f32.mrf.mxu0  ;;  %v1673_v45 = vpop.f32.mrf.mxu1 }
 0x346   :  { %v4817_v41 = vpop.eup %4816  ;;  %v1678_v42 = vadd.f32 %v1602_v35, %v9399_v10  ;;  %v9401_v10 = vld [vmem:[#allocation134_spill] sm:$0xff]  ;;  %v9402_v35 = vld [vmem:[#allocation132_spill] sm:$0xff] }
 0x347   :  { %v4819_v39 = vpop.eup %4818  ;;  %v1604_v8 = vpop.f32.mrf.mxu0 }
 0x348   :  { %v4821_v25 = vpop.eup %4820  ;;  %v4716_v26 = vmul.f32 -1.442695, %v1678_v42  ;;  %v1679_v19 = vadd.f32 %v1604_v8, %v9400_v37  ;;  %v1463_v5 = vmul.f32 %v4819_v39, %v4817_v41  ;;  %v1675_v28 = vpop.f32.mrf.mxu1  ;;  %v1680_v42 = vadd.f32 %v1673_v45, %v9402_v35  ;;  %v6613_v35 = vld [vmem:[#allocation3 + $0x1e0] sm:$0xff] }
 0x349   :  { %v1462_v31 = vmul.f32 %v4821_v25, %v6058_v57  ;;  %v1681_v30 = vadd.f32 %v1675_v28, %v9401_v10 }
 0x34a   :  { %4822 = vpow2.f32 %v4716_v26  ;;  %v4717_v38 = vmul.f32 -1.442695, %v1679_v19 }
 0x34b   :  { %v6602_v27 = vadd.f32 %v1463_v5, %v1462_v31  ;;  %v4718_v23 = vmul.f32 -1.442695, %v1681_v30 }
 0x34c   :  { %4824 = vpow2.f32 %v4717_v38 }
 0x34d   :  { %4826 = vrcp.f32 %v1459_v50 }
 0x34e   :  { %4828 = vtanh.f32 %v6602_v27 }
 0x34f   :  { %4830 = vtanh.f32 %v1680_v42  ;;  %v6615_v42 = vld [vmem:[#allocation3 + $0x1f0] sm:$0xff] }
 0x350   :  { %4832 = vpow2.f32 %v4718_v23 }
 0x357   :  { %v4823_v8 = vpop.eup %4822 }
 0x358   :  { %v1685_v41 = vadd.f32 1.0, %v4823_v8  ;;  %v6617_v8 = vld [vmem:[#allocation3 + $0x1c8] sm:$0xff] }
 0x359   :  { %v4825_v57 = vpop.eup %4824 }
 0x35a   :  { %v4827_v25 = vpop.eup %4826  ;;  %4834 = vrcp.f32 %v1685_v41  ;;  %v1691_v19 = vadd.f32 1.0, %v4825_v57  ;;  %v6619_v41 = vld [vmem:[#allocation3 + $0x1d8] sm:$0xff]  ;;  %v6625_v57 = vld [vmem:[#allocation3 + $0x1d0] sm:$0xff] }
 0x35b   :  { %v4829_v5 = vpop.eup %4828 }
 0x35c   :  { %4836 = vrcp.f32 %v1691_v19  ;;  %v1466_v46 = vmul.f32 %v4829_v5, %v4827_v25  ;;  %v4831_v39 = vpop.eup %4830  ;;  %v6629_v25 = vld [vmem:[#allocation3 + $0x1a8] sm:$0xff]  ;;  %v6631_v19 = vld [vmem:[#allocation3 + $0x1b8] sm:$0xff]  ;;  %v6635_v5 = vld [vmem:[#allocation3 + $0x1a0] sm:$0xff] }
 0x35d   :  { %v4833_v26 = vpop.eup %4832  ;;  %9403 = vst [vmem:[#allocation163_spill] sm:$0xff] %v6635_v5 }
 0x35e   :  { %1467 = vst [vmem:[#allocation8 + $0x8] sm:$0xff] %v1466_v46  ;;  %1898 = vmatprep.mubr.f32.mxu0 %v1466_v46  ;;  %1969 = vmatprep.mubr.f32.mxu1 %v1466_v46  ;;  %v1698_v45 = vadd.f32 1.0, %v4833_v26  ;;  %v6637_v46 = vld [vmem:[#allocation3 + $0x1b0] sm:$0xff]  ;;  %v6643_v26 = vld [vmem:[#allocation3 + $0x198] sm:$0xff] }
 0x35f   :  { %9404 = vst [vmem:[#allocation164_spill] sm:$0xff] %v6637_v46  ;;  %9406 = vst [vmem:[#allocation166_spill] sm:$0xff] %v6643_v26 }
 0x360   :  { %4838 = vrcp.f32 %v1698_v45  ;;  %v6655_v45 = vld [vmem:[#allocation3 + $0x178] sm:$0xff] }
 0x361   :  { %9410 = vst [vmem:[#allocation170_spill] sm:$0xff] %v6655_v45 }
 0x367   :  { %v4835_v37 = vpop.eup %4834 }
 0x368   :  { %v1702_v31 = vmul.f32 %v4835_v37, %v4831_v39  ;;  %v6641_v39 = vld [vmem:[#allocation3 + $0x188] sm:$0xff]  ;;  %v6647_v37 = vld [vmem:[#allocation3 + $0x180] sm:$0xff] }
 0x369   :  { %v4837_v50 = vpop.eup %4836  ;;  %9405 = vst [vmem:[#allocation165_spill] sm:$0xff] %v6641_v39  ;;  %9407 = vst [vmem:[#allocation167_spill] sm:$0xff] %v6647_v37 }
 0x36a   :  { %v1701_v38 = vmul.f32 %v4837_v50, %v6064_v20  ;;  %v6623_v20 = vld [vmem:[#allocation3 + $0x1c0] sm:$0xff]  ;;  %v6653_v50 = vld [vmem:[#allocation3 + $0x168] sm:$0xff] }
 0x36b   :  { %9409 = vst [vmem:[#allocation169_spill] sm:$0xff] %v6653_v50 }
 0x36c   :  { %v6608_v28 = vadd.f32 %v1702_v31, %v1701_v38  ;;  %v6649_v31 = vld [vmem:[#allocation3 + $0x190] sm:$0xff]  ;;  %v6659_v38 = vld [vmem:[#allocation3 + $0x160] sm:$0xff] }
 0x36d   :  { %v4839_v23 = vpop.eup %4838  ;;  %9408 = vst [vmem:[#allocation168_spill] sm:$0xff] %v6649_v31  ;;  %9411 = vst [vmem:[#allocation131_spill] sm:$0xff] %v6659_v38 }
 0x36e   :  { %4840 = vtanh.f32 %v6608_v28 }
 0x37b   :  { %v4841_v10 = vpop.eup %4840 }
 0x37c   :  { %v6611_v30 = vmul.f32 %v4841_v10, %v4839_v23  ;;  %v6661_v23 = vld [vmem:[#allocation3 + $0x170] sm:$0xff]  ;;  %v6665_v10 = vld [vmem:[#allocation3 + $0x148] sm:$0xff] }
 0x37e   :  { %1899 = vmatmul.mubr.f32.vlgmr.msra.gmra.mxu0 %v6611_v30  ;;  %1970 = vmatmul.mubr.f32.vlgmr.msra.gmra.mxu1 %v6611_v30 }
 0x37f   :  { %2070 = vmatpush1.msra.mxu0 %v6613_v35  ;;  %2141 = vmatpush1.msra.mxu1 %v6615_v42 }
 0x380   :  { %2071 = vmatprep.subr.mxu0 %v6617_v8  ;;  %2142 = vmatprep.subr.mxu1 %v6619_v41 }
 0x381   :  { %2072 = vmatpush1.msra.mxu0 %v6623_v20  ;;  %2143 = vmatpush1.msra.mxu1 %v6625_v57 }
 0x382   :  { %2073 = vmatprep.subr.mxu0 %v6629_v25  ;;  %2144 = vmatprep.subr.mxu1 %v6631_v19 }
 0x383   :  { %2074 = vmatpush1.msra.mxu0 %v6635_v5  ;;  %2145 = vmatpush1.msra.mxu1 %v6637_v46  ;;  %v6667_v5 = vld [vmem:[#allocation3 + $0x158] sm:$0xff]  ;;  %v6671_v46 = vld [vmem:[#allocation3 + $0x140] sm:$0xff] }
 0x384   :  { %2075 = vmatprep.subr.mxu0 %v6641_v39  ;;  %2146 = vmatprep.subr.mxu1 %v6643_v26  ;;  %v6673_v39 = vld [vmem:[#allocation3 + $0x150] sm:$0xff]  ;;  %v6677_v26 = vld [vmem:[#allocation3 + $0x128] sm:$0xff] }
 0x385   :  { %2076 = vmatpush1.msra.mxu0 %v6647_v37  ;;  %2147 = vmatpush1.msra.mxu1 %v6649_v31  ;;  %v6679_v37 = vld [vmem:[#allocation3 + $0x138] sm:$0xff]  ;;  %v6683_v31 = vld [vmem:[#allocation3 + $0x120] sm:$0xff] }
 0x386   :  { %2077 = vmatprep.subr.mxu0 %v6653_v50  ;;  %2148 = vmatprep.subr.mxu1 %v6655_v45  ;;  %v6685_v50 = vld [vmem:[#allocation3 + $0x130] sm:$0xff]  ;;  %v6689_v45 = vld [vmem:[#allocation3 + $0x108] sm:$0xff] }
 0x387   :  { %2078 = vmatpush1.msra.mxu0 %v6659_v38  ;;  %2149 = vmatpush1.msra.mxu1 %v6661_v23  ;;  %v6691_v38 = vld [vmem:[#allocation3 + $0x118] sm:$0xff] }
 0x388   :  { %2079 = vmatprep.subr.mxu0 %v6665_v10  ;;  %2150 = vmatprep.subr.mxu1 %v6667_v5 }
 0x389   :  { %2080 = vmatpush1.msra.mxu0 %v6671_v46  ;;  %2151 = vmatpush1.msra.mxu1 %v6673_v39 }
 0x38a   :  { %2081 = vmatprep.subr.mxu0 %v6677_v26  ;;  %2152 = vmatprep.subr.mxu1 %v6679_v37 }
 0x38b   :  { %2082 = vmatpush1.msra.mxu0 %v6683_v31  ;;  %2153 = vmatpush1.msra.mxu1 %v6685_v50 }
 0x38c   :  { %2083 = vmatprep.subr.mxu0 %v6689_v45  ;;  %2154 = vmatprep.subr.mxu1 %v6691_v38 }
 0x38d   :  { %2084 = vmatpush1.msra.mxu0 %v6095_v47  ;;  %2155 = vmatpush1.msra.mxu1 %v6097_v29  ;;  %v9412_v47 = vld [vmem:[#allocation16_spill] sm:$0xff]  ;;  %v9413_v29 = vld [vmem:[#allocation17_spill] sm:$0xff] }
 0x38e   :  { %2085 = vmatprep.subr.mxu0 %v6101_v34  ;;  %2156 = vmatprep.subr.mxu1 %v6103_v44  ;;  %v9414_v34 = vld [vmem:[#allocation18_spill] sm:$0xff]  ;;  %v9415_v44 = vld [vmem:[#allocation19_spill] sm:$0xff] }
 0x38f   :  { %2086 = vmatpush1.msra.mxu0 %v6107_v43  ;;  %2157 = vmatpush1.msra.mxu1 %v6109_v0  ;;  %v9416_v43 = vld [vmem:[#allocation20_spill] sm:$0xff]  ;;  %v9417_v0 = vld [vmem:[#allocation21_spill] sm:$0xff] }
 0x390   :  { %2087 = vmatprep.subr.mxu0 %v6113_v32  ;;  %2158 = vmatprep.subr.mxu1 %v6115_v40  ;;  %v9418_v32 = vld [vmem:[#allocation22_spill] sm:$0xff]  ;;  %v9419_v40 = vld [vmem:[#allocation23_spill] sm:$0xff] }
 0x391   :  { %2088 = vmatpush1.msra.mxu0 %v6119_v33  ;;  %2159 = vmatpush1.msra.mxu1 %v6121_v59  ;;  %v9420_v33 = vld [vmem:[#allocation24_spill] sm:$0xff]  ;;  %v9421_v59 = vld [vmem:[#allocation25_spill] sm:$0xff] }
 0x392   :  { %2089 = vmatprep.subr.mxu0 %v6125_v36  ;;  %2160 = vmatprep.subr.mxu1 %v6127_v49  ;;  %v9422_v36 = vld [vmem:[#allocation26_spill] sm:$0xff]  ;;  %v9423_v49 = vld [vmem:[#allocation27_spill] sm:$0xff] }
 0x393   :  { %2090 = vmatpush1.msra.mxu0 %v6131_v51  ;;  %2161 = vmatpush1.msra.mxu1 %v6133_v52  ;;  %v9424_v51 = vld [vmem:[#allocation28_spill] sm:$0xff]  ;;  %v9425_v52 = vld [vmem:[#allocation29_spill] sm:$0xff] }
 0x394   :  { %2091 = vmatprep.subr.mxu0 %v6137_v53  ;;  %2162 = vmatprep.subr.mxu1 %v6139_v54  ;;  %v9426_v53 = vld [vmem:[#allocation30_spill] sm:$0xff]  ;;  %v9427_v54 = vld [vmem:[#allocation31_spill] sm:$0xff] }
 0x395   :  { %2092 = vmatpush1.msra.mxu0 %v6143_v55  ;;  %2163 = vmatpush1.msra.mxu1 %v6145_v56  ;;  %v9428_v55 = vld [vmem:[#allocation32_spill] sm:$0xff]  ;;  %v9429_v56 = vld [vmem:[#allocation33_spill] sm:$0xff] }
 0x396   :  { %2093 = vmatprep.subr.mxu0 %v6149_v58  ;;  %2164 = vmatprep.subr.mxu1 %v6151_v60  ;;  %v9430_v58 = vld [vmem:[#allocation34_spill] sm:$0xff]  ;;  %v9431_v60 = vld [vmem:[#allocation35_spill] sm:$0xff] }
 0x397   :  { %2094 = vmatpush1.msra.mxu0 %v6155_v61  ;;  %2165 = vmatpush1.msra.mxu1 %v6157_v62  ;;  %v9432_v61 = vld [vmem:[#allocation36_spill] sm:$0xff]  ;;  %v9433_v62 = vld [vmem:[#allocation37_spill] sm:$0xff] }
 0x398   :  { %2095 = vmatprep.subr.mxu0 %v6161_v63  ;;  %2166 = vmatprep.subr.mxu1 %v6163_v1  ;;  %v9434_v63 = vld [vmem:[#allocation38_spill] sm:$0xff]  ;;  %v9435_v1 = vld [vmem:[#allocation39_spill] sm:$0xff] }
 0x399   :  { %2096 = vmatpush1.msra.mxu0 %v6167_v2  ;;  %2167 = vmatpush1.msra.mxu1 %v6169_v3  ;;  %v9436_v2 = vld [vmem:[#allocation40_spill] sm:$0xff]  ;;  %v9437_v3 = vld [vmem:[#allocation41_spill] sm:$0xff] }
 0x39a   :  { %2097 = vmatprep.subr.mxu0 %v6173_v4  ;;  %2168 = vmatprep.subr.mxu1 %v6175_v6  ;;  %v9438_v4 = vld [vmem:[#allocation42_spill] sm:$0xff]  ;;  %v9439_v6 = vld [vmem:[#allocation43_spill] sm:$0xff] }
 0x39b   :  { %2098 = vmatpush1.msra.mxu0 %v6179_v7  ;;  %2169 = vmatpush1.msra.mxu1 %v6181_v9  ;;  %v9440_v7 = vld [vmem:[#allocation44_spill] sm:$0xff]  ;;  %v9441_v9 = vld [vmem:[#allocation45_spill] sm:$0xff] }
 0x39c   :  { %2099 = vmatprep.subr.mxu0 %v6185_v11  ;;  %2170 = vmatprep.subr.mxu1 %v6187_v12  ;;  %v9442_v11 = vld [vmem:[#allocation46_spill] sm:$0xff]  ;;  %v9443_v12 = vld [vmem:[#allocation47_spill] sm:$0xff] }
 0x39d   :  { %2100 = vmatpush1.msra.mxu0 %v6191_v13  ;;  %2133 = vmatprep.mubr.f32.mxu0 %v9132_v48  ;;  %v9444_v13 = vld [vmem:[#allocation48_spill] sm:$0xff] }
 0x39e   :  { %2171 = vmatpush1.msra.mxu1 %v6195_v14  ;;  %2204 = vmatprep.mubr.f32.mxu1 %v9132_v48  ;;  %v9445_v14 = vld [vmem:[#allocation49_spill] sm:$0xff] }
 0x39f   :  { %2134 = vmatmul.mubr.f32.vlgmr.msra.gmra.mxu0 %v6611_v30  ;;  %2205 = vmatmul.mubr.f32.vlgmr.msra.gmra.mxu1 %v6611_v30  ;;  %v9453_v30 = vld [vmem:[#allocation57_spill] sm:$0xff] }
 0x3a0   :  { %2367 = vmatprep.subr.mxu0 %v6205_v15  ;;  %2438 = vmatprep.subr.mxu1 %v6207_v16  ;;  %v9446_v15 = vld [vmem:[#allocation50_spill] sm:$0xff]  ;;  %v9447_v16 = vld [vmem:[#allocation51_spill] sm:$0xff] }
 0x3a1   :  { %2368 = vmatpush1.msra.mxu0 %v6211_v17  ;;  %2439 = vmatpush1.msra.mxu1 %v6213_v18  ;;  %v9448_v17 = vld [vmem:[#allocation52_spill] sm:$0xff]  ;;  %v9449_v18 = vld [vmem:[#allocation53_spill] sm:$0xff] }
 0x3a2   :  { %2369 = vmatprep.subr.mxu0 %v6217_v21  ;;  %2440 = vmatprep.subr.mxu1 %v6219_v22  ;;  %v9450_v21 = vld [vmem:[#allocation54_spill] sm:$0xff]  ;;  %v9451_v22 = vld [vmem:[#allocation55_spill] sm:$0xff] }
 0x3a3   :  { %2370 = vmatpush1.msra.mxu0 %v6223_v24  ;;  %2441 = vmatpush1.msra.mxu1 %v9412_v47  ;;  %v9452_v24 = vld [vmem:[#allocation56_spill] sm:$0xff]  ;;  %v9454_v47 = vld [vmem:[#allocation58_spill] sm:$0xff] }
 0x3a4   :  { %2371 = vmatprep.subr.mxu0 %v9413_v29  ;;  %2442 = vmatprep.subr.mxu1 %v9414_v34  ;;  %v9455_v29 = vld [vmem:[#allocation59_spill] sm:$0xff]  ;;  %v9456_v34 = vld [vmem:[#allocation60_spill] sm:$0xff] }
 0x3a5   :  { %2372 = vmatpush1.msra.mxu0 %v9415_v44  ;;  %2443 = vmatpush1.msra.mxu1 %v9416_v43  ;;  %v9457_v44 = vld [vmem:[#allocation61_spill] sm:$0xff]  ;;  %v9458_v43 = vld [vmem:[#allocation62_spill] sm:$0xff] }
 0x3a6   :  { %2373 = vmatprep.subr.mxu0 %v9417_v0  ;;  %2444 = vmatprep.subr.mxu1 %v9418_v32  ;;  %v9459_v0 = vld [vmem:[#allocation63_spill] sm:$0xff]  ;;  %v9460_v32 = vld [vmem:[#allocation64_spill] sm:$0xff] }
 0x3a7   :  { %2374 = vmatpush1.msra.mxu0 %v9419_v40  ;;  %2445 = vmatpush1.msra.mxu1 %v9420_v33  ;;  %v9461_v40 = vld [vmem:[#allocation65_spill] sm:$0xff]  ;;  %v9462_v33 = vld [vmem:[#allocation66_spill] sm:$0xff] }
 0x3a8   :  { %2375 = vmatprep.subr.mxu0 %v9421_v59  ;;  %2446 = vmatprep.subr.mxu1 %v9422_v36  ;;  %v9463_v59 = vld [vmem:[#allocation67_spill] sm:$0xff]  ;;  %v9464_v36 = vld [vmem:[#allocation68_spill] sm:$0xff] }
 0x3a9   :  { %2376 = vmatpush1.msra.mxu0 %v9423_v49  ;;  %2447 = vmatpush1.msra.mxu1 %v9424_v51  ;;  %v9465_v49 = vld [vmem:[#allocation69_spill] sm:$0xff]  ;;  %v9466_v51 = vld [vmem:[#allocation70_spill] sm:$0xff] }
 0x3aa   :  { %2377 = vmatprep.subr.mxu0 %v9425_v52  ;;  %2448 = vmatprep.subr.mxu1 %v9426_v53  ;;  %v9467_v52 = vld [vmem:[#allocation71_spill] sm:$0xff]  ;;  %v9468_v53 = vld [vmem:[#allocation72_spill] sm:$0xff] }
 0x3ab   :  { %2378 = vmatpush1.msra.mxu0 %v9427_v54  ;;  %2449 = vmatpush1.msra.mxu1 %v9428_v55  ;;  %v9469_v54 = vld [vmem:[#allocation73_spill] sm:$0xff]  ;;  %v9470_v55 = vld [vmem:[#allocation74_spill] sm:$0xff] }
 0x3ac   :  { %2379 = vmatprep.subr.mxu0 %v9429_v56  ;;  %2450 = vmatprep.subr.mxu1 %v9430_v58  ;;  %v9471_v56 = vld [vmem:[#allocation75_spill] sm:$0xff]  ;;  %v9472_v58 = vld [vmem:[#allocation76_spill] sm:$0xff] }
 0x3ad   :  { %2380 = vmatpush1.msra.mxu0 %v9431_v60  ;;  %2451 = vmatpush1.msra.mxu1 %v9432_v61  ;;  %v9473_v60 = vld [vmem:[#allocation77_spill] sm:$0xff]  ;;  %v9474_v61 = vld [vmem:[#allocation78_spill] sm:$0xff] }
 0x3ae   :  { %2381 = vmatprep.subr.mxu0 %v9433_v62  ;;  %2452 = vmatprep.subr.mxu1 %v9434_v63  ;;  %v9475_v62 = vld [vmem:[#allocation79_spill] sm:$0xff]  ;;  %v9476_v63 = vld [vmem:[#allocation80_spill] sm:$0xff] }
 0x3af   :  { %2382 = vmatpush1.msra.mxu0 %v9435_v1  ;;  %2453 = vmatpush1.msra.mxu1 %v9436_v2  ;;  %v9477_v1 = vld [vmem:[#allocation81_spill] sm:$0xff]  ;;  %v9478_v2 = vld [vmem:[#allocation82_spill] sm:$0xff] }
 0x3b0   :  { %2383 = vmatprep.subr.mxu0 %v9437_v3  ;;  %2454 = vmatprep.subr.mxu1 %v9438_v4  ;;  %v9479_v3 = vld [vmem:[#allocation83_spill] sm:$0xff]  ;;  %v9480_v4 = vld [vmem:[#allocation84_spill] sm:$0xff] }
 0x3b1   :  { %2384 = vmatpush1.msra.mxu0 %v9439_v6  ;;  %2455 = vmatpush1.msra.mxu1 %v9440_v7  ;;  %v9481_v6 = vld [vmem:[#allocation85_spill] sm:$0xff]  ;;  %v9482_v7 = vld [vmem:[#allocation86_spill] sm:$0xff] }
 0x3b2   :  { %2385 = vmatprep.subr.mxu0 %v9441_v9  ;;  %2456 = vmatprep.subr.mxu1 %v9442_v11  ;;  %v9483_v9 = vld [vmem:[#allocation87_spill] sm:$0xff]  ;;  %v9484_v11 = vld [vmem:[#allocation88_spill] sm:$0xff] }
 0x3b3   :  { %2386 = vmatpush1.msra.mxu0 %v9443_v12  ;;  %2457 = vmatpush1.msra.mxu1 %v9444_v13  ;;  %v9485_v12 = vld [vmem:[#allocation89_spill] sm:$0xff]  ;;  %v9486_v13 = vld [vmem:[#allocation90_spill] sm:$0xff] }
 0x3b4   :  { %2387 = vmatprep.subr.mxu0 %v9445_v14  ;;  %2458 = vmatprep.subr.mxu1 %v9446_v15  ;;  %v9487_v14 = vld [vmem:[#allocation91_spill] sm:$0xff]  ;;  %v9488_v15 = vld [vmem:[#allocation92_spill] sm:$0xff] }
 0x3b5   :  { %2388 = vmatpush1.msra.mxu0 %v9447_v16  ;;  %2459 = vmatpush1.msra.mxu1 %v9448_v17  ;;  %v9489_v16 = vld [vmem:[#allocation93_spill] sm:$0xff]  ;;  %v9490_v17 = vld [vmem:[#allocation94_spill] sm:$0xff] }
 0x3b6   :  { %2389 = vmatprep.subr.mxu0 %v9449_v18  ;;  %2460 = vmatprep.subr.mxu1 %v9450_v21  ;;  %v9491_v18 = vld [vmem:[#allocation95_spill] sm:$0xff]  ;;  %v9492_v21 = vld [vmem:[#allocation96_spill] sm:$0xff] }
 0x3b7   :  { %2390 = vmatpush1.msra.mxu0 %v9451_v22  ;;  %2461 = vmatpush1.msra.mxu1 %v9452_v24  ;;  %v9493_v22 = vld [vmem:[#allocation97_spill] sm:$0xff]  ;;  %v9494_v24 = vld [vmem:[#allocation98_spill] sm:$0xff] }
 0x3b8   :  { %2391 = vmatprep.subr.mxu0 %v9453_v30  ;;  %2462 = vmatprep.subr.mxu1 %v9454_v47  ;;  %v9495_v30 = vld [vmem:[#allocation99_spill] sm:$0xff]  ;;  %v9496_v47 = vld [vmem:[#allocation100_spill] sm:$0xff] }
 0x3b9   :  { %2392 = vmatpush1.msra.mxu0 %v9455_v29  ;;  %2463 = vmatpush1.msra.mxu1 %v9456_v34  ;;  %v9497_v29 = vld [vmem:[#allocation101_spill] sm:$0xff]  ;;  %v9498_v34 = vld [vmem:[#allocation102_spill] sm:$0xff] }
 0x3ba   :  { %2393 = vmatprep.subr.mxu0 %v9457_v44  ;;  %2464 = vmatprep.subr.mxu1 %v9458_v43  ;;  %v9499_v44 = vld [vmem:[#allocation103_spill] sm:$0xff]  ;;  %v9500_v43 = vld [vmem:[#allocation104_spill] sm:$0xff] }
 0x3bb   :  { %2394 = vmatpush1.msra.mxu0 %v9459_v0  ;;  %2465 = vmatpush1.msra.mxu1 %v9460_v32  ;;  %v9501_v0 = vld [vmem:[#allocation105_spill] sm:$0xff]  ;;  %v9502_v32 = vld [vmem:[#allocation106_spill] sm:$0xff] }
 0x3bc   :  { %2395 = vmatprep.subr.mxu0 %v9461_v40  ;;  %2466 = vmatprep.subr.mxu1 %v9462_v33  ;;  %v9503_v40 = vld [vmem:[#allocation107_spill] sm:$0xff]  ;;  %v9504_v33 = vld [vmem:[#allocation108_spill] sm:$0xff] }
 0x3bd   :  { %2396 = vmatpush1.msra.mxu0 %v9463_v59  ;;  %2467 = vmatpush1.msra.mxu1 %v9464_v36  ;;  %v9505_v59 = vld [vmem:[#allocation109_spill] sm:$0xff]  ;;  %v9506_v36 = vld [vmem:[#allocation110_spill] sm:$0xff] }
 0x3be   :  { %2397 = vmatprep.subr.mxu0 %v9465_v49  ;;  %2468 = vmatprep.subr.mxu1 %v9466_v51  ;;  %v9507_v49 = vld [vmem:[#allocation111_spill] sm:$0xff]  ;;  %v9508_v51 = vld [vmem:[#allocation112_spill] sm:$0xff] }
 0x3bf   :  { %2398 = vmatpush1.msra.mxu0 %v9467_v52  ;;  %2469 = vmatpush1.msra.mxu1 %v9468_v53  ;;  %v9509_v52 = vld [vmem:[#allocation113_spill] sm:$0xff]  ;;  %v9510_v53 = vld [vmem:[#allocation114_spill] sm:$0xff] }
 0x3c0   :  { %2399 = vmatprep.subr.mxu0 %v9469_v54  ;;  %2470 = vmatprep.subr.mxu1 %v9470_v55  ;;  %v9511_v54 = vld [vmem:[#allocation115_spill] sm:$0xff]  ;;  %v9512_v55 = vld [vmem:[#allocation116_spill] sm:$0xff] }
 0x3c1   :  { %2400 = vmatpush2.msra.mxu0 %v9471_v56  ;;  %2471 = vmatpush2.msra.mxu1 %v9472_v58  ;;  %v9513_v56 = vld [vmem:[#allocation117_spill] sm:$0xff]  ;;  %v9514_v58 = vld [vmem:[#allocation118_spill] sm:$0xff] }
 0x3c2   :  { %2401 = vmatprep.subr.mxu0 %v9473_v60  ;;  %2472 = vmatprep.subr.mxu1 %v9474_v61  ;;  %v9515_v60 = vld [vmem:[#allocation119_spill] sm:$0xff]  ;;  %v9516_v61 = vld [vmem:[#allocation120_spill] sm:$0xff] }
 0x3c3   :  { %2402 = vmatpush2.msra.mxu0 %v9475_v62  ;;  %2473 = vmatpush2.msra.mxu1 %v9476_v63  ;;  %v9517_v62 = vld [vmem:[#allocation121_spill] sm:$0xff]  ;;  %v9518_v63 = vld [vmem:[#allocation122_spill] sm:$0xff] }
 0x3c4   :  { %2403 = vmatprep.subr.mxu0 %v9477_v1  ;;  %2474 = vmatprep.subr.mxu1 %v9478_v2  ;;  %v9519_v1 = vld [vmem:[#allocation123_spill] sm:$0xff]  ;;  %v9520_v2 = vld [vmem:[#allocation124_spill] sm:$0xff] }
 0x3c5   :  { %2404 = vmatpush2.msra.mxu0 %v9479_v3  ;;  %2475 = vmatpush2.msra.mxu1 %v9480_v4  ;;  %v9521_v3 = vld [vmem:[#allocation125_spill] sm:$0xff]  ;;  %v9522_v4 = vld [vmem:[#allocation126_spill] sm:$0xff] }
 0x3c6   :  { %2405 = vmatprep.subr.mxu0 %v9481_v6  ;;  %2476 = vmatprep.subr.mxu1 %v9482_v7  ;;  %v9523_v6 = vld [vmem:[#allocation127_spill] sm:$0xff]  ;;  %v9524_v7 = vld [vmem:[#allocation129_spill] sm:$0xff] }
 0x3c7   :  { %2406 = vmatpush2.msra.mxu0 %v9483_v9  ;;  %2477 = vmatpush2.msra.mxu1 %v9484_v11  ;;  %v9525_v9 = vld [vmem:[#allocation130_spill] sm:$0xff]  ;;  %v9526_v11 = vld [vmem:[#allocation128_spill] sm:$0xff] }
 0x3c8   :  { %2407 = vmatprep.subr.mxu0 %v9485_v12  ;;  %2478 = vmatprep.subr.mxu1 %v9486_v13  ;;  %v9527_v12 = vld [vmem:[#allocation155_spill] sm:$0xff]  ;;  %v9528_v13 = vld [vmem:[#allocation156_spill] sm:$0xff] }
 0x3c9   :  { %2408 = vmatpush2.msra.mxu0 %v9487_v14  ;;  %2479 = vmatpush2.msra.mxu1 %v9488_v15  ;;  %v9529_v14 = vld [vmem:[#allocation157_spill] sm:$0xff]  ;;  %v9530_v15 = vld [vmem:[#allocation158_spill] sm:$0xff] }
 0x3ca   :  { %2409 = vmatprep.subr.mxu0 %v9489_v16  ;;  %2480 = vmatprep.subr.mxu1 %v9490_v17  ;;  %v9531_v16 = vld [vmem:[#allocation159_spill] sm:$0xff]  ;;  %v9532_v17 = vld [vmem:[#allocation160_spill] sm:$0xff] }
 0x3cb   :  { %2410 = vmatpush2.msra.mxu0 %v9491_v18  ;;  %2481 = vmatpush2.msra.mxu1 %v9492_v21  ;;  %v9533_v18 = vld [vmem:[#allocation161_spill] sm:$0xff]  ;;  %v9534_v21 = vld [vmem:[#allocation162_spill] sm:$0xff] }
 0x3cc   :  { %2411 = vmatprep.subr.mxu0 %v9493_v22  ;;  %2482 = vmatprep.subr.mxu1 %v9494_v24  ;;  %v9535_v24 = vld [vmem:[#allocation12_spill] sm:$0xff] }
 0x3cd   :  { %2412 = vmatpush2.msra.mxu0 %v9495_v30  ;;  %2483 = vmatpush2.msra.mxu1 %v9496_v47 }
 0x3ce   :  { %2413 = vmatprep.subr.mxu0 %v9497_v29  ;;  %2484 = vmatprep.subr.mxu1 %v9498_v34  ;;  %v9536_v34 = vld [vmem:[#allocation13_spill] sm:$0xff] }
 0x3cf   :  { %2414 = vmatpush2.msra.mxu0 %v9499_v44  ;;  %2485 = vmatpush2.msra.mxu1 %v9500_v43 }
 0x3d0   :  { %2415 = vmatprep.subr.mxu0 %v9501_v0  ;;  %2486 = vmatprep.subr.mxu1 %v9502_v32 }
 0x3d1   :  { %2416 = vmatpush2.msra.mxu0 %v9503_v40  ;;  %2487 = vmatpush2.msra.mxu1 %v9504_v33  ;;  %v9537_v40 = vld [vmem:[#allocation14_spill] sm:$0xff] }
 0x3d2   :  { %2417 = vmatprep.subr.mxu0 %v9505_v59  ;;  %2488 = vmatprep.subr.mxu1 %v9506_v36 }
 0x3d3   :  { %2418 = vmatpush2.msra.mxu0 %v9507_v49  ;;  %2489 = vmatpush2.msra.mxu1 %v9508_v51  ;;  %v9538_v49 = vld [vmem:[#allocation15_spill] sm:$0xff] }
 0x3d4   :  { %2419 = vmatprep.subr.mxu0 %v9509_v52  ;;  %2490 = vmatprep.subr.mxu1 %v9510_v53 }
 0x3d5   :  { %2420 = vmatpush2.msra.mxu0 %v9511_v54  ;;  %2491 = vmatpush2.msra.mxu1 %v9512_v55 }
 0x3d6   :  { %2421 = vmatprep.subr.mxu0 %v9513_v56  ;;  %2492 = vmatprep.subr.mxu1 %v9514_v58 }
 0x3d7   :  { %2422 = vmatpush2.msra.mxu0 %v9515_v60  ;;  %2493 = vmatpush2.msra.mxu1 %v9516_v61  ;;  %v9539_v60 = vld [vmem:[#allocation135_spill] sm:$0xff] }
 0x3d8   :  { %2423 = vmatprep.subr.mxu0 %v9517_v62  ;;  %2494 = vmatprep.subr.mxu1 %v9518_v63 }
 0x3d9   :  { %2424 = vmatpush2.msra.mxu0 %v9519_v1  ;;  %2495 = vmatpush2.msra.mxu1 %v9520_v2 }
 0x3da   :  { %2425 = vmatprep.subr.mxu0 %v9521_v3  ;;  %2496 = vmatprep.subr.mxu1 %v9522_v4  ;;  %v9540_v3 = vld [vmem:[#allocation137_spill] sm:$0xff] }
 0x3db   :  { %2426 = vmatpush2.msra.mxu0 %v9523_v6  ;;  %2497 = vmatpush2.msra.mxu1 %v9524_v7 }
 0x3dc   :  { %2427 = vmatprep.subr.mxu0 %v9525_v9  ;;  %2498 = vmatprep.subr.mxu1 %v9526_v11 }
 0x3dd   :  { %2428 = vmatpush2.msra.mxu0 %v9527_v12  ;;  %2499 = vmatpush2.msra.mxu1 %v9528_v13 }
 0x3de   :  { %2429 = vmatprep.subr.mxu0 %v9529_v14  ;;  %2500 = vmatprep.subr.mxu1 %v9530_v15  ;;  %v9541_v15 = vld [vmem:[#allocation138_spill] sm:$0xff] }
 0x3df   :  { %2430 = vmatpush2.msra.mxu0 %v9531_v16  ;;  %2501 = vmatpush2.msra.mxu1 %v9532_v17  ;;  %v9542_v17 = vld [vmem:[#allocation136_spill] sm:$0xff] }
 0x3e0   :  { %2602 = vmatprep.subr.mxu0 %v9533_v18  ;;  %2673 = vmatprep.subr.mxu1 %v9534_v21 }
 0x43e   :  { %v1900_v22 = vpop.f32.mrf.mxu0  ;;  %v1971_v43 = vpop.f32.mrf.mxu1 }
 0x43f   :  { %v1901_v30 = vadd.f32 %v1900_v22, %v9535_v24  ;;  %v1972_v51 = vadd.f32 %v1971_v43, %v9538_v49 }
 0x440   :  { %v1902_v47 = vpop.f32.mrf.mxu0  ;;  %v1973_v32 = vpop.f32.mrf.mxu1 }
 0x441   :  { %v4719_v29 = vmul.f32 -1.442695, %v1901_v30  ;;  %v1903_v44 = vadd.f32 %v1902_v47, %v9536_v34  ;;  %v1974_v33 = vadd.f32 %v1973_v32, %v9537_v40 }
 0x443   :  { %4842 = vpow2.f32 %v4719_v29  ;;  %v4720_v0 = vmul.f32 -1.442695, %v1903_v44  ;;  %v4721_v59 = vmul.f32 -1.442695, %v1974_v33 }
 0x445   :  { %4844 = vpow2.f32 %v4720_v0 }
 0x446   :  { %4846 = vpow2.f32 %v4721_v59 }
 0x450   :  { %v4843_v36 = vpop.eup %4842 }
 0x451   :  { %v1979_v52 = vadd.f32 1.0, %v4843_v36 }
 0x452   :  { %v4845_v53 = vpop.eup %4844 }
 0x453   :  { %4848 = vrcp.f32 %v1979_v52  ;;  %v1985_v54 = vadd.f32 1.0, %v4845_v53  ;;  %v4847_v55 = vpop.eup %4846 }
 0x454   :  { %4850 = vtanh.f32 %v1972_v51  ;;  %v1992_v9 = vadd.f32 1.0, %v4847_v55 }
 0x455   :  { %4852 = vrcp.f32 %v1985_v54 }
 0x45f   :  { %v2135_v56 = vpop.f32.mrf.mxu0  ;;  %v2206_v11 = vpop.f32.mrf.mxu1 }
 0x460   :  { %v4849_v58 = vpop.eup %4848  ;;  %v2211_v61 = vadd.f32 %v2135_v56, %v9539_v60  ;;  %v2213_v18 = vadd.f32 %v2206_v11, %v9542_v17  ;;  %v9545_v60 = vld [vmem:[#allocation165_spill] sm:$0xff]  ;;  %v6979_v11 = vld [vmem:[#allocation3 + $0x58] sm:$0xff]  ;;  %v6995_v17 = vld [vmem:[#allocation3 + $0x20] sm:$0xff] }
 0x461   :  { %v4851_v62 = vpop.eup %4850  ;;  %v2137_v63 = vpop.f32.mrf.mxu0 }
 0x462   :  { %v4853_v1 = vpop.eup %4852  ;;  %v4722_v2 = vmul.f32 -1.442695, %v2211_v61  ;;  %v2212_v4 = vadd.f32 %v2137_v63, %v9540_v3  ;;  %v1996_v6 = vmul.f32 %v4851_v62, %v4849_v58  ;;  %v2208_v14 = vpop.f32.mrf.mxu1  ;;  %v9544_v58 = vld [vmem:[#allocation164_spill] sm:$0xff]  ;;  %v6949_v61 = vld [vmem:[#allocation3 + $0xb0] sm:$0xff]  ;;  %v6953_v62 = vld [vmem:[#allocation3 + $0x88] sm:$0xff] }
 0x463   :  { %v1995_v7 = vmul.f32 %v4853_v1, %v6602_v27  ;;  %v2214_v16 = vadd.f32 %v2208_v14, %v9541_v15  ;;  %v6955_v63 = vld [vmem:[#allocation3 + $0x98] sm:$0xff]  ;;  %v6959_v1 = vld [vmem:[#allocation3 + $0x80] sm:$0xff]  ;;  %v6965_v3 = vld [vmem:[#allocation3 + $0x68] sm:$0xff] }
 0x464   :  { %4854 = vpow2.f32 %v4722_v2  ;;  %v4723_v12 = vmul.f32 -1.442695, %v2212_v4  ;;  %v6961_v2 = vld [vmem:[#allocation3 + $0x90] sm:$0xff]  ;;  %v6967_v4 = vld [vmem:[#allocation3 + $0x78] sm:$0xff]  ;;  %v6989_v15 = vld [vmem:[#allocation3 + $0x28] sm:$0xff] }
 0x465   :  { %v6874_v13 = vadd.f32 %v1996_v6, %v1995_v7  ;;  %v4724_v21 = vmul.f32 -1.442695, %v2214_v16  ;;  %v6971_v6 = vld [vmem:[#allocation3 + $0x60] sm:$0xff]  ;;  %v6973_v7 = vld [vmem:[#allocation3 + $0x70] sm:$0xff]  ;;  %v6991_v16 = vld [vmem:[#allocation3 + $0x38] sm:$0xff] }
 0x466   :  { %4856 = vpow2.f32 %v4723_v12  ;;  %v6983_v12 = vld [vmem:[#allocation3 + $0x40] sm:$0xff]  ;;  %v6985_v14 = vld [vmem:[#allocation3 + $0x50] sm:$0xff] }
 0x467   :  { %4858 = vrcp.f32 %v1992_v9  ;;  %v6977_v9 = vld [vmem:[#allocation3 + $0x48] sm:$0xff] }
 0x468   :  { %4860 = vtanh.f32 %v6874_v13 }
 0x469   :  { %4862 = vtanh.f32 %v2213_v18  ;;  %v6997_v18 = vld [vmem:[#allocation3 + $0x30] sm:$0xff] }
 0x46a   :  { %4864 = vpow2.f32 %v4724_v21  ;;  %v7001_v21 = vld [vmem:[#allocation3 + $0x8] sm:$0xff] }
 0x471   :  { %v4855_v22 = vpop.eup %4854 }
 0x472   :  { %v2218_v30 = vadd.f32 1.0, %v4855_v22  ;;  %v7003_v22 = vld [vmem:[#allocation3 + $0x18] sm:$0xff] }
 0x473   :  { %v4857_v27 = vpop.eup %4856 }
 0x474   :  { %v4859_v47 = vpop.eup %4858  ;;  %4866 = vrcp.f32 %v2218_v30  ;;  %v2224_v29 = vadd.f32 1.0, %v4857_v27  ;;  %v7007_v30 = vld [vmem:[#allocation3] sm:$0xff]  ;;  %v7011_v27 = vld [vmem:[#allocation3 + $0x10] sm:$0xff] }
 0x475   :  { %v4861_v44 = vpop.eup %4860 }
 0x476   :  { %4868 = vrcp.f32 %v2224_v29  ;;  %v1999_v43 = vmul.f32 %v4861_v44, %v4859_v47  ;;  %v4863_v0 = vpop.eup %4862  ;;  %v7021_v47 = vld [vmem:[#allocation6 + $0x1e8] sm:$0xff]  ;;  %v7023_v29 = vld [vmem:[#allocation6 + $0x1f8] sm:$0xff]  ;;  %v7027_v44 = vld [vmem:[#allocation6 + $0x1e0] sm:$0xff] }
 0x477   :  { %v4865_v32 = vpop.eup %4864 }
 0x478   :  { %2000 = vst [vmem:[#allocation8 + $0x10] sm:$0xff] %v1999_v43  ;;  %2431 = vmatprep.mubr.f32.mxu0 %v1999_v43  ;;  %2502 = vmatprep.mubr.f32.mxu1 %v1999_v43  ;;  %v2231_v51 = vadd.f32 1.0, %v4865_v32  ;;  %v7029_v43 = vld [vmem:[#allocation6 + $0x1f0] sm:$0xff]  ;;  %v7035_v32 = vld [vmem:[#allocation6 + $0x1d8] sm:$0xff] }
 0x47a   :  { %4870 = vrcp.f32 %v2231_v51  ;;  %v7047_v51 = vld [vmem:[#allocation6 + $0x1b8] sm:$0xff] }
 0x47b   :  { %9554 = vst [vmem:[#allocation132_spill] sm:$0xff] %v7047_v51 }
 0x481   :  { %v4867_v33 = vpop.eup %4866 }
 0x482   :  { %v2235_v59 = vmul.f32 %v4867_v33, %v4863_v0  ;;  %v7033_v0 = vld [vmem:[#allocation6 + $0x1c8] sm:$0xff]  ;;  %v7039_v33 = vld [vmem:[#allocation6 + $0x1c0] sm:$0xff] }
 0x483   :  { %v4869_v36 = vpop.eup %4868 }
 0x484   :  { %v2234_v52 = vmul.f32 %v4869_v36, %v6608_v28  ;;  %v9543_v28 = vld [vmem:[#allocation163_spill] sm:$0xff]  ;;  %v7045_v36 = vld [vmem:[#allocation6 + $0x1a8] sm:$0xff] }
 0x485   :  { %9553 = vst [vmem:[#allocation134_spill] sm:$0xff] %v7045_v36 }
 0x486   :  { %v6880_v53 = vadd.f32 %v2235_v59, %v2234_v52  ;;  %v7041_v59 = vld [vmem:[#allocation6 + $0x1d0] sm:$0xff]  ;;  %v7051_v52 = vld [vmem:[#allocation6 + $0x1a0] sm:$0xff] }
 0x487   :  { %v4871_v54 = vpop.eup %4870  ;;  %9552 = vst [vmem:[#allocation133_spill] sm:$0xff] %v7041_v59  ;;  %9555 = vst [vmem:[#allocation16_spill] sm:$0xff] %v7051_v52 }
 0x488   :  { %4872 = vtanh.f32 %v6880_v53 }
 0x495   :  { %v4873_v55 = vpop.eup %4872 }
 0x496   :  { %v6883_v56 = vmul.f32 %v4873_v55, %v4871_v54  ;;  %v7053_v54 = vld [vmem:[#allocation6 + $0x1b0] sm:$0xff]  ;;  %v7057_v55 = vld [vmem:[#allocation6 + $0x188] sm:$0xff] }
 0x497   :  { %9556 = vst [vmem:[#allocation17_spill] sm:$0xff] %v7053_v54  ;;  %9557 = vst [vmem:[#allocation18_spill] sm:$0xff] %v7057_v55 }
 0x498   :  { %2432 = vmatmul.mubr.f32.vlgmr.msra.gmra.mxu0 %v6883_v56  ;;  %2503 = vmatmul.mubr.f32.vlgmr.msra.gmra.mxu1 %v6883_v56 }
 0x499   :  { %2603 = vmatpush1.msra.mxu0 %v6613_v35  ;;  %2674 = vmatpush1.msra.mxu1 %v6615_v42  ;;  %v9546_v35 = vld [vmem:[#allocation166_spill] sm:$0xff]  ;;  %v9547_v42 = vld [vmem:[#allocation167_spill] sm:$0xff] }
 0x49a   :  { %2604 = vmatprep.subr.mxu0 %v6617_v8  ;;  %2675 = vmatprep.subr.mxu1 %v6619_v41  ;;  %v9548_v8 = vld [vmem:[#allocation168_spill] sm:$0xff]  ;;  %v9549_v41 = vld [vmem:[#allocation169_spill] sm:$0xff] }
 0x49b   :  { %2605 = vmatpush1.msra.mxu0 %v6623_v20  ;;  %2676 = vmatpush1.msra.mxu1 %v6625_v57  ;;  %v9550_v20 = vld [vmem:[#allocation170_spill] sm:$0xff]  ;;  %v9551_v57 = vld [vmem:[#allocation131_spill] sm:$0xff] }
 0x49c   :  { %2606 = vmatprep.subr.mxu0 %v6629_v25  ;;  %2677 = vmatprep.subr.mxu1 %v6631_v19  ;;  %v6911_v25 = vld [vmem:[#allocation3 + $0x100] sm:$0xff]  ;;  %v6913_v19 = vld [vmem:[#allocation3 + $0x110] sm:$0xff] }
 0x49d   :  { %2607 = vmatpush1.msra.mxu0 %v9543_v28  ;;  %2678 = vmatpush1.msra.mxu1 %v9544_v58  ;;  %v7063_v28 = vld [vmem:[#allocation6 + $0x180] sm:$0xff]  ;;  %v7065_v58 = vld [vmem:[#allocation6 + $0x190] sm:$0xff] }
 0x49e   :  { %2608 = vmatprep.subr.mxu0 %v9545_v60  ;;  %2679 = vmatprep.subr.mxu1 %v9546_v35  ;;  %9559 = vst [vmem:[#allocation20_spill] sm:$0xff] %v7063_v28  ;;  %9560 = vst [vmem:[#allocation21_spill] sm:$0xff] %v7065_v58  ;;  %v7069_v60 = vld [vmem:[#allocation6 + $0x168] sm:$0xff]  ;;  %v7071_v35 = vld [vmem:[#allocation6 + $0x178] sm:$0xff] }
 0x49f   :  { %2609 = vmatpush1.msra.mxu0 %v9547_v42  ;;  %2680 = vmatpush1.msra.mxu1 %v9548_v8  ;;  %9561 = vst [vmem:[#allocation22_spill] sm:$0xff] %v7069_v60  ;;  %9562 = vst [vmem:[#allocation23_spill] sm:$0xff] %v7071_v35  ;;  %v7075_v42 = vld [vmem:[#allocation6 + $0x160] sm:$0xff]  ;;  %v7077_v8 = vld [vmem:[#allocation6 + $0x170] sm:$0xff] }
 0x4a0   :  { %2610 = vmatprep.subr.mxu0 %v9549_v41  ;;  %2681 = vmatprep.subr.mxu1 %v9550_v20  ;;  %9563 = vst [vmem:[#allocation24_spill] sm:$0xff] %v7075_v42  ;;  %9564 = vst [vmem:[#allocation25_spill] sm:$0xff] %v7077_v8  ;;  %v7081_v41 = vld [vmem:[#allocation6 + $0x148] sm:$0xff]  ;;  %v7083_v20 = vld [vmem:[#allocation6 + $0x158] sm:$0xff] }
 0x4a1   :  { %2611 = vmatpush1.msra.mxu0 %v9551_v57  ;;  %2682 = vmatpush1.msra.mxu1 %v6661_v23  ;;  %v6917_v23 = vld [vmem:[#allocation3 + $0xe8] sm:$0xff]  ;;  %9565 = vst [vmem:[#allocation26_spill] sm:$0xff] %v7081_v41  ;;  %9566 = vst [vmem:[#allocation27_spill] sm:$0xff] %v7083_v20  ;;  %v7087_v57 = vld [vmem:[#allocation6 + $0x140] sm:$0xff] }
 0x4a2   :  { %2612 = vmatprep.subr.mxu0 %v6665_v10  ;;  %2683 = vmatprep.subr.mxu1 %v6667_v5  ;;  %v6919_v10 = vld [vmem:[#allocation3 + $0xf8] sm:$0xff]  ;;  %v6923_v5 = vld [vmem:[#allocation3 + $0xe0] sm:$0xff]  ;;  %9567 = vst [vmem:[#allocation28_spill] sm:$0xff] %v7087_v57 }
 0x4a3   :  { %2613 = vmatpush1.msra.mxu0 %v6671_v46  ;;  %2684 = vmatpush1.msra.mxu1 %v6673_v39  ;;  %v6925_v46 = vld [vmem:[#allocation3 + $0xf0] sm:$0xff]  ;;  %v6929_v39 = vld [vmem:[#allocation3 + $0xc8] sm:$0xff] }
 0x4a4   :  { %2614 = vmatprep.subr.mxu0 %v6677_v26  ;;  %2685 = vmatprep.subr.mxu1 %v6679_v37  ;;  %v6931_v26 = vld [vmem:[#allocation3 + $0xd8] sm:$0xff]  ;;  %v6935_v37 = vld [vmem:[#allocation3 + $0xc0] sm:$0xff] }
 0x4a5   :  { %2615 = vmatpush1.msra.mxu0 %v6683_v31  ;;  %2686 = vmatpush1.msra.mxu1 %v6685_v50  ;;  %v6937_v31 = vld [vmem:[#allocation3 + $0xd0] sm:$0xff]  ;;  %v6941_v50 = vld [vmem:[#allocation3 + $0xa8] sm:$0xff] }
 0x4a6   :  { %2616 = vmatprep.subr.mxu0 %v6689_v45  ;;  %2687 = vmatprep.subr.mxu1 %v6691_v38  ;;  %v6943_v45 = vld [vmem:[#allocation3 + $0xb8] sm:$0xff]  ;;  %v6947_v38 = vld [vmem:[#allocation3 + $0xa0] sm:$0xff] }
 0x4a7   :  { %2617 = vmatpush1.msra.mxu0 %v6911_v25  ;;  %2688 = vmatpush1.msra.mxu1 %v6913_v19 }
 0x4a8   :  { %2618 = vmatprep.subr.mxu0 %v6917_v23  ;;  %2689 = vmatprep.subr.mxu1 %v6919_v10 }
 0x4a9   :  { %2619 = vmatpush1.msra.mxu0 %v6923_v5  ;;  %2690 = vmatpush1.msra.mxu1 %v6925_v46 }
 0x4aa   :  { %2620 = vmatprep.subr.mxu0 %v6929_v39  ;;  %2691 = vmatprep.subr.mxu1 %v6931_v26 }
 0x4ab   :  { %2621 = vmatpush1.msra.mxu0 %v6935_v37  ;;  %2692 = vmatpush1.msra.mxu1 %v6937_v31 }
 0x4ac   :  { %2622 = vmatprep.subr.mxu0 %v6941_v50  ;;  %2693 = vmatprep.subr.mxu1 %v6943_v45 }
 0x4ad   :  { %2623 = vmatpush1.msra.mxu0 %v6947_v38  ;;  %2694 = vmatpush1.msra.mxu1 %v6949_v61 }
 0x4ae   :  { %2624 = vmatprep.subr.mxu0 %v6953_v62  ;;  %2695 = vmatprep.subr.mxu1 %v6955_v63 }
 0x4af   :  { %2625 = vmatpush1.msra.mxu0 %v6959_v1  ;;  %2696 = vmatpush1.msra.mxu1 %v6961_v2 }
 0x4b0   :  { %2626 = vmatprep.subr.mxu0 %v6965_v3  ;;  %2697 = vmatprep.subr.mxu1 %v6967_v4 }
 0x4b1   :  { %2627 = vmatpush1.msra.mxu0 %v6971_v6  ;;  %2698 = vmatpush1.msra.mxu1 %v6973_v7 }
 0x4b2   :  { %2628 = vmatprep.subr.mxu0 %v6977_v9  ;;  %2699 = vmatprep.subr.mxu1 %v6979_v11 }
 0x4b3   :  { %2629 = vmatpush1.msra.mxu0 %v6983_v12  ;;  %2700 = vmatpush1.msra.mxu1 %v6985_v14 }
 0x4b4   :  { %2630 = vmatprep.subr.mxu0 %v6989_v15  ;;  %2701 = vmatprep.subr.mxu1 %v6991_v16 }
 0x4b5   :  { %2631 = vmatpush1.msra.mxu0 %v6995_v17  ;;  %2702 = vmatpush1.msra.mxu1 %v6997_v18 }
 0x4b6   :  { %2632 = vmatprep.subr.mxu0 %v7001_v21  ;;  %2703 = vmatprep.subr.mxu1 %v7003_v22 }
 0x4b7   :  { %2633 = vmatpush1.msra.mxu0 %v7007_v30  ;;  %2666 = vmatprep.mubr.f32.mxu0 %v9132_v48 }
 0x4b8   :  { %2704 = vmatpush1.msra.mxu1 %v7011_v27  ;;  %2737 = vmatprep.mubr.f32.mxu1 %v9132_v48 }
 0x4b9   :  { %2667 = vmatmul.mubr.f32.vlgmr.msra.gmra.mxu0 %v6883_v56  ;;  %2738 = vmatmul.mubr.f32.vlgmr.msra.gmra.mxu1 %v6883_v56  ;;  %v7059_v56 = vld [vmem:[#allocation6 + $0x198] sm:$0xff] }
 0x4ba   :  { %2900 = vmatprep.subr.mxu0 %v7021_v47  ;;  %2971 = vmatprep.subr.mxu1 %v7023_v29  ;;  %9558 = vst [vmem:[#allocation19_spill] sm:$0xff] %v7059_v56 }
 0x4bb   :  { %2901 = vmatpush1.msra.mxu0 %v7027_v44  ;;  %2972 = vmatpush1.msra.mxu1 %v7029_v43 }
 0x4bc   :  { %2902 = vmatprep.subr.mxu0 %v7033_v0  ;;  %2973 = vmatprep.subr.mxu1 %v7035_v32 }
 0x4bd   :  { %2903 = vmatpush1.msra.mxu0 %v7039_v33  ;;  %2974 = vmatpush1.msra.mxu1 %v7041_v59 }
 0x4be   :  { %2904 = vmatprep.subr.mxu0 %v7045_v36  ;;  %2975 = vmatprep.subr.mxu1 %v7047_v51 }
 0x4bf   :  { %2905 = vmatpush1.msra.mxu0 %v7051_v52  ;;  %2976 = vmatpush1.msra.mxu1 %v7053_v54 }
 0x4c0   :  { %2906 = vmatprep.subr.mxu0 %v7057_v55  ;;  %2977 = vmatprep.subr.mxu1 %v7059_v56  ;;  %v7331_v56 = vld [vmem:[#allocation6 + $0x2b8] sm:$0xff]  ;;  %v7347_v55 = vld [vmem:[#allocation6 + $0x280] sm:$0xff] }
 0x4c1   :  { %2907 = vmatpush1.msra.mxu0 %v7063_v28  ;;  %2978 = vmatpush1.msra.mxu1 %v7065_v58  ;;  %v7315_v58 = vld [vmem:[#allocation6 + $0x2f0] sm:$0xff]  ;;  %v7323_v28 = vld [vmem:[#allocation6 + $0x2c0] sm:$0xff]  ;;  %9650 = vst [vmem:[#allocation111_spill] sm:$0xff] %v7331_v56  ;;  %9655 = vst [vmem:[#allocation116_spill] sm:$0xff] %v7347_v55 }
 0x4c2   :  { %2908 = vmatprep.subr.mxu0 %v7069_v60  ;;  %2979 = vmatprep.subr.mxu1 %v7071_v35  ;;  %v7089_v60 = vld [vmem:[#allocation6 + $0x150] sm:$0xff]  ;;  %v7093_v35 = vld [vmem:[#allocation6 + $0x128] sm:$0xff]  ;;  %9644 = vst [vmem:[#allocation105_spill] sm:$0xff] %v7315_v58  ;;  %9647 = vst [vmem:[#allocation108_spill] sm:$0xff] %v7323_v28 }
 0x4c3   :  { %2909 = vmatpush1.msra.mxu0 %v7075_v42  ;;  %2980 = vmatpush1.msra.mxu1 %v7077_v8  ;;  %9568 = vst [vmem:[#allocation29_spill] sm:$0xff] %v7089_v60  ;;  %9569 = vst [vmem:[#allocation30_spill] sm:$0xff] %v7093_v35  ;;  %v7095_v42 = vld [vmem:[#allocation6 + $0x138] sm:$0xff]  ;;  %v7099_v8 = vld [vmem:[#allocation6 + $0x120] sm:$0xff] }
 0x4c4   :  { %2910 = vmatprep.subr.mxu0 %v7081_v41  ;;  %2981 = vmatprep.subr.mxu1 %v7083_v20  ;;  %9570 = vst [vmem:[#allocation31_spill] sm:$0xff] %v7095_v42  ;;  %9571 = vst [vmem:[#allocation32_spill] sm:$0xff] %v7099_v8  ;;  %v7101_v41 = vld [vmem:[#allocation6 + $0x130] sm:$0xff]  ;;  %v7105_v20 = vld [vmem:[#allocation6 + $0x108] sm:$0xff] }
 0x4c5   :  { %2911 = vmatpush1.msra.mxu0 %v7087_v57  ;;  %2982 = vmatpush1.msra.mxu1 %v7089_v60  ;;  %9572 = vst [vmem:[#allocation33_spill] sm:$0xff] %v7101_v41  ;;  %9573 = vst [vmem:[#allocation34_spill] sm:$0xff] %v7105_v20  ;;  %v7107_v57 = vld [vmem:[#allocation6 + $0x118] sm:$0xff]  ;;  %v7111_v60 = vld [vmem:[#allocation6 + $0x100] sm:$0xff] }
 0x4c6   :  { %2912 = vmatprep.subr.mxu0 %v7093_v35  ;;  %2983 = vmatprep.subr.mxu1 %v7095_v42  ;;  %9574 = vst [vmem:[#allocation35_spill] sm:$0xff] %v7107_v57  ;;  %9575 = vst [vmem:[#allocation36_spill] sm:$0xff] %v7111_v60  ;;  %v7113_v35 = vld [vmem:[#allocation6 + $0x110] sm:$0xff]  ;;  %v7117_v42 = vld [vmem:[#allocation6 + $0xe8] sm:$0xff] }
 0x4c7   :  { %2913 = vmatpush1.msra.mxu0 %v7099_v8  ;;  %2984 = vmatpush1.msra.mxu1 %v7101_v41  ;;  %9576 = vst [vmem:[#allocation37_spill] sm:$0xff] %v7113_v35  ;;  %9577 = vst [vmem:[#allocation38_spill] sm:$0xff] %v7117_v42  ;;  %v7119_v8 = vld [vmem:[#allocation6 + $0xf8] sm:$0xff]  ;;  %v7123_v41 = vld [vmem:[#allocation6 + $0xe0] sm:$0xff] }
 0x4c8   :  { %2914 = vmatprep.subr.mxu0 %v7105_v20  ;;  %2985 = vmatprep.subr.mxu1 %v7107_v57  ;;  %9578 = vst [vmem:[#allocation39_spill] sm:$0xff] %v7119_v8  ;;  %9579 = vst [vmem:[#allocation40_spill] sm:$0xff] %v7123_v41  ;;  %v7125_v20 = vld [vmem:[#allocation6 + $0xf0] sm:$0xff]  ;;  %v7129_v57 = vld [vmem:[#allocation6 + $0xc8] sm:$0xff] }
 0x4c9   :  { %2915 = vmatpush1.msra.mxu0 %v7111_v60  ;;  %2986 = vmatpush1.msra.mxu1 %v7113_v35  ;;  %9580 = vst [vmem:[#allocation41_spill] sm:$0xff] %v7125_v20  ;;  %9581 = vst [vmem:[#allocation42_spill] sm:$0xff] %v7129_v57  ;;  %v7131_v60 = vld [vmem:[#allocation6 + $0xd8] sm:$0xff]  ;;  %v7135_v35 = vld [vmem:[#allocation6 + $0xc0] sm:$0xff] }
 0x4ca   :  { %2916 = vmatprep.subr.mxu0 %v7117_v42  ;;  %2987 = vmatprep.subr.mxu1 %v7119_v8  ;;  %9582 = vst [vmem:[#allocation43_spill] sm:$0xff] %v7131_v60  ;;  %9583 = vst [vmem:[#allocation44_spill] sm:$0xff] %v7135_v35  ;;  %v7137_v42 = vld [vmem:[#allocation6 + $0xd0] sm:$0xff]  ;;  %v7141_v8 = vld [vmem:[#allocation6 + $0xa8] sm:$0xff] }
 0x4cb   :  { %2917 = vmatpush1.msra.mxu0 %v7123_v41  ;;  %2988 = vmatpush1.msra.mxu1 %v7125_v20  ;;  %9584 = vst [vmem:[#allocation45_spill] sm:$0xff] %v7137_v42  ;;  %9585 = vst [vmem:[#allocation46_spill] sm:$0xff] %v7141_v8  ;;  %v7143_v41 = vld [vmem:[#allocation6 + $0xb8] sm:$0xff]  ;;  %v7147_v20 = vld [vmem:[#allocation6 + $0xa0] sm:$0xff] }
 0x4cc   :  { %2918 = vmatprep.subr.mxu0 %v7129_v57  ;;  %2989 = vmatprep.subr.mxu1 %v7131_v60  ;;  %9586 = vst [vmem:[#allocation47_spill] sm:$0xff] %v7143_v41  ;;  %9587 = vst [vmem:[#allocation48_spill] sm:$0xff] %v7147_v20  ;;  %v7149_v57 = vld [vmem:[#allocation6 + $0xb0] sm:$0xff]  ;;  %v7153_v60 = vld [vmem:[#allocation6 + $0x88] sm:$0xff] }
 0x4cd   :  { %2919 = vmatpush1.msra.mxu0 %v7135_v35  ;;  %2990 = vmatpush1.msra.mxu1 %v7137_v42  ;;  %9588 = vst [vmem:[#allocation49_spill] sm:$0xff] %v7149_v57  ;;  %9589 = vst [vmem:[#allocation50_spill] sm:$0xff] %v7153_v60  ;;  %v7155_v35 = vld [vmem:[#allocation6 + $0x98] sm:$0xff]  ;;  %v7159_v42 = vld [vmem:[#allocation6 + $0x80] sm:$0xff] }
 0x4ce   :  { %2920 = vmatprep.subr.mxu0 %v7141_v8  ;;  %2991 = vmatprep.subr.mxu1 %v7143_v41  ;;  %9590 = vst [vmem:[#allocation51_spill] sm:$0xff] %v7155_v35  ;;  %9591 = vst [vmem:[#allocation52_spill] sm:$0xff] %v7159_v42  ;;  %v7161_v8 = vld [vmem:[#allocation6 + $0x90] sm:$0xff]  ;;  %v7165_v41 = vld [vmem:[#allocation6 + $0x68] sm:$0xff] }
 0x4cf   :  { %2921 = vmatpush1.msra.mxu0 %v7147_v20  ;;  %2992 = vmatpush1.msra.mxu1 %v7149_v57  ;;  %9592 = vst [vmem:[#allocation53_spill] sm:$0xff] %v7161_v8  ;;  %9593 = vst [vmem:[#allocation54_spill] sm:$0xff] %v7165_v41  ;;  %v7167_v20 = vld [vmem:[#allocation6 + $0x78] sm:$0xff]  ;;  %v7171_v57 = vld [vmem:[#allocation6 + $0x60] sm:$0xff] }
 0x4d0   :  { %2922 = vmatprep.subr.mxu0 %v7153_v60  ;;  %2993 = vmatprep.subr.mxu1 %v7155_v35  ;;  %9594 = vst [vmem:[#allocation55_spill] sm:$0xff] %v7167_v20  ;;  %9595 = vst [vmem:[#allocation56_spill] sm:$0xff] %v7171_v57  ;;  %v7173_v60 = vld [vmem:[#allocation6 + $0x70] sm:$0xff]  ;;  %v7177_v35 = vld [vmem:[#allocation6 + $0x48] sm:$0xff] }
 0x4d1   :  { %2923 = vmatpush1.msra.mxu0 %v7159_v42  ;;  %2994 = vmatpush1.msra.mxu1 %v7161_v8  ;;  %9596 = vst [vmem:[#allocation57_spill] sm:$0xff] %v7173_v60  ;;  %9597 = vst [vmem:[#allocation58_spill] sm:$0xff] %v7177_v35  ;;  %v7179_v42 = vld [vmem:[#allocation6 + $0x58] sm:$0xff]  ;;  %v7183_v8 = vld [vmem:[#allocation6 + $0x40] sm:$0xff] }
 0x4d2   :  { %2924 = vmatprep.subr.mxu0 %v7165_v41  ;;  %2995 = vmatprep.subr.mxu1 %v7167_v20  ;;  %9598 = vst [vmem:[#allocation59_spill] sm:$0xff] %v7179_v42  ;;  %9599 = vst [vmem:[#allocation60_spill] sm:$0xff] %v7183_v8  ;;  %v7185_v41 = vld [vmem:[#allocation6 + $0x50] sm:$0xff]  ;;  %v7189_v20 = vld [vmem:[#allocation6 + $0x28] sm:$0xff] }
 0x4d3   :  { %2925 = vmatpush1.msra.mxu0 %v7171_v57  ;;  %2996 = vmatpush1.msra.mxu1 %v7173_v60  ;;  %9600 = vst [vmem:[#allocation61_spill] sm:$0xff] %v7185_v41  ;;  %9601 = vst [vmem:[#allocation62_spill] sm:$0xff] %v7189_v20  ;;  %v7191_v57 = vld [vmem:[#allocation6 + $0x38] sm:$0xff]  ;;  %v7195_v60 = vld [vmem:[#allocation6 + $0x20] sm:$0xff] }
 0x4d4   :  { %2926 = vmatprep.subr.mxu0 %v7177_v35  ;;  %2997 = vmatprep.subr.mxu1 %v7179_v42  ;;  %9602 = vst [vmem:[#allocation63_spill] sm:$0xff] %v7191_v57  ;;  %9603 = vst [vmem:[#allocation64_spill] sm:$0xff] %v7195_v60  ;;  %v7197_v35 = vld [vmem:[#allocation6 + $0x30] sm:$0xff]  ;;  %v7201_v42 = vld [vmem:[#allocation6 + $0x8] sm:$0xff] }
 0x4d5   :  { %2927 = vmatpush1.msra.mxu0 %v7183_v8  ;;  %2998 = vmatpush1.msra.mxu1 %v7185_v41  ;;  %9604 = vst [vmem:[#allocation65_spill] sm:$0xff] %v7197_v35  ;;  %9605 = vst [vmem:[#allocation66_spill] sm:$0xff] %v7201_v42  ;;  %v7203_v8 = vld [vmem:[#allocation6 + $0x18] sm:$0xff]  ;;  %v7207_v41 = vld [vmem:[#allocation6] sm:$0xff] }
 0x4d6   :  { %2928 = vmatprep.subr.mxu0 %v7189_v20  ;;  %2999 = vmatprep.subr.mxu1 %v7191_v57  ;;  %9606 = vst [vmem:[#allocation67_spill] sm:$0xff] %v7203_v8  ;;  %9607 = vst [vmem:[#allocation68_spill] sm:$0xff] %v7207_v41  ;;  %v7209_v20 = vld [vmem:[#allocation6 + $0x10] sm:$0xff]  ;;  %v7213_v57 = vld [vmem:[#allocation6 + $0x3e8] sm:$0xff] }
 0x4d7   :  { %2929 = vmatpush1.msra.mxu0 %v7195_v60  ;;  %3000 = vmatpush1.msra.mxu1 %v7197_v35  ;;  %9608 = vst [vmem:[#allocation69_spill] sm:$0xff] %v7209_v20  ;;  %9609 = vst [vmem:[#allocation70_spill] sm:$0xff] %v7213_v57  ;;  %v7215_v60 = vld [vmem:[#allocation6 + $0x3f8] sm:$0xff]  ;;  %v7219_v35 = vld [vmem:[#allocation6 + $0x3e0] sm:$0xff] }
 0x4d8   :  { %2930 = vmatprep.subr.mxu0 %v7201_v42  ;;  %3001 = vmatprep.subr.mxu1 %v7203_v8  ;;  %9610 = vst [vmem:[#allocation71_spill] sm:$0xff] %v7215_v60  ;;  %9611 = vst [vmem:[#allocation72_spill] sm:$0xff] %v7219_v35  ;;  %v7221_v42 = vld [vmem:[#allocation6 + $0x3f0] sm:$0xff]  ;;  %v7225_v8 = vld [vmem:[#allocation6 + $0x3c8] sm:$0xff] }
 0x4d9   :  { %2931 = vmatpush1.msra.mxu0 %v7207_v41  ;;  %3002 = vmatpush1.msra.mxu1 %v7209_v20  ;;  %9612 = vst [vmem:[#allocation73_spill] sm:$0xff] %v7221_v42  ;;  %9613 = vst [vmem:[#allocation74_spill] sm:$0xff] %v7225_v8  ;;  %v7227_v41 = vld [vmem:[#allocation6 + $0x3d8] sm:$0xff]  ;;  %v7231_v20 = vld [vmem:[#allocation6 + $0x3c0] sm:$0xff] }
 0x4da   :  { %2932 = vmatprep.subr.mxu0 %v7213_v57  ;;  %3003 = vmatprep.subr.mxu1 %v7215_v60  ;;  %9614 = vst [vmem:[#allocation75_spill] sm:$0xff] %v7227_v41  ;;  %9615 = vst [vmem:[#allocation76_spill] sm:$0xff] %v7231_v20  ;;  %v7233_v57 = vld [vmem:[#allocation6 + $0x3d0] sm:$0xff]  ;;  %v7237_v60 = vld [vmem:[#allocation6 + $0x3a8] sm:$0xff] }
 0x4db   :  { %2933 = vmatpush2.msra.mxu0 %v7219_v35  ;;  %3004 = vmatpush2.msra.mxu1 %v7221_v42  ;;  %9616 = vst [vmem:[#allocation77_spill] sm:$0xff] %v7233_v57  ;;  %9617 = vst [vmem:[#allocation78_spill] sm:$0xff] %v7237_v60  ;;  %v7239_v35 = vld [vmem:[#allocation6 + $0x3b8] sm:$0xff]  ;;  %v7243_v42 = vld [vmem:[#allocation6 + $0x3a0] sm:$0xff] }
 0x4dc   :  { %2934 = vmatprep.subr.mxu0 %v7225_v8  ;;  %3005 = vmatprep.subr.mxu1 %v7227_v41  ;;  %9618 = vst [vmem:[#allocation79_spill] sm:$0xff] %v7239_v35  ;;  %9619 = vst [vmem:[#allocation80_spill] sm:$0xff] %v7243_v42  ;;  %v7245_v8 = vld [vmem:[#allocation6 + $0x3b0] sm:$0xff]  ;;  %v7249_v41 = vld [vmem:[#allocation6 + $0x388] sm:$0xff] }
 0x4dd   :  { %2935 = vmatpush2.msra.mxu0 %v7231_v20  ;;  %3006 = vmatpush2.msra.mxu1 %v7233_v57  ;;  %9620 = vst [vmem:[#allocation81_spill] sm:$0xff] %v7245_v8  ;;  %9621 = vst [vmem:[#allocation82_spill] sm:$0xff] %v7249_v41  ;;  %v7251_v20 = vld [vmem:[#allocation6 + $0x398] sm:$0xff]  ;;  %v7255_v57 = vld [vmem:[#allocation6 + $0x380] sm:$0xff] }
 0x4de   :  { %2936 = vmatprep.subr.mxu0 %v7237_v60  ;;  %3007 = vmatprep.subr.mxu1 %v7239_v35  ;;  %9622 = vst [vmem:[#allocation83_spill] sm:$0xff] %v7251_v20  ;;  %9623 = vst [vmem:[#allocation84_spill] sm:$0xff] %v7255_v57  ;;  %v7257_v60 = vld [vmem:[#allocation6 + $0x390] sm:$0xff]  ;;  %v7261_v35 = vld [vmem:[#allocation6 + $0x368] sm:$0xff] }
 0x4df   :  { %2937 = vmatpush2.msra.mxu0 %v7243_v42  ;;  %3008 = vmatpush2.msra.mxu1 %v7245_v8  ;;  %9624 = vst [vmem:[#allocation85_spill] sm:$0xff] %v7257_v60  ;;  %9625 = vst [vmem:[#allocation86_spill] sm:$0xff] %v7261_v35  ;;  %v7263_v42 = vld [vmem:[#allocation6 + $0x378] sm:$0xff]  ;;  %v7267_v8 = vld [vmem:[#allocation6 + $0x360] sm:$0xff] }
 0x4e0   :  { %2938 = vmatprep.subr.mxu0 %v7249_v41  ;;  %3009 = vmatprep.subr.mxu1 %v7251_v20  ;;  %9626 = vst [vmem:[#allocation87_spill] sm:$0xff] %v7263_v42  ;;  %9627 = vst [vmem:[#allocation88_spill] sm:$0xff] %v7267_v8  ;;  %v7269_v41 = vld [vmem:[#allocation6 + $0x370] sm:$0xff]  ;;  %v7273_v20 = vld [vmem:[#allocation6 + $0x348] sm:$0xff] }
 0x4e1   :  { %2939 = vmatpush2.msra.mxu0 %v7255_v57  ;;  %3010 = vmatpush2.msra.mxu1 %v7257_v60  ;;  %9628 = vst [vmem:[#allocation89_spill] sm:$0xff] %v7269_v41  ;;  %9629 = vst [vmem:[#allocation90_spill] sm:$0xff] %v7273_v20  ;;  %v7275_v57 = vld [vmem:[#allocation6 + $0x358] sm:$0xff]  ;;  %v7279_v60 = vld [vmem:[#allocation6 + $0x340] sm:$0xff] }
 0x4e2   :  { %2940 = vmatprep.subr.mxu0 %v7261_v35  ;;  %3011 = vmatprep.subr.mxu1 %v7263_v42  ;;  %9630 = vst [vmem:[#allocation91_spill] sm:$0xff] %v7275_v57  ;;  %9631 = vst [vmem:[#allocation92_spill] sm:$0xff] %v7279_v60  ;;  %v7281_v35 = vld [vmem:[#allocation6 + $0x350] sm:$0xff]  ;;  %v7285_v42 = vld [vmem:[#allocation6 + $0x328] sm:$0xff] }
 0x4e3   :  { %2941 = vmatpush2.msra.mxu0 %v7267_v8  ;;  %3012 = vmatpush2.msra.mxu1 %v7269_v41  ;;  %9632 = vst [vmem:[#allocation93_spill] sm:$0xff] %v7281_v35  ;;  %9633 = vst [vmem:[#allocation94_spill] sm:$0xff] %v7285_v42  ;;  %v7287_v8 = vld [vmem:[#allocation6 + $0x338] sm:$0xff]  ;;  %v7291_v41 = vld [vmem:[#allocation6 + $0x320] sm:$0xff] }
 0x4e4   :  { %2942 = vmatprep.subr.mxu0 %v7273_v20  ;;  %3013 = vmatprep.subr.mxu1 %v7275_v57  ;;  %9634 = vst [vmem:[#allocation95_spill] sm:$0xff] %v7287_v8  ;;  %9635 = vst [vmem:[#allocation96_spill] sm:$0xff] %v7291_v41  ;;  %v7293_v20 = vld [vmem:[#allocation6 + $0x330] sm:$0xff]  ;;  %v7297_v57 = vld [vmem:[#allocation6 + $0x308] sm:$0xff] }
 0x4e5   :  { %2943 = vmatpush2.msra.mxu0 %v7279_v60  ;;  %3014 = vmatpush2.msra.mxu1 %v7281_v35  ;;  %9636 = vst [vmem:[#allocation97_spill] sm:$0xff] %v7293_v20  ;;  %9637 = vst [vmem:[#allocation98_spill] sm:$0xff] %v7297_v57  ;;  %v7299_v60 = vld [vmem:[#allocation6 + $0x318] sm:$0xff]  ;;  %v7303_v35 = vld [vmem:[#allocation6 + $0x300] sm:$0xff] }
 0x4e6   :  { %2944 = vmatprep.subr.mxu0 %v7285_v42  ;;  %3015 = vmatprep.subr.mxu1 %v7287_v8  ;;  %9638 = vst [vmem:[#allocation99_spill] sm:$0xff] %v7299_v60  ;;  %9639 = vst [vmem:[#allocation100_spill] sm:$0xff] %v7303_v35  ;;  %v7305_v42 = vld [vmem:[#allocation6 + $0x310] sm:$0xff]  ;;  %v7307_v8 = vld [vmem:[#allocation6 + $0x2e8] sm:$0xff] }
 0x4e7   :  { %2945 = vmatpush2.msra.mxu0 %v7291_v41  ;;  %3016 = vmatpush2.msra.mxu1 %v7293_v20  ;;  %9640 = vst [vmem:[#allocation101_spill] sm:$0xff] %v7305_v42  ;;  %9641 = vst [vmem:[#allocation102_spill] sm:$0xff] %v7307_v8  ;;  %v7311_v41 = vld [vmem:[#allocation6 + $0x2f8] sm:$0xff]  ;;  %v7313_v20 = vld [vmem:[#allocation6 + $0x2e0] sm:$0xff] }
 0x4e8   :  { %2946 = vmatprep.subr.mxu0 %v7297_v57  ;;  %3017 = vmatprep.subr.mxu1 %v7299_v60  ;;  %9642 = vst [vmem:[#allocation103_spill] sm:$0xff] %v7311_v41  ;;  %9643 = vst [vmem:[#allocation104_spill] sm:$0xff] %v7313_v20  ;;  %v7319_v60 = vld [vmem:[#allocation6 + $0x2c8] sm:$0xff]  ;;  %v7321_v57 = vld [vmem:[#allocation6 + $0x2d8] sm:$0xff] }
 0x4e9   :  { %2947 = vmatpush2.msra.mxu0 %v7303_v35  ;;  %3018 = vmatpush2.msra.mxu1 %v7305_v42  ;;  %9645 = vst [vmem:[#allocation106_spill] sm:$0xff] %v7319_v60  ;;  %9646 = vst [vmem:[#allocation107_spill] sm:$0xff] %v7321_v57  ;;  %v7327_v42 = vld [vmem:[#allocation6 + $0x2d0] sm:$0xff]  ;;  %v7329_v35 = vld [vmem:[#allocation6 + $0x2a8] sm:$0xff] }
 0x4ea   :  { %2948 = vmatprep.subr.mxu0 %v7307_v8  ;;  %3019 = vmatprep.subr.mxu1 %v7311_v41  ;;  %9648 = vst [vmem:[#allocation109_spill] sm:$0xff] %v7327_v42  ;;  %9649 = vst [vmem:[#allocation110_spill] sm:$0xff] %v7329_v35  ;;  %v7335_v41 = vld [vmem:[#allocation6 + $0x2a0] sm:$0xff]  ;;  %v7337_v8 = vld [vmem:[#allocation6 + $0x2b0] sm:$0xff] }
 0x4eb   :  { %2949 = vmatpush2.msra.mxu0 %v7313_v20  ;;  %3020 = vmatpush2.msra.mxu1 %v7315_v58  ;;  %9651 = vst [vmem:[#allocation112_spill] sm:$0xff] %v7335_v41  ;;  %9652 = vst [vmem:[#allocation113_spill] sm:$0xff] %v7337_v8  ;;  %v7341_v20 = vld [vmem:[#allocation6 + $0x288] sm:$0xff]  ;;  %v7343_v58 = vld [vmem:[#allocation6 + $0x298] sm:$0xff] }
 0x4ec   :  { %2950 = vmatprep.subr.mxu0 %v7319_v60  ;;  %3021 = vmatprep.subr.mxu1 %v7321_v57  ;;  %9653 = vst [vmem:[#allocation114_spill] sm:$0xff] %v7341_v20  ;;  %9654 = vst [vmem:[#allocation115_spill] sm:$0xff] %v7343_v58  ;;  %v7349_v60 = vld [vmem:[#allocation6 + $0x290] sm:$0xff]  ;;  %v7353_v57 = vld [vmem:[#allocation6 + $0x268] sm:$0xff] }
 0x4ed   :  { %2951 = vmatpush2.msra.mxu0 %v7323_v28  ;;  %3022 = vmatpush2.msra.mxu1 %v7327_v42  ;;  %9656 = vst [vmem:[#allocation117_spill] sm:$0xff] %v7349_v60  ;;  %9657 = vst [vmem:[#allocation118_spill] sm:$0xff] %v7353_v57  ;;  %v7355_v28 = vld [vmem:[#allocation6 + $0x278] sm:$0xff]  ;;  %v7359_v42 = vld [vmem:[#allocation6 + $0x260] sm:$0xff] }
 0x4ee   :  { %2952 = vmatprep.subr.mxu0 %v7329_v35  ;;  %3023 = vmatprep.subr.mxu1 %v7331_v56  ;;  %9658 = vst [vmem:[#allocation119_spill] sm:$0xff] %v7355_v28  ;;  %9659 = vst [vmem:[#allocation120_spill] sm:$0xff] %v7359_v42  ;;  %v7361_v35 = vld [vmem:[#allocation6 + $0x270] sm:$0xff]  ;;  %v7365_v56 = vld [vmem:[#allocation6 + $0x248] sm:$0xff] }
 0x4ef   :  { %2953 = vmatpush2.msra.mxu0 %v7335_v41  ;;  %3024 = vmatpush2.msra.mxu1 %v7337_v8  ;;  %9660 = vst [vmem:[#allocation121_spill] sm:$0xff] %v7361_v35  ;;  %9661 = vst [vmem:[#allocation122_spill] sm:$0xff] %v7365_v56  ;;  %v7367_v41 = vld [vmem:[#allocation6 + $0x258] sm:$0xff]  ;;  %v7371_v8 = vld [vmem:[#allocation6 + $0x240] sm:$0xff] }
 0x4f0   :  { %2954 = vmatprep.subr.mxu0 %v7341_v20  ;;  %3025 = vmatprep.subr.mxu1 %v7343_v58  ;;  %9662 = vst [vmem:[#allocation123_spill] sm:$0xff] %v7367_v41  ;;  %9663 = vst [vmem:[#allocation124_spill] sm:$0xff] %v7371_v8  ;;  %v7373_v20 = vld [vmem:[#allocation6 + $0x250] sm:$0xff]  ;;  %v7377_v58 = vld [vmem:[#allocation6 + $0x228] sm:$0xff] }
 0x4f1   :  { %2955 = vmatpush2.msra.mxu0 %v7347_v55  ;;  %3026 = vmatpush2.msra.mxu1 %v7349_v60  ;;  %9664 = vst [vmem:[#allocation125_spill] sm:$0xff] %v7373_v20  ;;  %9665 = vst [vmem:[#allocation126_spill] sm:$0xff] %v7377_v58  ;;  %v7379_v55 = vld [vmem:[#allocation6 + $0x238] sm:$0xff]  ;;  %v7383_v60 = vld [vmem:[#allocation6 + $0x220] sm:$0xff] }
 0x4f2   :  { %2956 = vmatprep.subr.mxu0 %v7353_v57  ;;  %3027 = vmatprep.subr.mxu1 %v7355_v28  ;;  %9666 = vst [vmem:[#allocation127_spill] sm:$0xff] %v7379_v55  ;;  %9667 = vst [vmem:[#allocation129_spill] sm:$0xff] %v7383_v60  ;;  %v7385_v57 = vld [vmem:[#allocation6 + $0x230] sm:$0xff]  ;;  %v7389_v28 = vld [vmem:[#allocation6 + $0x208] sm:$0xff] }
 0x4f3   :  { %2957 = vmatpush2.msra.mxu0 %v7359_v42  ;;  %3028 = vmatpush2.msra.mxu1 %v7361_v35  ;;  %9668 = vst [vmem:[#allocation130_spill] sm:$0xff] %v7385_v57  ;;  %9669 = vst [vmem:[#allocation128_spill] sm:$0xff] %v7389_v28  ;;  %v7391_v42 = vld [vmem:[#allocation6 + $0x218] sm:$0xff]  ;;  %v7395_v35 = vld [vmem:[#allocation6 + $0x200] sm:$0xff] }
 0x4f4   :  { %2958 = vmatprep.subr.mxu0 %v7365_v56  ;;  %3029 = vmatprep.subr.mxu1 %v7367_v41  ;;  %9670 = vst [vmem:[#allocation155_spill] sm:$0xff] %v7391_v42  ;;  %9671 = vst [vmem:[#allocation156_spill] sm:$0xff] %v7395_v35  ;;  %v7397_v56 = vld [vmem:[#allocation6 + $0x210] sm:$0xff]  ;;  %v7401_v41 = vld [vmem:[#allocation3 + $0x1e8] sm:$0xff] }
 0x4f5   :  { %2959 = vmatpush2.msra.mxu0 %v7371_v8  ;;  %3030 = vmatpush2.msra.mxu1 %v7373_v20  ;;  %9672 = vst [vmem:[#allocation157_spill] sm:$0xff] %v7397_v56  ;;  %9673 = vst [vmem:[#allocation158_spill] sm:$0xff] %v7401_v41  ;;  %v7403_v8 = vld [vmem:[#allocation3 + $0x1f8] sm:$0xff] }
 0x4f6   :  { %2960 = vmatprep.subr.mxu0 %v7377_v58  ;;  %3031 = vmatprep.subr.mxu1 %v7379_v55  ;;  %9674 = vst [vmem:[#allocation159_spill] sm:$0xff] %v7403_v8 }
 0x4f7   :  { %2961 = vmatpush2.msra.mxu0 %v7383_v60  ;;  %3032 = vmatpush2.msra.mxu1 %v7385_v57 }
 0x4f8   :  { %2962 = vmatprep.subr.mxu0 %v7389_v28  ;;  %3033 = vmatprep.subr.mxu1 %v7391_v42 }
 0x4f9   :  { %2963 = vmatpush2.msra.mxu0 %v7395_v35  ;;  %3034 = vmatpush2.msra.mxu1 %v7397_v56 }
 0x4fa   :  { %3135 = vmatprep.subr.mxu0 %v7401_v41  ;;  %3206 = vmatprep.subr.mxu1 %v7403_v8 }
 0x558   :  { %v2433_v55 = vpop.f32.mrf.mxu0  ;;  %v2504_v54 = vpop.f32.mrf.mxu1 }
 0x559   :  { %v2434_v60 = vadd.f32 %v2433_v55, %v9535_v24  ;;  %v2505_v41 = vadd.f32 %v2504_v54, %v9538_v49 }
 0x55a   :  { %v2435_v57 = vpop.f32.mrf.mxu0  ;;  %v2506_v42 = vpop.f32.mrf.mxu1 }
 0x55b   :  { %v4725_v58 = vmul.f32 -1.442695, %v2434_v60  ;;  %v2436_v20 = vadd.f32 %v2435_v57, %v9536_v34  ;;  %v2507_v35 = vadd.f32 %v2506_v42, %v9537_v40  ;;  %v9675_v34 = vld [vmem:[#allocation139_spill] sm:$0xff] }
 0x55d   :  { %4874 = vpow2.f32 %v4725_v58  ;;  %v4726_v28 = vmul.f32 -1.442695, %v2436_v20  ;;  %v4727_v52 = vmul.f32 -1.442695, %v2507_v35  ;;  %v9676_v35 = vld [vmem:[#allocation141_spill] sm:$0xff] }
 0x55f   :  { %4876 = vpow2.f32 %v4726_v28 }
 0x560   :  { %4878 = vpow2.f32 %v4727_v52 }
 0x56a   :  { %v4875_v56 = vpop.eup %4874 }
 0x56b   :  { %v2512_v51 = vadd.f32 1.0, %v4875_v56 }
 0x56c   :  { %v4877_v8 = vpop.eup %4876 }
 0x56d   :  { %4880 = vrcp.f32 %v2512_v51  ;;  %v2518_v55 = vadd.f32 1.0, %v4877_v8  ;;  %v4879_v60 = vpop.eup %4878 }
 0x56e   :  { %4882 = vtanh.f32 %v2505_v41  ;;  %v2525_v56 = vadd.f32 1.0, %v4879_v60 }
 0x56f   :  { %4884 = vrcp.f32 %v2518_v55 }
 0x579   :  { %v2668_v57 = vpop.f32.mrf.mxu0  ;;  %v2739_v51 = vpop.f32.mrf.mxu1 }
 0x57a   :  { %v4881_v58 = vpop.eup %4880  ;;  %v2744_v20 = vadd.f32 %v2668_v57, %v9675_v34  ;;  %v9677_v34 = vld [vmem:[#allocation142_spill] sm:$0xff]  ;;  %v9678_v57 = vld [vmem:[#allocation140_spill] sm:$0xff] }
 0x57b   :  { %v4883_v28 = vpop.eup %4882  ;;  %v2670_v24 = vpop.f32.mrf.mxu0 }
 0x57c   :  { %v4885_v36 = vpop.eup %4884  ;;  %v4728_v42 = vmul.f32 -1.442695, %v2744_v20  ;;  %v2745_v40 = vadd.f32 %v2670_v24, %v9676_v35  ;;  %v2529_v59 = vmul.f32 %v4883_v28, %v4881_v58  ;;  %v2741_v41 = vpop.f32.mrf.mxu1  ;;  %v2746_v20 = vadd.f32 %v2739_v51, %v9678_v57  ;;  %v7429_v57 = vld [vmem:[#allocation3 + $0x1e0] sm:$0xff] }
 0x57d   :  { %v2528_v54 = vmul.f32 %v4885_v36, %v6874_v13  ;;  %v2747_v55 = vadd.f32 %v2741_v41, %v9677_v34 }
 0x57e   :  { %4886 = vpow2.f32 %v4728_v42  ;;  %v4729_v52 = vmul.f32 -1.442695, %v2745_v40 }
 0x57f   :  { %v7418_v8 = vadd.f32 %v2529_v59, %v2528_v54  ;;  %v4730_v49 = vmul.f32 -1.442695, %v2747_v55 }
 0x580   :  { %4888 = vpow2.f32 %v4729_v52 }
 0x581   :  { %4890 = vrcp.f32 %v2525_v56 }
 0x582   :  { %4892 = vtanh.f32 %v7418_v8 }
 0x583   :  { %4894 = vtanh.f32 %v2746_v20  ;;  %v7431_v20 = vld [vmem:[#allocation3 + $0x1f0] sm:$0xff] }
 0x584   :  { %4896 = vpow2.f32 %v4730_v49 }
 0x58b   :  { %v4887_v24 = vpop.eup %4886 }
 0x58c   :  { %v2751_v58 = vadd.f32 1.0, %v4887_v24  ;;  %v7433_v24 = vld [vmem:[#allocation3 + $0x1c8] sm:$0xff] }
 0x58d   :  { %v4889_v13 = vpop.eup %4888 }
 0x58e   :  { %v4891_v36 = vpop.eup %4890  ;;  %4898 = vrcp.f32 %v2751_v58  ;;  %v2757_v40 = vadd.f32 1.0, %v4889_v13  ;;  %v7435_v58 = vld [vmem:[#allocation3 + $0x1d8] sm:$0xff]  ;;  %v7441_v13 = vld [vmem:[#allocation3 + $0x1d0] sm:$0xff] }
 0x58f   :  { %v4893_v59 = vpop.eup %4892 }
 0x590   :  { %4900 = vrcp.f32 %v2757_v40  ;;  %v2532_v60 = vmul.f32 %v4893_v59, %v4891_v36  ;;  %v4895_v28 = vpop.eup %4894  ;;  %v7445_v36 = vld [vmem:[#allocation3 + $0x1a8] sm:$0xff]  ;;  %v7447_v40 = vld [vmem:[#allocation3 + $0x1b8] sm:$0xff]  ;;  %v7451_v59 = vld [vmem:[#allocation3 + $0x1a0] sm:$0xff] }
 0x591   :  { %v4897_v42 = vpop.eup %4896  ;;  %9679 = vst [vmem:[#allocation160_spill] sm:$0xff] %v7451_v59 }
 0x592   :  { %2533 = vst [vmem:[#allocation8 + $0x18] sm:$0xff] %v2532_v60  ;;  %2964 = vmatprep.mubr.f32.mxu0 %v2532_v60  ;;  %3035 = vmatprep.mubr.f32.mxu1 %v2532_v60  ;;  %v2764_v51 = vadd.f32 1.0, %v4897_v42  ;;  %v7453_v60 = vld [vmem:[#allocation3 + $0x1b0] sm:$0xff]  ;;  %v7459_v42 = vld [vmem:[#allocation3 + $0x198] sm:$0xff] }
 0x593   :  { %9680 = vst [vmem:[#allocation161_spill] sm:$0xff] %v7453_v60  ;;  %9682 = vst [vmem:[#allocation135_spill] sm:$0xff] %v7459_v42 }
 0x594   :  { %4902 = vrcp.f32 %v2764_v51  ;;  %v7471_v51 = vld [vmem:[#allocation3 + $0x178] sm:$0xff] }
 0x595   :  { %9686 = vst [vmem:[#allocation163_spill] sm:$0xff] %v7471_v51 }
 0x59b   :  { %v4899_v35 = vpop.eup %4898 }
 0x59c   :  { %v2768_v54 = vmul.f32 %v4899_v35, %v4895_v28  ;;  %v7457_v28 = vld [vmem:[#allocation3 + $0x188] sm:$0xff]  ;;  %v7463_v35 = vld [vmem:[#allocation3 + $0x180] sm:$0xff] }
 0x59d   :  { %v4901_v56 = vpop.eup %4900  ;;  %9681 = vst [vmem:[#allocation162_spill] sm:$0xff] %v7457_v28  ;;  %9683 = vst [vmem:[#allocation137_spill] sm:$0xff] %v7463_v35 }
 0x59e   :  { %v2767_v52 = vmul.f32 %v4901_v56, %v6880_v53  ;;  %v7439_v53 = vld [vmem:[#allocation3 + $0x1c0] sm:$0xff]  ;;  %v7469_v56 = vld [vmem:[#allocation3 + $0x168] sm:$0xff] }
 0x59f   :  { %9685 = vst [vmem:[#allocation136_spill] sm:$0xff] %v7469_v56 }
 0x5a0   :  { %v7424_v41 = vadd.f32 %v2768_v54, %v2767_v52  ;;  %v7465_v54 = vld [vmem:[#allocation3 + $0x190] sm:$0xff]  ;;  %v7475_v52 = vld [vmem:[#allocation3 + $0x160] sm:$0xff] }
 0x5a1   :  { %v4903_v49 = vpop.eup %4902  ;;  %9684 = vst [vmem:[#allocation138_spill] sm:$0xff] %v7465_v54  ;;  %9687 = vst [vmem:[#allocation164_spill] sm:$0xff] %v7475_v52 }
 0x5a2   :  { %4904 = vtanh.f32 %v7424_v41 }
 0x5af   :  { %v4905_v34 = vpop.eup %4904 }
 0x5b0   :  { %v7427_v55 = vmul.f32 %v4905_v34, %v4903_v49  ;;  %v7477_v49 = vld [vmem:[#allocation3 + $0x170] sm:$0xff]  ;;  %v7481_v34 = vld [vmem:[#allocation3 + $0x148] sm:$0xff] }
 0x5b2   :  { %2965 = vmatmul.mubr.f32.vlgmr.msra.gmra.mxu0 %v7427_v55  ;;  %3036 = vmatmul.mubr.f32.vlgmr.msra.gmra.mxu1 %v7427_v55 }
 0x5b3   :  { %3136 = vmatpush1.msra.mxu0 %v7429_v57  ;;  %3207 = vmatpush1.msra.mxu1 %v7431_v20 }
 0x5b4   :  { %3137 = vmatprep.subr.mxu0 %v7433_v24  ;;  %3208 = vmatprep.subr.mxu1 %v7435_v58 }
 0x5b5   :  { %3138 = vmatpush1.msra.mxu0 %v7439_v53  ;;  %3209 = vmatpush1.msra.mxu1 %v7441_v13 }
 0x5b6   :  { %3139 = vmatprep.subr.mxu0 %v7445_v36  ;;  %3210 = vmatprep.subr.mxu1 %v7447_v40 }
 0x5b7   :  { %3140 = vmatpush1.msra.mxu0 %v7451_v59  ;;  %3211 = vmatpush1.msra.mxu1 %v7453_v60  ;;  %v7483_v59 = vld [vmem:[#allocation3 + $0x158] sm:$0xff]  ;;  %v7487_v60 = vld [vmem:[#allocation3 + $0x140] sm:$0xff] }
 0x5b8   :  { %3141 = vmatprep.subr.mxu0 %v7457_v28  ;;  %3212 = vmatprep.subr.mxu1 %v7459_v42  ;;  %v7489_v28 = vld [vmem:[#allocation3 + $0x150] sm:$0xff]  ;;  %v7493_v42 = vld [vmem:[#allocation3 + $0x128] sm:$0xff] }
 0x5b9   :  { %3142 = vmatpush1.msra.mxu0 %v7463_v35  ;;  %3213 = vmatpush1.msra.mxu1 %v7465_v54  ;;  %v7495_v35 = vld [vmem:[#allocation3 + $0x138] sm:$0xff]  ;;  %v7499_v54 = vld [vmem:[#allocation3 + $0x120] sm:$0xff] }
 0x5ba   :  { %3143 = vmatprep.subr.mxu0 %v7469_v56  ;;  %3214 = vmatprep.subr.mxu1 %v7471_v51  ;;  %v7501_v56 = vld [vmem:[#allocation3 + $0x130] sm:$0xff]  ;;  %v7505_v51 = vld [vmem:[#allocation3 + $0x108] sm:$0xff] }
 0x5bb   :  { %3144 = vmatpush1.msra.mxu0 %v7475_v52  ;;  %3215 = vmatpush1.msra.mxu1 %v7477_v49  ;;  %v7507_v52 = vld [vmem:[#allocation3 + $0x118] sm:$0xff] }
 0x5bc   :  { %3145 = vmatprep.subr.mxu0 %v7481_v34  ;;  %3216 = vmatprep.subr.mxu1 %v7483_v59 }
 0x5bd   :  { %3146 = vmatpush1.msra.mxu0 %v7487_v60  ;;  %3217 = vmatpush1.msra.mxu1 %v7489_v28 }
 0x5be   :  { %3147 = vmatprep.subr.mxu0 %v7493_v42  ;;  %3218 = vmatprep.subr.mxu1 %v7495_v35 }
 0x5bf   :  { %3148 = vmatpush1.msra.mxu0 %v7499_v54  ;;  %3219 = vmatpush1.msra.mxu1 %v7501_v56 }
 0x5c0   :  { %3149 = vmatprep.subr.mxu0 %v7505_v51  ;;  %3220 = vmatprep.subr.mxu1 %v7507_v52 }
 0x5c1   :  { %3150 = vmatpush1.msra.mxu0 %v6911_v25  ;;  %3221 = vmatpush1.msra.mxu1 %v6913_v19  ;;  %v9688_v25 = vld [vmem:[#allocation133_spill] sm:$0xff]  ;;  %v9689_v19 = vld [vmem:[#allocation134_spill] sm:$0xff] }
 0x5c2   :  { %3151 = vmatprep.subr.mxu0 %v6917_v23  ;;  %3222 = vmatprep.subr.mxu1 %v6919_v10  ;;  %v9690_v23 = vld [vmem:[#allocation132_spill] sm:$0xff] }
 0x5c3   :  { %3152 = vmatpush1.msra.mxu0 %v6923_v5  ;;  %3223 = vmatpush1.msra.mxu1 %v6925_v46  ;;  %v9691_v10 = vld [vmem:[#allocation16_spill] sm:$0xff]  ;;  %v9692_v5 = vld [vmem:[#allocation17_spill] sm:$0xff]  ;;  %v9693_v46 = vld [vmem:[#allocation18_spill] sm:$0xff] }
 0x5c4   :  { %3153 = vmatprep.subr.mxu0 %v6929_v39  ;;  %3224 = vmatprep.subr.mxu1 %v6931_v26  ;;  %v9694_v39 = vld [vmem:[#allocation19_spill] sm:$0xff]  ;;  %v9695_v26 = vld [vmem:[#allocation20_spill] sm:$0xff] }
 0x5c5   :  { %3154 = vmatpush1.msra.mxu0 %v6935_v37  ;;  %3225 = vmatpush1.msra.mxu1 %v6937_v31  ;;  %v9696_v37 = vld [vmem:[#allocation21_spill] sm:$0xff]  ;;  %v9697_v31 = vld [vmem:[#allocation22_spill] sm:$0xff] }
 0x5c6   :  { %3155 = vmatprep.subr.mxu0 %v6941_v50  ;;  %3226 = vmatprep.subr.mxu1 %v6943_v45  ;;  %v9698_v50 = vld [vmem:[#allocation23_spill] sm:$0xff]  ;;  %v9699_v45 = vld [vmem:[#allocation24_spill] sm:$0xff] }
 0x5c7   :  { %3156 = vmatpush1.msra.mxu0 %v6947_v38  ;;  %3227 = vmatpush1.msra.mxu1 %v6949_v61  ;;  %v9700_v38 = vld [vmem:[#allocation25_spill] sm:$0xff]  ;;  %v9701_v61 = vld [vmem:[#allocation26_spill] sm:$0xff] }
 0x5c8   :  { %3157 = vmatprep.subr.mxu0 %v6953_v62  ;;  %3228 = vmatprep.subr.mxu1 %v6955_v63  ;;  %v9702_v62 = vld [vmem:[#allocation27_spill] sm:$0xff]  ;;  %v9703_v63 = vld [vmem:[#allocation28_spill] sm:$0xff] }
 0x5c9   :  { %3158 = vmatpush1.msra.mxu0 %v6959_v1  ;;  %3229 = vmatpush1.msra.mxu1 %v6961_v2  ;;  %v9704_v1 = vld [vmem:[#allocation29_spill] sm:$0xff]  ;;  %v9705_v2 = vld [vmem:[#allocation30_spill] sm:$0xff] }
 0x5ca   :  { %3159 = vmatprep.subr.mxu0 %v6965_v3  ;;  %3230 = vmatprep.subr.mxu1 %v6967_v4  ;;  %v9706_v3 = vld [vmem:[#allocation31_spill] sm:$0xff]  ;;  %v9707_v4 = vld [vmem:[#allocation32_spill] sm:$0xff] }
 0x5cb   :  { %3160 = vmatpush1.msra.mxu0 %v6971_v6  ;;  %3231 = vmatpush1.msra.mxu1 %v6973_v7  ;;  %v9708_v6 = vld [vmem:[#allocation33_spill] sm:$0xff]  ;;  %v9709_v7 = vld [vmem:[#allocation34_spill] sm:$0xff] }
 0x5cc   :  { %3161 = vmatprep.subr.mxu0 %v6977_v9  ;;  %3232 = vmatprep.subr.mxu1 %v6979_v11  ;;  %v9710_v9 = vld [vmem:[#allocation35_spill] sm:$0xff]  ;;  %v9711_v11 = vld [vmem:[#allocation36_spill] sm:$0xff] }
 0x5cd   :  { %3162 = vmatpush1.msra.mxu0 %v6983_v12  ;;  %3233 = vmatpush1.msra.mxu1 %v6985_v14  ;;  %v9712_v12 = vld [vmem:[#allocation37_spill] sm:$0xff]  ;;  %v9713_v14 = vld [vmem:[#allocation38_spill] sm:$0xff] }
 0x5ce   :  { %3163 = vmatprep.subr.mxu0 %v6989_v15  ;;  %3234 = vmatprep.subr.mxu1 %v6991_v16  ;;  %v9714_v15 = vld [vmem:[#allocation39_spill] sm:$0xff]  ;;  %v9715_v16 = vld [vmem:[#allocation40_spill] sm:$0xff] }
 0x5cf   :  { %3164 = vmatpush1.msra.mxu0 %v6995_v17  ;;  %3235 = vmatpush1.msra.mxu1 %v6997_v18  ;;  %v9716_v17 = vld [vmem:[#allocation41_spill] sm:$0xff]  ;;  %v9717_v18 = vld [vmem:[#allocation42_spill] sm:$0xff] }
 0x5d0   :  { %3165 = vmatprep.subr.mxu0 %v7001_v21  ;;  %3236 = vmatprep.subr.mxu1 %v7003_v22  ;;  %v9718_v21 = vld [vmem:[#allocation43_spill] sm:$0xff]  ;;  %v9719_v22 = vld [vmem:[#allocation44_spill] sm:$0xff] }
 0x5d1   :  { %3166 = vmatpush1.msra.mxu0 %v7007_v30  ;;  %3199 = vmatprep.mubr.f32.mxu0 %v9132_v48  ;;  %v9720_v30 = vld [vmem:[#allocation45_spill] sm:$0xff] }
 0x5d2   :  { %3237 = vmatpush1.msra.mxu1 %v7011_v27  ;;  %3270 = vmatprep.mubr.f32.mxu1 %v9132_v48  ;;  %v9721_v27 = vld [vmem:[#allocation46_spill] sm:$0xff] }
 0x5d3   :  { %3200 = vmatmul.mubr.f32.vlgmr.msra.gmra.mxu0 %v7427_v55  ;;  %3271 = vmatmul.mubr.f32.vlgmr.msra.gmra.mxu1 %v7427_v55  ;;  %v9729_v55 = vld [vmem:[#allocation54_spill] sm:$0xff] }
 0x5d4   :  { %3433 = vmatprep.subr.mxu0 %v7021_v47  ;;  %3504 = vmatprep.subr.mxu1 %v7023_v29  ;;  %v9722_v47 = vld [vmem:[#allocation47_spill] sm:$0xff]  ;;  %v9723_v29 = vld [vmem:[#allocation48_spill] sm:$0xff] }
 0x5d5   :  { %3434 = vmatpush1.msra.mxu0 %v7027_v44  ;;  %3505 = vmatpush1.msra.mxu1 %v7029_v43  ;;  %v9724_v44 = vld [vmem:[#allocation49_spill] sm:$0xff]  ;;  %v9725_v43 = vld [vmem:[#allocation50_spill] sm:$0xff] }
 0x5d6   :  { %3435 = vmatprep.subr.mxu0 %v7033_v0  ;;  %3506 = vmatprep.subr.mxu1 %v7035_v32  ;;  %v9726_v0 = vld [vmem:[#allocation51_spill] sm:$0xff]  ;;  %v9727_v32 = vld [vmem:[#allocation52_spill] sm:$0xff] }
 0x5d7   :  { %3436 = vmatpush1.msra.mxu0 %v7039_v33  ;;  %3507 = vmatpush1.msra.mxu1 %v9688_v25  ;;  %v9728_v33 = vld [vmem:[#allocation53_spill] sm:$0xff]  ;;  %v9730_v25 = vld [vmem:[#allocation55_spill] sm:$0xff] }
 0x5d8   :  { %3437 = vmatprep.subr.mxu0 %v9689_v19  ;;  %3508 = vmatprep.subr.mxu1 %v9690_v23  ;;  %v9731_v19 = vld [vmem:[#allocation56_spill] sm:$0xff]  ;;  %v9732_v23 = vld [vmem:[#allocation57_spill] sm:$0xff] }
 0x5d9   :  { %3438 = vmatpush1.msra.mxu0 %v9691_v10  ;;  %3509 = vmatpush1.msra.mxu1 %v9692_v5  ;;  %v9733_v10 = vld [vmem:[#allocation58_spill] sm:$0xff]  ;;  %v9734_v5 = vld [vmem:[#allocation59_spill] sm:$0xff] }
 0x5da   :  { %3439 = vmatprep.subr.mxu0 %v9693_v46  ;;  %3510 = vmatprep.subr.mxu1 %v9694_v39  ;;  %v9735_v46 = vld [vmem:[#allocation60_spill] sm:$0xff]  ;;  %v9736_v39 = vld [vmem:[#allocation61_spill] sm:$0xff] }
 0x5db   :  { %3440 = vmatpush1.msra.mxu0 %v9695_v26  ;;  %3511 = vmatpush1.msra.mxu1 %v9696_v37  ;;  %v9737_v26 = vld [vmem:[#allocation62_spill] sm:$0xff]  ;;  %v9738_v37 = vld [vmem:[#allocation63_spill] sm:$0xff] }
 0x5dc   :  { %3441 = vmatprep.subr.mxu0 %v9697_v31  ;;  %3512 = vmatprep.subr.mxu1 %v9698_v50  ;;  %v9739_v31 = vld [vmem:[#allocation64_spill] sm:$0xff]  ;;  %v9740_v50 = vld [vmem:[#allocation65_spill] sm:$0xff] }
 0x5dd   :  { %3442 = vmatpush1.msra.mxu0 %v9699_v45  ;;  %3513 = vmatpush1.msra.mxu1 %v9700_v38  ;;  %v9741_v45 = vld [vmem:[#allocation66_spill] sm:$0xff]  ;;  %v9742_v38 = vld [vmem:[#allocation67_spill] sm:$0xff] }
 0x5de   :  { %3443 = vmatprep.subr.mxu0 %v9701_v61  ;;  %3514 = vmatprep.subr.mxu1 %v9702_v62  ;;  %v9743_v61 = vld [vmem:[#allocation68_spill] sm:$0xff]  ;;  %v9744_v62 = vld [vmem:[#allocation69_spill] sm:$0xff] }
 0x5df   :  { %3444 = vmatpush1.msra.mxu0 %v9703_v63  ;;  %3515 = vmatpush1.msra.mxu1 %v9704_v1  ;;  %v9745_v63 = vld [vmem:[#allocation70_spill] sm:$0xff]  ;;  %v9746_v1 = vld [vmem:[#allocation71_spill] sm:$0xff] }
 0x5e0   :  { %3445 = vmatprep.subr.mxu0 %v9705_v2  ;;  %3516 = vmatprep.subr.mxu1 %v9706_v3  ;;  %v9747_v2 = vld [vmem:[#allocation72_spill] sm:$0xff]  ;;  %v9748_v3 = vld [vmem:[#allocation73_spill] sm:$0xff] }
 0x5e1   :  { %3446 = vmatpush1.msra.mxu0 %v9707_v4  ;;  %3517 = vmatpush1.msra.mxu1 %v9708_v6  ;;  %v9749_v4 = vld [vmem:[#allocation74_spill] sm:$0xff]  ;;  %v9750_v6 = vld [vmem:[#allocation75_spill] sm:$0xff] }
 0x5e2   :  { %3447 = vmatprep.subr.mxu0 %v9709_v7  ;;  %3518 = vmatprep.subr.mxu1 %v9710_v9  ;;  %v9751_v7 = vld [vmem:[#allocation76_spill] sm:$0xff]  ;;  %v9752_v9 = vld [vmem:[#allocation77_spill] sm:$0xff] }
 0x5e3   :  { %3448 = vmatpush1.msra.mxu0 %v9711_v11  ;;  %3519 = vmatpush1.msra.mxu1 %v9712_v12  ;;  %v9753_v11 = vld [vmem:[#allocation78_spill] sm:$0xff]  ;;  %v9754_v12 = vld [vmem:[#allocation79_spill] sm:$0xff] }
 0x5e4   :  { %3449 = vmatprep.subr.mxu0 %v9713_v14  ;;  %3520 = vmatprep.subr.mxu1 %v9714_v15  ;;  %v9755_v14 = vld [vmem:[#allocation80_spill] sm:$0xff]  ;;  %v9756_v15 = vld [vmem:[#allocation81_spill] sm:$0xff] }
 0x5e5   :  { %3450 = vmatpush1.msra.mxu0 %v9715_v16  ;;  %3521 = vmatpush1.msra.mxu1 %v9716_v17  ;;  %v9757_v16 = vld [vmem:[#allocation82_spill] sm:$0xff]  ;;  %v9758_v17 = vld [vmem:[#allocation83_spill] sm:$0xff] }
 0x5e6   :  { %3451 = vmatprep.subr.mxu0 %v9717_v18  ;;  %3522 = vmatprep.subr.mxu1 %v9718_v21  ;;  %v9759_v18 = vld [vmem:[#allocation84_spill] sm:$0xff]  ;;  %v9760_v21 = vld [vmem:[#allocation85_spill] sm:$0xff] }
 0x5e7   :  { %3452 = vmatpush1.msra.mxu0 %v9719_v22  ;;  %3523 = vmatpush1.msra.mxu1 %v9720_v30  ;;  %v9761_v22 = vld [vmem:[#allocation86_spill] sm:$0xff]  ;;  %v9762_v30 = vld [vmem:[#allocation87_spill] sm:$0xff] }
 0x5e8   :  { %3453 = vmatprep.subr.mxu0 %v9721_v27  ;;  %3524 = vmatprep.subr.mxu1 %v9722_v47  ;;  %v9763_v27 = vld [vmem:[#allocation88_spill] sm:$0xff]  ;;  %v9764_v47 = vld [vmem:[#allocation89_spill] sm:$0xff] }
 0x5e9   :  { %3454 = vmatpush1.msra.mxu0 %v9723_v29  ;;  %3525 = vmatpush1.msra.mxu1 %v9724_v44  ;;  %v9765_v29 = vld [vmem:[#allocation90_spill] sm:$0xff]  ;;  %v9766_v44 = vld [vmem:[#allocation91_spill] sm:$0xff] }
 0x5ea   :  { %3455 = vmatprep.subr.mxu0 %v9725_v43  ;;  %3526 = vmatprep.subr.mxu1 %v9726_v0  ;;  %v9767_v43 = vld [vmem:[#allocation92_spill] sm:$0xff]  ;;  %v9768_v0 = vld [vmem:[#allocation93_spill] sm:$0xff] }
 0x5eb   :  { %3456 = vmatpush1.msra.mxu0 %v9727_v32  ;;  %3527 = vmatpush1.msra.mxu1 %v9728_v33  ;;  %v9769_v32 = vld [vmem:[#allocation94_spill] sm:$0xff]  ;;  %v9770_v33 = vld [vmem:[#allocation95_spill] sm:$0xff] }
 0x5ec   :  { %3457 = vmatprep.subr.mxu0 %v9729_v55  ;;  %3528 = vmatprep.subr.mxu1 %v9730_v25  ;;  %v9771_v55 = vld [vmem:[#allocation96_spill] sm:$0xff]  ;;  %v9772_v25 = vld [vmem:[#allocation97_spill] sm:$0xff] }
 0x5ed   :  { %3458 = vmatpush1.msra.mxu0 %v9731_v19  ;;  %3529 = vmatpush1.msra.mxu1 %v9732_v23  ;;  %v9773_v19 = vld [vmem:[#allocation98_spill] sm:$0xff]  ;;  %v9774_v23 = vld [vmem:[#allocation99_spill] sm:$0xff] }
 0x5ee   :  { %3459 = vmatprep.subr.mxu0 %v9733_v10  ;;  %3530 = vmatprep.subr.mxu1 %v9734_v5  ;;  %v9775_v10 = vld [vmem:[#allocation100_spill] sm:$0xff]  ;;  %v9776_v5 = vld [vmem:[#allocation101_spill] sm:$0xff] }
 0x5ef   :  { %3460 = vmatpush1.msra.mxu0 %v9735_v46  ;;  %3531 = vmatpush1.msra.mxu1 %v9736_v39  ;;  %v9777_v46 = vld [vmem:[#allocation102_spill] sm:$0xff]  ;;  %v9778_v39 = vld [vmem:[#allocation103_spill] sm:$0xff] }
 0x5f0   :  { %3461 = vmatprep.subr.mxu0 %v9737_v26  ;;  %3532 = vmatprep.subr.mxu1 %v9738_v37  ;;  %v9779_v26 = vld [vmem:[#allocation104_spill] sm:$0xff]  ;;  %v9780_v37 = vld [vmem:[#allocation105_spill] sm:$0xff] }
 0x5f1   :  { %3462 = vmatpush1.msra.mxu0 %v9739_v31  ;;  %3533 = vmatpush1.msra.mxu1 %v9740_v50  ;;  %v9781_v31 = vld [vmem:[#allocation106_spill] sm:$0xff]  ;;  %v9782_v50 = vld [vmem:[#allocation107_spill] sm:$0xff] }
 0x5f2   :  { %3463 = vmatprep.subr.mxu0 %v9741_v45  ;;  %3534 = vmatprep.subr.mxu1 %v9742_v38  ;;  %v9783_v45 = vld [vmem:[#allocation108_spill] sm:$0xff]  ;;  %v9784_v38 = vld [vmem:[#allocation109_spill] sm:$0xff] }
 0x5f3   :  { %3464 = vmatpush1.msra.mxu0 %v9743_v61  ;;  %3535 = vmatpush1.msra.mxu1 %v9744_v62  ;;  %v9785_v61 = vld [vmem:[#allocation110_spill] sm:$0xff]  ;;  %v9786_v62 = vld [vmem:[#allocation111_spill] sm:$0xff] }
 0x5f4   :  { %3465 = vmatprep.subr.mxu0 %v9745_v63  ;;  %3536 = vmatprep.subr.mxu1 %v9746_v1  ;;  %v9787_v63 = vld [vmem:[#allocation112_spill] sm:$0xff]  ;;  %v9788_v1 = vld [vmem:[#allocation113_spill] sm:$0xff] }
 0x5f5   :  { %3466 = vmatpush2.msra.mxu0 %v9747_v2  ;;  %3537 = vmatpush2.msra.mxu1 %v9748_v3  ;;  %v9789_v2 = vld [vmem:[#allocation114_spill] sm:$0xff]  ;;  %v9790_v3 = vld [vmem:[#allocation115_spill] sm:$0xff] }
 0x5f6   :  { %3467 = vmatprep.subr.mxu0 %v9749_v4  ;;  %3538 = vmatprep.subr.mxu1 %v9750_v6  ;;  %v9791_v4 = vld [vmem:[#allocation116_spill] sm:$0xff]  ;;  %v9792_v6 = vld [vmem:[#allocation117_spill] sm:$0xff] }
 0x5f7   :  { %3468 = vmatpush2.msra.mxu0 %v9751_v7  ;;  %3539 = vmatpush2.msra.mxu1 %v9752_v9  ;;  %v9793_v7 = vld [vmem:[#allocation118_spill] sm:$0xff]  ;;  %v9794_v9 = vld [vmem:[#allocation119_spill] sm:$0xff] }
 0x5f8   :  { %3469 = vmatprep.subr.mxu0 %v9753_v11  ;;  %3540 = vmatprep.subr.mxu1 %v9754_v12  ;;  %v9795_v11 = vld [vmem:[#allocation120_spill] sm:$0xff]  ;;  %v9796_v12 = vld [vmem:[#allocation121_spill] sm:$0xff] }
 0x5f9   :  { %3470 = vmatpush2.msra.mxu0 %v9755_v14  ;;  %3541 = vmatpush2.msra.mxu1 %v9756_v15  ;;  %v9797_v14 = vld [vmem:[#allocation122_spill] sm:$0xff]  ;;  %v9798_v15 = vld [vmem:[#allocation123_spill] sm:$0xff] }
 0x5fa   :  { %3471 = vmatprep.subr.mxu0 %v9757_v16  ;;  %3542 = vmatprep.subr.mxu1 %v9758_v17  ;;  %v9799_v16 = vld [vmem:[#allocation124_spill] sm:$0xff]  ;;  %v9800_v17 = vld [vmem:[#allocation125_spill] sm:$0xff] }
 0x5fb   :  { %3472 = vmatpush2.msra.mxu0 %v9759_v18  ;;  %3543 = vmatpush2.msra.mxu1 %v9760_v21  ;;  %v9801_v18 = vld [vmem:[#allocation126_spill] sm:$0xff]  ;;  %v9802_v21 = vld [vmem:[#allocation127_spill] sm:$0xff] }
 0x5fc   :  { %3473 = vmatprep.subr.mxu0 %v9761_v22  ;;  %3544 = vmatprep.subr.mxu1 %v9762_v30  ;;  %v9803_v22 = vld [vmem:[#allocation129_spill] sm:$0xff]  ;;  %v9804_v30 = vld [vmem:[#allocation130_spill] sm:$0xff] }
 0x5fd   :  { %3474 = vmatpush2.msra.mxu0 %v9763_v27  ;;  %3545 = vmatpush2.msra.mxu1 %v9764_v47  ;;  %v9805_v27 = vld [vmem:[#allocation128_spill] sm:$0xff]  ;;  %v9806_v47 = vld [vmem:[#allocation155_spill] sm:$0xff] }
 0x5fe   :  { %3475 = vmatprep.subr.mxu0 %v9765_v29  ;;  %3546 = vmatprep.subr.mxu1 %v9766_v44  ;;  %v9807_v29 = vld [vmem:[#allocation156_spill] sm:$0xff]  ;;  %v9808_v44 = vld [vmem:[#allocation157_spill] sm:$0xff] }
 0x5ff   :  { %3476 = vmatpush2.msra.mxu0 %v9767_v43  ;;  %3547 = vmatpush2.msra.mxu1 %v9768_v0  ;;  %v9809_v43 = vld [vmem:[#allocation158_spill] sm:$0xff]  ;;  %v9810_v0 = vld [vmem:[#allocation159_spill] sm:$0xff] }
 0x600   :  { %3477 = vmatprep.subr.mxu0 %v9769_v32  ;;  %3548 = vmatprep.subr.mxu1 %v9770_v33  ;;  %v9811_v33 = vld [vmem:[#allocation12_spill] sm:$0xff] }
 0x601   :  { %3478 = vmatpush2.msra.mxu0 %v9771_v55  ;;  %3549 = vmatpush2.msra.mxu1 %v9772_v25 }
 0x602   :  { %3479 = vmatprep.subr.mxu0 %v9773_v19  ;;  %3550 = vmatprep.subr.mxu1 %v9774_v23  ;;  %v9812_v23 = vld [vmem:[#allocation13_spill] sm:$0xff] }
 0x603   :  { %3480 = vmatpush2.msra.mxu0 %v9775_v10  ;;  %3551 = vmatpush2.msra.mxu1 %v9776_v5 }
 0x604   :  { %3481 = vmatprep.subr.mxu0 %v9777_v46  ;;  %3552 = vmatprep.subr.mxu1 %v9778_v39 }
 0x605   :  { %3482 = vmatpush2.msra.mxu0 %v9779_v26  ;;  %3553 = vmatpush2.msra.mxu1 %v9780_v37  ;;  %v9813_v26 = vld [vmem:[#allocation14_spill] sm:$0xff] }
 0x606   :  { %3483 = vmatprep.subr.mxu0 %v9781_v31  ;;  %3554 = vmatprep.subr.mxu1 %v9782_v50 }
 0x607   :  { %3484 = vmatpush2.msra.mxu0 %v9783_v45  ;;  %3555 = vmatpush2.msra.mxu1 %v9784_v38  ;;  %v9814_v45 = vld [vmem:[#allocation15_spill] sm:$0xff] }
 0x608   :  { %3485 = vmatprep.subr.mxu0 %v9785_v61  ;;  %3556 = vmatprep.subr.mxu1 %v9786_v62 }
 0x609   :  { %3486 = vmatpush2.msra.mxu0 %v9787_v63  ;;  %3557 = vmatpush2.msra.mxu1 %v9788_v1 }
 0x60a   :  { %3487 = vmatprep.subr.mxu0 %v9789_v2  ;;  %3558 = vmatprep.subr.mxu1 %v9790_v3 }
 0x60b   :  { %3488 = vmatpush2.msra.mxu0 %v9791_v4  ;;  %3559 = vmatpush2.msra.mxu1 %v9792_v6  ;;  %v9815_v4 = vld [vmem:[#allocation143_spill] sm:$0xff] }
 0x60c   :  { %3489 = vmatprep.subr.mxu0 %v9793_v7  ;;  %3560 = vmatprep.subr.mxu1 %v9794_v9 }
 0x60d   :  { %3490 = vmatpush2.msra.mxu0 %v9795_v11  ;;  %3561 = vmatpush2.msra.mxu1 %v9796_v12 }
 0x60e   :  { %3491 = vmatprep.subr.mxu0 %v9797_v14  ;;  %3562 = vmatprep.subr.mxu1 %v9798_v15  ;;  %v9816_v14 = vld [vmem:[#allocation145_spill] sm:$0xff] }
 0x60f   :  { %3492 = vmatpush2.msra.mxu0 %v9799_v16  ;;  %3563 = vmatpush2.msra.mxu1 %v9800_v17 }
 0x610   :  { %3493 = vmatprep.subr.mxu0 %v9801_v18  ;;  %3564 = vmatprep.subr.mxu1 %v9802_v21 }
 0x611   :  { %3494 = vmatpush2.msra.mxu0 %v9803_v22  ;;  %3565 = vmatpush2.msra.mxu1 %v9804_v30 }
 0x612   :  { %3495 = vmatprep.subr.mxu0 %v9805_v27  ;;  %3566 = vmatprep.subr.mxu1 %v9806_v47  ;;  %v9817_v47 = vld [vmem:[#allocation146_spill] sm:$0xff] }
 0x613   :  { %3496 = vmatpush2.msra.mxu0 %v9807_v29  ;;  %3567 = vmatpush2.msra.mxu1 %v9808_v44  ;;  %v9818_v44 = vld [vmem:[#allocation144_spill] sm:$0xff] }
 0x614   :  { %3668 = vmatprep.subr.mxu0 %v9809_v43  ;;  %3739 = vmatprep.subr.mxu1 %v9810_v0 }
 0x672   :  { %v2966_v32 = vpop.f32.mrf.mxu0  ;;  %v3037_v5 = vpop.f32.mrf.mxu1 }
 0x673   :  { %v2967_v55 = vadd.f32 %v2966_v32, %v9811_v33  ;;  %v3038_v38 = vadd.f32 %v3037_v5, %v9814_v45 }
 0x674   :  { %v2968_v25 = vpop.f32.mrf.mxu0  ;;  %v3039_v39 = vpop.f32.mrf.mxu1 }
 0x675   :  { %v4731_v19 = vmul.f32 -1.442695, %v2967_v55  ;;  %v2969_v10 = vadd.f32 %v2968_v25, %v9812_v23  ;;  %v3040_v37 = vadd.f32 %v3039_v39, %v9813_v26 }
 0x677   :  { %4906 = vpow2.f32 %v4731_v19  ;;  %v4732_v46 = vmul.f32 -1.442695, %v2969_v10  ;;  %v4733_v31 = vmul.f32 -1.442695, %v3040_v37 }
 0x679   :  { %4908 = vpow2.f32 %v4732_v46 }
 0x67a   :  { %4910 = vpow2.f32 %v4733_v31 }
 0x684   :  { %v4907_v50 = vpop.eup %4906 }
 0x685   :  { %v3045_v61 = vadd.f32 1.0, %v4907_v50 }
 0x686   :  { %v4909_v62 = vpop.eup %4908 }
 0x687   :  { %4912 = vrcp.f32 %v3045_v61  ;;  %v3051_v63 = vadd.f32 1.0, %v4909_v62  ;;  %v4911_v1 = vpop.eup %4910 }
 0x688   :  { %4914 = vtanh.f32 %v3038_v38  ;;  %v3058_v18 = vadd.f32 1.0, %v4911_v1 }
 0x689   :  { %4916 = vrcp.f32 %v3051_v63 }
 0x693   :  { %v3201_v2 = vpop.f32.mrf.mxu0  ;;  %v3272_v21 = vpop.f32.mrf.mxu1 }
 0x694   :  { %v4913_v3 = vpop.eup %4912  ;;  %v3277_v6 = vadd.f32 %v3201_v2, %v9815_v4  ;;  %v3279_v43 = vadd.f32 %v3272_v21, %v9818_v44  ;;  %v9821_v4 = vld [vmem:[#allocation162_spill] sm:$0xff]  ;;  %v7795_v21 = vld [vmem:[#allocation3 + $0x58] sm:$0xff]  ;;  %v7811_v44 = vld [vmem:[#allocation3 + $0x20] sm:$0xff] }
 0x695   :  { %v4915_v7 = vpop.eup %4914  ;;  %v3203_v9 = vpop.f32.mrf.mxu0 }
 0x696   :  { %v4917_v11 = vpop.eup %4916  ;;  %v4734_v12 = vmul.f32 -1.442695, %v3277_v6  ;;  %v3278_v15 = vadd.f32 %v3203_v9, %v9816_v14  ;;  %v3062_v16 = vmul.f32 %v4915_v7, %v4913_v3  ;;  %v3274_v27 = vpop.f32.mrf.mxu1  ;;  %v9820_v3 = vld [vmem:[#allocation161_spill] sm:$0xff]  ;;  %v7765_v6 = vld [vmem:[#allocation3 + $0xb0] sm:$0xff]  ;;  %v7771_v9 = vld [vmem:[#allocation3 + $0x98] sm:$0xff] }
 0x697   :  { %v3061_v17 = vmul.f32 %v4917_v11, %v7418_v8  ;;  %v3280_v29 = vadd.f32 %v3274_v27, %v9817_v47  ;;  %v7769_v7 = vld [vmem:[#allocation3 + $0x88] sm:$0xff]  ;;  %v7775_v11 = vld [vmem:[#allocation3 + $0x80] sm:$0xff]  ;;  %v7801_v27 = vld [vmem:[#allocation3 + $0x50] sm:$0xff] }
 0x698   :  { %4918 = vpow2.f32 %v4734_v12  ;;  %v4735_v22 = vmul.f32 -1.442695, %v3278_v15  ;;  %v7777_v12 = vld [vmem:[#allocation3 + $0x90] sm:$0xff]  ;;  %v7781_v14 = vld [vmem:[#allocation3 + $0x68] sm:$0xff]  ;;  %v7783_v15 = vld [vmem:[#allocation3 + $0x78] sm:$0xff] }
 0x699   :  { %v7690_v30 = vadd.f32 %v3062_v16, %v3061_v17  ;;  %v4736_v0 = vmul.f32 -1.442695, %v3280_v29  ;;  %v7787_v16 = vld [vmem:[#allocation3 + $0x60] sm:$0xff]  ;;  %v7789_v17 = vld [vmem:[#allocation3 + $0x70] sm:$0xff]  ;;  %v7805_v47 = vld [vmem:[#allocation3 + $0x28] sm:$0xff] }
 0x69a   :  { %4920 = vpow2.f32 %v4735_v22  ;;  %v7799_v22 = vld [vmem:[#allocation3 + $0x40] sm:$0xff]  ;;  %v7807_v29 = vld [vmem:[#allocation3 + $0x38] sm:$0xff] }
 0x69b   :  { %4922 = vrcp.f32 %v3058_v18  ;;  %v7793_v18 = vld [vmem:[#allocation3 + $0x48] sm:$0xff] }
 0x69c   :  { %4924 = vtanh.f32 %v7690_v30 }
 0x69d   :  { %4926 = vtanh.f32 %v3279_v43  ;;  %v7813_v43 = vld [vmem:[#allocation3 + $0x30] sm:$0xff] }
 0x69e   :  { %4928 = vpow2.f32 %v4736_v0  ;;  %v7817_v0 = vld [vmem:[#allocation3 + $0x8] sm:$0xff] }
 0x6a5   :  { %v4919_v32 = vpop.eup %4918 }
 0x6a6   :  { %v3284_v55 = vadd.f32 1.0, %v4919_v32  ;;  %v7819_v32 = vld [vmem:[#allocation3 + $0x18] sm:$0xff] }
 0x6a7   :  { %v4921_v8 = vpop.eup %4920 }
 0x6a8   :  { %v4923_v25 = vpop.eup %4922  ;;  %4930 = vrcp.f32 %v3284_v55  ;;  %v3290_v19 = vadd.f32 1.0, %v4921_v8  ;;  %v7823_v55 = vld [vmem:[#allocation3] sm:$0xff]  ;;  %v7827_v8 = vld [vmem:[#allocation3 + $0x10] sm:$0xff] }
 0x6a9   :  { %v4925_v10 = vpop.eup %4924 }
 0x6aa   :  { %4932 = vrcp.f32 %v3290_v19  ;;  %v3065_v5 = vmul.f32 %v4925_v10, %v4923_v25  ;;  %v4927_v46 = vpop.eup %4926  ;;  %v7837_v25 = vld [vmem:[#allocation6 + $0x1e8] sm:$0xff]  ;;  %v7839_v19 = vld [vmem:[#allocation6 + $0x1f8] sm:$0xff]  ;;  %v7843_v10 = vld [vmem:[#allocation6 + $0x1e0] sm:$0xff] }
 0x6ab   :  { %v4929_v39 = vpop.eup %4928 }
 0x6ac   :  { %3066 = vst [vmem:[#allocation8 + $0x20] sm:$0xff] %v3065_v5  ;;  %3497 = vmatprep.mubr.f32.mxu0 %v3065_v5  ;;  %3568 = vmatprep.mubr.f32.mxu1 %v3065_v5  ;;  %v3297_v38 = vadd.f32 1.0, %v4929_v39  ;;  %v7845_v5 = vld [vmem:[#allocation6 + $0x1f0] sm:$0xff]  ;;  %v7851_v39 = vld [vmem:[#allocation6 + $0x1d8] sm:$0xff] }
 0x6ae   :  { %4934 = vrcp.f32 %v3297_v38  ;;  %v7863_v38 = vld [vmem:[#allocation6 + $0x1b8] sm:$0xff] }
 0x6af   :  { %9830 = vst [vmem:[#allocation167_spill] sm:$0xff] %v7863_v38 }
 0x6b5   :  { %v4931_v37 = vpop.eup %4930 }
 0x6b6   :  { %v3301_v31 = vmul.f32 %v4931_v37, %v4927_v46  ;;  %v7849_v46 = vld [vmem:[#allocation6 + $0x1c8] sm:$0xff]  ;;  %v7855_v37 = vld [vmem:[#allocation6 + $0x1c0] sm:$0xff] }
 0x6b7   :  { %v4933_v50 = vpop.eup %4932 }
 0x6b8   :  { %v3300_v61 = vmul.f32 %v4933_v50, %v7424_v41  ;;  %v9819_v41 = vld [vmem:[#allocation160_spill] sm:$0xff]  ;;  %v7861_v50 = vld [vmem:[#allocation6 + $0x1a8] sm:$0xff] }
 0x6b9   :  { %9829 = vst [vmem:[#allocation166_spill] sm:$0xff] %v7861_v50 }
 0x6ba   :  { %v7696_v62 = vadd.f32 %v3301_v31, %v3300_v61  ;;  %v7857_v31 = vld [vmem:[#allocation6 + $0x1d0] sm:$0xff]  ;;  %v7867_v61 = vld [vmem:[#allocation6 + $0x1a0] sm:$0xff] }
 0x6bb   :  { %v4935_v63 = vpop.eup %4934  ;;  %9828 = vst [vmem:[#allocation165_spill] sm:$0xff] %v7857_v31  ;;  %9831 = vst [vmem:[#allocation168_spill] sm:$0xff] %v7867_v61 }
 0x6bc   :  { %4936 = vtanh.f32 %v7696_v62 }
 0x6c9   :  { %v4937_v1 = vpop.eup %4936 }
 0x6ca   :  { %v7699_v2 = vmul.f32 %v4937_v1, %v4935_v63  ;;  %v7869_v63 = vld [vmem:[#allocation6 + $0x1b0] sm:$0xff]  ;;  %v7873_v1 = vld [vmem:[#allocation6 + $0x188] sm:$0xff] }
 0x6cb   :  { %9832 = vst [vmem:[#allocation169_spill] sm:$0xff] %v7869_v63  ;;  %9833 = vst [vmem:[#allocation170_spill] sm:$0xff] %v7873_v1 }
 0x6cc   :  { %3498 = vmatmul.mubr.f32.vlgmr.msra.gmra.mxu0 %v7699_v2  ;;  %3569 = vmatmul.mubr.f32.vlgmr.msra.gmra.mxu1 %v7699_v2 }
 0x6cd   :  { %3669 = vmatpush1.msra.mxu0 %v7429_v57  ;;  %3740 = vmatpush1.msra.mxu1 %v7431_v20  ;;  %v9822_v57 = vld [vmem:[#allocation135_spill] sm:$0xff]  ;;  %v9823_v20 = vld [vmem:[#allocation137_spill] sm:$0xff] }
 0x6ce   :  { %3670 = vmatprep.subr.mxu0 %v7433_v24  ;;  %3741 = vmatprep.subr.mxu1 %v7435_v58  ;;  %v9824_v24 = vld [vmem:[#allocation138_spill] sm:$0xff]  ;;  %v9825_v58 = vld [vmem:[#allocation136_spill] sm:$0xff] }
 0x6cf   :  { %3671 = vmatpush1.msra.mxu0 %v7439_v53  ;;  %3742 = vmatpush1.msra.mxu1 %v7441_v13  ;;  %v9826_v53 = vld [vmem:[#allocation163_spill] sm:$0xff]  ;;  %v9827_v13 = vld [vmem:[#allocation164_spill] sm:$0xff] }
 0x6d0   :  { %3672 = vmatprep.subr.mxu0 %v7445_v36  ;;  %3743 = vmatprep.subr.mxu1 %v7447_v40  ;;  %v7727_v36 = vld [vmem:[#allocation3 + $0x100] sm:$0xff]  ;;  %v7729_v40 = vld [vmem:[#allocation3 + $0x110] sm:$0xff] }
 0x6d1   :  { %3673 = vmatpush1.msra.mxu0 %v9819_v41  ;;  %3744 = vmatpush1.msra.mxu1 %v9820_v3  ;;  %v7879_v41 = vld [vmem:[#allocation6 + $0x180] sm:$0xff]  ;;  %v7881_v3 = vld [vmem:[#allocation6 + $0x190] sm:$0xff] }
 0x6d2   :  { %3674 = vmatprep.subr.mxu0 %v9821_v4  ;;  %3745 = vmatprep.subr.mxu1 %v9822_v57  ;;  %9835 = vst [vmem:[#allocation139_spill] sm:$0xff] %v7879_v41  ;;  %9836 = vst [vmem:[#allocation141_spill] sm:$0xff] %v7881_v3  ;;  %v7885_v4 = vld [vmem:[#allocation6 + $0x168] sm:$0xff]  ;;  %v7887_v57 = vld [vmem:[#allocation6 + $0x178] sm:$0xff] }
 0x6d3   :  { %3675 = vmatpush1.msra.mxu0 %v9823_v20  ;;  %3746 = vmatpush1.msra.mxu1 %v9824_v24  ;;  %9837 = vst [vmem:[#allocation142_spill] sm:$0xff] %v7885_v4  ;;  %9838 = vst [vmem:[#allocation140_spill] sm:$0xff] %v7887_v57  ;;  %v7891_v20 = vld [vmem:[#allocation6 + $0x160] sm:$0xff]  ;;  %v7893_v24 = vld [vmem:[#allocation6 + $0x170] sm:$0xff] }
 0x6d4   :  { %3676 = vmatprep.subr.mxu0 %v9825_v58  ;;  %3747 = vmatprep.subr.mxu1 %v9826_v53  ;;  %9839 = vst [vmem:[#allocation133_spill] sm:$0xff] %v7891_v20  ;;  %9840 = vst [vmem:[#allocation134_spill] sm:$0xff] %v7893_v24  ;;  %v7897_v58 = vld [vmem:[#allocation6 + $0x148] sm:$0xff]  ;;  %v7899_v53 = vld [vmem:[#allocation6 + $0x158] sm:$0xff] }
 0x6d5   :  { %3677 = vmatpush1.msra.mxu0 %v9827_v13  ;;  %3748 = vmatpush1.msra.mxu1 %v7477_v49  ;;  %v7733_v49 = vld [vmem:[#allocation3 + $0xe8] sm:$0xff]  ;;  %9841 = vst [vmem:[#allocation132_spill] sm:$0xff] %v7897_v58  ;;  %9842 = vst [vmem:[#allocation16_spill] sm:$0xff] %v7899_v53  ;;  %v7903_v13 = vld [vmem:[#allocation6 + $0x140] sm:$0xff] }
 0x6d6   :  { %3678 = vmatprep.subr.mxu0 %v7481_v34  ;;  %3749 = vmatprep.subr.mxu1 %v7483_v59  ;;  %v7735_v34 = vld [vmem:[#allocation3 + $0xf8] sm:$0xff]  ;;  %v7739_v59 = vld [vmem:[#allocation3 + $0xe0] sm:$0xff]  ;;  %9843 = vst [vmem:[#allocation17_spill] sm:$0xff] %v7903_v13 }
 0x6d7   :  { %3679 = vmatpush1.msra.mxu0 %v7487_v60  ;;  %3750 = vmatpush1.msra.mxu1 %v7489_v28  ;;  %v7741_v60 = vld [vmem:[#allocation3 + $0xf0] sm:$0xff]  ;;  %v7745_v28 = vld [vmem:[#allocation3 + $0xc8] sm:$0xff] }
 0x6d8   :  { %3680 = vmatprep.subr.mxu0 %v7493_v42  ;;  %3751 = vmatprep.subr.mxu1 %v7495_v35  ;;  %v7747_v42 = vld [vmem:[#allocation3 + $0xd8] sm:$0xff]  ;;  %v7751_v35 = vld [vmem:[#allocation3 + $0xc0] sm:$0xff] }
 0x6d9   :  { %3681 = vmatpush1.msra.mxu0 %v7499_v54  ;;  %3752 = vmatpush1.msra.mxu1 %v7501_v56  ;;  %v7753_v54 = vld [vmem:[#allocation3 + $0xd0] sm:$0xff]  ;;  %v7757_v56 = vld [vmem:[#allocation3 + $0xa8] sm:$0xff] }
 0x6da   :  { %3682 = vmatprep.subr.mxu0 %v7505_v51  ;;  %3753 = vmatprep.subr.mxu1 %v7507_v52  ;;  %v7759_v51 = vld [vmem:[#allocation3 + $0xb8] sm:$0xff]  ;;  %v7763_v52 = vld [vmem:[#allocation3 + $0xa0] sm:$0xff] }
 0x6db   :  { %3683 = vmatpush1.msra.mxu0 %v7727_v36  ;;  %3754 = vmatpush1.msra.mxu1 %v7729_v40 }
 0x6dc   :  { %3684 = vmatprep.subr.mxu0 %v7733_v49  ;;  %3755 = vmatprep.subr.mxu1 %v7735_v34 }
 0x6dd   :  { %3685 = vmatpush1.msra.mxu0 %v7739_v59  ;;  %3756 = vmatpush1.msra.mxu1 %v7741_v60 }
 0x6de   :  { %3686 = vmatprep.subr.mxu0 %v7745_v28  ;;  %3757 = vmatprep.subr.mxu1 %v7747_v42 }
 0x6df   :  { %3687 = vmatpush1.msra.mxu0 %v7751_v35  ;;  %3758 = vmatpush1.msra.mxu1 %v7753_v54 }
 0x6e0   :  { %3688 = vmatprep.subr.mxu0 %v7757_v56  ;;  %3759 = vmatprep.subr.mxu1 %v7759_v51 }
 0x6e1   :  { %3689 = vmatpush1.msra.mxu0 %v7763_v52  ;;  %3760 = vmatpush1.msra.mxu1 %v7765_v6 }
 0x6e2   :  { %3690 = vmatprep.subr.mxu0 %v7769_v7  ;;  %3761 = vmatprep.subr.mxu1 %v7771_v9 }
 0x6e3   :  { %3691 = vmatpush1.msra.mxu0 %v7775_v11  ;;  %3762 = vmatpush1.msra.mxu1 %v7777_v12 }
 0x6e4   :  { %3692 = vmatprep.subr.mxu0 %v7781_v14  ;;  %3763 = vmatprep.subr.mxu1 %v7783_v15 }
 0x6e5   :  { %3693 = vmatpush1.msra.mxu0 %v7787_v16  ;;  %3764 = vmatpush1.msra.mxu1 %v7789_v17 }
 0x6e6   :  { %3694 = vmatprep.subr.mxu0 %v7793_v18  ;;  %3765 = vmatprep.subr.mxu1 %v7795_v21 }
 0x6e7   :  { %3695 = vmatpush1.msra.mxu0 %v7799_v22  ;;  %3766 = vmatpush1.msra.mxu1 %v7801_v27 }
 0x6e8   :  { %3696 = vmatprep.subr.mxu0 %v7805_v47  ;;  %3767 = vmatprep.subr.mxu1 %v7807_v29 }
 0x6e9   :  { %3697 = vmatpush1.msra.mxu0 %v7811_v44  ;;  %3768 = vmatpush1.msra.mxu1 %v7813_v43 }
 0x6ea   :  { %3698 = vmatprep.subr.mxu0 %v7817_v0  ;;  %3769 = vmatprep.subr.mxu1 %v7819_v32 }
 0x6eb   :  { %3699 = vmatpush1.msra.mxu0 %v7823_v55  ;;  %3732 = vmatprep.mubr.f32.mxu0 %v9132_v48 }
 0x6ec   :  { %3770 = vmatpush1.msra.mxu1 %v7827_v8  ;;  %3803 = vmatprep.mubr.f32.mxu1 %v9132_v48 }
 0x6ed   :  { %3733 = vmatmul.mubr.f32.vlgmr.msra.gmra.mxu0 %v7699_v2  ;;  %3804 = vmatmul.mubr.f32.vlgmr.msra.gmra.mxu1 %v7699_v2  ;;  %v7875_v2 = vld [vmem:[#allocation6 + $0x198] sm:$0xff] }
 0x6ee   :  { %3966 = vmatprep.subr.mxu0 %v7837_v25  ;;  %4037 = vmatprep.subr.mxu1 %v7839_v19  ;;  %9834 = vst [vmem:[#allocation131_spill] sm:$0xff] %v7875_v2 }
 0x6ef   :  { %3967 = vmatpush1.msra.mxu0 %v7843_v10  ;;  %4038 = vmatpush1.msra.mxu1 %v7845_v5 }
 0x6f0   :  { %3968 = vmatprep.subr.mxu0 %v7849_v46  ;;  %4039 = vmatprep.subr.mxu1 %v7851_v39 }
 0x6f1   :  { %3969 = vmatpush1.msra.mxu0 %v7855_v37  ;;  %4040 = vmatpush1.msra.mxu1 %v7857_v31 }
 0x6f2   :  { %3970 = vmatprep.subr.mxu0 %v7861_v50  ;;  %4041 = vmatprep.subr.mxu1 %v7863_v38 }
 0x6f3   :  { %3971 = vmatpush1.msra.mxu0 %v7867_v61  ;;  %4042 = vmatpush1.msra.mxu1 %v7869_v63 }
 0x6f4   :  { %3972 = vmatprep.subr.mxu0 %v7873_v1  ;;  %4043 = vmatprep.subr.mxu1 %v7875_v2  ;;  %v8147_v2 = vld [vmem:[#allocation6 + $0x2b8] sm:$0xff]  ;;  %v8163_v1 = vld [vmem:[#allocation6 + $0x280] sm:$0xff] }
 0x6f5   :  { %3973 = vmatpush1.msra.mxu0 %v7879_v41  ;;  %4044 = vmatpush1.msra.mxu1 %v7881_v3  ;;  %v8131_v3 = vld [vmem:[#allocation6 + $0x2f0] sm:$0xff]  ;;  %v8139_v41 = vld [vmem:[#allocation6 + $0x2c0] sm:$0xff]  ;;  %9926 = vst [vmem:[#allocation100_spill] sm:$0xff] %v8147_v2  ;;  %9931 = vst [vmem:[#allocation105_spill] sm:$0xff] %v8163_v1 }
 0x6f6   :  { %3974 = vmatprep.subr.mxu0 %v7885_v4  ;;  %4045 = vmatprep.subr.mxu1 %v7887_v57  ;;  %v7905_v4 = vld [vmem:[#allocation6 + $0x150] sm:$0xff]  ;;  %v7909_v57 = vld [vmem:[#allocation6 + $0x128] sm:$0xff]  ;;  %9920 = vst [vmem:[#allocation94_spill] sm:$0xff] %v8131_v3  ;;  %9923 = vst [vmem:[#allocation97_spill] sm:$0xff] %v8139_v41 }
 0x6f7   :  { %3975 = vmatpush1.msra.mxu0 %v7891_v20  ;;  %4046 = vmatpush1.msra.mxu1 %v7893_v24  ;;  %9844 = vst [vmem:[#allocation18_spill] sm:$0xff] %v7905_v4  ;;  %9845 = vst [vmem:[#allocation19_spill] sm:$0xff] %v7909_v57  ;;  %v7911_v20 = vld [vmem:[#allocation6 + $0x138] sm:$0xff]  ;;  %v7915_v24 = vld [vmem:[#allocation6 + $0x120] sm:$0xff] }
 0x6f8   :  { %3976 = vmatprep.subr.mxu0 %v7897_v58  ;;  %4047 = vmatprep.subr.mxu1 %v7899_v53  ;;  %9846 = vst [vmem:[#allocation20_spill] sm:$0xff] %v7911_v20  ;;  %9847 = vst [vmem:[#allocation21_spill] sm:$0xff] %v7915_v24  ;;  %v7917_v58 = vld [vmem:[#allocation6 + $0x130] sm:$0xff]  ;;  %v7921_v53 = vld [vmem:[#allocation6 + $0x108] sm:$0xff] }
 0x6f9   :  { %3977 = vmatpush1.msra.mxu0 %v7903_v13  ;;  %4048 = vmatpush1.msra.mxu1 %v7905_v4  ;;  %9848 = vst [vmem:[#allocation22_spill] sm:$0xff] %v7917_v58  ;;  %9849 = vst [vmem:[#allocation23_spill] sm:$0xff] %v7921_v53  ;;  %v7923_v13 = vld [vmem:[#allocation6 + $0x118] sm:$0xff]  ;;  %v7927_v4 = vld [vmem:[#allocation6 + $0x100] sm:$0xff] }
 0x6fa   :  { %3978 = vmatprep.subr.mxu0 %v7909_v57  ;;  %4049 = vmatprep.subr.mxu1 %v7911_v20  ;;  %9850 = vst [vmem:[#allocation24_spill] sm:$0xff] %v7923_v13  ;;  %9851 = vst [vmem:[#allocation25_spill] sm:$0xff] %v7927_v4  ;;  %v7929_v57 = vld [vmem:[#allocation6 + $0x110] sm:$0xff]  ;;  %v7933_v20 = vld [vmem:[#allocation6 + $0xe8] sm:$0xff] }
 0x6fb   :  { %3979 = vmatpush1.msra.mxu0 %v7915_v24  ;;  %4050 = vmatpush1.msra.mxu1 %v7917_v58  ;;  %9852 = vst [vmem:[#allocation26_spill] sm:$0xff] %v7929_v57  ;;  %9853 = vst [vmem:[#allocation27_spill] sm:$0xff] %v7933_v20  ;;  %v7935_v24 = vld [vmem:[#allocation6 + $0xf8] sm:$0xff]  ;;  %v7939_v58 = vld [vmem:[#allocation6 + $0xe0] sm:$0xff] }
 0x6fc   :  { %3980 = vmatprep.subr.mxu0 %v7921_v53  ;;  %4051 = vmatprep.subr.mxu1 %v7923_v13  ;;  %9854 = vst [vmem:[#allocation28_spill] sm:$0xff] %v7935_v24  ;;  %9855 = vst [vmem:[#allocation29_spill] sm:$0xff] %v7939_v58  ;;  %v7941_v53 = vld [vmem:[#allocation6 + $0xf0] sm:$0xff]  ;;  %v7945_v13 = vld [vmem:[#allocation6 + $0xc8] sm:$0xff] }
 0x6fd   :  { %3981 = vmatpush1.msra.mxu0 %v7927_v4  ;;  %4052 = vmatpush1.msra.mxu1 %v7929_v57  ;;  %9856 = vst [vmem:[#allocation30_spill] sm:$0xff] %v7941_v53  ;;  %9857 = vst [vmem:[#allocation31_spill] sm:$0xff] %v7945_v13  ;;  %v7947_v4 = vld [vmem:[#allocation6 + $0xd8] sm:$0xff]  ;;  %v7951_v57 = vld [vmem:[#allocation6 + $0xc0] sm:$0xff] }
 0x6fe   :  { %3982 = vmatprep.subr.mxu0 %v7933_v20  ;;  %4053 = vmatprep.subr.mxu1 %v7935_v24  ;;  %9858 = vst [vmem:[#allocation32_spill] sm:$0xff] %v7947_v4  ;;  %9859 = vst [vmem:[#allocation33_spill] sm:$0xff] %v7951_v57  ;;  %v7953_v20 = vld [vmem:[#allocation6 + $0xd0] sm:$0xff]  ;;  %v7957_v24 = vld [vmem:[#allocation6 + $0xa8] sm:$0xff] }
 0x6ff   :  { %3983 = vmatpush1.msra.mxu0 %v7939_v58  ;;  %4054 = vmatpush1.msra.mxu1 %v7941_v53  ;;  %9860 = vst [vmem:[#allocation34_spill] sm:$0xff] %v7953_v20  ;;  %9861 = vst [vmem:[#allocation35_spill] sm:$0xff] %v7957_v24  ;;  %v7959_v58 = vld [vmem:[#allocation6 + $0xb8] sm:$0xff]  ;;  %v7963_v53 = vld [vmem:[#allocation6 + $0xa0] sm:$0xff] }
 0x700   :  { %3984 = vmatprep.subr.mxu0 %v7945_v13  ;;  %4055 = vmatprep.subr.mxu1 %v7947_v4  ;;  %9862 = vst [vmem:[#allocation36_spill] sm:$0xff] %v7959_v58  ;;  %9863 = vst [vmem:[#allocation37_spill] sm:$0xff] %v7963_v53  ;;  %v7965_v13 = vld [vmem:[#allocation6 + $0xb0] sm:$0xff]  ;;  %v7969_v4 = vld [vmem:[#allocation6 + $0x88] sm:$0xff] }
 0x701   :  { %3985 = vmatpush1.msra.mxu0 %v7951_v57  ;;  %4056 = vmatpush1.msra.mxu1 %v7953_v20  ;;  %9864 = vst [vmem:[#allocation38_spill] sm:$0xff] %v7965_v13  ;;  %9865 = vst [vmem:[#allocation39_spill] sm:$0xff] %v7969_v4  ;;  %v7971_v57 = vld [vmem:[#allocation6 + $0x98] sm:$0xff]  ;;  %v7975_v20 = vld [vmem:[#allocation6 + $0x80] sm:$0xff] }
 0x702   :  { %3986 = vmatprep.subr.mxu0 %v7957_v24  ;;  %4057 = vmatprep.subr.mxu1 %v7959_v58  ;;  %9866 = vst [vmem:[#allocation40_spill] sm:$0xff] %v7971_v57  ;;  %9867 = vst [vmem:[#allocation41_spill] sm:$0xff] %v7975_v20  ;;  %v7977_v24 = vld [vmem:[#allocation6 + $0x90] sm:$0xff]  ;;  %v7981_v58 = vld [vmem:[#allocation6 + $0x68] sm:$0xff] }
 0x703   :  { %3987 = vmatpush1.msra.mxu0 %v7963_v53  ;;  %4058 = vmatpush1.msra.mxu1 %v7965_v13  ;;  %9868 = vst [vmem:[#allocation42_spill] sm:$0xff] %v7977_v24  ;;  %9869 = vst [vmem:[#allocation43_spill] sm:$0xff] %v7981_v58  ;;  %v7983_v53 = vld [vmem:[#allocation6 + $0x78] sm:$0xff]  ;;  %v7987_v13 = vld [vmem:[#allocation6 + $0x60] sm:$0xff] }
 0x704   :  { %3988 = vmatprep.subr.mxu0 %v7969_v4  ;;  %4059 = vmatprep.subr.mxu1 %v7971_v57  ;;  %9870 = vst [vmem:[#allocation44_spill] sm:$0xff] %v7983_v53  ;;  %9871 = vst [vmem:[#allocation45_spill] sm:$0xff] %v7987_v13  ;;  %v7989_v4 = vld [vmem:[#allocation6 + $0x70] sm:$0xff]  ;;  %v7993_v57 = vld [vmem:[#allocation6 + $0x48] sm:$0xff] }
 0x705   :  { %3989 = vmatpush1.msra.mxu0 %v7975_v20  ;;  %4060 = vmatpush1.msra.mxu1 %v7977_v24  ;;  %9872 = vst [vmem:[#allocation46_spill] sm:$0xff] %v7989_v4  ;;  %9873 = vst [vmem:[#allocation47_spill] sm:$0xff] %v7993_v57  ;;  %v7995_v20 = vld [vmem:[#allocation6 + $0x58] sm:$0xff]  ;;  %v7999_v24 = vld [vmem:[#allocation6 + $0x40] sm:$0xff] }
 0x706   :  { %3990 = vmatprep.subr.mxu0 %v7981_v58  ;;  %4061 = vmatprep.subr.mxu1 %v7983_v53  ;;  %9874 = vst [vmem:[#allocation48_spill] sm:$0xff] %v7995_v20  ;;  %9875 = vst [vmem:[#allocation49_spill] sm:$0xff] %v7999_v24  ;;  %v8001_v58 = vld [vmem:[#allocation6 + $0x50] sm:$0xff]  ;;  %v8005_v53 = vld [vmem:[#allocation6 + $0x28] sm:$0xff] }
 0x707   :  { %3991 = vmatpush1.msra.mxu0 %v7987_v13  ;;  %4062 = vmatpush1.msra.mxu1 %v7989_v4  ;;  %9876 = vst [vmem:[#allocation50_spill] sm:$0xff] %v8001_v58  ;;  %9877 = vst [vmem:[#allocation51_spill] sm:$0xff] %v8005_v53  ;;  %v8007_v13 = vld [vmem:[#allocation6 + $0x38] sm:$0xff]  ;;  %v8011_v4 = vld [vmem:[#allocation6 + $0x20] sm:$0xff] }
 0x708   :  { %3992 = vmatprep.subr.mxu0 %v7993_v57  ;;  %4063 = vmatprep.subr.mxu1 %v7995_v20  ;;  %9878 = vst [vmem:[#allocation52_spill] sm:$0xff] %v8007_v13  ;;  %9879 = vst [vmem:[#allocation53_spill] sm:$0xff] %v8011_v4  ;;  %v8013_v57 = vld [vmem:[#allocation6 + $0x30] sm:$0xff]  ;;  %v8017_v20 = vld [vmem:[#allocation6 + $0x8] sm:$0xff] }
 0x709   :  { %3993 = vmatpush1.msra.mxu0 %v7999_v24  ;;  %4064 = vmatpush1.msra.mxu1 %v8001_v58  ;;  %9880 = vst [vmem:[#allocation54_spill] sm:$0xff] %v8013_v57  ;;  %9881 = vst [vmem:[#allocation55_spill] sm:$0xff] %v8017_v20  ;;  %v8019_v24 = vld [vmem:[#allocation6 + $0x18] sm:$0xff]  ;;  %v8023_v58 = vld [vmem:[#allocation6] sm:$0xff] }
 0x70a   :  { %3994 = vmatprep.subr.mxu0 %v8005_v53  ;;  %4065 = vmatprep.subr.mxu1 %v8007_v13  ;;  %9882 = vst [vmem:[#allocation56_spill] sm:$0xff] %v8019_v24  ;;  %9883 = vst [vmem:[#allocation57_spill] sm:$0xff] %v8023_v58  ;;  %v8025_v53 = vld [vmem:[#allocation6 + $0x10] sm:$0xff]  ;;  %v8029_v13 = vld [vmem:[#allocation6 + $0x3e8] sm:$0xff] }
 0x70b   :  { %3995 = vmatpush1.msra.mxu0 %v8011_v4  ;;  %4066 = vmatpush1.msra.mxu1 %v8013_v57  ;;  %9884 = vst [vmem:[#allocation58_spill] sm:$0xff] %v8025_v53  ;;  %9885 = vst [vmem:[#allocation59_spill] sm:$0xff] %v8029_v13  ;;  %v8031_v4 = vld [vmem:[#allocation6 + $0x3f8] sm:$0xff]  ;;  %v8035_v57 = vld [vmem:[#allocation6 + $0x3e0] sm:$0xff] }
 0x70c   :  { %3996 = vmatprep.subr.mxu0 %v8017_v20  ;;  %4067 = vmatprep.subr.mxu1 %v8019_v24  ;;  %9886 = vst [vmem:[#allocation60_spill] sm:$0xff] %v8031_v4  ;;  %9887 = vst [vmem:[#allocation61_spill] sm:$0xff] %v8035_v57  ;;  %v8037_v20 = vld [vmem:[#allocation6 + $0x3f0] sm:$0xff]  ;;  %v8041_v24 = vld [vmem:[#allocation6 + $0x3c8] sm:$0xff] }
 0x70d   :  { %3997 = vmatpush1.msra.mxu0 %v8023_v58  ;;  %4068 = vmatpush1.msra.mxu1 %v8025_v53  ;;  %9888 = vst [vmem:[#allocation62_spill] sm:$0xff] %v8037_v20  ;;  %9889 = vst [vmem:[#allocation63_spill] sm:$0xff] %v8041_v24  ;;  %v8043_v58 = vld [vmem:[#allocation6 + $0x3d8] sm:$0xff]  ;;  %v8047_v53 = vld [vmem:[#allocation6 + $0x3c0] sm:$0xff] }
 0x70e   :  { %3998 = vmatprep.subr.mxu0 %v8029_v13  ;;  %4069 = vmatprep.subr.mxu1 %v8031_v4  ;;  %9890 = vst [vmem:[#allocation64_spill] sm:$0xff] %v8043_v58  ;;  %9891 = vst [vmem:[#allocation65_spill] sm:$0xff] %v8047_v53  ;;  %v8049_v13 = vld [vmem:[#allocation6 + $0x3d0] sm:$0xff]  ;;  %v8053_v4 = vld [vmem:[#allocation6 + $0x3a8] sm:$0xff] }
 0x70f   :  { %3999 = vmatpush2.msra.mxu0 %v8035_v57  ;;  %4070 = vmatpush2.msra.mxu1 %v8037_v20  ;;  %9892 = vst [vmem:[#allocation66_spill] sm:$0xff] %v8049_v13  ;;  %9893 = vst [vmem:[#allocation67_spill] sm:$0xff] %v8053_v4  ;;  %v8055_v57 = vld [vmem:[#allocation6 + $0x3b8] sm:$0xff]  ;;  %v8059_v20 = vld [vmem:[#allocation6 + $0x3a0] sm:$0xff] }
 0x710   :  { %4000 = vmatprep.subr.mxu0 %v8041_v24  ;;  %4071 = vmatprep.subr.mxu1 %v8043_v58  ;;  %9894 = vst [vmem:[#allocation68_spill] sm:$0xff] %v8055_v57  ;;  %9895 = vst [vmem:[#allocation69_spill] sm:$0xff] %v8059_v20  ;;  %v8061_v24 = vld [vmem:[#allocation6 + $0x3b0] sm:$0xff]  ;;  %v8065_v58 = vld [vmem:[#allocation6 + $0x388] sm:$0xff] }
 0x711   :  { %4001 = vmatpush2.msra.mxu0 %v8047_v53  ;;  %4072 = vmatpush2.msra.mxu1 %v8049_v13  ;;  %9896 = vst [vmem:[#allocation70_spill] sm:$0xff] %v8061_v24  ;;  %9897 = vst [vmem:[#allocation71_spill] sm:$0xff] %v8065_v58  ;;  %v8067_v53 = vld [vmem:[#allocation6 + $0x398] sm:$0xff]  ;;  %v8071_v13 = vld [vmem:[#allocation6 + $0x380] sm:$0xff] }
 0x712   :  { %4002 = vmatprep.subr.mxu0 %v8053_v4  ;;  %4073 = vmatprep.subr.mxu1 %v8055_v57  ;;  %9898 = vst [vmem:[#allocation72_spill] sm:$0xff] %v8067_v53  ;;  %9899 = vst [vmem:[#allocation73_spill] sm:$0xff] %v8071_v13  ;;  %v8073_v4 = vld [vmem:[#allocation6 + $0x390] sm:$0xff]  ;;  %v8077_v57 = vld [vmem:[#allocation6 + $0x368] sm:$0xff] }
 0x713   :  { %4003 = vmatpush2.msra.mxu0 %v8059_v20  ;;  %4074 = vmatpush2.msra.mxu1 %v8061_v24  ;;  %9900 = vst [vmem:[#allocation74_spill] sm:$0xff] %v8073_v4  ;;  %9901 = vst [vmem:[#allocation75_spill] sm:$0xff] %v8077_v57  ;;  %v8079_v20 = vld [vmem:[#allocation6 + $0x378] sm:$0xff]  ;;  %v8083_v24 = vld [vmem:[#allocation6 + $0x360] sm:$0xff] }
 0x714   :  { %4004 = vmatprep.subr.mxu0 %v8065_v58  ;;  %4075 = vmatprep.subr.mxu1 %v8067_v53  ;;  %9902 = vst [vmem:[#allocation76_spill] sm:$0xff] %v8079_v20  ;;  %9903 = vst [vmem:[#allocation77_spill] sm:$0xff] %v8083_v24  ;;  %v8085_v58 = vld [vmem:[#allocation6 + $0x370] sm:$0xff]  ;;  %v8089_v53 = vld [vmem:[#allocation6 + $0x348] sm:$0xff] }
 0x715   :  { %4005 = vmatpush2.msra.mxu0 %v8071_v13  ;;  %4076 = vmatpush2.msra.mxu1 %v8073_v4  ;;  %9904 = vst [vmem:[#allocation78_spill] sm:$0xff] %v8085_v58  ;;  %9905 = vst [vmem:[#allocation79_spill] sm:$0xff] %v8089_v53  ;;  %v8091_v13 = vld [vmem:[#allocation6 + $0x358] sm:$0xff]  ;;  %v8095_v4 = vld [vmem:[#allocation6 + $0x340] sm:$0xff] }
 0x716   :  { %4006 = vmatprep.subr.mxu0 %v8077_v57  ;;  %4077 = vmatprep.subr.mxu1 %v8079_v20  ;;  %9906 = vst [vmem:[#allocation80_spill] sm:$0xff] %v8091_v13  ;;  %9907 = vst [vmem:[#allocation81_spill] sm:$0xff] %v8095_v4  ;;  %v8097_v57 = vld [vmem:[#allocation6 + $0x350] sm:$0xff]  ;;  %v8101_v20 = vld [vmem:[#allocation6 + $0x328] sm:$0xff] }
 0x717   :  { %4007 = vmatpush2.msra.mxu0 %v8083_v24  ;;  %4078 = vmatpush2.msra.mxu1 %v8085_v58  ;;  %9908 = vst [vmem:[#allocation82_spill] sm:$0xff] %v8097_v57  ;;  %9909 = vst [vmem:[#allocation83_spill] sm:$0xff] %v8101_v20  ;;  %v8103_v24 = vld [vmem:[#allocation6 + $0x338] sm:$0xff]  ;;  %v8107_v58 = vld [vmem:[#allocation6 + $0x320] sm:$0xff] }
 0x718   :  { %4008 = vmatprep.subr.mxu0 %v8089_v53  ;;  %4079 = vmatprep.subr.mxu1 %v8091_v13  ;;  %9910 = vst [vmem:[#allocation84_spill] sm:$0xff] %v8103_v24  ;;  %9911 = vst [vmem:[#allocation85_spill] sm:$0xff] %v8107_v58  ;;  %v8109_v53 = vld [vmem:[#allocation6 + $0x330] sm:$0xff]  ;;  %v8113_v13 = vld [vmem:[#allocation6 + $0x308] sm:$0xff] }
 0x719   :  { %4009 = vmatpush2.msra.mxu0 %v8095_v4  ;;  %4080 = vmatpush2.msra.mxu1 %v8097_v57  ;;  %9912 = vst [vmem:[#allocation86_spill] sm:$0xff] %v8109_v53  ;;  %9913 = vst [vmem:[#allocation87_spill] sm:$0xff] %v8113_v13  ;;  %v8115_v4 = vld [vmem:[#allocation6 + $0x318] sm:$0xff]  ;;  %v8119_v57 = vld [vmem:[#allocation6 + $0x300] sm:$0xff] }
 0x71a   :  { %4010 = vmatprep.subr.mxu0 %v8101_v20  ;;  %4081 = vmatprep.subr.mxu1 %v8103_v24  ;;  %9914 = vst [vmem:[#allocation88_spill] sm:$0xff] %v8115_v4  ;;  %9915 = vst [vmem:[#allocation89_spill] sm:$0xff] %v8119_v57  ;;  %v8121_v20 = vld [vmem:[#allocation6 + $0x310] sm:$0xff]  ;;  %v8123_v24 = vld [vmem:[#allocation6 + $0x2e8] sm:$0xff] }
 0x71b   :  { %4011 = vmatpush2.msra.mxu0 %v8107_v58  ;;  %4082 = vmatpush2.msra.mxu1 %v8109_v53  ;;  %9916 = vst [vmem:[#allocation90_spill] sm:$0xff] %v8121_v20  ;;  %9917 = vst [vmem:[#allocation91_spill] sm:$0xff] %v8123_v24  ;;  %v8127_v58 = vld [vmem:[#allocation6 + $0x2f8] sm:$0xff]  ;;  %v8129_v53 = vld [vmem:[#allocation6 + $0x2e0] sm:$0xff] }
 0x71c   :  { %4012 = vmatprep.subr.mxu0 %v8113_v13  ;;  %4083 = vmatprep.subr.mxu1 %v8115_v4  ;;  %9918 = vst [vmem:[#allocation92_spill] sm:$0xff] %v8127_v58  ;;  %9919 = vst [vmem:[#allocation93_spill] sm:$0xff] %v8129_v53  ;;  %v8135_v4 = vld [vmem:[#allocation6 + $0x2c8] sm:$0xff]  ;;  %v8137_v13 = vld [vmem:[#allocation6 + $0x2d8] sm:$0xff] }
 0x71d   :  { %4013 = vmatpush2.msra.mxu0 %v8119_v57  ;;  %4084 = vmatpush2.msra.mxu1 %v8121_v20  ;;  %9921 = vst [vmem:[#allocation95_spill] sm:$0xff] %v8135_v4  ;;  %9922 = vst [vmem:[#allocation96_spill] sm:$0xff] %v8137_v13  ;;  %v8143_v20 = vld [vmem:[#allocation6 + $0x2d0] sm:$0xff]  ;;  %v8145_v57 = vld [vmem:[#allocation6 + $0x2a8] sm:$0xff] }
 0x71e   :  { %4014 = vmatprep.subr.mxu0 %v8123_v24  ;;  %4085 = vmatprep.subr.mxu1 %v8127_v58  ;;  %9924 = vst [vmem:[#allocation98_spill] sm:$0xff] %v8143_v20  ;;  %9925 = vst [vmem:[#allocation99_spill] sm:$0xff] %v8145_v57  ;;  %v8151_v58 = vld [vmem:[#allocation6 + $0x2a0] sm:$0xff]  ;;  %v8153_v24 = vld [vmem:[#allocation6 + $0x2b0] sm:$0xff] }
 0x71f   :  { %4015 = vmatpush2.msra.mxu0 %v8129_v53  ;;  %4086 = vmatpush2.msra.mxu1 %v8131_v3  ;;  %9927 = vst [vmem:[#allocation101_spill] sm:$0xff] %v8151_v58  ;;  %9928 = vst [vmem:[#allocation102_spill] sm:$0xff] %v8153_v24  ;;  %v8157_v53 = vld [vmem:[#allocation6 + $0x288] sm:$0xff]  ;;  %v8159_v3 = vld [vmem:[#allocation6 + $0x298] sm:$0xff] }
 0x720   :  { %4016 = vmatprep.subr.mxu0 %v8135_v4  ;;  %4087 = vmatprep.subr.mxu1 %v8137_v13  ;;  %9929 = vst [vmem:[#allocation103_spill] sm:$0xff] %v8157_v53  ;;  %9930 = vst [vmem:[#allocation104_spill] sm:$0xff] %v8159_v3  ;;  %v8165_v4 = vld [vmem:[#allocation6 + $0x290] sm:$0xff]  ;;  %v8169_v13 = vld [vmem:[#allocation6 + $0x268] sm:$0xff] }
 0x721   :  { %4017 = vmatpush2.msra.mxu0 %v8139_v41  ;;  %4088 = vmatpush2.msra.mxu1 %v8143_v20  ;;  %9932 = vst [vmem:[#allocation106_spill] sm:$0xff] %v8165_v4  ;;  %9933 = vst [vmem:[#allocation107_spill] sm:$0xff] %v8169_v13  ;;  %v8171_v41 = vld [vmem:[#allocation6 + $0x278] sm:$0xff]  ;;  %v8175_v20 = vld [vmem:[#allocation6 + $0x260] sm:$0xff] }
 0x722   :  { %4018 = vmatprep.subr.mxu0 %v8145_v57  ;;  %4089 = vmatprep.subr.mxu1 %v8147_v2  ;;  %9934 = vst [vmem:[#allocation108_spill] sm:$0xff] %v8171_v41  ;;  %9935 = vst [vmem:[#allocation109_spill] sm:$0xff] %v8175_v20  ;;  %v8177_v57 = vld [vmem:[#allocation6 + $0x270] sm:$0xff]  ;;  %v8181_v2 = vld [vmem:[#allocation6 + $0x248] sm:$0xff] }
 0x723   :  { %4019 = vmatpush2.msra.mxu0 %v8151_v58  ;;  %4090 = vmatpush2.msra.mxu1 %v8153_v24  ;;  %9936 = vst [vmem:[#allocation110_spill] sm:$0xff] %v8177_v57  ;;  %9937 = vst [vmem:[#allocation111_spill] sm:$0xff] %v8181_v2  ;;  %v8183_v58 = vld [vmem:[#allocation6 + $0x258] sm:$0xff]  ;;  %v8187_v24 = vld [vmem:[#allocation6 + $0x240] sm:$0xff] }
 0x724   :  { %4020 = vmatprep.subr.mxu0 %v8157_v53  ;;  %4091 = vmatprep.subr.mxu1 %v8159_v3  ;;  %9938 = vst [vmem:[#allocation112_spill] sm:$0xff] %v8183_v58  ;;  %9939 = vst [vmem:[#allocation113_spill] sm:$0xff] %v8187_v24  ;;  %v8189_v53 = vld [vmem:[#allocation6 + $0x250] sm:$0xff]  ;;  %v8193_v3 = vld [vmem:[#allocation6 + $0x228] sm:$0xff] }
 0x725   :  { %4021 = vmatpush2.msra.mxu0 %v8163_v1  ;;  %4092 = vmatpush2.msra.mxu1 %v8165_v4  ;;  %9940 = vst [vmem:[#allocation114_spill] sm:$0xff] %v8189_v53  ;;  %9941 = vst [vmem:[#allocation115_spill] sm:$0xff] %v8193_v3  ;;  %v8195_v1 = vld [vmem:[#allocation6 + $0x238] sm:$0xff]  ;;  %v8199_v4 = vld [vmem:[#allocation6 + $0x220] sm:$0xff] }
 0x726   :  { %4022 = vmatprep.subr.mxu0 %v8169_v13  ;;  %4093 = vmatprep.subr.mxu1 %v8171_v41  ;;  %9942 = vst [vmem:[#allocation116_spill] sm:$0xff] %v8195_v1  ;;  %9943 = vst [vmem:[#allocation117_spill] sm:$0xff] %v8199_v4  ;;  %v8201_v13 = vld [vmem:[#allocation6 + $0x230] sm:$0xff]  ;;  %v8205_v41 = vld [vmem:[#allocation6 + $0x208] sm:$0xff] }
 0x727   :  { %4023 = vmatpush2.msra.mxu0 %v8175_v20  ;;  %4094 = vmatpush2.msra.mxu1 %v8177_v57  ;;  %9944 = vst [vmem:[#allocation118_spill] sm:$0xff] %v8201_v13  ;;  %9945 = vst [vmem:[#allocation119_spill] sm:$0xff] %v8205_v41  ;;  %v8207_v20 = vld [vmem:[#allocation6 + $0x218] sm:$0xff]  ;;  %v8211_v57 = vld [vmem:[#allocation6 + $0x200] sm:$0xff] }
 0x728   :  { %4024 = vmatprep.subr.mxu0 %v8181_v2  ;;  %4095 = vmatprep.subr.mxu1 %v8183_v58  ;;  %9946 = vst [vmem:[#allocation120_spill] sm:$0xff] %v8207_v20  ;;  %9947 = vst [vmem:[#allocation121_spill] sm:$0xff] %v8211_v57  ;;  %v8213_v2 = vld [vmem:[#allocation6 + $0x210] sm:$0xff]  ;;  %v4198_v58 = vld [vmem:[#allocation3 + $0x1e8] sm:$0xff] }
 0x729   :  { %4025 = vmatpush2.msra.mxu0 %v8187_v24  ;;  %4096 = vmatpush2.msra.mxu1 %v8189_v53  ;;  %9948 = vst [vmem:[#allocation122_spill] sm:$0xff] %v8213_v2  ;;  %v4200_v24 = vld [vmem:[#allocation3 + $0x1f8] sm:$0xff] }
 0x72a   :  { %4026 = vmatprep.subr.mxu0 %v8193_v3  ;;  %4097 = vmatprep.subr.mxu1 %v8195_v1 }
 0x72b   :  { %4027 = vmatpush2.msra.mxu0 %v8199_v4  ;;  %4098 = vmatpush2.msra.mxu1 %v8201_v13 }
 0x72c   :  { %4028 = vmatprep.subr.mxu0 %v8205_v41  ;;  %4099 = vmatprep.subr.mxu1 %v8207_v20 }
 0x72d   :  { %4029 = vmatpush2.msra.mxu0 %v8211_v57  ;;  %4100 = vmatpush2.msra.mxu1 %v8213_v2 }
 0x72e   :  { %4201 = vmatprep.subr.mxu0 %v4198_v58  ;;  %4272 = vmatprep.subr.mxu1 %v4200_v24 }
 0x78c   :  { %v3499_v1 = vpop.f32.mrf.mxu0  ;;  %v3570_v13 = vpop.f32.mrf.mxu1 }
 0x78d   :  { %v3500_v3 = vadd.f32 %v3499_v1, %v9811_v33  ;;  %v3571_v2 = vadd.f32 %v3570_v13, %v9814_v45 }
 0x78e   :  { %v3501_v53 = vpop.f32.mrf.mxu0  ;;  %v3572_v41 = vpop.f32.mrf.mxu1 }
 0x78f   :  { %v4737_v63 = vmul.f32 -1.442695, %v3500_v3  ;;  %v3502_v4 = vadd.f32 %v3501_v53, %v9812_v23  ;;  %v3573_v20 = vadd.f32 %v3572_v41, %v9813_v26  ;;  %v9949_v23 = vld [vmem:[#allocation147_spill] sm:$0xff] }
 0x791   :  { %4938 = vpow2.f32 %v4737_v63  ;;  %v4738_v61 = vmul.f32 -1.442695, %v3502_v4  ;;  %v4739_v38 = vmul.f32 -1.442695, %v3573_v20  ;;  %v9950_v20 = vld [vmem:[#allocation149_spill] sm:$0xff] }
 0x793   :  { %4940 = vpow2.f32 %v4738_v61 }
 0x794   :  { %4942 = vpow2.f32 %v4739_v38 }
 0x79e   :  { %v4939_v57 = vpop.eup %4938 }
 0x79f   :  { %v3578_v58 = vadd.f32 1.0, %v4939_v57 }
 0x7a0   :  { %v4941_v24 = vpop.eup %4940 }
 0x7a1   :  { %4944 = vrcp.f32 %v3578_v58  ;;  %v3584_v1 = vadd.f32 1.0, %v4941_v24  ;;  %v4943_v3 = vpop.eup %4942 }
 0x7a2   :  { %4946 = vtanh.f32 %v3571_v2  ;;  %v3591_v13 = vadd.f32 1.0, %v4943_v3 }
 0x7a3   :  { %4948 = vrcp.f32 %v3584_v1 }
 0x7ad   :  { %v3734_v53 = vpop.f32.mrf.mxu0  ;;  %v3805_v38 = vpop.f32.mrf.mxu1 }
 0x7ae   :  { %v4945_v63 = vpop.eup %4944  ;;  %v3810_v4 = vadd.f32 %v3734_v53, %v9949_v23  ;;  %v9951_v23 = vld [vmem:[#allocation150_spill] sm:$0xff]  ;;  %v9952_v53 = vld [vmem:[#allocation148_spill] sm:$0xff] }
 0x7af   :  { %v4947_v61 = vpop.eup %4946  ;;  %v3736_v33 = vpop.f32.mrf.mxu0 }
 0x7b0   :  { %v4949_v50 = vpop.eup %4948  ;;  %v4740_v41 = vmul.f32 -1.442695, %v3810_v4  ;;  %v3811_v26 = vadd.f32 %v3736_v33, %v9950_v20  ;;  %v3595_v31 = vmul.f32 %v4947_v61, %v4945_v63  ;;  %v3807_v24 = vpop.f32.mrf.mxu1  ;;  %v3812_v4 = vadd.f32 %v3805_v38, %v9952_v53  ;;  %v4197_v53 = vld [vmem:[#allocation3 + $0x1e0] sm:$0xff] }
 0x7b1   :  { %v3594_v57 = vmul.f32 %v4949_v50, %v7690_v30  ;;  %v3813_v1 = vadd.f32 %v3807_v24, %v9951_v23 }
 0x7b2   :  { %4950 = vpow2.f32 %v4740_v41  ;;  %v4741_v58 = vmul.f32 -1.442695, %v3811_v26 }
 0x7b3   :  { %v8228_v2 = vadd.f32 %v3595_v31, %v3594_v57  ;;  %v4742_v45 = vmul.f32 -1.442695, %v3813_v1 }
 0x7b4   :  { %4952 = vpow2.f32 %v4741_v58 }
 0x7b5   :  { %4954 = vrcp.f32 %v3591_v13 }
 0x7b6   :  { %4956 = vtanh.f32 %v8228_v2 }
 0x7b7   :  { %4958 = vtanh.f32 %v3812_v4  ;;  %v4199_v4 = vld [vmem:[#allocation3 + $0x1f0] sm:$0xff] }
 0x7b8   :  { %4960 = vpow2.f32 %v4742_v45 }
 0x7bf   :  { %v4951_v33 = vpop.eup %4950 }
 0x7c0   :  { %v3817_v63 = vadd.f32 1.0, %v4951_v33  ;;  %v4194_v33 = vld [vmem:[#allocation3 + $0x1c8] sm:$0xff] }
 0x7c1   :  { %v4953_v30 = vpop.eup %4952 }
 0x7c2   :  { %v4955_v50 = vpop.eup %4954  ;;  %4962 = vrcp.f32 %v3817_v63  ;;  %v3823_v26 = vadd.f32 1.0, %v4953_v30  ;;  %v4196_v63 = vld [vmem:[#allocation3 + $0x1d8] sm:$0xff]  ;;  %v4193_v30 = vld [vmem:[#allocation3 + $0x1c0] sm:$0xff] }
 0x7c3   :  { %v4957_v31 = vpop.eup %4956 }
 0x7c4   :  { %4964 = vrcp.f32 %v3823_v26  ;;  %v3598_v3 = vmul.f32 %v4957_v31, %v4955_v50  ;;  %v4959_v61 = vpop.eup %4958  ;;  %v4195_v50 = vld [vmem:[#allocation3 + $0x1d0] sm:$0xff]  ;;  %v4192_v26 = vld [vmem:[#allocation3 + $0x1b8] sm:$0xff]  ;;  %v4189_v31 = vld [vmem:[#allocation3 + $0x1a0] sm:$0xff] }
 0x7c5   :  { %v4961_v41 = vpop.eup %4960 }
 0x7c6   :  { %3599 = vst [vmem:[#allocation8 + $0x28] sm:$0xff] %v3598_v3  ;;  %4030 = vmatprep.mubr.f32.mxu0 %v3598_v3  ;;  %4101 = vmatprep.mubr.f32.mxu1 %v3598_v3  ;;  %v3830_v38 = vadd.f32 1.0, %v4961_v41  ;;  %v4191_v3 = vld [vmem:[#allocation3 + $0x1b0] sm:$0xff]  ;;  %v4188_v41 = vld [vmem:[#allocation3 + $0x198] sm:$0xff] }
 0x7c8   :  { %4966 = vrcp.f32 %v3830_v38  ;;  %v4184_v38 = vld [vmem:[#allocation3 + $0x178] sm:$0xff] }
 0x7cf   :  { %v4963_v20 = vpop.eup %4962 }
 0x7d0   :  { %v3834_v57 = vmul.f32 %v4963_v20, %v4959_v61  ;;  %v4186_v61 = vld [vmem:[#allocation3 + $0x188] sm:$0xff]  ;;  %v4185_v20 = vld [vmem:[#allocation3 + $0x180] sm:$0xff] }
 0x7d1   :  { %v4965_v13 = vpop.eup %4964 }
 0x7d2   :  { %v3833_v58 = vmul.f32 %v4965_v13, %v7696_v62  ;;  %v4190_v62 = vld [vmem:[#allocation3 + $0x1a8] sm:$0xff] }
 0x7d3   :  { %v4182_v13 = vld [vmem:[#allocation3 + $0x168] sm:$0xff] }
 0x7d4   :  { %v8234_v24 = vadd.f32 %v3834_v57, %v3833_v58  ;;  %v4187_v57 = vld [vmem:[#allocation3 + $0x190] sm:$0xff]  ;;  %v4181_v58 = vld [vmem:[#allocation3 + $0x160] sm:$0xff] }
 0x7d5   :  { %v4967_v45 = vpop.eup %4966 }
 0x7d6   :  { %4968 = vtanh.f32 %v8234_v24 }
 0x7e3   :  { %v4969_v23 = vpop.eup %4968 }
 0x7e4   :  { %v8237_v1 = vmul.f32 %v4969_v23, %v4967_v45  ;;  %v4183_v45 = vld [vmem:[#allocation3 + $0x170] sm:$0xff]  ;;  %v4178_v23 = vld [vmem:[#allocation3 + $0x148] sm:$0xff] }
 0x7e6   :  { %4031 = vmatmul.mubr.f32.vlgmr.msra.gmra.mxu0 %v8237_v1  ;;  %4102 = vmatmul.mubr.f32.vlgmr.msra.gmra.mxu1 %v8237_v1 }
 0x7e7   :  { %4202 = vmatpush1.msra.mxu0 %v4197_v53  ;;  %4273 = vmatpush1.msra.mxu1 %v4199_v4  ;;  %v4180_v53 = vld [vmem:[#allocation3 + $0x158] sm:$0xff]  ;;  %v4177_v4 = vld [vmem:[#allocation3 + $0x140] sm:$0xff] }
 0x7e8   :  { %4203 = vmatprep.subr.mxu0 %v4194_v33  ;;  %4274 = vmatprep.subr.mxu1 %v4196_v63  ;;  %v4179_v33 = vld [vmem:[#allocation3 + $0x150] sm:$0xff]  ;;  %v4174_v63 = vld [vmem:[#allocation3 + $0x128] sm:$0xff] }
 0x7e9   :  { %4204 = vmatpush1.msra.mxu0 %v4193_v30  ;;  %4275 = vmatpush1.msra.mxu1 %v4195_v50  ;;  %v4176_v30 = vld [vmem:[#allocation3 + $0x138] sm:$0xff]  ;;  %v4173_v50 = vld [vmem:[#allocation3 + $0x120] sm:$0xff] }
 0x7ea   :  { %4205 = vmatprep.subr.mxu0 %v4190_v62  ;;  %4276 = vmatprep.subr.mxu1 %v4192_v26  ;;  %v4175_v62 = vld [vmem:[#allocation3 + $0x130] sm:$0xff]  ;;  %v4170_v26 = vld [vmem:[#allocation3 + $0x108] sm:$0xff] }
 0x7eb   :  { %4206 = vmatpush1.msra.mxu0 %v4189_v31  ;;  %4277 = vmatpush1.msra.mxu1 %v4191_v3  ;;  %v4172_v31 = vld [vmem:[#allocation3 + $0x118] sm:$0xff]  ;;  %v9996_v3 = vld [vmem:[#allocation45_spill] sm:$0xff] }
 0x7ec   :  { %4207 = vmatprep.subr.mxu0 %v4186_v61  ;;  %4278 = vmatprep.subr.mxu1 %v4188_v41  ;;  %v9997_v61 = vld [vmem:[#allocation46_spill] sm:$0xff]  ;;  %v9998_v41 = vld [vmem:[#allocation47_spill] sm:$0xff] }
 0x7ed   :  { %4208 = vmatpush1.msra.mxu0 %v4185_v20  ;;  %4279 = vmatpush1.msra.mxu1 %v4187_v57  ;;  %v9999_v20 = vld [vmem:[#allocation48_spill] sm:$0xff]  ;;  %v10000_v57 = vld [vmem:[#allocation49_spill] sm:$0xff] }
 0x7ee   :  { %4209 = vmatprep.subr.mxu0 %v4182_v13  ;;  %4280 = vmatprep.subr.mxu1 %v4184_v38  ;;  %v10001_v13 = vld [vmem:[#allocation50_spill] sm:$0xff]  ;;  %v10002_v38 = vld [vmem:[#allocation51_spill] sm:$0xff] }
 0x7ef   :  { %4210 = vmatpush1.msra.mxu0 %v4181_v58  ;;  %4281 = vmatpush1.msra.mxu1 %v4183_v45  ;;  %v10003_v58 = vld [vmem:[#allocation52_spill] sm:$0xff]  ;;  %v10004_v45 = vld [vmem:[#allocation53_spill] sm:$0xff] }
 0x7f0   :  { %4211 = vmatprep.subr.mxu0 %v4178_v23  ;;  %4282 = vmatprep.subr.mxu1 %v4180_v53  ;;  %v10005_v23 = vld [vmem:[#allocation54_spill] sm:$0xff]  ;;  %v10006_v53 = vld [vmem:[#allocation55_spill] sm:$0xff] }
 0x7f1   :  { %4212 = vmatpush1.msra.mxu0 %v4177_v4  ;;  %4283 = vmatpush1.msra.mxu1 %v4179_v33  ;;  %v10007_v4 = vld [vmem:[#allocation56_spill] sm:$0xff]  ;;  %v10008_v33 = vld [vmem:[#allocation57_spill] sm:$0xff] }
 0x7f2   :  { %4213 = vmatprep.subr.mxu0 %v4174_v63  ;;  %4284 = vmatprep.subr.mxu1 %v4176_v30  ;;  %v10009_v63 = vld [vmem:[#allocation58_spill] sm:$0xff]  ;;  %v10010_v30 = vld [vmem:[#allocation59_spill] sm:$0xff] }
 0x7f3   :  { %4214 = vmatpush1.msra.mxu0 %v4173_v50  ;;  %4285 = vmatpush1.msra.mxu1 %v4175_v62  ;;  %v10011_v50 = vld [vmem:[#allocation60_spill] sm:$0xff]  ;;  %v10012_v62 = vld [vmem:[#allocation61_spill] sm:$0xff] }
 0x7f4   :  { %4215 = vmatprep.subr.mxu0 %v4170_v26  ;;  %4286 = vmatprep.subr.mxu1 %v4172_v31  ;;  %v10013_v26 = vld [vmem:[#allocation62_spill] sm:$0xff]  ;;  %v10014_v31 = vld [vmem:[#allocation63_spill] sm:$0xff] }
 0x7f5   :  { %4216 = vmatpush1.msra.mxu0 %v7727_v36  ;;  %4287 = vmatpush1.msra.mxu1 %v7729_v40  ;;  %v9953_v36 = vld [vmem:[#allocation165_spill] sm:$0xff]  ;;  %v9955_v40 = vld [vmem:[#allocation167_spill] sm:$0xff] }
 0x7f6   :  { %4217 = vmatprep.subr.mxu0 %v7733_v49  ;;  %4288 = vmatprep.subr.mxu1 %v7735_v34  ;;  %v9956_v49 = vld [vmem:[#allocation168_spill] sm:$0xff]  ;;  %v9957_v34 = vld [vmem:[#allocation169_spill] sm:$0xff] }
 0x7f7   :  { %4218 = vmatpush1.msra.mxu0 %v7739_v59  ;;  %4289 = vmatpush1.msra.mxu1 %v7741_v60  ;;  %v9958_v59 = vld [vmem:[#allocation170_spill] sm:$0xff]  ;;  %v9959_v60 = vld [vmem:[#allocation131_spill] sm:$0xff] }
 0x7f8   :  { %4219 = vmatprep.subr.mxu0 %v7745_v28  ;;  %4290 = vmatprep.subr.mxu1 %v7747_v42  ;;  %v9960_v28 = vld [vmem:[#allocation139_spill] sm:$0xff]  ;;  %v9961_v42 = vld [vmem:[#allocation141_spill] sm:$0xff] }
 0x7f9   :  { %4220 = vmatpush1.msra.mxu0 %v7751_v35  ;;  %4291 = vmatpush1.msra.mxu1 %v7753_v54  ;;  %v9962_v35 = vld [vmem:[#allocation142_spill] sm:$0xff]  ;;  %v9963_v54 = vld [vmem:[#allocation140_spill] sm:$0xff] }
 0x7fa   :  { %4221 = vmatprep.subr.mxu0 %v7757_v56  ;;  %4292 = vmatprep.subr.mxu1 %v7759_v51  ;;  %v9964_v56 = vld [vmem:[#allocation133_spill] sm:$0xff]  ;;  %v9965_v51 = vld [vmem:[#allocation134_spill] sm:$0xff] }
 0x7fb   :  { %4222 = vmatpush1.msra.mxu0 %v7763_v52  ;;  %4293 = vmatpush1.msra.mxu1 %v7765_v6  ;;  %v9966_v52 = vld [vmem:[#allocation132_spill] sm:$0xff] }
 0x7fc   :  { %4223 = vmatprep.subr.mxu0 %v7769_v7  ;;  %4294 = vmatprep.subr.mxu1 %v7771_v9  ;;  %v9967_v6 = vld [vmem:[#allocation16_spill] sm:$0xff]  ;;  %v9968_v7 = vld [vmem:[#allocation17_spill] sm:$0xff]  ;;  %v9969_v9 = vld [vmem:[#allocation18_spill] sm:$0xff] }
 0x7fd   :  { %4224 = vmatpush1.msra.mxu0 %v7775_v11  ;;  %4295 = vmatpush1.msra.mxu1 %v7777_v12  ;;  %v9970_v11 = vld [vmem:[#allocation19_spill] sm:$0xff]  ;;  %v9971_v12 = vld [vmem:[#allocation20_spill] sm:$0xff] }
 0x7fe   :  { %4225 = vmatprep.subr.mxu0 %v7781_v14  ;;  %4296 = vmatprep.subr.mxu1 %v7783_v15  ;;  %v9972_v14 = vld [vmem:[#allocation21_spill] sm:$0xff]  ;;  %v9973_v15 = vld [vmem:[#allocation22_spill] sm:$0xff] }
 0x7ff   :  { %4226 = vmatpush1.msra.mxu0 %v7787_v16  ;;  %4297 = vmatpush1.msra.mxu1 %v7789_v17  ;;  %v9974_v16 = vld [vmem:[#allocation23_spill] sm:$0xff]  ;;  %v9975_v17 = vld [vmem:[#allocation24_spill] sm:$0xff] }
 0x800   :  { %4227 = vmatprep.subr.mxu0 %v7793_v18  ;;  %4298 = vmatprep.subr.mxu1 %v7795_v21  ;;  %v9976_v18 = vld [vmem:[#allocation25_spill] sm:$0xff]  ;;  %v9977_v21 = vld [vmem:[#allocation26_spill] sm:$0xff] }
 0x801   :  { %4228 = vmatpush1.msra.mxu0 %v7799_v22  ;;  %4299 = vmatpush1.msra.mxu1 %v7801_v27  ;;  %v9978_v22 = vld [vmem:[#allocation27_spill] sm:$0xff]  ;;  %v9979_v27 = vld [vmem:[#allocation28_spill] sm:$0xff] }
 0x802   :  { %4229 = vmatprep.subr.mxu0 %v7805_v47  ;;  %4300 = vmatprep.subr.mxu1 %v7807_v29  ;;  %v9980_v47 = vld [vmem:[#allocation29_spill] sm:$0xff]  ;;  %v9981_v29 = vld [vmem:[#allocation30_spill] sm:$0xff] }
 0x803   :  { %4230 = vmatpush1.msra.mxu0 %v7811_v44  ;;  %4301 = vmatpush1.msra.mxu1 %v7813_v43  ;;  %v9982_v44 = vld [vmem:[#allocation31_spill] sm:$0xff]  ;;  %v9983_v43 = vld [vmem:[#allocation32_spill] sm:$0xff] }
 0x804   :  { %4231 = vmatprep.subr.mxu0 %v7817_v0  ;;  %4302 = vmatprep.subr.mxu1 %v7819_v32  ;;  %v9984_v0 = vld [vmem:[#allocation33_spill] sm:$0xff]  ;;  %v9985_v32 = vld [vmem:[#allocation34_spill] sm:$0xff] }
 0x805   :  { %4232 = vmatpush1.msra.mxu0 %v7823_v55  ;;  %4265 = vmatprep.mubr.f32.mxu0 %v9132_v48  ;;  %v9986_v55 = vld [vmem:[#allocation35_spill] sm:$0xff] }
 0x806   :  { %4303 = vmatpush1.msra.mxu1 %v7827_v8  ;;  %4336 = vmatprep.mubr.f32.mxu1 %v9132_v48  ;;  %v9954_v48 = vld [vmem:[#allocation166_spill] sm:$0xff]  ;;  %v9987_v8 = vld [vmem:[#allocation36_spill] sm:$0xff] }
 0x807   :  { %4266 = vmatmul.mubr.f32.vlgmr.msra.gmra.mxu0 %v8237_v1  ;;  %4337 = vmatmul.mubr.f32.vlgmr.msra.gmra.mxu1 %v8237_v1  ;;  %v9995_v1 = vld [vmem:[#allocation44_spill] sm:$0xff] }
 0x808   :  { %4499 = vmatprep.subr.mxu0 %v7837_v25  ;;  %4570 = vmatprep.subr.mxu1 %v7839_v19  ;;  %v9988_v25 = vld [vmem:[#allocation37_spill] sm:$0xff]  ;;  %v9989_v19 = vld [vmem:[#allocation38_spill] sm:$0xff] }
 0x809   :  { %4500 = vmatpush1.msra.mxu0 %v7843_v10  ;;  %4571 = vmatpush1.msra.mxu1 %v7845_v5  ;;  %v9990_v10 = vld [vmem:[#allocation39_spill] sm:$0xff]  ;;  %v9991_v5 = vld [vmem:[#allocation40_spill] sm:$0xff] }
 0x80a   :  { %4501 = vmatprep.subr.mxu0 %v7849_v46  ;;  %4572 = vmatprep.subr.mxu1 %v7851_v39  ;;  %v9992_v46 = vld [vmem:[#allocation41_spill] sm:$0xff]  ;;  %v9993_v39 = vld [vmem:[#allocation42_spill] sm:$0xff] }
 0x80b   :  { %4502 = vmatpush1.msra.mxu0 %v7855_v37  ;;  %4573 = vmatpush1.msra.mxu1 %v9953_v36  ;;  %v9994_v37 = vld [vmem:[#allocation43_spill] sm:$0xff]  ;;  %v10015_v36 = vld [vmem:[#allocation64_spill] sm:$0xff] }
 0x80c   :  { %4503 = vmatprep.subr.mxu0 %v9954_v48  ;;  %4574 = vmatprep.subr.mxu1 %v9955_v40  ;;  %v10016_v48 = vld [vmem:[#allocation65_spill] sm:$0xff]  ;;  %v10017_v40 = vld [vmem:[#allocation66_spill] sm:$0xff] }
 0x80d   :  { %4504 = vmatpush1.msra.mxu0 %v9956_v49  ;;  %4575 = vmatpush1.msra.mxu1 %v9957_v34  ;;  %v10018_v49 = vld [vmem:[#allocation67_spill] sm:$0xff]  ;;  %v10019_v34 = vld [vmem:[#allocation68_spill] sm:$0xff] }
 0x80e   :  { %4505 = vmatprep.subr.mxu0 %v9958_v59  ;;  %4576 = vmatprep.subr.mxu1 %v9959_v60  ;;  %v10020_v59 = vld [vmem:[#allocation69_spill] sm:$0xff]  ;;  %v10021_v60 = vld [vmem:[#allocation70_spill] sm:$0xff] }
 0x80f   :  { %4506 = vmatpush1.msra.mxu0 %v9960_v28  ;;  %4577 = vmatpush1.msra.mxu1 %v9961_v42  ;;  %v10022_v28 = vld [vmem:[#allocation71_spill] sm:$0xff]  ;;  %v10023_v42 = vld [vmem:[#allocation72_spill] sm:$0xff] }
 0x810   :  { %4507 = vmatprep.subr.mxu0 %v9962_v35  ;;  %4578 = vmatprep.subr.mxu1 %v9963_v54  ;;  %v10024_v35 = vld [vmem:[#allocation73_spill] sm:$0xff]  ;;  %v10025_v54 = vld [vmem:[#allocation74_spill] sm:$0xff] }
 0x811   :  { %4508 = vmatpush1.msra.mxu0 %v9964_v56  ;;  %4579 = vmatpush1.msra.mxu1 %v9965_v51  ;;  %v10026_v56 = vld [vmem:[#allocation75_spill] sm:$0xff]  ;;  %v10027_v51 = vld [vmem:[#allocation76_spill] sm:$0xff] }
 0x812   :  { %4509 = vmatprep.subr.mxu0 %v9966_v52  ;;  %4580 = vmatprep.subr.mxu1 %v9967_v6  ;;  %v10028_v52 = vld [vmem:[#allocation77_spill] sm:$0xff]  ;;  %v10029_v6 = vld [vmem:[#allocation78_spill] sm:$0xff] }
 0x813   :  { %4510 = vmatpush1.msra.mxu0 %v9968_v7  ;;  %4581 = vmatpush1.msra.mxu1 %v9969_v9  ;;  %v10030_v7 = vld [vmem:[#allocation79_spill] sm:$0xff]  ;;  %v10031_v9 = vld [vmem:[#allocation80_spill] sm:$0xff] }
 0x814   :  { %4511 = vmatprep.subr.mxu0 %v9970_v11  ;;  %4582 = vmatprep.subr.mxu1 %v9971_v12  ;;  %v10032_v11 = vld [vmem:[#allocation81_spill] sm:$0xff]  ;;  %v10033_v12 = vld [vmem:[#allocation82_spill] sm:$0xff] }
 0x815   :  { %4512 = vmatpush1.msra.mxu0 %v9972_v14  ;;  %4583 = vmatpush1.msra.mxu1 %v9973_v15  ;;  %v10034_v14 = vld [vmem:[#allocation83_spill] sm:$0xff]  ;;  %v10035_v15 = vld [vmem:[#allocation84_spill] sm:$0xff] }
 0x816   :  { %4513 = vmatprep.subr.mxu0 %v9974_v16  ;;  %4584 = vmatprep.subr.mxu1 %v9975_v17  ;;  %v10036_v16 = vld [vmem:[#allocation85_spill] sm:$0xff]  ;;  %v10037_v17 = vld [vmem:[#allocation86_spill] sm:$0xff] }
 0x817   :  { %4514 = vmatpush1.msra.mxu0 %v9976_v18  ;;  %4585 = vmatpush1.msra.mxu1 %v9977_v21  ;;  %v10038_v18 = vld [vmem:[#allocation87_spill] sm:$0xff]  ;;  %v10039_v21 = vld [vmem:[#allocation88_spill] sm:$0xff] }
 0x818   :  { %4515 = vmatprep.subr.mxu0 %v9978_v22  ;;  %4586 = vmatprep.subr.mxu1 %v9979_v27  ;;  %v10040_v22 = vld [vmem:[#allocation89_spill] sm:$0xff]  ;;  %v10041_v27 = vld [vmem:[#allocation90_spill] sm:$0xff] }
 0x819   :  { %4516 = vmatpush1.msra.mxu0 %v9980_v47  ;;  %4587 = vmatpush1.msra.mxu1 %v9981_v29  ;;  %v10042_v47 = vld [vmem:[#allocation91_spill] sm:$0xff]  ;;  %v10043_v29 = vld [vmem:[#allocation92_spill] sm:$0xff] }
 0x81a   :  { %4517 = vmatprep.subr.mxu0 %v9982_v44  ;;  %4588 = vmatprep.subr.mxu1 %v9983_v43  ;;  %v10044_v44 = vld [vmem:[#allocation93_spill] sm:$0xff]  ;;  %v10045_v43 = vld [vmem:[#allocation94_spill] sm:$0xff] }
 0x81b   :  { %4518 = vmatpush1.msra.mxu0 %v9984_v0  ;;  %4589 = vmatpush1.msra.mxu1 %v9985_v32  ;;  %v10046_v0 = vld [vmem:[#allocation95_spill] sm:$0xff]  ;;  %v10047_v32 = vld [vmem:[#allocation96_spill] sm:$0xff] }
 0x81c   :  { %4519 = vmatprep.subr.mxu0 %v9986_v55  ;;  %4590 = vmatprep.subr.mxu1 %v9987_v8  ;;  %v10048_v55 = vld [vmem:[#allocation97_spill] sm:$0xff]  ;;  %v10049_v8 = vld [vmem:[#allocation98_spill] sm:$0xff] }
 0x81d   :  { %4520 = vmatpush1.msra.mxu0 %v9988_v25  ;;  %4591 = vmatpush1.msra.mxu1 %v9989_v19  ;;  %v10050_v25 = vld [vmem:[#allocation99_spill] sm:$0xff]  ;;  %v10051_v19 = vld [vmem:[#allocation100_spill] sm:$0xff] }
 0x81e   :  { %4521 = vmatprep.subr.mxu0 %v9990_v10  ;;  %4592 = vmatprep.subr.mxu1 %v9991_v5  ;;  %v10052_v10 = vld [vmem:[#allocation101_spill] sm:$0xff]  ;;  %v10053_v5 = vld [vmem:[#allocation102_spill] sm:$0xff] }
 0x81f   :  { %4522 = vmatpush1.msra.mxu0 %v9992_v46  ;;  %4593 = vmatpush1.msra.mxu1 %v9993_v39  ;;  %v10054_v46 = vld [vmem:[#allocation103_spill] sm:$0xff]  ;;  %v10055_v39 = vld [vmem:[#allocation104_spill] sm:$0xff] }
 0x820   :  { %4523 = vmatprep.subr.mxu0 %v9994_v37  ;;  %4594 = vmatprep.subr.mxu1 %v9995_v1  ;;  %v10056_v37 = vld [vmem:[#allocation105_spill] sm:$0xff]  ;;  %v10057_v1 = vld [vmem:[#allocation106_spill] sm:$0xff] }
 0x821   :  { %4524 = vmatpush1.msra.mxu0 %v9996_v3  ;;  %4595 = vmatpush1.msra.mxu1 %v9997_v61  ;;  %v10058_v3 = vld [vmem:[#allocation107_spill] sm:$0xff]  ;;  %v10059_v61 = vld [vmem:[#allocation108_spill] sm:$0xff] }
 0x822   :  { %4525 = vmatprep.subr.mxu0 %v9998_v41  ;;  %4596 = vmatprep.subr.mxu1 %v9999_v20  ;;  %v10060_v41 = vld [vmem:[#allocation109_spill] sm:$0xff]  ;;  %v10061_v20 = vld [vmem:[#allocation110_spill] sm:$0xff] }
 0x823   :  { %4526 = vmatpush1.msra.mxu0 %v10000_v57  ;;  %4597 = vmatpush1.msra.mxu1 %v10001_v13  ;;  %v10062_v57 = vld [vmem:[#allocation111_spill] sm:$0xff]  ;;  %v10063_v13 = vld [vmem:[#allocation112_spill] sm:$0xff] }
 0x824   :  { %4527 = vmatprep.subr.mxu0 %v10002_v38  ;;  %4598 = vmatprep.subr.mxu1 %v10003_v58  ;;  %v10064_v38 = vld [vmem:[#allocation113_spill] sm:$0xff]  ;;  %v10065_v58 = vld [vmem:[#allocation114_spill] sm:$0xff] }
 0x825   :  { %4528 = vmatpush1.msra.mxu0 %v10004_v45  ;;  %4599 = vmatpush1.msra.mxu1 %v10005_v23  ;;  %v10066_v45 = vld [vmem:[#allocation115_spill] sm:$0xff]  ;;  %v10067_v23 = vld [vmem:[#allocation116_spill] sm:$0xff] }
 0x826   :  { %4529 = vmatprep.subr.mxu0 %v10006_v53  ;;  %4600 = vmatprep.subr.mxu1 %v10007_v4  ;;  %v10068_v53 = vld [vmem:[#allocation117_spill] sm:$0xff]  ;;  %v10069_v4 = vld [vmem:[#allocation118_spill] sm:$0xff] }
 0x827   :  { %4530 = vmatpush1.msra.mxu0 %v10008_v33  ;;  %4601 = vmatpush1.msra.mxu1 %v10009_v63  ;;  %v10070_v33 = vld [vmem:[#allocation119_spill] sm:$0xff]  ;;  %v10071_v63 = vld [vmem:[#allocation120_spill] sm:$0xff] }
 0x828   :  { %4531 = vmatprep.subr.mxu0 %v10010_v30  ;;  %4602 = vmatprep.subr.mxu1 %v10011_v50  ;;  %v10072_v30 = vld [vmem:[#allocation121_spill] sm:$0xff]  ;;  %v10073_v50 = vld [vmem:[#allocation122_spill] sm:$0xff] }
 0x829   :  { %4532 = vmatpush2.msra.mxu0 %v10012_v62  ;;  %4603 = vmatpush2.msra.mxu1 %v10013_v26  ;;  %v10074_v26 = vld [vmem:[#allocation12_spill] sm:$0xff] }
 0x82a   :  { %4533 = vmatprep.subr.mxu0 %v10014_v31  ;;  %4604 = vmatprep.subr.mxu1 %v10015_v36 }
 0x82b   :  { %4534 = vmatpush2.msra.mxu0 %v10016_v48  ;;  %4605 = vmatpush2.msra.mxu1 %v10017_v40  ;;  %v10075_v40 = vld [vmem:[#allocation13_spill] sm:$0xff] }
 0x82c   :  { %4535 = vmatprep.subr.mxu0 %v10018_v49  ;;  %4606 = vmatprep.subr.mxu1 %v10019_v34 }
 0x82d   :  { %4536 = vmatpush2.msra.mxu0 %v10020_v59  ;;  %4607 = vmatpush2.msra.mxu1 %v10021_v60 }
 0x82e   :  { %4537 = vmatprep.subr.mxu0 %v10022_v28  ;;  %4608 = vmatprep.subr.mxu1 %v10023_v42  ;;  %v10076_v28 = vld [vmem:[#allocation14_spill] sm:$0xff] }
 0x82f   :  { %4538 = vmatpush2.msra.mxu0 %v10024_v35  ;;  %4609 = vmatpush2.msra.mxu1 %v10025_v54 }
 0x830   :  { %4539 = vmatprep.subr.mxu0 %v10026_v56  ;;  %4610 = vmatprep.subr.mxu1 %v10027_v51  ;;  %v10077_v56 = vld [vmem:[#allocation15_spill] sm:$0xff] }
 0x831   :  { %4540 = vmatpush2.msra.mxu0 %v10028_v52  ;;  %4611 = vmatpush2.msra.mxu1 %v10029_v6 }
 0x832   :  { %4541 = vmatprep.subr.mxu0 %v10030_v7  ;;  %4612 = vmatprep.subr.mxu1 %v10031_v9 }
 0x833   :  { %4542 = vmatpush2.msra.mxu0 %v10032_v11  ;;  %4613 = vmatpush2.msra.mxu1 %v10033_v12 }
 0x834   :  { %4543 = vmatprep.subr.mxu0 %v10034_v14  ;;  %4614 = vmatprep.subr.mxu1 %v10035_v15  ;;  %v10078_v14 = vld [vmem:[#allocation151_spill] sm:$0xff] }
 0x835   :  { %4544 = vmatpush2.msra.mxu0 %v10036_v16  ;;  %4615 = vmatpush2.msra.mxu1 %v10037_v17 }
 0x836   :  { %4545 = vmatprep.subr.mxu0 %v10038_v18  ;;  %4616 = vmatprep.subr.mxu1 %v10039_v21 }
 0x837   :  { %4546 = vmatpush2.msra.mxu0 %v10040_v22  ;;  %4617 = vmatpush2.msra.mxu1 %v10041_v27  ;;  %v10079_v22 = vld [vmem:[#allocation153_spill] sm:$0xff] }
 0x838   :  { %4547 = vmatprep.subr.mxu0 %v10042_v47  ;;  %4618 = vmatprep.subr.mxu1 %v10043_v29 }
 0x839   :  { %4548 = vmatpush2.msra.mxu0 %v10044_v44  ;;  %4619 = vmatpush2.msra.mxu1 %v10045_v43 }
 0x83a   :  { %4549 = vmatprep.subr.mxu0 %v10046_v0  ;;  %4620 = vmatprep.subr.mxu1 %v10047_v32 }
 0x83b   :  { %4550 = vmatpush2.msra.mxu0 %v10048_v55  ;;  %4621 = vmatpush2.msra.mxu1 %v10049_v8  ;;  %v10080_v8 = vld [vmem:[#allocation154_spill] sm:$0xff] }
 0x83c   :  { %4551 = vmatprep.subr.mxu0 %v10050_v25  ;;  %4622 = vmatprep.subr.mxu1 %v10051_v19  ;;  %v10081_v19 = vld [vmem:[#allocation152_spill] sm:$0xff] }
 0x83d   :  { %4552 = vmatpush2.msra.mxu0 %v10052_v10  ;;  %4623 = vmatpush2.msra.mxu1 %v10053_v5 }
 0x83e   :  { %4553 = vmatprep.subr.mxu0 %v10054_v46  ;;  %4624 = vmatprep.subr.mxu1 %v10055_v39 }
 0x83f   :  { %4554 = vmatpush2.msra.mxu0 %v10056_v37  ;;  %4625 = vmatpush2.msra.mxu1 %v10057_v1 }
 0x840   :  { %4555 = vmatprep.subr.mxu0 %v10058_v3  ;;  %4626 = vmatprep.subr.mxu1 %v10059_v61 }
 0x841   :  { %4556 = vmatpush2.msra.mxu0 %v10060_v41  ;;  %4627 = vmatpush2.msra.mxu1 %v10061_v20 }
 0x842   :  { %4557 = vmatprep.subr.mxu0 %v10062_v57  ;;  %4628 = vmatprep.subr.mxu1 %v10063_v13 }
 0x843   :  { %4558 = vmatpush2.msra.mxu0 %v10064_v38  ;;  %4629 = vmatpush2.msra.mxu1 %v10065_v58 }
 0x844   :  { %4559 = vmatprep.subr.mxu0 %v10066_v45  ;;  %4630 = vmatprep.subr.mxu1 %v10067_v23 }
 0x845   :  { %4560 = vmatpush2.msra.mxu0 %v10068_v53  ;;  %4631 = vmatpush2.msra.mxu1 %v10069_v4 }
 0x846   :  { %4561 = vmatprep.subr.mxu0 %v10070_v33  ;;  %4632 = vmatprep.subr.mxu1 %v10071_v63 }
 0x847   :  { %4562 = vmatpush2.msra.mxu0 %v10072_v30  ;;  %4633 = vmatpush2.msra.mxu1 %v10073_v50 }
 0x8a6   :  { %v4032_v62 = vpop.f32.mrf.mxu0  ;;  %v4103_v34 = vpop.f32.mrf.mxu1 }
 0x8a7   :  { %v4033_v31 = vadd.f32 %v4032_v62, %v10074_v26  ;;  %v4104_v51 = vadd.f32 %v4103_v34, %v10077_v56 }
 0x8a8   :  { %v4034_v36 = vpop.f32.mrf.mxu0  ;;  %v4105_v60 = vpop.f32.mrf.mxu1 }
 0x8a9   :  { %v4743_v48 = vmul.f32 -1.442695, %v4033_v31  ;;  %v4035_v49 = vadd.f32 %v4034_v36, %v10075_v40  ;;  %v4106_v42 = vadd.f32 %v4105_v60, %v10076_v28 }
 0x8ab   :  { %4970 = vpow2.f32 %v4743_v48  ;;  %v4744_v59 = vmul.f32 -1.442695, %v4035_v49  ;;  %v4745_v35 = vmul.f32 -1.442695, %v4106_v42 }
 0x8ad   :  { %4972 = vpow2.f32 %v4744_v59 }
 0x8ae   :  { %4974 = vpow2.f32 %v4745_v35 }
 0x8b8   :  { %v4971_v54 = vpop.eup %4970 }
 0x8b9   :  { %v4111_v52 = vadd.f32 1.0, %v4971_v54 }
 0x8ba   :  { %v4973_v6 = vpop.eup %4972 }
 0x8bb   :  { %4976 = vrcp.f32 %v4111_v52  ;;  %v4117_v7 = vadd.f32 1.0, %v4973_v6  ;;  %v4975_v9 = vpop.eup %4974 }
 0x8bc   :  { %4978 = vtanh.f32 %v4104_v51  ;;  %v4124_v44 = vadd.f32 1.0, %v4975_v9 }
 0x8bd   :  { %4980 = vrcp.f32 %v4117_v7 }
 0x8c7   :  { %v4267_v11 = vpop.f32.mrf.mxu0  ;;  %v4338_v43 = vpop.f32.mrf.mxu1 }
 0x8c8   :  { %v4977_v12 = vpop.eup %4976  ;;  %v4343_v15 = vadd.f32 %v4267_v11, %v10078_v14  ;;  %v4345_v10 = vadd.f32 %v4338_v43, %v10081_v19 }
 0x8c9   :  { %v4979_v16 = vpop.eup %4978  ;;  %v4269_v17 = vpop.f32.mrf.mxu0 }
 0x8ca   :  { %v4981_v18 = vpop.eup %4980  ;;  %v4746_v21 = vmul.f32 -1.442695, %v4343_v15  ;;  %v4344_v27 = vadd.f32 %v4269_v17, %v10079_v22  ;;  %v4128_v47 = vmul.f32 %v4979_v16, %v4977_v12  ;;  %v4340_v55 = vpop.f32.mrf.mxu1 }
 0x8cb   :  { %v4127_v29 = vmul.f32 %v4981_v18, %v8228_v2  ;;  %v4346_v25 = vadd.f32 %v4340_v55, %v10080_v8 }
 0x8cc   :  { %4982 = vpow2.f32 %v4746_v21  ;;  %v4747_v0 = vmul.f32 -1.442695, %v4344_v27 }
 0x8cd   :  { %v8414_v32 = vadd.f32 %v4128_v47, %v4127_v29  ;;  %v4748_v5 = vmul.f32 -1.442695, %v4346_v25 }
 0x8ce   :  { %4984 = vpow2.f32 %v4747_v0 }
 0x8cf   :  { %4986 = vrcp.f32 %v4124_v44 }
 0x8d0   :  { %4988 = vtanh.f32 %v8414_v32 }
 0x8d1   :  { %4990 = vtanh.f32 %v4345_v10 }
 0x8d2   :  { %4992 = vpow2.f32 %v4748_v5 }
 0x8d9   :  { %v4983_v46 = vpop.eup %4982 }
 0x8da   :  { %v4350_v39 = vadd.f32 1.0, %v4983_v46 }
 0x8db   :  { %v4985_v2 = vpop.eup %4984 }
 0x8dc   :  { %v4987_v37 = vpop.eup %4986  ;;  %4994 = vrcp.f32 %v4350_v39  ;;  %v4356_v1 = vadd.f32 1.0, %v4985_v2 }
 0x8dd   :  { %v4989_v3 = vpop.eup %4988 }
 0x8de   :  { %4996 = vrcp.f32 %v4356_v1  ;;  %v4131_v61 = vmul.f32 %v4989_v3, %v4987_v37  ;;  %v4991_v41 = vpop.eup %4990 }
 0x8df   :  { %v4993_v20 = vpop.eup %4992 }
 0x8e0   :  { %4132 = vst [vmem:[#allocation8 + $0x30] sm:$0xff] %v4131_v61  ;;  %4563 = vmatprep.mubr.f32.mxu0 %v4131_v61  ;;  %4634 = vmatprep.mubr.f32.mxu1 %v4131_v61  ;;  %v4363_v58 = vadd.f32 1.0, %v4993_v20 }
 0x8e2   :  { %4998 = vrcp.f32 %v4363_v58 }
 0x8e9   :  { %v4995_v57 = vpop.eup %4994 }
 0x8ea   :  { %v4367_v13 = vmul.f32 %v4995_v57, %v4991_v41 }
 0x8eb   :  { %v4997_v38 = vpop.eup %4996 }
 0x8ec   :  { %v4366_v45 = vmul.f32 %v4997_v38, %v8234_v24 }
 0x8ee   :  { %v4368_v23 = vadd.f32 %v4367_v13, %v4366_v45 }
 0x8ef   :  { %v4999_v53 = vpop.eup %4998 }
 0x8f0   :  { %5000 = vtanh.f32 %v4368_v23 }
 0x8fd   :  { %v5001_v4 = vpop.eup %5000 }
 0x8fe   :  { %v4370_v33 = vmul.f32 %v5001_v4, %v4999_v53 }
 0x900   :  { %4564 = vmatmul.mubr.f32.vlgmr.msra.gmra.mxu0 %v4370_v33  ;;  %4635 = vmatmul.mubr.f32.vlgmr.msra.gmra.mxu1 %v4370_v33 }
 0x9c0   :  { %v4565_v63 = vpop.f32.mrf.mxu0  ;;  %v4636_v36 = vpop.f32.mrf.mxu1 }
 0x9c1   :  { %v4566_v30 = vadd.f32 %v4565_v63, %v10074_v26  ;;  %v4637_v60 = vadd.f32 %v4636_v36, %v10077_v56 }
 0x9c2   :  { %v4567_v50 = vpop.f32.mrf.mxu0  ;;  %v4638_v24 = vpop.f32.mrf.mxu1 }
 0x9c3   :  { %v4749_v62 = vmul.f32 -1.442695, %v4566_v30  ;;  %v4568_v31 = vadd.f32 %v4567_v50, %v10075_v40  ;;  %v4639_v49 = vadd.f32 %v4638_v24, %v10076_v28 }
 0x9c5   :  { %5002 = vpow2.f32 %v4749_v62  ;;  %v4750_v48 = vmul.f32 -1.442695, %v4568_v31  ;;  %v4751_v34 = vmul.f32 -1.442695, %v4639_v49 }
 0x9c7   :  { %5004 = vpow2.f32 %v4750_v48 }
 0x9c8   :  { %5006 = vpow2.f32 %v4751_v34 }
 0x9d2   :  { %v5003_v59 = vpop.eup %5002 }
 0x9d3   :  { %v4644_v42 = vadd.f32 1.0, %v5003_v59 }
 0x9d4   :  { %v5005_v35 = vpop.eup %5004 }
 0x9d5   :  { %5008 = vrcp.f32 %v4644_v42  ;;  %v4650_v26 = vadd.f32 1.0, %v5005_v35  ;;  %v5007_v54 = vpop.eup %5006 }
 0x9d6   :  { %5010 = vtanh.f32 %v4637_v60  ;;  %v4657_v6 = vadd.f32 1.0, %v5007_v54 }
 0x9d7   :  { %5012 = vrcp.f32 %v4650_v26 }
 0x9d8   :  { %5014 = vrcp.f32 %v4657_v6 }
 0x9e2   :  { %v5009_v40 = vpop.eup %5008 }
 0x9e3   :  { %v5011_v51 = vpop.eup %5010 }
 0x9e4   :  { %v5013_v52 = vpop.eup %5012  ;;  %v4661_v7 = vmul.f32 %v5011_v51, %v5009_v40 }
 0x9e5   :  { %v4660_v9 = vmul.f32 %v5013_v52, %v8414_v32  ;;  %v5015_v56 = vpop.eup %5014 }
 0x9e7   :  { %v4662_v28 = vadd.f32 %v4661_v7, %v4660_v9 }
 0x9e9   :  { %5016 = vtanh.f32 %v4662_v28 }
 0x9f6   :  { %v5017_v11 = vpop.eup %5016 }
 0x9f7   :  { %v4664_v12 = vmul.f32 %v5017_v11, %v5015_v56 }
 0x9f9   :  { %4665 = vst [vmem:[#allocation8 + $0x38] sm:$0xff] %v4664_v12 }
 0x9fa   :  { %5077 = shalt.err (!%p5074_p0)
}
 0x9fb   :  { %s5098_s30 = smov 128   ;;  %s5099_s7 = smov 8  }
 0x9fc   :  { %4677 = dma.vmem_to_hbm [thread:$0]  %s4672_s28, 1024, %s8434_s6, [#allocation5], %s5098_s30, %s5098_s30, %s5099_s7  }
 0x9fd   :  { %5090 = dma.done.wait [#allocation5], 1024  }
 0x9fe   :  { %5091 = vsyncadd [#allocation5], 4294966272 }
 0x9ff   :  { %4681 = vsyncpa [#allocation4], 1 }
 0xa00   :  { %4682 = vsyncpa [#allocation7], 1 }
 0xa01   :  { %4683 = vsyncpa [#allocation5], 1 }

</bundles_post_ra>
